<compile_context>
chip_gen: v5e
topology: v5e:2x2
jax: 0.10.0
libtpu: 0.0.40
codegen_flags: <defaults>
</compile_context>

<pallas_src>
import functools

import jax
import jax.numpy as jnp
from jax.experimental import pallas as pl
from jax.experimental.pallas import tpu as pltpu

GROWTH = 32
BLOCK_CONFIG = (6, 12, 24, 16)   # DenseNet-121
BN_SIZE = 4
NUM_INIT_FEATURES = 64
NUM_CLASSES = 43
EPS = 1e-5
LANE = 128


def _round_up(x, m):
    return (x + m - 1) // m * m


# --------------------------------------------------------------------------------------
# Fused (BN+ReLU prologue) -> MXU matmul -> (BN/bias [+ReLU] epilogue) Pallas kernel
# --------------------------------------------------------------------------------------
def _make_kernel(prologue, epilogue, epilogue_relu):
    def kernel(*refs):
        a_ref, b_ref = refs[0], refs[1]
        i = 2
        if prologue:
            ps_ref, pb_ref = refs[i], refs[i + 1]
            i += 2
        if epilogue:
            es_ref, eb_ref = refs[i], refs[i + 1]
            i += 2
        o_ref = refs[i]

        a = a_ref[...]                                            # f32
        if prologue:                                              # BN + ReLU on A (per-K)
            a = jnp.maximum(a * ps_ref[...] + pb_ref[...], 0.0)
        acc = jnp.dot(a.astype(jnp.bfloat16), b_ref[...],         # bf16 MXU, f32 accum
                      preferred_element_type=jnp.float32)
        if epilogue:                                              # BN / bias on O (per-N)
            acc = acc * es_ref[...] + eb_ref[...]
            if epilogue_relu:
                acc = jnp.maximum(acc, 0.0)
        o_ref[...] = acc.astype(o_ref.dtype)
    return kernel


@functools.lru_cache(maxsize=None)
def _build_matmul(Mp, Kp, Np, prologue, epilogue, epilogue_relu):
    # Full-K single-step matmul; grid is (1, 1) for every shape in this network.
    tm = Mp if Mp <= 512 else 256
    tn = Np if Np <= 512 else 512
    assert Mp % tm == 0 and Np % tn == 0 and Kp % LANE == 0
    in_specs = [pl.BlockSpec((tm, Kp), lambda i, j: (i, 0)),
                pl.BlockSpec((Kp, tn), lambda i, j: (0, j))]
    if prologue:
        in_specs += [pl.BlockSpec((1, Kp), lambda i, j: (0, 0)),
                     pl.BlockSpec((1, Kp), lambda i, j: (0, 0))]
    if epilogue:
        in_specs += [pl.BlockSpec((1, tn), lambda i, j: (0, j)),
                     pl.BlockSpec((1, tn), lambda i, j: (0, j))]
    return pl.pallas_call(
        _make_kernel(prologue, epilogue, epilogue_relu),
        out_shape=jax.ShapeDtypeStruct((Mp, Np), jnp.float32),
        grid=(Mp // tm, Np // tn),
        in_specs=in_specs,
        out_specs=pl.BlockSpec((tm, tn), lambda i, j: (i, j)),
        compiler_params=pltpu.CompilerParams(
            dimension_semantics=("parallel", "parallel")),
    )


def fused_matmul(a, b, prologue=None, epilogue=None, epilogue_relu=False):
    """a: (M, K) f32, b: (K, N) bf16 (K, N pre-padded to multiples of 128)."""
    M, K = a.shape
    K2, N = b.shape
    assert K == K2 and K % LANE == 0 and N % LANE == 0
    mp8 = _round_up(M, 8)
    Mp = mp8 if mp8 <= 512 else _round_up(M, 256)
    if Mp != M:
        a = jnp.pad(a, ((0, Mp - M), (0, 0)))
    args = [a, b]
    if prologue is not None:
        args += [prologue[0], prologue[1]]
    if epilogue is not None:
        args += [epilogue[0], epilogue[1]]
    f = _build_matmul(Mp, K, N, prologue is not None,
                      epilogue is not None, bool(epilogue_relu))
    out = f(*args)
    return out[:M] if Mp != M else out


# --------------------------------------------------------------------------------------
# im2col + pooling glue (fused by XLA inside the single jit)
# --------------------------------------------------------------------------------------
def _im2col(x, kh, kw, stride, pad):
    N, H, W, C = x.shape
    if pad:
        x = jnp.pad(x, ((0, 0), (pad, pad), (pad, pad), (0, 0)))
    Ho = (H + 2 * pad - kh) // stride + 1
    Wo = (W + 2 * pad - kw) // stride + 1
    cols = []
    for i in range(kh):
        for j in range(kw):
            cols.append(x[:, i:i + stride * (Ho - 1) + 1:stride,
                          j:j + stride * (Wo - 1) + 1:stride, :])
    patches = jnp.stack(cols, axis=3).reshape(N * Ho * Wo, kh * kw * C)
    return patches, Ho, Wo


def maxpool_3x3_s2_p1(x):
    return jax.lax.reduce_window(
        x, -jnp.inf, jax.lax.max,
        window_dimensions=(1, 3, 3, 1),
        window_strides=(1, 2, 2, 1),
        padding=((0, 0), (1, 1), (1, 1), (0, 0)))


def avgpool_2x2(x):
    N, H, W, C = x.shape
    return x.reshape(N, H // 2, 2, W // 2, 2, C).mean(axis=(2, 4))


# --------------------------------------------------------------------------------------
# Deterministic synthetic parameters (DenseNet-121 shapes), pre-padded / bf16 for kernels
# --------------------------------------------------------------------------------------
def _bn_params(key, c):
    k1, k2, k3, k4 = jax.random.split(key, 4)
    gamma = 1.0 + 0.1 * jax.random.normal(k1, (c,), jnp.float32)
    beta = 0.05 * jax.random.normal(k2, (c,), jnp.float32)
    rmean = 0.05 * jax.random.normal(k3, (c,), jnp.float32)
    rvar = 1.0 + 0.1 * jnp.abs(jax.random.normal(k4, (c,), jnp.float32))
    scale = gamma / jnp.sqrt(rvar + EPS)      # eval-mode BN folded to affine
    bias = beta - rmean * scale
    return scale, bias


def _conv_w(key, kh, kw, cin, cout):
    fan_in = kh * kw * cin
    return jax.random.normal(key, (kh, kw, cin, cout), jnp.float32) * (2.0 / fan_in) ** 0.5


def _pad_row(v, n):
    return jnp.pad(v, (0, n - v.shape[0])).reshape(1, n)


def init_params(key):
    keys = iter(jax.random.split(key, 512))
    p = {}

    # conv0 (1 -> 64, 7x7) as (49, 64) matmul weight, K padded to 128, N padded to 128.
    w0 = _conv_w(next(keys), 7, 7, 1, NUM_INIT_FEATURES).reshape(49, NUM_INIT_FEATURES)
    p['conv0_w'] = jnp.pad(w0, ((0, LANE - 49), (0, LANE - NUM_INIT_FEATURES))
                           ).astype(jnp.bfloat16)
    s0, b0 = _bn_params(next(keys), NUM_INIT_FEATURES)
    p['norm0'] = (_pad_row(s0, LANE), _pad_row(b0, LANE))           # conv0 epilogue

    p['blocks'] = []
    p['transitions'] = []
    c = NUM_INIT_FEATURES
    for nb, n_layers in enumerate(BLOCK_CONFIG):
        c_full = c + n_layers * GROWTH         # fixed dense-block buffer width (128-mult)
        layers = []
        cc = c
        for _ in range(n_layers):
            s1, b1 = _bn_params(next(keys), cc)
            w1 = _conv_w(next(keys), 1, 1, cc, BN_SIZE * GROWTH).reshape(cc, BN_SIZE * GROWTH)
            s2, b2 = _bn_params(next(keys), BN_SIZE * GROWTH)
            w2 = _conv_w(next(keys), 3, 3, BN_SIZE * GROWTH,
                         GROWTH).reshape(9 * BN_SIZE * GROWTH, GROWTH)
            layers.append({
                # prologue scale/bias padded with zeros beyond cc; w1 rows beyond cc are
                # zero, so the not-yet-written buffer channels contribute exactly 0.
                'n1': (_pad_row(s1, c_full), _pad_row(b1, c_full)),
                'w1': jnp.pad(w1, ((0, c_full - cc), (0, 0))).astype(jnp.bfloat16),
                'n2': (s2.reshape(1, -1), b2.reshape(1, -1)),
                'w2': jnp.pad(w2, ((0, 0), (0, LANE - GROWTH))).astype(jnp.bfloat16),
            })
            cc += GROWTH
        p['blocks'].append(layers)
        c = c_full
        if nb != len(BLOCK_CONFIG) - 1:
            st, bt = _bn_params(next(keys), c)
            wt = _conv_w(next(keys), 1, 1, c, c // 2).reshape(c, c // 2)
            p['transitions'].append({
                'n': (st.reshape(1, -1), bt.reshape(1, -1)),        # prologue
                'w': wt.astype(jnp.bfloat16),
            })
            c //= 2

    # norm5 (affine, no ReLU) folded into the classifier:  W' = diag(s5)@W, b' = b + b5@W
    s5, b5 = _bn_params(next(keys), c)                              # c == 1024
    lin_w = 0.02 * jax.random.normal(next(keys), (c, NUM_CLASSES), jnp.float32)
    lin_b = jnp.zeros((NUM_CLASSES,), jnp.float32)
    w_cls = s5[:, None] * lin_w
    b_cls = lin_b + b5 @ lin_w
    p['cls_w'] = jnp.pad(w_cls, ((0, 0), (0, LANE - NUM_CLASSES))).astype(jnp.bfloat16)
    p['cls_eb'] = (jnp.ones((1, LANE), jnp.float32), _pad_row(b_cls, LANE))
    return p


# --------------------------------------------------------------------------------------
# Forward pass (mirrors transfer_DenseNet.forward); run under a single jax.jit
# --------------------------------------------------------------------------------------
def forward(params, image_nchw):
    x = jnp.transpose(image_nchw, (0, 2, 3, 1)).astype(jnp.float32)   # NHWC
    Nb = x.shape[0]

    # conv0: Conv2d(1, 64, 7x7, s2, p3, bias=False)  +  norm0+ReLU fused as epilogue
    patches, Ho, Wo = _im2col(x, 7, 7, stride=2, pad=3)               # (N*16*16, 49)
    patches = jnp.pad(patches, ((0, 0), (0, LANE - patches.shape[1])))
    y = fused_matmul(patches, params['conv0_w'],
                     epilogue=params['norm0'], epilogue_relu=True)
    x = y[:, :NUM_INIT_FEATURES].reshape(Nb, Ho, Wo, NUM_INIT_FEATURES)

    x = maxpool_3x3_s2_p1(x)                                          # pool0

    c = NUM_INIT_FEATURES
    for nb, n_layers in enumerate(BLOCK_CONFIG):
        c_full = c + n_layers * GROWTH
        _, H, W, _ = x.shape
        M = Nb * H * W
        # Fixed-width feature buffer: each layer writes its 32 new channels in place,
        # replacing the per-layer growing concatenation.
        buf = jnp.zeros((Nb, H, W, c_full), jnp.float32).at[..., :c].set(x)
        cc = c
        for lp in params['blocks'][nb]:
            # 1x1 bottleneck conv:  BN1+ReLU prologue on A, BN2+ReLU epilogue on O.
            y1 = fused_matmul(buf.reshape(M, c_full), lp['w1'],
                              prologue=lp['n1'], epilogue=lp['n2'],
                              epilogue_relu=True)                      # (M, 128)
            y1 = y1.reshape(Nb, H, W, BN_SIZE * GROWTH)
            # 3x3 conv (pad=1) on the already-normalized activations (zero pad is exact).
            pat, _, _ = _im2col(y1, 3, 3, stride=1, pad=1)             # (M, 1152)
            y2 = fused_matmul(pat, lp['w2'])                           # (M, 128); 32 valid
            buf = buf.at[..., cc:cc + GROWTH].set(
                y2[:, :GROWTH].reshape(Nb, H, W, GROWTH))
            cc += GROWTH
        x = buf
        c = c_full
        if nb != len(BLOCK_CONFIG) - 1:
            tp = params['transitions'][nb]
            # transition: BN+ReLU prologue fused into the 1x1 conv, then 2x2 avgpool.
            y = fused_matmul(x.reshape(M, c), tp['w'], prologue=tp['n'])
            x = avgpool_2x2(y.reshape(Nb, H, W, c // 2))
            c //= 2

    # norm5 is folded into the classifier weights.  Flatten in NCHW order (exact; the
    # feature map is 1x1 here so it equals NHWC flatten).
    feat = jnp.transpose(x, (0, 3, 1, 2)).reshape(Nb, -1)              # (N, 1024)
    # TODO(synk): nn.Dropout2d is random in train mode; implemented as identity (eval).
    logits = fused_matmul(feat, params['cls_w'],
                          epilogue=params['cls_eb'], epilogue_relu=False)
    return logits[:, :NUM_CLASSES]


if __name__ == "__main__":
    key = jax.random.PRNGKey(0)
    pkey, xkey = jax.random.split(key)
    params = init_params(pkey)

    # batch=2, 1 channel, 32x32: DenseNet-121 reduces 32x32 -> 1x1x1024, matching the
    # Linear(1024, 43) in the original module.
    image = jax.random.normal(xkey, (2, 1, 32, 32), jnp.float32)

    fwd = jax.jit(forward)
    out = fwd(params, image)
    out = jax.block_until_ready(out)
    assert out.shape == (2, NUM_CLASSES), out.shape
    assert bool(jnp.all(jnp.isfinite(out)))
    print("KERNEL_OK")
</pallas_src>

<mosaic_0001>
module attributes {stable_mosaic.version = 11 : i64} {
  func.func @kernel(%arg0: i32, %arg1: i32, %arg2: memref<512x128xf32, #tpu.memory_space<vmem>>, %arg3: memref<128x128xbf16, #tpu.memory_space<vmem>>, %arg4: memref<1x128xf32, #tpu.memory_space<vmem>>, %arg5: memref<1x128xf32, #tpu.memory_space<vmem>>, %arg6: memref<512x128xf32, #tpu.memory_space<vmem>>) attributes {dimension_semantics = [#tpu.dimension_semantics<parallel>, #tpu.dimension_semantics<parallel>], iteration_bounds = array<i64: 1, 1>, scalar_prefetch = 0 : i64, scratch_operands = 0 : i64, tpu.core_type = #tpu.core_type<tc>, window_params = [{transform_indices = @transform_0, window_bounds = array<i64: 512, 128>}, {transform_indices = @transform_1, window_bounds = array<i64: 128, 128>}, {transform_indices = @transform_2, window_bounds = array<i64: 1, 128>}, {transform_indices = @transform_3, window_bounds = array<i64: 1, 128>}, {transform_indices = @transform_4, window_bounds = array<i64: 512, 128>}]} {
    %c0 = arith.constant 0 : index
    %c0_0 = arith.constant 0 : index
    %0 = vector.load %arg2[%c0, %c0_0] : memref<512x128xf32, #tpu.memory_space<vmem>>, vector<512x128xf32>
    %1 = arith.truncf %0 : vector<512x128xf32> to vector<512x128xbf16>
    %c0_1 = arith.constant 0 : index
    %c0_2 = arith.constant 0 : index
    %2 = vector.load %arg3[%c0_1, %c0_2] : memref<128x128xbf16, #tpu.memory_space<vmem>>, vector<128x128xbf16>
    %cst = arith.constant dense<0.000000e+00> : vector<512x128xf32>
    %3 = tpu.matmul %1, %2, %cst {dimension_numbers = #tpu.dot_dimension_numbers<[1], [0], [0], [1], [0, 0, 1, 1], [], []>} : vector<512x128xbf16>, vector<128x128xbf16>, vector<512x128xf32> -> vector<512x128xf32>
    %c0_3 = arith.constant 0 : index
    %c0_4 = arith.constant 0 : index
    %4 = vector.load %arg4[%c0_3, %c0_4] : memref<1x128xf32, #tpu.memory_space<vmem>>, vector<1x128xf32>
    %5 = vector.broadcast %4 : vector<1x128xf32> to vector<512x128xf32>
    %6 = arith.mulf %3, %5 : vector<512x128xf32>
    %c0_5 = arith.constant 0 : index
    %c0_6 = arith.constant 0 : index
    %7 = vector.load %arg5[%c0_5, %c0_6] : memref<1x128xf32, #tpu.memory_space<vmem>>, vector<1x128xf32>
    %8 = vector.broadcast %7 : vector<1x128xf32> to vector<512x128xf32>
    %9 = arith.addf %6, %8 : vector<512x128xf32>
    %cst_7 = arith.constant 0.000000e+00 : f32
    %10 = vector.broadcast %cst_7 : f32 to vector<512x128xf32>
    %11 = arith.maximumf %9, %10 : vector<512x128xf32>
    %c0_8 = arith.constant 0 : index
    %c0_9 = arith.constant 0 : index
    %12 = vector.load %arg6[%c0_8, %c0_9] : memref<512x128xf32, #tpu.memory_space<vmem>>, vector<512x128xf32>
    tpu.vector_store %arg6[%c0_8, %c0_9], %11 {strides = array<i32>} : memref<512x128xf32, #tpu.memory_space<vmem>>, vector<512x128xf32>,
    return
  }
  func.func @transform_0(%arg0: i32, %arg1: i32) -> (i32, i32) {
    %c0_i32 = arith.constant 0 : i32
    %c0_i32_0 = arith.constant 0 : i32
    return %arg0, %c0_i32 : i32, i32
  }
  func.func @transform_1(%arg0: i32, %arg1: i32) -> (i32, i32) {
    %c0_i32 = arith.constant 0 : i32
    %c0_i32_0 = arith.constant 0 : i32
    return %c0_i32, %arg1 : i32, i32
  }
  func.func @transform_2(%arg0: i32, %arg1: i32) -> (i32, i32) {
    %c0_i32 = arith.constant 0 : i32
    %c0_i32_0 = arith.constant 0 : i32
    return %c0_i32, %arg1 : i32, i32
  }
  func.func @transform_3(%arg0: i32, %arg1: i32) -> (i32, i32) {
    %c0_i32 = arith.constant 0 : i32
    %c0_i32_0 = arith.constant 0 : i32
    return %c0_i32, %arg1 : i32, i32
  }
  func.func @transform_4(%arg0: i32, %arg1: i32) -> (i32, i32) {
    %c0_i32 = arith.constant 0 : i32
    return %arg0, %arg1 : i32, i32
  }
}

module attributes {stable_mosaic.version = 11 : i64} {
  func.func @kernel(%arg0: i32, %arg1: i32, %arg2: memref<128x256xf32, #tpu.memory_space<vmem>>, %arg3: memref<256x128xbf16, #tpu.memory_space<vmem>>, %arg4: memref<1x256xf32, #tpu.memory_space<vmem>>, %arg5: memref<1x256xf32, #tpu.memory_space<vmem>>, %arg6: memref<1x128xf32, #tpu.memory_space<vmem>>, %arg7: memref<1x128xf32, #tpu.memory_space<vmem>>, %arg8: memref<128x128xf32, #tpu.memory_space<vmem>>) attributes {dimension_semantics = [#tpu.dimension_semantics<parallel>, #tpu.dimension_semantics<parallel>], iteration_bounds = array<i64: 1, 1>, scalar_prefetch = 0 : i64, scratch_operands = 0 : i64, tpu.core_type = #tpu.core_type<tc>, window_params = [{transform_indices = @transform_0, window_bounds = array<i64: 128, 256>}, {transform_indices = @transform_1, window_bounds = array<i64: 256, 128>}, {pipeline_mode = #tpu.pipeline_mode<synchronous>, transform_indices = @transform_2, window_bounds = array<i64: 1, 256>}, {pipeline_mode = #tpu.pipeline_mode<synchronous>, transform_indices = @transform_3, window_bounds = array<i64: 1, 256>}, {transform_indices = @transform_4, window_bounds = array<i64: 1, 128>}, {transform_indices = @transform_5, window_bounds = array<i64: 1, 128>}, {transform_indices = @transform_6, window_bounds = array<i64: 128, 128>}]} {
    %c0 = arith.constant 0 : index
    %c0_0 = arith.constant 0 : index
    %0 = vector.load %arg2[%c0, %c0_0] : memref<128x256xf32, #tpu.memory_space<vmem>>, vector<128x256xf32>
    %c0_1 = arith.constant 0 : index
    %c0_2 = arith.constant 0 : index
    %1 = vector.load %arg4[%c0_1, %c0_2] : memref<1x256xf32, #tpu.memory_space<vmem>>, vector<1x256xf32>
    %2 = vector.broadcast %1 : vector<1x256xf32> to vector<128x256xf32>
    %3 = arith.mulf %0, %2 : vector<128x256xf32>
    %c0_3 = arith.constant 0 : index
    %c0_4 = arith.constant 0 : index
    %4 = vector.load %arg5[%c0_3, %c0_4] : memref<1x256xf32, #tpu.memory_space<vmem>>, vector<1x256xf32>
    %5 = vector.broadcast %4 : vector<1x256xf32> to vector<128x256xf32>
    %6 = arith.addf %3, %5 : vector<128x256xf32>
    %cst = arith.constant 0.000000e+00 : f32
    %7 = vector.broadcast %cst : f32 to vector<128x256xf32>
    %8 = arith.maximumf %6, %7 : vector<128x256xf32>
    %9 = arith.truncf %8 : vector<128x256xf32> to vector<128x256xbf16>
    %c0_5 = arith.constant 0 : index
    %c0_6 = arith.constant 0 : index
    %10 = vector.load %arg3[%c0_5, %c0_6] : memref<256x128xbf16, #tpu.memory_space<vmem>>, vector<256x128xbf16>
    %cst_7 = arith.constant dense<0.000000e+00> : vector<128x128xf32>
    %11 = tpu.matmul %9, %10, %cst_7 {dimension_numbers = #tpu.dot_dimension_numbers<[1], [0], [0], [1], [0, 0, 1, 1], [], []>} : vector<128x256xbf16>, vector<256x128xbf16>, vector<128x128xf32> -> vector<128x128xf32>
    %c0_8 = arith.constant 0 : index
    %c0_9 = arith.constant 0 : index
    %12 = vector.load %arg6[%c0_8, %c0_9] : memref<1x128xf32, #tpu.memory_space<vmem>>, vector<1x128xf32>
    %13 = vector.broadcast %12 : vector<1x128xf32> to vector<128x128xf32>
    %14 = arith.mulf %11, %13 : vector<128x128xf32>
    %c0_10 = arith.constant 0 : index
    %c0_11 = arith.constant 0 : index
    %15 = vector.load %arg7[%c0_10, %c0_11] : memref<1x128xf32, #tpu.memory_space<vmem>>, vector<1x128xf32>
    %16 = vector.broadcast %15 : vector<1x128xf32> to vector<128x128xf32>
    %17 = arith.addf %14, %16 : vector<128x128xf32>
    %cst_12 = arith.constant 0.000000e+00 : f32
    %18 = vector.broadcast %cst_12 : f32 to vector<128x128xf32>
    %19 = arith.maximumf %17, %18 : vector<128x128xf32>
    %c0_13 = arith.constant 0 : index
    %c0_14 = arith.constant 0 : index
    %20 = vector.load %arg8[%c0_13, %c0_14] : memref<128x128xf32, #tpu.memory_space<vmem>>, vector<128x128xf32>
    tpu.vector_store %arg8[%c0_13, %c0_14], %19 {strides = array<i32>} : memref<128x128xf32, #tpu.memory_space<vmem>>, vector<128x128xf32>,
    return
  }
  func.func @transform_0(%arg0: i32, %arg1: i32) -> (i32, i32) {
    %c0_i32 = arith.constant 0 : i32
    %c0_i32_0 = arith.constant 0 : i32
    return %arg0, %c0_i32 : i32, i32
  }
  func.func @transform_1(%arg0: i32, %arg1: i32) -> (i32, i32) {
    %c0_i32 = arith.constant 0 : i32
    %c0_i32_0 = arith.constant 0 : i32
    return %c0_i32, %arg1 : i32, i32
  }
  func.func @transform_2(%arg0: i32, %arg1: i32) -> (i32, i32) {
    %c0_i32 = arith.constant 0 : i32
    %c0_i32_0 = arith.constant 0 : i32
    %c0_i32_1 = arith.constant 0 : i32
    return %c0_i32, %c0_i32_0 : i32, i32
  }
  func.func @transform_3(%arg0: i32, %arg1: i32) -> (i32, i32) {
    %c0_i32 = arith.constant 0 : i32
    %c0_i32_0 = arith.constant 0 : i32
    %c0_i32_1 = arith.constant 0 : i32
    return %c0_i32, %c0_i32_0 : i32, i32
  }
  func.func @transform_4(%arg0: i32, %arg1: i32) -> (i32, i32) {
    %c0_i32 = arith.constant 0 : i32
    %c0_i32_0 = arith.constant 0 : i32
    return %c0_i32, %arg1 : i32, i32
  }
  func.func @transform_5(%arg0: i32, %arg1: i32) -> (i32, i32) {
    %c0_i32 = arith.constant 0 : i32
    %c0_i32_0 = arith.constant 0 : i32
    return %c0_i32, %arg1 : i32, i32
  }
  func.func @transform_6(%arg0: i32, %arg1: i32) -> (i32, i32) {
    %c0_i32 = arith.constant 0 : i32
    return %arg0, %arg1 : i32, i32
  }
}

module attributes {stable_mosaic.version = 11 : i64} {
  func.func @kernel(%arg0: i32, %arg1: i32, %arg2: memref<128x1152xf32, #tpu.memory_space<vmem>>, %arg3: memref<1152x128xbf16, #tpu.memory_space<vmem>>, %arg4: memref<128x128xf32, #tpu.memory_space<vmem>>) attributes {dimension_semantics = [#tpu.dimension_semantics<parallel>, #tpu.dimension_semantics<parallel>], iteration_bounds = array<i64: 1, 1>, scalar_prefetch = 0 : i64, scratch_operands = 0 : i64, tpu.core_type = #tpu.core_type<tc>, window_params = [{transform_indices = @transform_0, window_bounds = array<i64: 128, 1152>}, {transform_indices = @transform_1, window_bounds = array<i64: 1152, 128>}, {transform_indices = @transform_2, window_bounds = array<i64: 128, 128>}]} {
    %c0 = arith.constant 0 : index
    %c0_0 = arith.constant 0 : index
    %0 = vector.load %arg2[%c0, %c0_0] : memref<128x1152xf32, #tpu.memory_space<vmem>>, vector<128x1152xf32>
    %1 = arith.truncf %0 : vector<128x1152xf32> to vector<128x1152xbf16>
    %c0_1 = arith.constant 0 : index
    %c0_2 = arith.constant 0 : index
    %2 = vector.load %arg3[%c0_1, %c0_2] : memref<1152x128xbf16, #tpu.memory_space<vmem>>, vector<1152x128xbf16>
    %cst = arith.constant dense<0.000000e+00> : vector<128x128xf32>
    %3 = tpu.matmul %1, %2, %cst {dimension_numbers = #tpu.dot_dimension_numbers<[1], [0], [0], [1], [0, 0, 1, 1], [], []>} : vector<128x1152xbf16>, vector<1152x128xbf16>, vector<128x128xf32> -> vector<128x128xf32>
    %c0_3 = arith.constant 0 : index
    %c0_4 = arith.constant 0 : index
    %4 = vector.load %arg4[%c0_3, %c0_4] : memref<128x128xf32, #tpu.memory_space<vmem>>, vector<128x128xf32>
    tpu.vector_store %arg4[%c0_3, %c0_4], %3 {strides = array<i32>} : memref<128x128xf32, #tpu.memory_space<vmem>>, vector<128x128xf32>,
    return
  }
  func.func @transform_0(%arg0: i32, %arg1: i32) -> (i32, i32) {
    %c0_i32 = arith.constant 0 : i32
    %c0_i32_0 = arith.constant 0 : i32
    return %arg0, %c0_i32 : i32, i32
  }
  func.func @transform_1(%arg0: i32, %arg1: i32) -> (i32, i32) {
    %c0_i32 = arith.constant 0 : i32
    %c0_i32_0 = arith.constant 0 : i32
    return %c0_i32, %arg1 : i32, i32
  }
  func.func @transform_2(%arg0: i32, %arg1: i32) -> (i32, i32) {
    %c0_i32 = arith.constant 0 : i32
    return %arg0, %arg1 : i32, i32
  }
}

module attributes {stable_mosaic.version = 11 : i64} {
  func.func @kernel(%arg0: i32, %arg1: i32, %arg2: memref<128x256xf32, #tpu.memory_space<vmem>>, %arg3: memref<256x128xbf16, #tpu.memory_space<vmem>>, %arg4: memref<1x256xf32, #tpu.memory_space<vmem>>, %arg5: memref<1x256xf32, #tpu.memory_space<vmem>>, %arg6: memref<128x128xf32, #tpu.memory_space<vmem>>) attributes {dimension_semantics = [#tpu.dimension_semantics<parallel>, #tpu.dimension_semantics<parallel>], iteration_bounds = array<i64: 1, 1>, scalar_prefetch = 0 : i64, scratch_operands = 0 : i64, tpu.core_type = #tpu.core_type<tc>, window_params = [{transform_indices = @transform_0, window_bounds = array<i64: 128, 256>}, {transform_indices = @transform_1, window_bounds = array<i64: 256, 128>}, {pipeline_mode = #tpu.pipeline_mode<synchronous>, transform_indices = @transform_2, window_bounds = array<i64: 1, 256>}, {pipeline_mode = #tpu.pipeline_mode<synchronous>, transform_indices = @transform_3, window_bounds = array<i64: 1, 256>}, {transform_indices = @transform_4, window_bounds = array<i64: 128, 128>}]} {
    %c0 = arith.constant 0 : index
    %c0_0 = arith.constant 0 : index
    %0 = vector.load %arg2[%c0, %c0_0] : memref<128x256xf32, #tpu.memory_space<vmem>>, vector<128x256xf32>
    %c0_1 = arith.constant 0 : index
    %c0_2 = arith.constant 0 : index
    %1 = vector.load %arg4[%c0_1, %c0_2] : memref<1x256xf32, #tpu.memory_space<vmem>>, vector<1x256xf32>
    %2 = vector.broadcast %1 : vector<1x256xf32> to vector<128x256xf32>
    %3 = arith.mulf %0, %2 : vector<128x256xf32>
    %c0_3 = arith.constant 0 : index
    %c0_4 = arith.constant 0 : index
    %4 = vector.load %arg5[%c0_3, %c0_4] : memref<1x256xf32, #tpu.memory_space<vmem>>, vector<1x256xf32>
    %5 = vector.broadcast %4 : vector<1x256xf32> to vector<128x256xf32>
    %6 = arith.addf %3, %5 : vector<128x256xf32>
    %cst = arith.constant 0.000000e+00 : f32
    %7 = vector.broadcast %cst : f32 to vector<128x256xf32>
    %8 = arith.maximumf %6, %7 : vector<128x256xf32>
    %9 = arith.truncf %8 : vector<128x256xf32> to vector<128x256xbf16>
    %c0_5 = arith.constant 0 : index
    %c0_6 = arith.constant 0 : index
    %10 = vector.load %arg3[%c0_5, %c0_6] : memref<256x128xbf16, #tpu.memory_space<vmem>>, vector<256x128xbf16>
    %cst_7 = arith.constant dense<0.000000e+00> : vector<128x128xf32>
    %11 = tpu.matmul %9, %10, %cst_7 {dimension_numbers = #tpu.dot_dimension_numbers<[1], [0], [0], [1], [0, 0, 1, 1], [], []>} : vector<128x256xbf16>, vector<256x128xbf16>, vector<128x128xf32> -> vector<128x128xf32>
    %c0_8 = arith.constant 0 : index
    %c0_9 = arith.constant 0 : index
    %12 = vector.load %arg6[%c0_8, %c0_9] : memref<128x128xf32, #tpu.memory_space<vmem>>, vector<128x128xf32>
    tpu.vector_store %arg6[%c0_8, %c0_9], %11 {strides = array<i32>} : memref<128x128xf32, #tpu.memory_space<vmem>>, vector<128x128xf32>,
    return
  }
  func.func @transform_0(%arg0: i32, %arg1: i32) -> (i32, i32) {
    %c0_i32 = arith.constant 0 : i32
    %c0_i32_0 = arith.constant 0 : i32
    return %arg0, %c0_i32 : i32, i32
  }
  func.func @transform_1(%arg0: i32, %arg1: i32) -> (i32, i32) {
    %c0_i32 = arith.constant 0 : i32
    %c0_i32_0 = arith.constant 0 : i32
    return %c0_i32, %arg1 : i32, i32
  }
  func.func @transform_2(%arg0: i32, %arg1: i32) -> (i32, i32) {
    %c0_i32 = arith.constant 0 : i32
    %c0_i32_0 = arith.constant 0 : i32
    %c0_i32_1 = arith.constant 0 : i32
    return %c0_i32, %c0_i32_0 : i32, i32
  }
  func.func @transform_3(%arg0: i32, %arg1: i32) -> (i32, i32) {
    %c0_i32 = arith.constant 0 : i32
    %c0_i32_0 = arith.constant 0 : i32
    %c0_i32_1 = arith.constant 0 : i32
    return %c0_i32, %c0_i32_0 : i32, i32
  }
  func.func @transform_4(%arg0: i32, %arg1: i32) -> (i32, i32) {
    %c0_i32 = arith.constant 0 : i32
    return %arg0, %arg1 : i32, i32
  }
}

module attributes {stable_mosaic.version = 11 : i64} {
  func.func @kernel(%arg0: i32, %arg1: i32, %arg2: memref<32x512xf32, #tpu.memory_space<vmem>>, %arg3: memref<512x128xbf16, #tpu.memory_space<vmem>>, %arg4: memref<1x512xf32, #tpu.memory_space<vmem>>, %arg5: memref<1x512xf32, #tpu.memory_space<vmem>>, %arg6: memref<1x128xf32, #tpu.memory_space<vmem>>, %arg7: memref<1x128xf32, #tpu.memory_space<vmem>>, %arg8: memref<32x128xf32, #tpu.memory_space<vmem>>) attributes {dimension_semantics = [#tpu.dimension_semantics<parallel>, #tpu.dimension_semantics<parallel>], iteration_bounds = array<i64: 1, 1>, scalar_prefetch = 0 : i64, scratch_operands = 0 : i64, tpu.core_type = #tpu.core_type<tc>, window_params = [{transform_indices = @transform_0, window_bounds = array<i64: 32, 512>}, {transform_indices = @transform_1, window_bounds = array<i64: 512, 128>}, {pipeline_mode = #tpu.pipeline_mode<synchronous>, transform_indices = @transform_2, window_bounds = array<i64: 1, 512>}, {pipeline_mode = #tpu.pipeline_mode<synchronous>, transform_indices = @transform_3, window_bounds = array<i64: 1, 512>}, {transform_indices = @transform_4, window_bounds = array<i64: 1, 128>}, {transform_indices = @transform_5, window_bounds = array<i64: 1, 128>}, {transform_indices = @transform_6, window_bounds = array<i64: 32, 128>}]} {
    %c0 = arith.constant 0 : index
    %c0_0 = arith.constant 0 : index
    %0 = vector.load %arg2[%c0, %c0_0] : memref<32x512xf32, #tpu.memory_space<vmem>>, vector<32x512xf32>
    %c0_1 = arith.constant 0 : index
    %c0_2 = arith.constant 0 : index
    %1 = vector.load %arg4[%c0_1, %c0_2] : memref<1x512xf32, #tpu.memory_space<vmem>>, vector<1x512xf32>
    %2 = vector.broadcast %1 : vector<1x512xf32> to vector<32x512xf32>
    %3 = arith.mulf %0, %2 : vector<32x512xf32>
    %c0_3 = arith.constant 0 : index
    %c0_4 = arith.constant 0 : index
    %4 = vector.load %arg5[%c0_3, %c0_4] : memref<1x512xf32, #tpu.memory_space<vmem>>, vector<1x512xf32>
    %5 = vector.broadcast %4 : vector<1x512xf32> to vector<32x512xf32>
    %6 = arith.addf %3, %5 : vector<32x512xf32>
    %cst = arith.constant 0.000000e+00 : f32
    %7 = vector.broadcast %cst : f32 to vector<32x512xf32>
    %8 = arith.maximumf %6, %7 : vector<32x512xf32>
    %9 = arith.truncf %8 : vector<32x512xf32> to vector<32x512xbf16>
    %c0_5 = arith.constant 0 : index
    %c0_6 = arith.constant 0 : index
    %10 = vector.load %arg3[%c0_5, %c0_6] : memref<512x128xbf16, #tpu.memory_space<vmem>>, vector<512x128xbf16>
    %cst_7 = arith.constant dense<0.000000e+00> : vector<32x128xf32>
    %11 = tpu.matmul %9, %10, %cst_7 {dimension_numbers = #tpu.dot_dimension_numbers<[1], [0], [0], [1], [0, 0, 1, 1], [], []>} : vector<32x512xbf16>, vector<512x128xbf16>, vector<32x128xf32> -> vector<32x128xf32>
    %c0_8 = arith.constant 0 : index
    %c0_9 = arith.constant 0 : index
    %12 = vector.load %arg6[%c0_8, %c0_9] : memref<1x128xf32, #tpu.memory_space<vmem>>, vector<1x128xf32>
    %13 = vector.broadcast %12 : vector<1x128xf32> to vector<32x128xf32>
    %14 = arith.mulf %11, %13 : vector<32x128xf32>
    %c0_10 = arith.constant 0 : index
    %c0_11 = arith.constant 0 : index
    %15 = vector.load %arg7[%c0_10, %c0_11] : memref<1x128xf32, #tpu.memory_space<vmem>>, vector<1x128xf32>
    %16 = vector.broadcast %15 : vector<1x128xf32> to vector<32x128xf32>
    %17 = arith.addf %14, %16 : vector<32x128xf32>
    %cst_12 = arith.constant 0.000000e+00 : f32
    %18 = vector.broadcast %cst_12 : f32 to vector<32x128xf32>
    %19 = arith.maximumf %17, %18 : vector<32x128xf32>
    %c0_13 = arith.constant 0 : index
    %c0_14 = arith.constant 0 : index
    %20 = vector.load %arg8[%c0_13, %c0_14] : memref<32x128xf32, #tpu.memory_space<vmem>>, vector<32x128xf32>
    tpu.vector_store %arg8[%c0_13, %c0_14], %19 {strides = array<i32>} : memref<32x128xf32, #tpu.memory_space<vmem>>, vector<32x128xf32>,
    return
  }
  func.func @transform_0(%arg0: i32, %arg1: i32) -> (i32, i32) {
    %c0_i32 = arith.constant 0 : i32
    %c0_i32_0 = arith.constant 0 : i32
    return %arg0, %c0_i32 : i32, i32
  }
  func.func @transform_1(%arg0: i32, %arg1: i32) -> (i32, i32) {
    %c0_i32 = arith.constant 0 : i32
    %c0_i32_0 = arith.constant 0 : i32
    return %c0_i32, %arg1 : i32, i32
  }
  func.func @transform_2(%arg0: i32, %arg1: i32) -> (i32, i32) {
    %c0_i32 = arith.constant 0 : i32
    %c0_i32_0 = arith.constant 0 : i32
    %c0_i32_1 = arith.constant 0 : i32
    return %c0_i32, %c0_i32_0 : i32, i32
  }
  func.func @transform_3(%arg0: i32, %arg1: i32) -> (i32, i32) {
    %c0_i32 = arith.constant 0 : i32
    %c0_i32_0 = arith.constant 0 : i32
    %c0_i32_1 = arith.constant 0 : i32
    return %c0_i32, %c0_i32_0 : i32, i32
  }
  func.func @transform_4(%arg0: i32, %arg1: i32) -> (i32, i32) {
    %c0_i32 = arith.constant 0 : i32
    %c0_i32_0 = arith.constant 0 : i32
    return %c0_i32, %arg1 : i32, i32
  }
  func.func @transform_5(%arg0: i32, %arg1: i32) -> (i32, i32) {
    %c0_i32 = arith.constant 0 : i32
    %c0_i32_0 = arith.constant 0 : i32
    return %c0_i32, %arg1 : i32, i32
  }
  func.func @transform_6(%arg0: i32, %arg1: i32) -> (i32, i32) {
    %c0_i32 = arith.constant 0 : i32
    return %arg0, %arg1 : i32, i32
  }
}

module attributes {stable_mosaic.version = 11 : i64} {
  func.func @kernel(%arg0: i32, %arg1: i32, %arg2: memref<32x1152xf32, #tpu.memory_space<vmem>>, %arg3: memref<1152x128xbf16, #tpu.memory_space<vmem>>, %arg4: memref<32x128xf32, #tpu.memory_space<vmem>>) attributes {dimension_semantics = [#tpu.dimension_semantics<parallel>, #tpu.dimension_semantics<parallel>], iteration_bounds = array<i64: 1, 1>, scalar_prefetch = 0 : i64, scratch_operands = 0 : i64, tpu.core_type = #tpu.core_type<tc>, window_params = [{transform_indices = @transform_0, window_bounds = array<i64: 32, 1152>}, {transform_indices = @transform_1, window_bounds = array<i64: 1152, 128>}, {transform_indices = @transform_2, window_bounds = array<i64: 32, 128>}]} {
    %c0 = arith.constant 0 : index
    %c0_0 = arith.constant 0 : index
    %0 = vector.load %arg2[%c0, %c0_0] : memref<32x1152xf32, #tpu.memory_space<vmem>>, vector<32x1152xf32>
    %1 = arith.truncf %0 : vector<32x1152xf32> to vector<32x1152xbf16>
    %c0_1 = arith.constant 0 : index
    %c0_2 = arith.constant 0 : index
    %2 = vector.load %arg3[%c0_1, %c0_2] : memref<1152x128xbf16, #tpu.memory_space<vmem>>, vector<1152x128xbf16>
    %cst = arith.constant dense<0.000000e+00> : vector<32x128xf32>
    %3 = tpu.matmul %1, %2, %cst {dimension_numbers = #tpu.dot_dimension_numbers<[1], [0], [0], [1], [0, 0, 1, 1], [], []>} : vector<32x1152xbf16>, vector<1152x128xbf16>, vector<32x128xf32> -> vector<32x128xf32>
    %c0_3 = arith.constant 0 : index
    %c0_4 = arith.constant 0 : index
    %4 = vector.load %arg4[%c0_3, %c0_4] : memref<32x128xf32, #tpu.memory_space<vmem>>, vector<32x128xf32>
    tpu.vector_store %arg4[%c0_3, %c0_4], %3 {strides = array<i32>} : memref<32x128xf32, #tpu.memory_space<vmem>>, vector<32x128xf32>,
    return
  }
  func.func @transform_0(%arg0: i32, %arg1: i32) -> (i32, i32) {
    %c0_i32 = arith.constant 0 : i32
    %c0_i32_0 = arith.constant 0 : i32
    return %arg0, %c0_i32 : i32, i32
  }
  func.func @transform_1(%arg0: i32, %arg1: i32) -> (i32, i32) {
    %c0_i32 = arith.constant 0 : i32
    %c0_i32_0 = arith.constant 0 : i32
    return %c0_i32, %arg1 : i32, i32
  }
  func.func @transform_2(%arg0: i32, %arg1: i32) -> (i32, i32) {
    %c0_i32 = arith.constant 0 : i32
    return %arg0, %arg1 : i32, i32
  }
}

module attributes {stable_mosaic.version = 11 : i64} {
  func.func @kernel(%arg0: i32, %arg1: i32, %arg2: memref<32x512xf32, #tpu.memory_space<vmem>>, %arg3: memref<512x256xbf16, #tpu.memory_space<vmem>>, %arg4: memref<1x512xf32, #tpu.memory_space<vmem>>, %arg5: memref<1x512xf32, #tpu.memory_space<vmem>>, %arg6: memref<32x256xf32, #tpu.memory_space<vmem>>) attributes {dimension_semantics = [#tpu.dimension_semantics<parallel>, #tpu.dimension_semantics<parallel>], iteration_bounds = array<i64: 1, 1>, scalar_prefetch = 0 : i64, scratch_operands = 0 : i64, tpu.core_type = #tpu.core_type<tc>, window_params = [{transform_indices = @transform_0, window_bounds = array<i64: 32, 512>}, {transform_indices = @transform_1, window_bounds = array<i64: 512, 256>}, {pipeline_mode = #tpu.pipeline_mode<synchronous>, transform_indices = @transform_2, window_bounds = array<i64: 1, 512>}, {pipeline_mode = #tpu.pipeline_mode<synchronous>, transform_indices = @transform_3, window_bounds = array<i64: 1, 512>}, {transform_indices = @transform_4, window_bounds = array<i64: 32, 256>}]} {
    %c0 = arith.constant 0 : index
    %c0_0 = arith.constant 0 : index
    %0 = vector.load %arg2[%c0, %c0_0] : memref<32x512xf32, #tpu.memory_space<vmem>>, vector<32x512xf32>
    %c0_1 = arith.constant 0 : index
    %c0_2 = arith.constant 0 : index
    %1 = vector.load %arg4[%c0_1, %c0_2] : memref<1x512xf32, #tpu.memory_space<vmem>>, vector<1x512xf32>
    %2 = vector.broadcast %1 : vector<1x512xf32> to vector<32x512xf32>
    %3 = arith.mulf %0, %2 : vector<32x512xf32>
    %c0_3 = arith.constant 0 : index
    %c0_4 = arith.constant 0 : index
    %4 = vector.load %arg5[%c0_3, %c0_4] : memref<1x512xf32, #tpu.memory_space<vmem>>, vector<1x512xf32>
    %5 = vector.broadcast %4 : vector<1x512xf32> to vector<32x512xf32>
    %6 = arith.addf %3, %5 : vector<32x512xf32>
    %cst = arith.constant 0.000000e+00 : f32
    %7 = vector.broadcast %cst : f32 to vector<32x512xf32>
    %8 = arith.maximumf %6, %7 : vector<32x512xf32>
    %9 = arith.truncf %8 : vector<32x512xf32> to vector<32x512xbf16>
    %c0_5 = arith.constant 0 : index
    %c0_6 = arith.constant 0 : index
    %10 = vector.load %arg3[%c0_5, %c0_6] : memref<512x256xbf16, #tpu.memory_space<vmem>>, vector<512x256xbf16>
    %cst_7 = arith.constant dense<0.000000e+00> : vector<32x256xf32>
    %11 = tpu.matmul %9, %10, %cst_7 {dimension_numbers = #tpu.dot_dimension_numbers<[1], [0], [0], [1], [0, 0, 1, 1], [], []>} : vector<32x512xbf16>, vector<512x256xbf16>, vector<32x256xf32> -> vector<32x256xf32>
    %c0_8 = arith.constant 0 : index
    %c0_9 = arith.constant 0 : index
    %12 = vector.load %arg6[%c0_8, %c0_9] : memref<32x256xf32, #tpu.memory_space<vmem>>, vector<32x256xf32>
    tpu.vector_store %arg6[%c0_8, %c0_9], %11 {strides = array<i32>} : memref<32x256xf32, #tpu.memory_space<vmem>>, vector<32x256xf32>,
    return
  }
  func.func @transform_0(%arg0: i32, %arg1: i32) -> (i32, i32) {
    %c0_i32 = arith.constant 0 : i32
    %c0_i32_0 = arith.constant 0 : i32
    return %arg0, %c0_i32 : i32, i32
  }
  func.func @transform_1(%arg0: i32, %arg1: i32) -> (i32, i32) {
    %c0_i32 = arith.constant 0 : i32
    %c0_i32_0 = arith.constant 0 : i32
    return %c0_i32, %arg1 : i32, i32
  }
  func.func @transform_2(%arg0: i32, %arg1: i32) -> (i32, i32) {
    %c0_i32 = arith.constant 0 : i32
    %c0_i32_0 = arith.constant 0 : i32
    %c0_i32_1 = arith.constant 0 : i32
    return %c0_i32, %c0_i32_0 : i32, i32
  }
  func.func @transform_3(%arg0: i32, %arg1: i32) -> (i32, i32) {
    %c0_i32 = arith.constant 0 : i32
    %c0_i32_0 = arith.constant 0 : i32
    %c0_i32_1 = arith.constant 0 : i32
    return %c0_i32, %c0_i32_0 : i32, i32
  }
  func.func @transform_4(%arg0: i32, %arg1: i32) -> (i32, i32) {
    %c0_i32 = arith.constant 0 : i32
    return %arg0, %arg1 : i32, i32
  }
}

module attributes {stable_mosaic.version = 11 : i64} {
  func.func @kernel(%arg0: i32, %arg1: i32, %arg2: memref<8x1024xf32, #tpu.memory_space<vmem>>, %arg3: memref<1024x128xbf16, #tpu.memory_space<vmem>>, %arg4: memref<1x1024xf32, #tpu.memory_space<vmem>>, %arg5: memref<1x1024xf32, #tpu.memory_space<vmem>>, %arg6: memref<1x128xf32, #tpu.memory_space<vmem>>, %arg7: memref<1x128xf32, #tpu.memory_space<vmem>>, %arg8: memref<8x128xf32, #tpu.memory_space<vmem>>) attributes {dimension_semantics = [#tpu.dimension_semantics<parallel>, #tpu.dimension_semantics<parallel>], iteration_bounds = array<i64: 1, 1>, scalar_prefetch = 0 : i64, scratch_operands = 0 : i64, tpu.core_type = #tpu.core_type<tc>, window_params = [{transform_indices = @transform_0, window_bounds = array<i64: 8, 1024>}, {transform_indices = @transform_1, window_bounds = array<i64: 1024, 128>}, {pipeline_mode = #tpu.pipeline_mode<synchronous>, transform_indices = @transform_2, window_bounds = array<i64: 1, 1024>}, {pipeline_mode = #tpu.pipeline_mode<synchronous>, transform_indices = @transform_3, window_bounds = array<i64: 1, 1024>}, {transform_indices = @transform_4, window_bounds = array<i64: 1, 128>}, {transform_indices = @transform_5, window_bounds = array<i64: 1, 128>}, {transform_indices = @transform_6, window_bounds = array<i64: 8, 128>}]} {
    %c0 = arith.constant 0 : index
    %c0_0 = arith.constant 0 : index
    %0 = vector.load %arg2[%c0, %c0_0] : memref<8x1024xf32, #tpu.memory_space<vmem>>, vector<8x1024xf32>
    %c0_1 = arith.constant 0 : index
    %c0_2 = arith.constant 0 : index
    %1 = vector.load %arg4[%c0_1, %c0_2] : memref<1x1024xf32, #tpu.memory_space<vmem>>, vector<1x1024xf32>
    %2 = vector.broadcast %1 : vector<1x1024xf32> to vector<8x1024xf32>
    %3 = arith.mulf %0, %2 : vector<8x1024xf32>
    %c0_3 = arith.constant 0 : index
    %c0_4 = arith.constant 0 : index
    %4 = vector.load %arg5[%c0_3, %c0_4] : memref<1x1024xf32, #tpu.memory_space<vmem>>, vector<1x1024xf32>
    %5 = vector.broadcast %4 : vector<1x1024xf32> to vector<8x1024xf32>
    %6 = arith.addf %3, %5 : vector<8x1024xf32>
    %cst = arith.constant 0.000000e+00 : f32
    %7 = vector.broadcast %cst : f32 to vector<8x1024xf32>
    %8 = arith.maximumf %6, %7 : vector<8x1024xf32>
    %9 = arith.truncf %8 : vector<8x1024xf32> to vector<8x1024xbf16>
    %c0_5 = arith.constant 0 : index
    %c0_6 = arith.constant 0 : index
    %10 = vector.load %arg3[%c0_5, %c0_6] : memref<1024x128xbf16, #tpu.memory_space<vmem>>, vector<1024x128xbf16>
    %cst_7 = arith.constant dense<0.000000e+00> : vector<8x128xf32>
    %11 = tpu.matmul %9, %10, %cst_7 {dimension_numbers = #tpu.dot_dimension_numbers<[1], [0], [0], [1], [0, 0, 1, 1], [], []>} : vector<8x1024xbf16>, vector<1024x128xbf16>, vector<8x128xf32> -> vector<8x128xf32>
    %c0_8 = arith.constant 0 : index
    %c0_9 = arith.constant 0 : index
    %12 = vector.load %arg6[%c0_8, %c0_9] : memref<1x128xf32, #tpu.memory_space<vmem>>, vector<1x128xf32>
    %13 = vector.broadcast %12 : vector<1x128xf32> to vector<8x128xf32>
    %14 = arith.mulf %11, %13 : vector<8x128xf32>
    %c0_10 = arith.constant 0 : index
    %c0_11 = arith.constant 0 : index
    %15 = vector.load %arg7[%c0_10, %c0_11] : memref<1x128xf32, #tpu.memory_space<vmem>>, vector<1x128xf32>
    %16 = vector.broadcast %15 : vector<1x128xf32> to vector<8x128xf32>
    %17 = arith.addf %14, %16 : vector<8x128xf32>
    %cst_12 = arith.constant 0.000000e+00 : f32
    %18 = vector.broadcast %cst_12 : f32 to vector<8x128xf32>
    %19 = arith.maximumf %17, %18 : vector<8x128xf32>
    %c0_13 = arith.constant 0 : index
    %c0_14 = arith.constant 0 : index
    %20 = vector.load %arg8[%c0_13, %c0_14] : memref<8x128xf32, #tpu.memory_space<vmem>>, vector<8x128xf32>
    tpu.vector_store %arg8[%c0_13, %c0_14], %19 {strides = array<i32>} : memref<8x128xf32, #tpu.memory_space<vmem>>, vector<8x128xf32>,
    return
  }
  func.func @transform_0(%arg0: i32, %arg1: i32) -> (i32, i32) {
    %c0_i32 = arith.constant 0 : i32
    %c0_i32_0 = arith.constant 0 : i32
    return %arg0, %c0_i32 : i32, i32
  }
  func.func @transform_1(%arg0: i32, %arg1: i32) -> (i32, i32) {
    %c0_i32 = arith.constant 0 : i32
    %c0_i32_0 = arith.constant 0 : i32
    return %c0_i32, %arg1 : i32, i32
  }
  func.func @transform_2(%arg0: i32, %arg1: i32) -> (i32, i32) {
    %c0_i32 = arith.constant 0 : i32
    %c0_i32_0 = arith.constant 0 : i32
    %c0_i32_1 = arith.constant 0 : i32
    return %c0_i32, %c0_i32_0 : i32, i32
  }
  func.func @transform_3(%arg0: i32, %arg1: i32) -> (i32, i32) {
    %c0_i32 = arith.constant 0 : i32
    %c0_i32_0 = arith.constant 0 : i32
    %c0_i32_1 = arith.constant 0 : i32
    return %c0_i32, %c0_i32_0 : i32, i32
  }
  func.func @transform_4(%arg0: i32, %arg1: i32) -> (i32, i32) {
    %c0_i32 = arith.constant 0 : i32
    %c0_i32_0 = arith.constant 0 : i32
    return %c0_i32, %arg1 : i32, i32
  }
  func.func @transform_5(%arg0: i32, %arg1: i32) -> (i32, i32) {
    %c0_i32 = arith.constant 0 : i32
    %c0_i32_0 = arith.constant 0 : i32
    return %c0_i32, %arg1 : i32, i32
  }
  func.func @transform_6(%arg0: i32, %arg1: i32) -> (i32, i32) {
    %c0_i32 = arith.constant 0 : i32
    return %arg0, %arg1 : i32, i32
  }
}

module attributes {stable_mosaic.version = 11 : i64} {
  func.func @kernel(%arg0: i32, %arg1: i32, %arg2: memref<8x1152xf32, #tpu.memory_space<vmem>>, %arg3: memref<1152x128xbf16, #tpu.memory_space<vmem>>, %arg4: memref<8x128xf32, #tpu.memory_space<vmem>>) attributes {dimension_semantics = [#tpu.dimension_semantics<parallel>, #tpu.dimension_semantics<parallel>], iteration_bounds = array<i64: 1, 1>, scalar_prefetch = 0 : i64, scratch_operands = 0 : i64, tpu.core_type = #tpu.core_type<tc>, window_params = [{transform_indices = @transform_0, window_bounds = array<i64: 8, 1152>}, {transform_indices = @transform_1, window_bounds = array<i64: 1152, 128>}, {transform_indices = @transform_2, window_bounds = array<i64: 8, 128>}]} {
    %c0 = arith.constant 0 : index
    %c0_0 = arith.constant 0 : index
    %0 = vector.load %arg2[%c0, %c0_0] : memref<8x1152xf32, #tpu.memory_space<vmem>>, vector<8x1152xf32>
    %1 = arith.truncf %0 : vector<8x1152xf32> to vector<8x1152xbf16>
    %c0_1 = arith.constant 0 : index
    %c0_2 = arith.constant 0 : index
    %2 = vector.load %arg3[%c0_1, %c0_2] : memref<1152x128xbf16, #tpu.memory_space<vmem>>, vector<1152x128xbf16>
    %cst = arith.constant dense<0.000000e+00> : vector<8x128xf32>
    %3 = tpu.matmul %1, %2, %cst {dimension_numbers = #tpu.dot_dimension_numbers<[1], [0], [0], [1], [0, 0, 1, 1], [], []>} : vector<8x1152xbf16>, vector<1152x128xbf16>, vector<8x128xf32> -> vector<8x128xf32>
    %c0_3 = arith.constant 0 : index
    %c0_4 = arith.constant 0 : index
    %4 = vector.load %arg4[%c0_3, %c0_4] : memref<8x128xf32, #tpu.memory_space<vmem>>, vector<8x128xf32>
    tpu.vector_store %arg4[%c0_3, %c0_4], %3 {strides = array<i32>} : memref<8x128xf32, #tpu.memory_space<vmem>>, vector<8x128xf32>,
    return
  }
  func.func @transform_0(%arg0: i32, %arg1: i32) -> (i32, i32) {
    %c0_i32 = arith.constant 0 : i32
    %c0_i32_0 = arith.constant 0 : i32
    return %arg0, %c0_i32 : i32, i32
  }
  func.func @transform_1(%arg0: i32, %arg1: i32) -> (i32, i32) {
    %c0_i32 = arith.constant 0 : i32
    %c0_i32_0 = arith.constant 0 : i32
    return %c0_i32, %arg1 : i32, i32
  }
  func.func @transform_2(%arg0: i32, %arg1: i32) -> (i32, i32) {
    %c0_i32 = arith.constant 0 : i32
    return %arg0, %arg1 : i32, i32
  }
}

module attributes {stable_mosaic.version = 11 : i64} {
  func.func @kernel(%arg0: i32, %arg1: i32, %arg2: memref<8x1024xf32, #tpu.memory_space<vmem>>, %arg3: memref<1024x512xbf16, #tpu.memory_space<vmem>>, %arg4: memref<1x1024xf32, #tpu.memory_space<vmem>>, %arg5: memref<1x1024xf32, #tpu.memory_space<vmem>>, %arg6: memref<8x512xf32, #tpu.memory_space<vmem>>) attributes {dimension_semantics = [#tpu.dimension_semantics<parallel>, #tpu.dimension_semantics<parallel>], iteration_bounds = array<i64: 1, 1>, scalar_prefetch = 0 : i64, scratch_operands = 0 : i64, tpu.core_type = #tpu.core_type<tc>, window_params = [{transform_indices = @transform_0, window_bounds = array<i64: 8, 1024>}, {transform_indices = @transform_1, window_bounds = array<i64: 1024, 512>}, {pipeline_mode = #tpu.pipeline_mode<synchronous>, transform_indices = @transform_2, window_bounds = array<i64: 1, 1024>}, {pipeline_mode = #tpu.pipeline_mode<synchronous>, transform_indices = @transform_3, window_bounds = array<i64: 1, 1024>}, {transform_indices = @transform_4, window_bounds = array<i64: 8, 512>}]} {
    %c0 = arith.constant 0 : index
    %c0_0 = arith.constant 0 : index
    %0 = vector.load %arg2[%c0, %c0_0] : memref<8x1024xf32, #tpu.memory_space<vmem>>, vector<8x1024xf32>
    %c0_1 = arith.constant 0 : index
    %c0_2 = arith.constant 0 : index
    %1 = vector.load %arg4[%c0_1, %c0_2] : memref<1x1024xf32, #tpu.memory_space<vmem>>, vector<1x1024xf32>
    %2 = vector.broadcast %1 : vector<1x1024xf32> to vector<8x1024xf32>
    %3 = arith.mulf %0, %2 : vector<8x1024xf32>
    %c0_3 = arith.constant 0 : index
    %c0_4 = arith.constant 0 : index
    %4 = vector.load %arg5[%c0_3, %c0_4] : memref<1x1024xf32, #tpu.memory_space<vmem>>, vector<1x1024xf32>
    %5 = vector.broadcast %4 : vector<1x1024xf32> to vector<8x1024xf32>
    %6 = arith.addf %3, %5 : vector<8x1024xf32>
    %cst = arith.constant 0.000000e+00 : f32
    %7 = vector.broadcast %cst : f32 to vector<8x1024xf32>
    %8 = arith.maximumf %6, %7 : vector<8x1024xf32>
    %9 = arith.truncf %8 : vector<8x1024xf32> to vector<8x1024xbf16>
    %c0_5 = arith.constant 0 : index
    %c0_6 = arith.constant 0 : index
    %10 = vector.load %arg3[%c0_5, %c0_6] : memref<1024x512xbf16, #tpu.memory_space<vmem>>, vector<1024x512xbf16>
    %cst_7 = arith.constant dense<0.000000e+00> : vector<8x512xf32>
    %11 = tpu.matmul %9, %10, %cst_7 {dimension_numbers = #tpu.dot_dimension_numbers<[1], [0], [0], [1], [0, 0, 1, 1], [], []>} : vector<8x1024xbf16>, vector<1024x512xbf16>, vector<8x512xf32> -> vector<8x512xf32>
    %c0_8 = arith.constant 0 : index
    %c0_9 = arith.constant 0 : index
    %12 = vector.load %arg6[%c0_8, %c0_9] : memref<8x512xf32, #tpu.memory_space<vmem>>, vector<8x512xf32>
    tpu.vector_store %arg6[%c0_8, %c0_9], %11 {strides = array<i32>} : memref<8x512xf32, #tpu.memory_space<vmem>>, vector<8x512xf32>,
    return
  }
  func.func @transform_0(%arg0: i32, %arg1: i32) -> (i32, i32) {
    %c0_i32 = arith.constant 0 : i32
    %c0_i32_0 = arith.constant 0 : i32
    return %arg0, %c0_i32 : i32, i32
  }
  func.func @transform_1(%arg0: i32, %arg1: i32) -> (i32, i32) {
    %c0_i32 = arith.constant 0 : i32
    %c0_i32_0 = arith.constant 0 : i32
    return %c0_i32, %arg1 : i32, i32
  }
  func.func @transform_2(%arg0: i32, %arg1: i32) -> (i32, i32) {
    %c0_i32 = arith.constant 0 : i32
    %c0_i32_0 = arith.constant 0 : i32
    %c0_i32_1 = arith.constant 0 : i32
    return %c0_i32, %c0_i32_0 : i32, i32
  }
  func.func @transform_3(%arg0: i32, %arg1: i32) -> (i32, i32) {
    %c0_i32 = arith.constant 0 : i32
    %c0_i32_0 = arith.constant 0 : i32
    %c0_i32_1 = arith.constant 0 : i32
    return %c0_i32, %c0_i32_0 : i32, i32
  }
  func.func @transform_4(%arg0: i32, %arg1: i32) -> (i32, i32) {
    %c0_i32 = arith.constant 0 : i32
    return %arg0, %arg1 : i32, i32
  }
}

module attributes {stable_mosaic.version = 11 : i64} {
  func.func @kernel(%arg0: i32, %arg1: i32, %arg2: memref<8x1024xf32, #tpu.memory_space<vmem>>, %arg3: memref<1024x128xbf16, #tpu.memory_space<vmem>>, %arg4: memref<1x128xf32, #tpu.memory_space<vmem>>, %arg5: memref<1x128xf32, #tpu.memory_space<vmem>>, %arg6: memref<8x128xf32, #tpu.memory_space<vmem>>) attributes {dimension_semantics = [#tpu.dimension_semantics<parallel>, #tpu.dimension_semantics<parallel>], iteration_bounds = array<i64: 1, 1>, scalar_prefetch = 0 : i64, scratch_operands = 0 : i64, tpu.core_type = #tpu.core_type<tc>, window_params = [{transform_indices = @transform_0, window_bounds = array<i64: 8, 1024>}, {transform_indices = @transform_1, window_bounds = array<i64: 1024, 128>}, {transform_indices = @transform_2, window_bounds = array<i64: 1, 128>}, {transform_indices = @transform_3, window_bounds = array<i64: 1, 128>}, {transform_indices = @transform_4, window_bounds = array<i64: 8, 128>}]} {
    %c0 = arith.constant 0 : index
    %c0_0 = arith.constant 0 : index
    %0 = vector.load %arg2[%c0, %c0_0] : memref<8x1024xf32, #tpu.memory_space<vmem>>, vector<8x1024xf32>
    %1 = arith.truncf %0 : vector<8x1024xf32> to vector<8x1024xbf16>
    %c0_1 = arith.constant 0 : index
    %c0_2 = arith.constant 0 : index
    %2 = vector.load %arg3[%c0_1, %c0_2] : memref<1024x128xbf16, #tpu.memory_space<vmem>>, vector<1024x128xbf16>
    %cst = arith.constant dense<0.000000e+00> : vector<8x128xf32>
    %3 = tpu.matmul %1, %2, %cst {dimension_numbers = #tpu.dot_dimension_numbers<[1], [0], [0], [1], [0, 0, 1, 1], [], []>} : vector<8x1024xbf16>, vector<1024x128xbf16>, vector<8x128xf32> -> vector<8x128xf32>
    %c0_3 = arith.constant 0 : index
    %c0_4 = arith.constant 0 : index
    %4 = vector.load %arg4[%c0_3, %c0_4] : memref<1x128xf32, #tpu.memory_space<vmem>>, vector<1x128xf32>
    %5 = vector.broadcast %4 : vector<1x128xf32> to vector<8x128xf32>
    %6 = arith.mulf %3, %5 : vector<8x128xf32>
    %c0_5 = arith.constant 0 : index
    %c0_6 = arith.constant 0 : index
    %7 = vector.load %arg5[%c0_5, %c0_6] : memref<1x128xf32, #tpu.memory_space<vmem>>, vector<1x128xf32>
    %8 = vector.broadcast %7 : vector<1x128xf32> to vector<8x128xf32>
    %9 = arith.addf %6, %8 : vector<8x128xf32>
    %c0_7 = arith.constant 0 : index
    %c0_8 = arith.constant 0 : index
    %10 = vector.load %arg6[%c0_7, %c0_8] : memref<8x128xf32, #tpu.memory_space<vmem>>, vector<8x128xf32>
    tpu.vector_store %arg6[%c0_7, %c0_8], %9 {strides = array<i32>} : memref<8x128xf32, #tpu.memory_space<vmem>>, vector<8x128xf32>,
    return
  }
  func.func @transform_0(%arg0: i32, %arg1: i32) -> (i32, i32) {
    %c0_i32 = arith.constant 0 : i32
    %c0_i32_0 = arith.constant 0 : i32
    return %arg0, %c0_i32 : i32, i32
  }
  func.func @transform_1(%arg0: i32, %arg1: i32) -> (i32, i32) {
    %c0_i32 = arith.constant 0 : i32
    %c0_i32_0 = arith.constant 0 : i32
    return %c0_i32, %arg1 : i32, i32
  }
  func.func @transform_2(%arg0: i32, %arg1: i32) -> (i32, i32) {
    %c0_i32 = arith.constant 0 : i32
    %c0_i32_0 = arith.constant 0 : i32
    return %c0_i32, %arg1 : i32, i32
  }
  func.func @transform_3(%arg0: i32, %arg1: i32) -> (i32, i32) {
    %c0_i32 = arith.constant 0 : i32
    %c0_i32_0 = arith.constant 0 : i32
    return %c0_i32, %arg1 : i32, i32
  }
  func.func @transform_4(%arg0: i32, %arg1: i32) -> (i32, i32) {
    %c0_i32 = arith.constant 0 : i32
    return %arg0, %arg1 : i32, i32
  }
}

</mosaic_0001>

<bundles_post_ra>
// kernel: forward.122
= control target key start
LH: loop header
LB: loop body
LE: loop exit
PB: predicated region body
PF: predicated region fallthrough
CT: control target
= control target key end

     0   :  { %s926_s1 = inlined_call_operand.vmem [shape: bf16[256,128], index: 1, kind: input, shape index: {}]   ;;  %s927_s2 = inlined_call_operand.vmem [shape: f32[1,256], index: 2, kind: input, shape index: {}]   ;;  %s928_s0 = inlined_call_operand.vmem [shape: f32[128,256], index: 0, kind: input, shape index: {}]   ;;  %s929_s3 = inlined_call_operand.vmem [shape: f32[1,256], index: 3, kind: input, shape index: {}]   ;;  %s930_s4 = inlined_call_operand.vmem [shape: f32[1,128], index: 4, kind: input, shape index: {}]   ;;  %s931_s5 = inlined_call_operand.vmem [shape: f32[1,128], index: 5, kind: input, shape index: {}]   ;;  %s932_s6 = inlined_call_operand.vmem [shape: f32[128,128], index: 6, kind: output, shape index: {}]  }
   0x1   :  { %v552_v0 = vld [vmem:[%s926_s1 + $0x38] sm:$0xff]  ;;  %v551_v2 = vld [vmem:[%s926_s1 + $0x30] sm:$0xff]  ;;  %v550_v4 = vld [vmem:[%s926_s1 + $0x28] sm:$0xff] }
   0x2   :  { %v560_v1 = vld [vmem:[%s926_s1 + $0x78] sm:$0xff]  ;;  %307 = vmatpush.bf16.msra.mxu0 %v552_v0  ;;  %561 = vmatpush.bf16.msra.mxu2 %v552_v0  ;;  %v559_v3 = vld [vmem:[%s926_s1 + $0x70] sm:$0xff]  ;;  %v558_v5 = vld [vmem:[%s926_s1 + $0x68] sm:$0xff] }
   0x3   :  { %356 = vmatpush.bf16.msra.mxu1 %v560_v1  ;;  %569 = vmatpush.bf16.msra.mxu3 %v560_v1  ;;  %v55_v6 = vld [vmem:[%s927_s2] sm:$0x3]  ;;  %v548_v9 = vld [vmem:[%s926_s1 + $0x18] sm:$0xff]  ;;  %v25_v13 = vld [vmem:[%s928_s0 + $0x10] sm:$0xff] }
   0x4   :  { %v549_v7 = vld [vmem:[%s926_s1 + $0x20] sm:$0xff]  ;;  %v644_v10 = vperm.slane %v55_v6, 0  ;;  %v556_v11 = vld [vmem:[%s926_s1 + $0x58] sm:$0xff]  ;;  %v658_v15 = vperm.slane %v55_v6, 1  ;;  %v41_v17 = vld [vmem:[%s928_s0 + $0x90] sm:$0xff] }
   0x5   :  { %v557_v8 = vld [vmem:[%s926_s1 + $0x60] sm:$0xff]  ;;  %v24_v18 = vld [vmem:[%s928_s0 + $0x8] sm:$0xff]  ;;  %v26_v19 = vld [vmem:[%s928_s0 + $0x18] sm:$0xff] }
   0x6   :  { %308 = vmatpush.bf16.msra.mxu0 %v551_v2  ;;  %562 = vmatpush.bf16.msra.mxu2 %v551_v2  ;;  %v23_v12 = vld [vmem:[%s928_s0] sm:$0xff]  ;;  %v40_v20 = vld [vmem:[%s928_s0 + $0x88] sm:$0xff]  ;;  %v42_v21 = vld [vmem:[%s928_s0 + $0x98] sm:$0xff]  ;;  %v63_v25 = vmul.f32 %v644_v10, %v25_v13  ;;  %v79_v27 = vmul.f32 %v644_v10, %v41_v17  ;;  %v62_v28 = vmul.f32 %v658_v15, %v24_v18 }
   0x7   :  { %357 = vmatpush.bf16.msra.mxu1 %v559_v3  ;;  %570 = vmatpush.bf16.msra.mxu3 %v559_v3  ;;  %v93_v14 = vld [vmem:[%s929_s3] sm:$0x3]  ;;  %v61_v22 = vmul.f32 %v644_v10, %v23_v12  ;;  %v547_v29 = vld [vmem:[%s926_s1 + $0x10] sm:$0xff]  ;;  %v64_v30 = vmul.f32 %v658_v15, %v26_v19  ;;  %v78_v31 = vmul.f32 %v658_v15, %v40_v20  ;;  %v546_v39 = vld [vmem:[%s926_s1 + $0x8] sm:$0xff] }
   0x8   :  { %v39_v16 = vld [vmem:[%s928_s0 + $0x80] sm:$0xff]  ;;  %v679_v23 = vperm.slane %v93_v14, 0  ;;  %v681_v24 = vperm.slane %v93_v14, 1  ;;  %v80_v32 = vmul.f32 %v658_v15, %v42_v21  ;;  %v555_v33 = vld [vmem:[%s926_s1 + $0x50] sm:$0xff]  ;;  %v554_v43 = vld [vmem:[%s926_s1 + $0x48] sm:$0xff] }
   0x9   :  { %v77_v26 = vmul.f32 %v644_v10, %v39_v16  ;;  %v545_v48 = vld [vmem:[%s926_s1] sm:$0xff]  ;;  %v29_v57 = vld [vmem:[%s928_s0 + $0x30] sm:$0xff]  ;;  %v28_v62 = vld [vmem:[%s928_s0 + $0x28] sm:$0xff] }
   0xa   :  { %309 = vmatpush.bf16.msra.mxu0 %v550_v4  ;;  %563 = vmatpush.bf16.msra.mxu2 %v550_v4  ;;  %v99_v34 = vadd.f32 %v679_v23, %v61_v22  ;;  %v101_v35 = vadd.f32 %v679_v23, %v63_v25  ;;  %v117_v37 = vadd.f32 %v679_v23, %v79_v27  ;;  %v553_v53 = vld [vmem:[%s926_s1 + $0x40] sm:$0xff]  ;;  %v45_v61 = vld [vmem:[%s928_s0 + $0xb0] sm:$0xff]  ;;  %v30_v63 = vld [vmem:[%s928_s0 + $0x38] sm:$0xff] }
   0xb   :  { %358 = vmatpush.bf16.msra.mxu1 %v558_v5  ;;  %571 = vmatpush.bf16.msra.mxu3 %v558_v5  ;;  %v115_v36 = vadd.f32 %v679_v23, %v77_v26  ;;  %v100_v38 = vadd.f32 %v681_v24, %v62_v28  ;;  %v102_v40 = vadd.f32 %v681_v24, %v64_v30  ;;  %v27_v56 = vld [vmem:[%s928_s0 + $0x20] sm:$0xff]  ;;  %v44_v0 = vld [vmem:[%s928_s0 + $0xa8] sm:$0xff]  ;;  %v46_v1 = vld [vmem:[%s928_s0 + $0xb8] sm:$0xff] }
   0xc   :  { %v116_v41 = vadd.f32 %v681_v24, %v78_v31  ;;  %v118_v42 = vadd.f32 %v681_v24, %v80_v32  ;;  %v131_v44 = vmax.f32 %v99_v34, 0.0  ;;  %v133_v45 = vmax.f32 %v101_v35, 0.0  ;;  %v43_v58 = vld [vmem:[%s928_s0 + $0xa0] sm:$0xff] }
   0xd   :  { %v147_v46 = vmax.f32 %v115_v36, 0.0  ;;  %v149_v47 = vmax.f32 %v117_v37, 0.0  ;;  %v132_v49 = vmax.f32 %v100_v38, 0.0  ;;  %v134_v50 = vmax.f32 %v102_v40, 0.0  ;;  %v31_v32 = vld [vmem:[%s928_s0 + $0x40] sm:$0xff]  ;;  %v49_v37 = vld [vmem:[%s928_s0 + $0xd0] sm:$0xff] }
   0xe   :  { %310 = vmatpush.bf16.msra.mxu0 %v549_v7  ;;  %564 = vmatpush.bf16.msra.mxu2 %v549_v7  ;;  %v148_v51 = vmax.f32 %v116_v41, 0.0  ;;  %v150_v52 = vmax.f32 %v118_v42, 0.0  ;;  %v163_v54 = vpack.c.bf16 %v133_v45, %v131_v44  ;;  %v65_v2 = vmul.f32 %v644_v10, %v27_v56  ;;  %v47_v36 = vld [vmem:[%s928_s0 + $0xc0] sm:$0xff]  ;;  %v32_v38 = vld [vmem:[%s928_s0 + $0x48] sm:$0xff]  ;;  %v50_v41 = vld [vmem:[%s928_s0 + $0xd8] sm:$0xff] }
   0xf   :  { %359 = vmatpush.bf16.msra.mxu1 %v557_v8  ;;  %572 = vmatpush.bf16.msra.mxu3 %v557_v8  ;;  %v171_v55 = vpack.c.bf16 %v149_v47, %v147_v46  ;;  %v164_v59 = vpack.c.bf16 %v134_v50, %v132_v49  ;;  %v67_v3 = vmul.f32 %v644_v10, %v29_v57  ;;  %v48_v40 = vld [vmem:[%s928_s0 + $0xc8] sm:$0xff] }
  0x10   :  { %v172_v60 = vpack.c.bf16 %v150_v52, %v148_v51  ;;  %v81_v4 = vmul.f32 %v644_v10, %v43_v58  ;;  %v83_v5 = vmul.f32 %v644_v10, %v45_v61  ;;  %v66_v6 = vmul.f32 %v658_v15, %v28_v62 }
  0x11   :  { %v68_v7 = vmul.f32 %v658_v15, %v30_v63  ;;  %v82_v8 = vmul.f32 %v658_v15, %v44_v0  ;;  %v105_v12 = vadd.f32 %v679_v23, %v67_v3  ;;  %v69_v42 = vmul.f32 %v644_v10, %v31_v32 }
  0x12   :  { %311 = vmatpush.bf16.msra.mxu0 %v548_v9  ;;  %565 = vmatpush.bf16.msra.mxu2 %v548_v9  ;;  %v84_v9 = vmul.f32 %v658_v15, %v46_v1  ;;  %v119_v13 = vadd.f32 %v679_v23, %v81_v4  ;;  %v121_v14 = vadd.f32 %v679_v23, %v83_v5  ;;  %v35_v4 = vld [vmem:[%s928_s0 + $0x60] sm:$0xff]  ;;  %v37_v5 = vld [vmem:[%s928_s0 + $0x70] sm:$0xff] }
  0x13   :  { %360 = vmatpush.bf16.msra.mxu1 %v556_v11  ;;  %573 = vmatpush.bf16.msra.mxu3 %v556_v11  ;;  %v103_v11 = vadd.f32 %v679_v23, %v65_v2  ;;  %v104_v16 = vadd.f32 %v681_v24, %v66_v6  ;;  %v106_v17 = vadd.f32 %v681_v24, %v68_v7  ;;  %v137_v21 = vmax.f32 %v105_v12, 0.0  ;;  %v38_v12 = vld [vmem:[%s928_s0 + $0x78] sm:$0xff] }
  0x14   :  { %v120_v18 = vadd.f32 %v681_v24, %v82_v8  ;;  %v122_v19 = vadd.f32 %v681_v24, %v84_v9  ;;  %v151_v22 = vmax.f32 %v119_v13, 0.0  ;;  %v153_v25 = vmax.f32 %v121_v14, 0.0  ;;  %v51_v8 = vld [vmem:[%s928_s0 + $0xe0] sm:$0xff]  ;;  %v53_v9 = vld [vmem:[%s928_s0 + $0xf0] sm:$0xff]  ;;  %v52_v13 = vld [vmem:[%s928_s0 + $0xe8] sm:$0xff] }
  0x15   :  { %v135_v20 = vmax.f32 %v103_v11, 0.0  ;;  %v136_v26 = vmax.f32 %v104_v16, 0.0  ;;  %v138_v27 = vmax.f32 %v106_v17, 0.0  ;;  %v85_v44 = vmul.f32 %v644_v10, %v47_v36  ;;  %v36_v11 = vld [vmem:[%s928_s0 + $0x68] sm:$0xff]  ;;  %v54_v14 = vld [vmem:[%s928_s0 + $0xf8] sm:$0xff] }
  0x16   :  { %312 = vmatpush.bf16.msra.mxu0 %v547_v29  ;;  %566 = vmatpush.bf16.msra.mxu2 %v547_v29  ;;  %v152_v28 = vmax.f32 %v120_v18, 0.0  ;;  %v154_v29 = vmax.f32 %v122_v19, 0.0  ;;  %v173_v31 = vpack.c.bf16 %v153_v25, %v151_v22  ;;  %v87_v45 = vmul.f32 %v644_v10, %v49_v37 }
  0x17   :  { %361 = vmatpush.bf16.msra.mxu1 %v555_v33  ;;  %574 = vmatpush.bf16.msra.mxu3 %v555_v33  ;;  %v165_v30 = vpack.c.bf16 %v137_v21, %v135_v20  ;;  %v33_v33 = vld [vmem:[%s928_s0 + $0x50] sm:$0xff]  ;;  %v166_v34 = vpack.c.bf16 %v138_v27, %v136_v26  ;;  %v70_v46 = vmul.f32 %v658_v15, %v32_v38 }
  0x18   :  { %v174_v35 = vpack.c.bf16 %v154_v29, %v152_v28  ;;  %v88_v49 = vmul.f32 %v658_v15, %v50_v41  ;;  %v107_v50 = vadd.f32 %v679_v23, %v69_v42  ;;  %v123_v52 = vadd.f32 %v679_v23, %v85_v44 }
  0x19   :  { %v73_v16 = vmul.f32 %v644_v10, %v35_v4  ;;  %v75_v17 = vmul.f32 %v644_v10, %v37_v5  ;;  %v89_v18 = vmul.f32 %v644_v10, %v51_v8  ;;  %v91_v19 = vmul.f32 %v644_v10, %v53_v9 }
  0x1a   :  { %313 = vmatpush.bf16.msra.mxu0 %v546_v39  ;;  %567 = vmatpush.bf16.msra.mxu2 %v546_v39  ;;  %v34_v39 = vld [vmem:[%s928_s0 + $0x58] sm:$0xff]  ;;  %v126_v57 = vadd.f32 %v681_v24, %v88_v49  ;;  %v139_v58 = vmax.f32 %v107_v50, 0.0  ;;  %v74_v20 = vmul.f32 %v658_v15, %v36_v11  ;;  %v76_v21 = vmul.f32 %v658_v15, %v38_v12 }
  0x1b   :  { %362 = vmatpush.bf16.msra.mxu1 %v554_v43  ;;  %575 = vmatpush.bf16.msra.mxu3 %v554_v43  ;;  %v71_v43 = vmul.f32 %v644_v10, %v33_v33  ;;  %v72_v47 = vmul.f32 %v658_v15, %v34_v39  ;;  %v90_v22 = vmul.f32 %v658_v15, %v52_v13 }
  0x1c   :  { %v158_v1 = vmax.f32 %v126_v57, 0.0  ;;  %v92_v25 = vmul.f32 %v658_v15, %v54_v14  ;;  %v111_v26 = vadd.f32 %v679_v23, %v73_v16  ;;  %v113_v27 = vadd.f32 %v679_v23, %v75_v17 }
  0x1d   :  { %v109_v51 = vadd.f32 %v679_v23, %v71_v43  ;;  %v127_v28 = vadd.f32 %v679_v23, %v89_v18  ;;  %v129_v29 = vadd.f32 %v679_v23, %v91_v19  ;;  %v112_v10 = vadd.f32 %v681_v24, %v74_v20 }
  0x1e   :  { %314 = vmatpush.bf16.msra.mxu0 %v545_v48  ;;  %568 = vmatpush.bf16.msra.mxu2 %v545_v48  ;;  %v86_v48 = vmul.f32 %v658_v15, %v48_v40  ;;  %v130_v32 = vadd.f32 %v681_v24, %v92_v25  ;;  %v143_v33 = vmax.f32 %v111_v26, 0.0 }
  0x1f   :  { %363 = vmatpush.bf16.msra.mxu1 %v553_v53  ;;  %576 = vmatpush.bf16.msra.mxu3 %v553_v53  ;;  %v125_v53 = vadd.f32 %v679_v23, %v87_v45  ;;  %v161_v15 = vmax.f32 %v129_v29, 0.0  ;;  %v144_v36 = vmax.f32 %v112_v10, 0.0 }
  0x20   :  { %v124_v56 = vadd.f32 %v681_v24, %v86_v48  ;;  %v162_v39 = vmax.f32 %v130_v32, 0.0 }
  0x21   :  { %315 = vmatmul.bf16.vlgmr.msra.gmra.mxu0 %v163_v54  ;;  %335 = vmatmul.bf16.vlgmr.msra.gmra.mxu2 %v171_v55  ;;  %v108_v54 = vadd.f32 %v681_v24, %v70_v46  ;;  %v110_v55 = vadd.f32 %v681_v24, %v72_v47  ;;  %v157_v61 = vmax.f32 %v125_v53, 0.0  ;;  %v844_v46 = vld [vmem:[%s931_s5] ss:$0 sm:$0xff] }
  0x22   :  { %364 = vmatmul.bf16.vlgmr.msra.gmra.mxu1 %v164_v59  ;;  %384 = vmatmul.bf16.vlgmr.msra.gmra.mxu3 %v172_v60  ;;  %v141_v59 = vmax.f32 %v109_v51, 0.0  ;;  %v155_v60 = vmax.f32 %v123_v52, 0.0  ;;  %v156_v0 = vmax.f32 %v124_v56, 0.0 }
  0x23   :  { %v140_v62 = vmax.f32 %v108_v54, 0.0  ;;  %v142_v63 = vmax.f32 %v110_v55, 0.0 }
  0x24   :  { %v167_v2 = vpack.c.bf16 %v141_v59, %v139_v58  ;;  %v175_v3 = vpack.c.bf16 %v157_v61, %v155_v60  ;;  %v176_v7 = vpack.c.bf16 %v158_v1, %v156_v0 }
  0x25   :  { %v168_v6 = vpack.c.bf16 %v142_v63, %v140_v62 }
  0x31   :  { %320 = vmatmul.bf16.gmra.mxu0 %v165_v30  ;;  %340 = vmatmul.bf16.gmra.mxu2 %v173_v31  ;;  %v114_v30 = vadd.f32 %v681_v24, %v76_v21  ;;  %v128_v31 = vadd.f32 %v681_v24, %v90_v22  ;;  %v839_v24 = vld [vmem:[%s930_s4] ss:$0 sm:$0xff] }
  0x32   :  { %369 = vmatmul.bf16.gmra.mxu1 %v166_v34  ;;  %389 = vmatmul.bf16.gmra.mxu3 %v174_v35  ;;  %v145_v34 = vmax.f32 %v113_v27, 0.0  ;;  %v159_v35 = vmax.f32 %v127_v28, 0.0 }
  0x33   :  { %v146_v37 = vmax.f32 %v114_v30, 0.0  ;;  %v160_v38 = vmax.f32 %v128_v31, 0.0 }
  0x34   :  { %v169_v40 = vpack.c.bf16 %v145_v34, %v143_v33  ;;  %v177_v41 = vpack.c.bf16 %v161_v15, %v159_v35 }
  0x35   :  { %v170_v42 = vpack.c.bf16 %v146_v37, %v144_v36  ;;  %v178_v23 = vpack.c.bf16 %v162_v39, %v160_v38 }
  0x41   :  { %325 = vmatmul.bf16.gmra.mxu0 %v167_v2  ;;  %345 = vmatmul.bf16.gmra.mxu2 %v175_v3 }
  0x42   :  { %374 = vmatmul.bf16.gmra.mxu1 %v168_v6  ;;  %394 = vmatmul.bf16.gmra.mxu3 %v176_v7 }
  0x51   :  { %330 = vmatmul.bf16.gmra.mxu0 %v169_v40  ;;  %350 = vmatmul.bf16.gmra.mxu2 %v177_v41 }
  0x52   :  { %379 = vmatmul.bf16.gmra.mxu1 %v170_v42  ;;  %399 = vmatmul.bf16.gmra.mxu3 %v178_v23 }
  0x9e   :  { %v316_v43 = vpop.f32.mrf.mxu0 }
  0x9f   :  { %v365_v44 = vpop.f32.mrf.mxu1 }
  0xa0   :  { %v366_v45 = vadd.f32 %v365_v44, %v316_v43 }
  0xa2   :  { %v409_v47 = vmul.f32 %v839_v24, %v366_v45 }
  0xa4   :  { %v429_v48 = vadd.f32 %v844_v46, %v409_v47  ;;  %v336_v49 = vpop.f32.mrf.mxu2 }
  0xa5   :  { %v385_v50 = vpop.f32.mrf.mxu3 }
  0xa6   :  { %v445_v51 = vmax.f32 %v429_v48, 0.0  ;;  %v386_v52 = vadd.f32 %v385_v50, %v336_v49  ;;  %v318_v53 = vpop.f32.mrf.mxu0 }
  0xa7   :  { %v367_v54 = vpop.f32.mrf.mxu1 }
  0xa8   :  { %461 = vst [vmem:[%s932_s6] sm:$0xff] %v445_v51  ;;  %v417_v55 = vmul.f32 %v839_v24, %v386_v52  ;;  %v368_v56 = vadd.f32 %v367_v54, %v318_v53 }
  0xaa   :  { %v437_v57 = vadd.f32 %v844_v46, %v417_v55  ;;  %v410_v58 = vmul.f32 %v839_v24, %v368_v56 }
  0xac   :  { %v453_v59 = vmax.f32 %v437_v57, 0.0  ;;  %v430_v60 = vadd.f32 %v844_v46, %v410_v58  ;;  %v338_v61 = vpop.f32.mrf.mxu2 }
  0xad   :  { %v387_v62 = vpop.f32.mrf.mxu3 }
  0xae   :  { %469 = vst [vmem:[%s932_s6 + $0x40] sm:$0xff] %v453_v59  ;;  %v446_v63 = vmax.f32 %v430_v60, 0.0  ;;  %v388_v0 = vadd.f32 %v387_v62, %v338_v61  ;;  %v321_v1 = vpop.f32.mrf.mxu0 }
  0xaf   :  { %v370_v2 = vpop.f32.mrf.mxu1 }
  0xb0   :  { %462 = vst [vmem:[%s932_s6 + $0x8] sm:$0xff] %v446_v63  ;;  %v418_v3 = vmul.f32 %v839_v24, %v388_v0  ;;  %v371_v4 = vadd.f32 %v370_v2, %v321_v1 }
  0xb2   :  { %v438_v5 = vadd.f32 %v844_v46, %v418_v3  ;;  %v411_v6 = vmul.f32 %v839_v24, %v371_v4 }
  0xb4   :  { %v454_v7 = vmax.f32 %v438_v5, 0.0  ;;  %v431_v8 = vadd.f32 %v844_v46, %v411_v6  ;;  %v341_v9 = vpop.f32.mrf.mxu2 }
  0xb5   :  { %v390_v11 = vpop.f32.mrf.mxu3 }
  0xb6   :  { %470 = vst [vmem:[%s932_s6 + $0x48] sm:$0xff] %v454_v7  ;;  %v447_v12 = vmax.f32 %v431_v8, 0.0  ;;  %v391_v13 = vadd.f32 %v390_v11, %v341_v9  ;;  %v323_v14 = vpop.f32.mrf.mxu0 }
  0xb7   :  { %v372_v16 = vpop.f32.mrf.mxu1 }
  0xb8   :  { %463 = vst [vmem:[%s932_s6 + $0x10] sm:$0xff] %v447_v12  ;;  %v419_v17 = vmul.f32 %v839_v24, %v391_v13  ;;  %v373_v18 = vadd.f32 %v372_v16, %v323_v14 }
  0xba   :  { %v439_v19 = vadd.f32 %v844_v46, %v419_v17  ;;  %v412_v20 = vmul.f32 %v839_v24, %v373_v18 }
  0xbc   :  { %v455_v21 = vmax.f32 %v439_v19, 0.0  ;;  %v432_v22 = vadd.f32 %v844_v46, %v412_v20  ;;  %v343_v25 = vpop.f32.mrf.mxu2 }
  0xbd   :  { %v392_v26 = vpop.f32.mrf.mxu3 }
  0xbe   :  { %471 = vst [vmem:[%s932_s6 + $0x50] sm:$0xff] %v455_v21  ;;  %v448_v27 = vmax.f32 %v432_v22, 0.0  ;;  %v393_v28 = vadd.f32 %v392_v26, %v343_v25  ;;  %v326_v29 = vpop.f32.mrf.mxu0 }
  0xbf   :  { %v375_v10 = vpop.f32.mrf.mxu1 }
  0xc0   :  { %464 = vst [vmem:[%s932_s6 + $0x18] sm:$0xff] %v448_v27  ;;  %v420_v30 = vmul.f32 %v839_v24, %v393_v28  ;;  %v376_v31 = vadd.f32 %v375_v10, %v326_v29 }
  0xc2   :  { %v440_v32 = vadd.f32 %v844_v46, %v420_v30  ;;  %v413_v33 = vmul.f32 %v839_v24, %v376_v31 }
  0xc4   :  { %v456_v34 = vmax.f32 %v440_v32, 0.0  ;;  %v433_v35 = vadd.f32 %v844_v46, %v413_v33  ;;  %v346_v15 = vpop.f32.mrf.mxu2 }
  0xc5   :  { %v395_v36 = vpop.f32.mrf.mxu3 }
  0xc6   :  { %472 = vst [vmem:[%s932_s6 + $0x58] sm:$0xff] %v456_v34  ;;  %v449_v37 = vmax.f32 %v433_v35, 0.0  ;;  %v396_v38 = vadd.f32 %v395_v36, %v346_v15  ;;  %v328_v39 = vpop.f32.mrf.mxu0 }
  0xc7   :  { %v377_v40 = vpop.f32.mrf.mxu1 }
  0xc8   :  { %465 = vst [vmem:[%s932_s6 + $0x20] sm:$0xff] %v449_v37  ;;  %v421_v41 = vmul.f32 %v839_v24, %v396_v38  ;;  %v378_v42 = vadd.f32 %v377_v40, %v328_v39 }
  0xca   :  { %v441_v23 = vadd.f32 %v844_v46, %v421_v41  ;;  %v414_v43 = vmul.f32 %v839_v24, %v378_v42 }
  0xcc   :  { %v457_v44 = vmax.f32 %v441_v23, 0.0  ;;  %v434_v45 = vadd.f32 %v844_v46, %v414_v43  ;;  %v348_v47 = vpop.f32.mrf.mxu2 }
  0xcd   :  { %v397_v48 = vpop.f32.mrf.mxu3 }
  0xce   :  { %473 = vst [vmem:[%s932_s6 + $0x60] sm:$0xff] %v457_v44  ;;  %v450_v49 = vmax.f32 %v434_v45, 0.0  ;;  %v398_v50 = vadd.f32 %v397_v48, %v348_v47  ;;  %v331_v51 = vpop.f32.mrf.mxu0 }
  0xcf   :  { %v380_v52 = vpop.f32.mrf.mxu1 }
  0xd0   :  { %466 = vst [vmem:[%s932_s6 + $0x28] sm:$0xff] %v450_v49  ;;  %v422_v53 = vmul.f32 %v839_v24, %v398_v50  ;;  %v381_v54 = vadd.f32 %v380_v52, %v331_v51 }
  0xd2   :  { %v442_v55 = vadd.f32 %v844_v46, %v422_v53  ;;  %v415_v56 = vmul.f32 %v839_v24, %v381_v54 }
  0xd4   :  { %v458_v57 = vmax.f32 %v442_v55, 0.0  ;;  %v435_v58 = vadd.f32 %v844_v46, %v415_v56  ;;  %v351_v59 = vpop.f32.mrf.mxu2 }
  0xd5   :  { %v400_v60 = vpop.f32.mrf.mxu3 }
  0xd6   :  { %474 = vst [vmem:[%s932_s6 + $0x68] sm:$0xff] %v458_v57  ;;  %v451_v61 = vmax.f32 %v435_v58, 0.0  ;;  %v401_v62 = vadd.f32 %v400_v60, %v351_v59  ;;  %v333_v63 = vpop.f32.mrf.mxu0 }
  0xd7   :  { %v382_v0 = vpop.f32.mrf.mxu1 }
  0xd8   :  { %467 = vst [vmem:[%s932_s6 + $0x30] sm:$0xff] %v451_v61  ;;  %v423_v1 = vmul.f32 %v839_v24, %v401_v62  ;;  %v383_v2 = vadd.f32 %v382_v0, %v333_v63 }
  0xda   :  { %v443_v3 = vadd.f32 %v844_v46, %v423_v1  ;;  %v416_v4 = vmul.f32 %v839_v24, %v383_v2 }
  0xdc   :  { %v459_v5 = vmax.f32 %v443_v3, 0.0  ;;  %v436_v6 = vadd.f32 %v844_v46, %v416_v4  ;;  %v353_v7 = vpop.f32.mrf.mxu2 }
  0xdd   :  { %v402_v8 = vpop.f32.mrf.mxu3 }
  0xde   :  { %475 = vst [vmem:[%s932_s6 + $0x70] sm:$0xff] %v459_v5  ;;  %v452_v9 = vmax.f32 %v436_v6, 0.0  ;;  %v403_v11 = vadd.f32 %v402_v8, %v353_v7 }
  0xe0   :  { %468 = vst [vmem:[%s932_s6 + $0x38] sm:$0xff] %v452_v9  ;;  %v424_v12 = vmul.f32 %v839_v24, %v403_v11 }
  0xe2   :  { %v444_v13 = vadd.f32 %v844_v46, %v424_v12 }
  0xe4   :  { %v460_v14 = vmax.f32 %v444_v13, 0.0 }
  0xe6   :  { %476 = vst [vmem:[%s932_s6 + $0x78] sm:$0xff] %v460_v14 }

// kernel: forward.121
= control target key start
LH: loop header
LB: loop body
LE: loop exit
PB: predicated region body
PF: predicated region fallthrough
CT: control target
= control target key end

     0   :  { %s1251_s1 = inlined_call_operand.vmem [shape: bf16[128,128], index: 1, kind: input, shape index: {}]   ;;  %s1252_s2 = inlined_call_operand.vmem [shape: f32[1,128], index: 2, kind: input, shape index: {}]   ;;  %s1253_s3 = inlined_call_operand.vmem [shape: f32[1,128], index: 3, kind: input, shape index: {}]   ;;  %s1254_s0 = inlined_call_operand.vmem [shape: f32[512,128], index: 0, kind: input, shape index: {}]   ;;  %s1255_s4 = inlined_call_operand.vmem [shape: f32[512,128], index: 4, kind: output, shape index: {}]  }
   0x1   :  { %v653_v0 = vld [vmem:[%s1251_s1 + $0x38] sm:$0xff]  ;;  %v652_v1 = vld [vmem:[%s1251_s1 + $0x30] sm:$0xff]  ;;  %v651_v2 = vld [vmem:[%s1251_s1 + $0x28] sm:$0xff] }
   0x2   :  { %177 = vmatpush.bf16.msra.mxu0 %v653_v0  ;;  %654 = vmatpush.bf16.msra.mxu1 %v653_v0  ;;  %v650_v3 = vld [vmem:[%s1251_s1 + $0x20] sm:$0xff]  ;;  %v649_v4 = vld [vmem:[%s1251_s1 + $0x18] sm:$0xff]  ;;  %v648_v5 = vld [vmem:[%s1251_s1 + $0x10] sm:$0xff] }
   0x3   :  { %655 = vmatpush.bf16.msra.mxu2 %v653_v0  ;;  %656 = vmatpush.bf16.msra.mxu3 %v653_v0  ;;  %v647_v6 = vld [vmem:[%s1251_s1 + $0x8] sm:$0xff]  ;;  %v646_v7 = vld [vmem:[%s1251_s1] sm:$0xff]  ;;  %v19_v20 = vld [vmem:[%s1254_s0 + $0x10] sm:$0xff] }
   0x4   :  { %v17_v8 = vld [vmem:[%s1254_s0] sm:$0xff]  ;;  %v18_v9 = vld [vmem:[%s1254_s0 + $0x8] sm:$0xff]  ;;  %v20_v21 = vld [vmem:[%s1254_s0 + $0x18] sm:$0xff] }
   0x5   :  { %v33_v10 = vld [vmem:[%s1254_s0 + $0x80] sm:$0xff]  ;;  %v34_v11 = vld [vmem:[%s1254_s0 + $0x88] sm:$0xff]  ;;  %v81_v16 = vpack.c.bf16 %v18_v9, %v17_v8  ;;  %v35_v22 = vld [vmem:[%s1254_s0 + $0x90] sm:$0xff]  ;;  %v82_v28 = vpack.c.bf16 %v20_v21, %v19_v20 }
   0x6   :  { %178 = vmatpush.bf16.msra.mxu0 %v652_v1  ;;  %657 = vmatpush.bf16.msra.mxu1 %v652_v1  ;;  %v49_v12 = vld [vmem:[%s1254_s0 + $0x100] sm:$0xff]  ;;  %v50_v13 = vld [vmem:[%s1254_s0 + $0x108] sm:$0xff]  ;;  %v89_v17 = vpack.c.bf16 %v34_v11, %v33_v10  ;;  %v36_v23 = vld [vmem:[%s1254_s0 + $0x98] sm:$0xff] }
   0x7   :  { %658 = vmatpush.bf16.msra.mxu2 %v652_v1  ;;  %659 = vmatpush.bf16.msra.mxu3 %v652_v1  ;;  %v65_v14 = vld [vmem:[%s1254_s0 + $0x180] sm:$0xff]  ;;  %v66_v15 = vld [vmem:[%s1254_s0 + $0x188] sm:$0xff]  ;;  %v97_v18 = vpack.c.bf16 %v50_v13, %v49_v12  ;;  %v51_v24 = vld [vmem:[%s1254_s0 + $0x110] sm:$0xff]  ;;  %v90_v29 = vpack.c.bf16 %v36_v23, %v35_v22 }
   0x8   :  { %v105_v19 = vpack.c.bf16 %v66_v15, %v65_v14  ;;  %v52_v25 = vld [vmem:[%s1254_s0 + $0x118] sm:$0xff]  ;;  %v67_v26 = vld [vmem:[%s1254_s0 + $0x190] sm:$0xff]  ;;  %v21_v32 = vld [vmem:[%s1254_s0 + $0x20] sm:$0xff] }
   0x9   :  { %v68_v27 = vld [vmem:[%s1254_s0 + $0x198] sm:$0xff]  ;;  %v98_v30 = vpack.c.bf16 %v52_v25, %v51_v24  ;;  %v22_v33 = vld [vmem:[%s1254_s0 + $0x28] sm:$0xff]  ;;  %v37_v34 = vld [vmem:[%s1254_s0 + $0xa0] sm:$0xff] }
   0xa   :  { %179 = vmatpush.bf16.msra.mxu0 %v651_v2  ;;  %660 = vmatpush.bf16.msra.mxu1 %v651_v2  ;;  %v106_v31 = vpack.c.bf16 %v68_v27, %v67_v26  ;;  %v38_v35 = vld [vmem:[%s1254_s0 + $0xa8] sm:$0xff]  ;;  %v53_v36 = vld [vmem:[%s1254_s0 + $0x120] sm:$0xff]  ;;  %v83_v40 = vpack.c.bf16 %v22_v33, %v21_v32  ;;  %v23_v44 = vld [vmem:[%s1254_s0 + $0x30] sm:$0xff] }
   0xb   :  { %661 = vmatpush.bf16.msra.mxu2 %v651_v2  ;;  %662 = vmatpush.bf16.msra.mxu3 %v651_v2  ;;  %v54_v37 = vld [vmem:[%s1254_s0 + $0x128] sm:$0xff]  ;;  %v69_v38 = vld [vmem:[%s1254_s0 + $0x1a0] sm:$0xff]  ;;  %v91_v41 = vpack.c.bf16 %v38_v35, %v37_v34  ;;  %v24_v45 = vld [vmem:[%s1254_s0 + $0x38] sm:$0xff] }
   0xc   :  { %v70_v39 = vld [vmem:[%s1254_s0 + $0x1a8] sm:$0xff]  ;;  %v99_v42 = vpack.c.bf16 %v54_v37, %v53_v36  ;;  %v39_v46 = vld [vmem:[%s1254_s0 + $0xb0] sm:$0xff]  ;;  %v40_v47 = vld [vmem:[%s1254_s0 + $0xb8] sm:$0xff]  ;;  %v84_v52 = vpack.c.bf16 %v24_v45, %v23_v44 }
   0xd   :  { %v107_v43 = vpack.c.bf16 %v70_v39, %v69_v38  ;;  %v55_v48 = vld [vmem:[%s1254_s0 + $0x130] sm:$0xff]  ;;  %v56_v49 = vld [vmem:[%s1254_s0 + $0x138] sm:$0xff]  ;;  %v92_v53 = vpack.c.bf16 %v40_v47, %v39_v46  ;;  %v25_v56 = vld [vmem:[%s1254_s0 + $0x40] sm:$0xff] }
   0xe   :  { %180 = vmatpush.bf16.msra.mxu0 %v650_v3  ;;  %663 = vmatpush.bf16.msra.mxu1 %v650_v3  ;;  %v71_v50 = vld [vmem:[%s1254_s0 + $0x1b0] sm:$0xff]  ;;  %v72_v51 = vld [vmem:[%s1254_s0 + $0x1b8] sm:$0xff]  ;;  %v100_v54 = vpack.c.bf16 %v56_v49, %v55_v48  ;;  %v26_v57 = vld [vmem:[%s1254_s0 + $0x48] sm:$0xff] }
   0xf   :  { %664 = vmatpush.bf16.msra.mxu2 %v650_v3  ;;  %665 = vmatpush.bf16.msra.mxu3 %v650_v3  ;;  %v108_v55 = vpack.c.bf16 %v72_v51, %v71_v50  ;;  %v41_v58 = vld [vmem:[%s1254_s0 + $0xc0] sm:$0xff]  ;;  %v42_v59 = vld [vmem:[%s1254_s0 + $0xc8] sm:$0xff]  ;;  %v85_v0 = vpack.c.bf16 %v26_v57, %v25_v56  ;;  %v59_v8 = vld [vmem:[%s1254_s0 + $0x150] sm:$0xff] }
  0x10   :  { %v57_v60 = vld [vmem:[%s1254_s0 + $0x140] sm:$0xff]  ;;  %v58_v61 = vld [vmem:[%s1254_s0 + $0x148] sm:$0xff]  ;;  %v93_v1 = vpack.c.bf16 %v42_v59, %v41_v58  ;;  %v60_v9 = vld [vmem:[%s1254_s0 + $0x158] sm:$0xff] }
  0x11   :  { %v73_v62 = vld [vmem:[%s1254_s0 + $0x1c0] sm:$0xff]  ;;  %v74_v63 = vld [vmem:[%s1254_s0 + $0x1c8] sm:$0xff]  ;;  %v101_v2 = vpack.c.bf16 %v58_v61, %v57_v60  ;;  %v75_v10 = vld [vmem:[%s1254_s0 + $0x1d0] sm:$0xff]  ;;  %v102_v14 = vpack.c.bf16 %v60_v9, %v59_v8 }
  0x12   :  { %181 = vmatpush.bf16.msra.mxu0 %v649_v4  ;;  %666 = vmatpush.bf16.msra.mxu1 %v649_v4  ;;  %v109_v3 = vpack.c.bf16 %v74_v63, %v73_v62  ;;  %v76_v11 = vld [vmem:[%s1254_s0 + $0x1d8] sm:$0xff]  ;;  %v61_v20 = vld [vmem:[%s1254_s0 + $0x160] sm:$0xff]  ;;  %v62_v21 = vld [vmem:[%s1254_s0 + $0x168] sm:$0xff] }
  0x13   :  { %667 = vmatpush.bf16.msra.mxu2 %v649_v4  ;;  %668 = vmatpush.bf16.msra.mxu3 %v649_v4  ;;  %v27_v4 = vld [vmem:[%s1254_s0 + $0x50] sm:$0xff]  ;;  %v110_v15 = vpack.c.bf16 %v76_v11, %v75_v10  ;;  %v77_v22 = vld [vmem:[%s1254_s0 + $0x1e0] sm:$0xff]  ;;  %v78_v23 = vld [vmem:[%s1254_s0 + $0x1e8] sm:$0xff]  ;;  %v103_v26 = vpack.c.bf16 %v62_v21, %v61_v20 }
  0x14   :  { %v111_v27 = vpack.c.bf16 %v78_v23, %v77_v22  ;;  %v63_v32 = vld [vmem:[%s1254_s0 + $0x170] sm:$0xff]  ;;  %v64_v33 = vld [vmem:[%s1254_s0 + $0x178] sm:$0xff] }
  0x15   :  { %v79_v34 = vld [vmem:[%s1254_s0 + $0x1f0] sm:$0xff]  ;;  %v80_v35 = vld [vmem:[%s1254_s0 + $0x1f8] sm:$0xff]  ;;  %v104_v38 = vpack.c.bf16 %v64_v33, %v63_v32 }
  0x16   :  { %182 = vmatpush.bf16.msra.mxu0 %v648_v5  ;;  %669 = vmatpush.bf16.msra.mxu1 %v648_v5  ;;  %v112_v39 = vpack.c.bf16 %v80_v35, %v79_v34 }
  0x17   :  { %670 = vmatpush.bf16.msra.mxu2 %v648_v5  ;;  %671 = vmatpush.bf16.msra.mxu3 %v648_v5  ;;  %v28_v5 = vld [vmem:[%s1254_s0 + $0x58] sm:$0xff] }
  0x18   :  { %v86_v12 = vpack.c.bf16 %v28_v5, %v27_v4 }
  0x1a   :  { %183 = vmatpush.bf16.msra.mxu0 %v647_v6  ;;  %672 = vmatpush.bf16.msra.mxu1 %v647_v6 }
  0x1b   :  { %673 = vmatpush.bf16.msra.mxu2 %v647_v6  ;;  %674 = vmatpush.bf16.msra.mxu3 %v647_v6  ;;  %v43_v6 = vld [vmem:[%s1254_s0 + $0xd0] sm:$0xff] }
  0x1e   :  { %184 = vmatpush.bf16.msra.mxu0 %v646_v7  ;;  %675 = vmatpush.bf16.msra.mxu1 %v646_v7 }
  0x1f   :  { %676 = vmatpush.bf16.msra.mxu2 %v646_v7  ;;  %677 = vmatpush.bf16.msra.mxu3 %v646_v7  ;;  %v44_v7 = vld [vmem:[%s1254_s0 + $0xd8] sm:$0xff] }
  0x20   :  { %v94_v13 = vpack.c.bf16 %v44_v7, %v43_v6 }
  0x21   :  { %185 = vmatmul.bf16.vlgmr.msra.gmra.mxu0 %v81_v16  ;;  %225 = vmatmul.bf16.vlgmr.msra.gmra.mxu1 %v89_v17  ;;  %v29_v16 = vld [vmem:[%s1254_s0 + $0x60] sm:$0xff]  ;;  %v30_v17 = vld [vmem:[%s1254_s0 + $0x68] sm:$0xff] }
  0x22   :  { %265 = vmatmul.bf16.vlgmr.msra.gmra.mxu2 %v97_v18  ;;  %305 = vmatmul.bf16.vlgmr.msra.gmra.mxu3 %v105_v19  ;;  %v45_v18 = vld [vmem:[%s1254_s0 + $0xe0] sm:$0xff]  ;;  %v46_v19 = vld [vmem:[%s1254_s0 + $0xe8] sm:$0xff]  ;;  %v87_v24 = vpack.c.bf16 %v30_v17, %v29_v16 }
  0x23   :  { %v95_v25 = vpack.c.bf16 %v46_v19, %v45_v18 }
  0x31   :  { %190 = vmatmul.bf16.gmra.mxu0 %v82_v28  ;;  %230 = vmatmul.bf16.gmra.mxu1 %v90_v29  ;;  %v31_v28 = vld [vmem:[%s1254_s0 + $0x70] sm:$0xff]  ;;  %v32_v29 = vld [vmem:[%s1254_s0 + $0x78] sm:$0xff] }
  0x32   :  { %270 = vmatmul.bf16.gmra.mxu2 %v98_v30  ;;  %310 = vmatmul.bf16.gmra.mxu3 %v106_v31  ;;  %v47_v30 = vld [vmem:[%s1254_s0 + $0xf0] sm:$0xff]  ;;  %v48_v31 = vld [vmem:[%s1254_s0 + $0xf8] sm:$0xff]  ;;  %v88_v36 = vpack.c.bf16 %v32_v29, %v31_v28 }
  0x33   :  { %v96_v37 = vpack.c.bf16 %v48_v31, %v47_v30 }
  0x41   :  { %195 = vmatmul.bf16.gmra.mxu0 %v83_v40  ;;  %235 = vmatmul.bf16.gmra.mxu1 %v91_v41  ;;  %v924_v40 = vld [vmem:[%s1252_s2] ss:$0 sm:$0xff] }
  0x42   :  { %275 = vmatmul.bf16.gmra.mxu2 %v99_v42  ;;  %315 = vmatmul.bf16.gmra.mxu3 %v107_v43  ;;  %v929_v41 = vld [vmem:[%s1253_s3] ss:$0 sm:$0xff] }
  0x51   :  { %200 = vmatmul.bf16.gmra.mxu0 %v84_v52  ;;  %240 = vmatmul.bf16.gmra.mxu1 %v92_v53 }
  0x52   :  { %280 = vmatmul.bf16.gmra.mxu2 %v100_v54  ;;  %320 = vmatmul.bf16.gmra.mxu3 %v108_v55 }
  0x61   :  { %205 = vmatmul.bf16.gmra.mxu0 %v85_v0  ;;  %245 = vmatmul.bf16.gmra.mxu1 %v93_v1 }
  0x62   :  { %285 = vmatmul.bf16.gmra.mxu2 %v101_v2  ;;  %325 = vmatmul.bf16.gmra.mxu3 %v109_v3 }
  0x71   :  { %210 = vmatmul.bf16.gmra.mxu0 %v86_v12  ;;  %250 = vmatmul.bf16.gmra.mxu1 %v94_v13 }
  0x72   :  { %290 = vmatmul.bf16.gmra.mxu2 %v102_v14  ;;  %330 = vmatmul.bf16.gmra.mxu3 %v110_v15 }
  0x81   :  { %215 = vmatmul.bf16.gmra.mxu0 %v87_v24  ;;  %255 = vmatmul.bf16.gmra.mxu1 %v95_v25 }
  0x82   :  { %295 = vmatmul.bf16.gmra.mxu2 %v103_v26  ;;  %335 = vmatmul.bf16.gmra.mxu3 %v111_v27 }
  0x91   :  { %220 = vmatmul.bf16.gmra.mxu0 %v88_v36  ;;  %260 = vmatmul.bf16.gmra.mxu1 %v96_v37 }
  0x92   :  { %300 = vmatmul.bf16.gmra.mxu2 %v104_v38  ;;  %340 = vmatmul.bf16.gmra.mxu3 %v112_v39 }
  0x9e   :  { %v186_v42 = vpop.f32.mrf.mxu0  ;;  %v226_v43 = vpop.f32.mrf.mxu1 }
  0x9f   :  { %v350_v44 = vmul.f32 %v924_v40, %v186_v42  ;;  %v366_v45 = vmul.f32 %v924_v40, %v226_v43 }
  0xa1   :  { %v418_v46 = vadd.f32 %v929_v41, %v350_v44  ;;  %v434_v47 = vadd.f32 %v929_v41, %v366_v45 }
  0xa3   :  { %v482_v48 = vmax.f32 %v418_v46, 0.0  ;;  %v498_v49 = vmax.f32 %v434_v47, 0.0 }
  0xa5   :  { %546 = vst [vmem:[%s1255_s4] sm:$0xff] %v482_v48  ;;  %v266_v50 = vpop.f32.mrf.mxu2  ;;  %v306_v51 = vpop.f32.mrf.mxu3 }
  0xa6   :  { %562 = vst [vmem:[%s1255_s4 + $0x80] sm:$0xff] %v498_v49  ;;  %v382_v52 = vmul.f32 %v924_v40, %v266_v50  ;;  %v398_v53 = vmul.f32 %v924_v40, %v306_v51  ;;  %v188_v54 = vpop.f32.mrf.mxu0  ;;  %v228_v55 = vpop.f32.mrf.mxu1 }
  0xa7   :  { %v351_v56 = vmul.f32 %v924_v40, %v188_v54  ;;  %v367_v57 = vmul.f32 %v924_v40, %v228_v55 }
  0xa8   :  { %v450_v58 = vadd.f32 %v929_v41, %v382_v52  ;;  %v466_v59 = vadd.f32 %v929_v41, %v398_v53 }
  0xa9   :  { %v419_v60 = vadd.f32 %v929_v41, %v351_v56  ;;  %v435_v61 = vadd.f32 %v929_v41, %v367_v57 }
  0xaa   :  { %v514_v62 = vmax.f32 %v450_v58, 0.0  ;;  %v530_v63 = vmax.f32 %v466_v59, 0.0 }
  0xab   :  { %v483_v0 = vmax.f32 %v419_v60, 0.0  ;;  %v499_v1 = vmax.f32 %v435_v61, 0.0 }
  0xac   :  { %578 = vst [vmem:[%s1255_s4 + $0x100] sm:$0xff] %v514_v62 }
  0xad   :  { %594 = vst [vmem:[%s1255_s4 + $0x180] sm:$0xff] %v530_v63  ;;  %v268_v2 = vpop.f32.mrf.mxu2  ;;  %v308_v3 = vpop.f32.mrf.mxu3 }
  0xae   :  { %547 = vst [vmem:[%s1255_s4 + $0x8] sm:$0xff] %v483_v0  ;;  %v383_v4 = vmul.f32 %v924_v40, %v268_v2  ;;  %v399_v5 = vmul.f32 %v924_v40, %v308_v3  ;;  %v191_v6 = vpop.f32.mrf.mxu0  ;;  %v231_v7 = vpop.f32.mrf.mxu1 }
  0xaf   :  { %563 = vst [vmem:[%s1255_s4 + $0x88] sm:$0xff] %v499_v1  ;;  %v352_v8 = vmul.f32 %v924_v40, %v191_v6  ;;  %v368_v9 = vmul.f32 %v924_v40, %v231_v7 }
  0xb0   :  { %v451_v10 = vadd.f32 %v929_v41, %v383_v4  ;;  %v467_v11 = vadd.f32 %v929_v41, %v399_v5 }
  0xb1   :  { %v420_v12 = vadd.f32 %v929_v41, %v352_v8  ;;  %v436_v13 = vadd.f32 %v929_v41, %v368_v9 }
  0xb2   :  { %v515_v14 = vmax.f32 %v451_v10, 0.0  ;;  %v531_v15 = vmax.f32 %v467_v11, 0.0 }
  0xb3   :  { %v484_v16 = vmax.f32 %v420_v12, 0.0  ;;  %v500_v17 = vmax.f32 %v436_v13, 0.0 }
  0xb4   :  { %579 = vst [vmem:[%s1255_s4 + $0x108] sm:$0xff] %v515_v14 }
  0xb5   :  { %595 = vst [vmem:[%s1255_s4 + $0x188] sm:$0xff] %v531_v15  ;;  %v271_v18 = vpop.f32.mrf.mxu2  ;;  %v311_v19 = vpop.f32.mrf.mxu3 }
  0xb6   :  { %548 = vst [vmem:[%s1255_s4 + $0x10] sm:$0xff] %v484_v16  ;;  %v384_v20 = vmul.f32 %v924_v40, %v271_v18  ;;  %v400_v21 = vmul.f32 %v924_v40, %v311_v19  ;;  %v193_v22 = vpop.f32.mrf.mxu0  ;;  %v233_v23 = vpop.f32.mrf.mxu1 }
  0xb7   :  { %564 = vst [vmem:[%s1255_s4 + $0x90] sm:$0xff] %v500_v17  ;;  %v353_v24 = vmul.f32 %v924_v40, %v193_v22  ;;  %v369_v25 = vmul.f32 %v924_v40, %v233_v23 }
  0xb8   :  { %v452_v26 = vadd.f32 %v929_v41, %v384_v20  ;;  %v468_v27 = vadd.f32 %v929_v41, %v400_v21 }
  0xb9   :  { %v421_v28 = vadd.f32 %v929_v41, %v353_v24  ;;  %v437_v29 = vadd.f32 %v929_v41, %v369_v25 }
  0xba   :  { %v516_v30 = vmax.f32 %v452_v26, 0.0  ;;  %v532_v31 = vmax.f32 %v468_v27, 0.0 }
  0xbb   :  { %v485_v32 = vmax.f32 %v421_v28, 0.0  ;;  %v501_v33 = vmax.f32 %v437_v29, 0.0 }
  0xbc   :  { %580 = vst [vmem:[%s1255_s4 + $0x110] sm:$0xff] %v516_v30 }
  0xbd   :  { %596 = vst [vmem:[%s1255_s4 + $0x190] sm:$0xff] %v532_v31  ;;  %v273_v34 = vpop.f32.mrf.mxu2  ;;  %v313_v35 = vpop.f32.mrf.mxu3 }
  0xbe   :  { %549 = vst [vmem:[%s1255_s4 + $0x18] sm:$0xff] %v485_v32  ;;  %v385_v36 = vmul.f32 %v924_v40, %v273_v34  ;;  %v401_v37 = vmul.f32 %v924_v40, %v313_v35  ;;  %v196_v38 = vpop.f32.mrf.mxu0  ;;  %v236_v39 = vpop.f32.mrf.mxu1 }
  0xbf   :  { %565 = vst [vmem:[%s1255_s4 + $0x98] sm:$0xff] %v501_v33  ;;  %v354_v42 = vmul.f32 %v924_v40, %v196_v38  ;;  %v370_v43 = vmul.f32 %v924_v40, %v236_v39 }
  0xc0   :  { %v453_v44 = vadd.f32 %v929_v41, %v385_v36  ;;  %v469_v45 = vadd.f32 %v929_v41, %v401_v37 }
  0xc1   :  { %v422_v46 = vadd.f32 %v929_v41, %v354_v42  ;;  %v438_v47 = vadd.f32 %v929_v41, %v370_v43 }
  0xc2   :  { %v517_v48 = vmax.f32 %v453_v44, 0.0  ;;  %v533_v49 = vmax.f32 %v469_v45, 0.0 }
  0xc3   :  { %v486_v50 = vmax.f32 %v422_v46, 0.0  ;;  %v502_v51 = vmax.f32 %v438_v47, 0.0 }
  0xc4   :  { %581 = vst [vmem:[%s1255_s4 + $0x118] sm:$0xff] %v517_v48 }
  0xc5   :  { %597 = vst [vmem:[%s1255_s4 + $0x198] sm:$0xff] %v533_v49  ;;  %v276_v52 = vpop.f32.mrf.mxu2  ;;  %v316_v53 = vpop.f32.mrf.mxu3 }
  0xc6   :  { %550 = vst [vmem:[%s1255_s4 + $0x20] sm:$0xff] %v486_v50  ;;  %v386_v54 = vmul.f32 %v924_v40, %v276_v52  ;;  %v402_v55 = vmul.f32 %v924_v40, %v316_v53  ;;  %v198_v56 = vpop.f32.mrf.mxu0  ;;  %v238_v57 = vpop.f32.mrf.mxu1 }
  0xc7   :  { %566 = vst [vmem:[%s1255_s4 + $0xa0] sm:$0xff] %v502_v51  ;;  %v355_v58 = vmul.f32 %v924_v40, %v198_v56  ;;  %v371_v59 = vmul.f32 %v924_v40, %v238_v57 }
  0xc8   :  { %v454_v60 = vadd.f32 %v929_v41, %v386_v54  ;;  %v470_v61 = vadd.f32 %v929_v41, %v402_v55 }
  0xc9   :  { %v423_v62 = vadd.f32 %v929_v41, %v355_v58  ;;  %v439_v63 = vadd.f32 %v929_v41, %v371_v59 }
  0xca   :  { %v518_v0 = vmax.f32 %v454_v60, 0.0  ;;  %v534_v1 = vmax.f32 %v470_v61, 0.0 }
  0xcb   :  { %v487_v2 = vmax.f32 %v423_v62, 0.0  ;;  %v503_v3 = vmax.f32 %v439_v63, 0.0 }
  0xcc   :  { %582 = vst [vmem:[%s1255_s4 + $0x120] sm:$0xff] %v518_v0 }
  0xcd   :  { %598 = vst [vmem:[%s1255_s4 + $0x1a0] sm:$0xff] %v534_v1  ;;  %v278_v4 = vpop.f32.mrf.mxu2  ;;  %v318_v5 = vpop.f32.mrf.mxu3 }
  0xce   :  { %551 = vst [vmem:[%s1255_s4 + $0x28] sm:$0xff] %v487_v2  ;;  %v387_v6 = vmul.f32 %v924_v40, %v278_v4  ;;  %v403_v7 = vmul.f32 %v924_v40, %v318_v5  ;;  %v201_v8 = vpop.f32.mrf.mxu0  ;;  %v241_v9 = vpop.f32.mrf.mxu1 }
  0xcf   :  { %567 = vst [vmem:[%s1255_s4 + $0xa8] sm:$0xff] %v503_v3  ;;  %v356_v10 = vmul.f32 %v924_v40, %v201_v8  ;;  %v372_v11 = vmul.f32 %v924_v40, %v241_v9 }
  0xd0   :  { %v455_v12 = vadd.f32 %v929_v41, %v387_v6  ;;  %v471_v13 = vadd.f32 %v929_v41, %v403_v7 }
  0xd1   :  { %v424_v14 = vadd.f32 %v929_v41, %v356_v10  ;;  %v440_v15 = vadd.f32 %v929_v41, %v372_v11 }
  0xd2   :  { %v519_v16 = vmax.f32 %v455_v12, 0.0  ;;  %v535_v17 = vmax.f32 %v471_v13, 0.0 }
  0xd3   :  { %v488_v18 = vmax.f32 %v424_v14, 0.0  ;;  %v504_v19 = vmax.f32 %v440_v15, 0.0 }
  0xd4   :  { %583 = vst [vmem:[%s1255_s4 + $0x128] sm:$0xff] %v519_v16 }
  0xd5   :  { %599 = vst [vmem:[%s1255_s4 + $0x1a8] sm:$0xff] %v535_v17  ;;  %v281_v20 = vpop.f32.mrf.mxu2  ;;  %v321_v21 = vpop.f32.mrf.mxu3 }
  0xd6   :  { %552 = vst [vmem:[%s1255_s4 + $0x30] sm:$0xff] %v488_v18  ;;  %v388_v22 = vmul.f32 %v924_v40, %v281_v20  ;;  %v404_v23 = vmul.f32 %v924_v40, %v321_v21  ;;  %v203_v24 = vpop.f32.mrf.mxu0  ;;  %v243_v25 = vpop.f32.mrf.mxu1 }
  0xd7   :  { %568 = vst [vmem:[%s1255_s4 + $0xb0] sm:$0xff] %v504_v19  ;;  %v357_v26 = vmul.f32 %v924_v40, %v203_v24  ;;  %v373_v27 = vmul.f32 %v924_v40, %v243_v25 }
  0xd8   :  { %v456_v28 = vadd.f32 %v929_v41, %v388_v22  ;;  %v472_v29 = vadd.f32 %v929_v41, %v404_v23 }
  0xd9   :  { %v425_v30 = vadd.f32 %v929_v41, %v357_v26  ;;  %v441_v31 = vadd.f32 %v929_v41, %v373_v27 }
  0xda   :  { %v520_v32 = vmax.f32 %v456_v28, 0.0  ;;  %v536_v33 = vmax.f32 %v472_v29, 0.0 }
  0xdb   :  { %v489_v34 = vmax.f32 %v425_v30, 0.0  ;;  %v505_v35 = vmax.f32 %v441_v31, 0.0 }
  0xdc   :  { %584 = vst [vmem:[%s1255_s4 + $0x130] sm:$0xff] %v520_v32 }
  0xdd   :  { %600 = vst [vmem:[%s1255_s4 + $0x1b0] sm:$0xff] %v536_v33  ;;  %v283_v36 = vpop.f32.mrf.mxu2  ;;  %v323_v37 = vpop.f32.mrf.mxu3 }
  0xde   :  { %553 = vst [vmem:[%s1255_s4 + $0x38] sm:$0xff] %v489_v34  ;;  %v389_v38 = vmul.f32 %v924_v40, %v283_v36  ;;  %v405_v39 = vmul.f32 %v924_v40, %v323_v37  ;;  %v206_v42 = vpop.f32.mrf.mxu0  ;;  %v246_v43 = vpop.f32.mrf.mxu1 }
  0xdf   :  { %569 = vst [vmem:[%s1255_s4 + $0xb8] sm:$0xff] %v505_v35  ;;  %v358_v44 = vmul.f32 %v924_v40, %v206_v42  ;;  %v374_v45 = vmul.f32 %v924_v40, %v246_v43 }
  0xe0   :  { %v457_v46 = vadd.f32 %v929_v41, %v389_v38  ;;  %v473_v47 = vadd.f32 %v929_v41, %v405_v39 }
  0xe1   :  { %v426_v48 = vadd.f32 %v929_v41, %v358_v44  ;;  %v442_v49 = vadd.f32 %v929_v41, %v374_v45 }
  0xe2   :  { %v521_v50 = vmax.f32 %v457_v46, 0.0  ;;  %v537_v51 = vmax.f32 %v473_v47, 0.0 }
  0xe3   :  { %v490_v52 = vmax.f32 %v426_v48, 0.0  ;;  %v506_v53 = vmax.f32 %v442_v49, 0.0 }
  0xe4   :  { %585 = vst [vmem:[%s1255_s4 + $0x138] sm:$0xff] %v521_v50 }
  0xe5   :  { %601 = vst [vmem:[%s1255_s4 + $0x1b8] sm:$0xff] %v537_v51  ;;  %v286_v54 = vpop.f32.mrf.mxu2  ;;  %v326_v55 = vpop.f32.mrf.mxu3 }
  0xe6   :  { %554 = vst [vmem:[%s1255_s4 + $0x40] sm:$0xff] %v490_v52  ;;  %v390_v56 = vmul.f32 %v924_v40, %v286_v54  ;;  %v406_v57 = vmul.f32 %v924_v40, %v326_v55  ;;  %v208_v58 = vpop.f32.mrf.mxu0  ;;  %v248_v59 = vpop.f32.mrf.mxu1 }
  0xe7   :  { %570 = vst [vmem:[%s1255_s4 + $0xc0] sm:$0xff] %v506_v53  ;;  %v359_v60 = vmul.f32 %v924_v40, %v208_v58  ;;  %v375_v61 = vmul.f32 %v924_v40, %v248_v59 }
  0xe8   :  { %v458_v62 = vadd.f32 %v929_v41, %v390_v56  ;;  %v474_v63 = vadd.f32 %v929_v41, %v406_v57 }
  0xe9   :  { %v427_v0 = vadd.f32 %v929_v41, %v359_v60  ;;  %v443_v1 = vadd.f32 %v929_v41, %v375_v61 }
  0xea   :  { %v522_v2 = vmax.f32 %v458_v62, 0.0  ;;  %v538_v3 = vmax.f32 %v474_v63, 0.0 }
  0xeb   :  { %v491_v4 = vmax.f32 %v427_v0, 0.0  ;;  %v507_v5 = vmax.f32 %v443_v1, 0.0 }
  0xec   :  { %586 = vst [vmem:[%s1255_s4 + $0x140] sm:$0xff] %v522_v2 }
  0xed   :  { %602 = vst [vmem:[%s1255_s4 + $0x1c0] sm:$0xff] %v538_v3  ;;  %v288_v6 = vpop.f32.mrf.mxu2  ;;  %v328_v7 = vpop.f32.mrf.mxu3 }
  0xee   :  { %555 = vst [vmem:[%s1255_s4 + $0x48] sm:$0xff] %v491_v4  ;;  %v391_v8 = vmul.f32 %v924_v40, %v288_v6  ;;  %v407_v9 = vmul.f32 %v924_v40, %v328_v7  ;;  %v211_v10 = vpop.f32.mrf.mxu0  ;;  %v251_v11 = vpop.f32.mrf.mxu1 }
  0xef   :  { %571 = vst [vmem:[%s1255_s4 + $0xc8] sm:$0xff] %v507_v5  ;;  %v360_v12 = vmul.f32 %v924_v40, %v211_v10  ;;  %v376_v13 = vmul.f32 %v924_v40, %v251_v11 }
  0xf0   :  { %v459_v14 = vadd.f32 %v929_v41, %v391_v8  ;;  %v475_v15 = vadd.f32 %v929_v41, %v407_v9 }
  0xf1   :  { %v428_v16 = vadd.f32 %v929_v41, %v360_v12  ;;  %v444_v17 = vadd.f32 %v929_v41, %v376_v13 }
  0xf2   :  { %v523_v18 = vmax.f32 %v459_v14, 0.0  ;;  %v539_v19 = vmax.f32 %v475_v15, 0.0 }
  0xf3   :  { %v492_v20 = vmax.f32 %v428_v16, 0.0  ;;  %v508_v21 = vmax.f32 %v444_v17, 0.0 }
  0xf4   :  { %587 = vst [vmem:[%s1255_s4 + $0x148] sm:$0xff] %v523_v18 }
  0xf5   :  { %603 = vst [vmem:[%s1255_s4 + $0x1c8] sm:$0xff] %v539_v19  ;;  %v291_v22 = vpop.f32.mrf.mxu2  ;;  %v331_v23 = vpop.f32.mrf.mxu3 }
  0xf6   :  { %556 = vst [vmem:[%s1255_s4 + $0x50] sm:$0xff] %v492_v20  ;;  %v392_v24 = vmul.f32 %v924_v40, %v291_v22  ;;  %v408_v25 = vmul.f32 %v924_v40, %v331_v23  ;;  %v213_v26 = vpop.f32.mrf.mxu0  ;;  %v253_v27 = vpop.f32.mrf.mxu1 }
  0xf7   :  { %572 = vst [vmem:[%s1255_s4 + $0xd0] sm:$0xff] %v508_v21  ;;  %v361_v28 = vmul.f32 %v924_v40, %v213_v26  ;;  %v377_v29 = vmul.f32 %v924_v40, %v253_v27 }
  0xf8   :  { %v460_v30 = vadd.f32 %v929_v41, %v392_v24  ;;  %v476_v31 = vadd.f32 %v929_v41, %v408_v25 }
  0xf9   :  { %v429_v32 = vadd.f32 %v929_v41, %v361_v28  ;;  %v445_v33 = vadd.f32 %v929_v41, %v377_v29 }
  0xfa   :  { %v524_v34 = vmax.f32 %v460_v30, 0.0  ;;  %v540_v35 = vmax.f32 %v476_v31, 0.0 }
  0xfb   :  { %v493_v36 = vmax.f32 %v429_v32, 0.0  ;;  %v509_v37 = vmax.f32 %v445_v33, 0.0 }
  0xfc   :  { %588 = vst [vmem:[%s1255_s4 + $0x150] sm:$0xff] %v524_v34 }
  0xfd   :  { %604 = vst [vmem:[%s1255_s4 + $0x1d0] sm:$0xff] %v540_v35  ;;  %v293_v38 = vpop.f32.mrf.mxu2  ;;  %v333_v39 = vpop.f32.mrf.mxu3 }
  0xfe   :  { %557 = vst [vmem:[%s1255_s4 + $0x58] sm:$0xff] %v493_v36  ;;  %v393_v42 = vmul.f32 %v924_v40, %v293_v38  ;;  %v409_v43 = vmul.f32 %v924_v40, %v333_v39  ;;  %v216_v44 = vpop.f32.mrf.mxu0  ;;  %v256_v45 = vpop.f32.mrf.mxu1 }
  0xff   :  { %573 = vst [vmem:[%s1255_s4 + $0xd8] sm:$0xff] %v509_v37  ;;  %v362_v46 = vmul.f32 %v924_v40, %v216_v44  ;;  %v378_v47 = vmul.f32 %v924_v40, %v256_v45 }
 0x100   :  { %v461_v48 = vadd.f32 %v929_v41, %v393_v42  ;;  %v477_v49 = vadd.f32 %v929_v41, %v409_v43 }
 0x101   :  { %v430_v50 = vadd.f32 %v929_v41, %v362_v46  ;;  %v446_v51 = vadd.f32 %v929_v41, %v378_v47 }
 0x102   :  { %v525_v52 = vmax.f32 %v461_v48, 0.0  ;;  %v541_v53 = vmax.f32 %v477_v49, 0.0 }
 0x103   :  { %v494_v54 = vmax.f32 %v430_v50, 0.0  ;;  %v510_v55 = vmax.f32 %v446_v51, 0.0 }
 0x104   :  { %589 = vst [vmem:[%s1255_s4 + $0x158] sm:$0xff] %v525_v52 }
 0x105   :  { %605 = vst [vmem:[%s1255_s4 + $0x1d8] sm:$0xff] %v541_v53  ;;  %v296_v56 = vpop.f32.mrf.mxu2  ;;  %v336_v57 = vpop.f32.mrf.mxu3 }
 0x106   :  { %558 = vst [vmem:[%s1255_s4 + $0x60] sm:$0xff] %v494_v54  ;;  %v394_v58 = vmul.f32 %v924_v40, %v296_v56  ;;  %v410_v59 = vmul.f32 %v924_v40, %v336_v57  ;;  %v218_v60 = vpop.f32.mrf.mxu0  ;;  %v258_v61 = vpop.f32.mrf.mxu1 }
 0x107   :  { %574 = vst [vmem:[%s1255_s4 + $0xe0] sm:$0xff] %v510_v55  ;;  %v363_v62 = vmul.f32 %v924_v40, %v218_v60  ;;  %v379_v63 = vmul.f32 %v924_v40, %v258_v61 }
 0x108   :  { %v462_v0 = vadd.f32 %v929_v41, %v394_v58  ;;  %v478_v1 = vadd.f32 %v929_v41, %v410_v59 }
 0x109   :  { %v431_v2 = vadd.f32 %v929_v41, %v363_v62  ;;  %v447_v3 = vadd.f32 %v929_v41, %v379_v63 }
 0x10a   :  { %v526_v4 = vmax.f32 %v462_v0, 0.0  ;;  %v542_v5 = vmax.f32 %v478_v1, 0.0 }
 0x10b   :  { %v495_v6 = vmax.f32 %v431_v2, 0.0  ;;  %v511_v7 = vmax.f32 %v447_v3, 0.0 }
 0x10c   :  { %590 = vst [vmem:[%s1255_s4 + $0x160] sm:$0xff] %v526_v4 }
 0x10d   :  { %606 = vst [vmem:[%s1255_s4 + $0x1e0] sm:$0xff] %v542_v5  ;;  %v298_v8 = vpop.f32.mrf.mxu2  ;;  %v338_v9 = vpop.f32.mrf.mxu3 }
 0x10e   :  { %559 = vst [vmem:[%s1255_s4 + $0x68] sm:$0xff] %v495_v6  ;;  %v395_v10 = vmul.f32 %v924_v40, %v298_v8  ;;  %v411_v11 = vmul.f32 %v924_v40, %v338_v9  ;;  %v221_v12 = vpop.f32.mrf.mxu0  ;;  %v261_v13 = vpop.f32.mrf.mxu1 }
 0x10f   :  { %575 = vst [vmem:[%s1255_s4 + $0xe8] sm:$0xff] %v511_v7  ;;  %v364_v14 = vmul.f32 %v924_v40, %v221_v12  ;;  %v380_v15 = vmul.f32 %v924_v40, %v261_v13 }
 0x110   :  { %v463_v16 = vadd.f32 %v929_v41, %v395_v10  ;;  %v479_v17 = vadd.f32 %v929_v41, %v411_v11 }
 0x111   :  { %v432_v18 = vadd.f32 %v929_v41, %v364_v14  ;;  %v448_v19 = vadd.f32 %v929_v41, %v380_v15 }
 0x112   :  { %v527_v20 = vmax.f32 %v463_v16, 0.0  ;;  %v543_v21 = vmax.f32 %v479_v17, 0.0 }
 0x113   :  { %v496_v22 = vmax.f32 %v432_v18, 0.0  ;;  %v512_v23 = vmax.f32 %v448_v19, 0.0 }
 0x114   :  { %591 = vst [vmem:[%s1255_s4 + $0x168] sm:$0xff] %v527_v20 }
 0x115   :  { %607 = vst [vmem:[%s1255_s4 + $0x1e8] sm:$0xff] %v543_v21  ;;  %v301_v24 = vpop.f32.mrf.mxu2  ;;  %v341_v25 = vpop.f32.mrf.mxu3 }
 0x116   :  { %560 = vst [vmem:[%s1255_s4 + $0x70] sm:$0xff] %v496_v22  ;;  %v396_v26 = vmul.f32 %v924_v40, %v301_v24  ;;  %v412_v27 = vmul.f32 %v924_v40, %v341_v25  ;;  %v223_v28 = vpop.f32.mrf.mxu0  ;;  %v263_v29 = vpop.f32.mrf.mxu1 }
 0x117   :  { %576 = vst [vmem:[%s1255_s4 + $0xf0] sm:$0xff] %v512_v23  ;;  %v365_v30 = vmul.f32 %v924_v40, %v223_v28  ;;  %v381_v31 = vmul.f32 %v924_v40, %v263_v29 }
 0x118   :  { %v464_v32 = vadd.f32 %v929_v41, %v396_v26  ;;  %v480_v33 = vadd.f32 %v929_v41, %v412_v27 }
 0x119   :  { %v433_v34 = vadd.f32 %v929_v41, %v365_v30  ;;  %v449_v35 = vadd.f32 %v929_v41, %v381_v31 }
 0x11a   :  { %v528_v36 = vmax.f32 %v464_v32, 0.0  ;;  %v544_v37 = vmax.f32 %v480_v33, 0.0 }
 0x11b   :  { %v497_v38 = vmax.f32 %v433_v34, 0.0  ;;  %v513_v39 = vmax.f32 %v449_v35, 0.0 }
 0x11c   :  { %592 = vst [vmem:[%s1255_s4 + $0x170] sm:$0xff] %v528_v36 }
 0x11d   :  { %608 = vst [vmem:[%s1255_s4 + $0x1f0] sm:$0xff] %v544_v37  ;;  %v303_v42 = vpop.f32.mrf.mxu2  ;;  %v343_v43 = vpop.f32.mrf.mxu3 }
 0x11e   :  { %561 = vst [vmem:[%s1255_s4 + $0x78] sm:$0xff] %v497_v38  ;;  %v397_v44 = vmul.f32 %v924_v40, %v303_v42  ;;  %v413_v45 = vmul.f32 %v924_v40, %v343_v43 }
 0x11f   :  { %577 = vst [vmem:[%s1255_s4 + $0xf8] sm:$0xff] %v513_v39 }
 0x120   :  { %v465_v46 = vadd.f32 %v929_v41, %v397_v44  ;;  %v481_v47 = vadd.f32 %v929_v41, %v413_v45 }
 0x122   :  { %v529_v48 = vmax.f32 %v465_v46, 0.0  ;;  %v545_v49 = vmax.f32 %v481_v47, 0.0 }
 0x124   :  { %593 = vst [vmem:[%s1255_s4 + $0x178] sm:$0xff] %v529_v48 }
 0x125   :  { %609 = vst [vmem:[%s1255_s4 + $0x1f8] sm:$0xff] %v545_v49 }

// kernel: forward.123
= control target key start
LH: loop header
LB: loop body
LE: loop exit
PB: predicated region body
PF: predicated region fallthrough
CT: control target
= control target key end

     0   :  { %7 = vsyncpa [#allocation3], 0  ;;  %s1694_s12 = smov [#allocation2]   ;;  %s1695_s14 = smov 1152   ;;  %s2063_s0 = inlined_call_operand.hbm [shape: f32[128,1152], index: 0, kind: input, shape index: {}]   ;;  %s2064_s1 = inlined_call_operand.vmem [shape: bf16[1152,128], index: 1, kind: input, shape index: {}]   ;;  %s2065_s2 = inlined_call_operand.vmem [shape: f32[128,128], index: 2, kind: output, shape index: {}]  }
   0x1   :  { %s12_s11 = sshll.u32 %s2063_s0, 4  ;;  %s14_s13 = sshll.u32 %s1694_s12, 4  ;;  %s13_s11 = int_to_ptr.hbm [resolvable:$true] %s12_s11  ;;  %s15_s13 = int_to_ptr.vmem [resolvable:$true] %s14_s13 }
   0x2   :  { %s1696_s15 = smov 72  }
   0x3   :  { %20 = dma.hbm_to_vmem [thread:$0]  %s13_s11, 18432, %s15_s13, [#allocation3], %s1695_s14, %s1695_s14, %s1696_s15  }
   0x4   :  { %1692 = dma.done.wait [#allocation3], 18432  }
   0x5   :  { %1693 = vsyncadd [#allocation3], 4294948864  ;;  %v1576_v0 = vld [vmem:[%s2064_s1 + $0x38] sm:$0xff]  ;;  %v1575_v1 = vld [vmem:[%s2064_s1 + $0x30] sm:$0xff] }
   0x6   :  { %1641 = vmatpush.bf16.msra.mxu1 %v1576_v0  ;;  %1642 = vmatpush.bf16.msra.mxu2 %v1576_v0  ;;  %v1574_v2 = vld [vmem:[%s2064_s1 + $0x28] sm:$0xff]  ;;  %v1573_v3 = vld [vmem:[%s2064_s1 + $0x20] sm:$0xff]  ;;  %v1572_v4 = vld [vmem:[%s2064_s1 + $0x18] sm:$0xff] }
   0x7   :  { %1643 = vmatpush.bf16.msra.mxu3 %v1576_v0  ;;  %819 = vmatpush.bf16.msra.mxu0 %v1576_v0  ;;  %v1571_v5 = vld [vmem:[%s2064_s1 + $0x10] sm:$0xff]  ;;  %v1570_v6 = vld [vmem:[%s2064_s1 + $0x8] sm:$0xff]  ;;  %v1569_v7 = vld [vmem:[%s2064_s1] sm:$0xff] }
   0x8   :  { %v63_v8 = vld [vmem:[#allocation2 + $0x120] sm:$0xff]  ;;  %v72_v9 = vld [vmem:[#allocation2 + $0x168] sm:$0xff]  ;;  %v1592_v16 = vld [vmem:[%s2064_s1 + $0xb8] sm:$0xff] }
   0x9   :  { %v99_v10 = vld [vmem:[#allocation2 + $0x240] sm:$0xff]  ;;  %v108_v11 = vld [vmem:[#allocation2 + $0x288] sm:$0xff]  ;;  %v1584_v17 = vld [vmem:[%s2064_s1 + $0x78] sm:$0xff]  ;;  %v189_v18 = vpack.c.bf16 %v72_v9, %v63_v8 }
   0xa   :  { %1644 = vmatpush.bf16.msra.mxu1 %v1575_v1  ;;  %1645 = vmatpush.bf16.msra.mxu2 %v1575_v1  ;;  %v135_v12 = vld [vmem:[#allocation2 + $0x360] sm:$0xff]  ;;  %v144_v13 = vld [vmem:[#allocation2 + $0x3a8] sm:$0xff]  ;;  %v207_v19 = vpack.c.bf16 %v108_v11, %v99_v10  ;;  %v1600_v22 = vld [vmem:[%s2064_s1 + $0xf8] sm:$0xff] }
   0xb   :  { %1646 = vmatpush.bf16.msra.mxu3 %v1575_v1  ;;  %820 = vmatpush.bf16.msra.mxu0 %v1575_v1  ;;  %v27_v14 = vld [vmem:[#allocation2] sm:$0xff]  ;;  %v36_v15 = vld [vmem:[#allocation2 + $0x48] sm:$0xff]  ;;  %v225_v20 = vpack.c.bf16 %v144_v13, %v135_v12  ;;  %v1608_v23 = vld [vmem:[%s2064_s1 + $0x138] sm:$0xff] }
   0xc   :  { %v171_v21 = vpack.c.bf16 %v36_v15, %v27_v14  ;;  %v1591_v24 = vld [vmem:[%s2064_s1 + $0xb0] sm:$0xff]  ;;  %v1590_v28 = vld [vmem:[%s2064_s1 + $0xa8] sm:$0xff]  ;;  %v1589_v32 = vld [vmem:[%s2064_s1 + $0xa0] sm:$0xff] }
   0xd   :  { %v1583_v25 = vld [vmem:[%s2064_s1 + $0x70] sm:$0xff]  ;;  %v1582_v29 = vld [vmem:[%s2064_s1 + $0x68] sm:$0xff]  ;;  %v1581_v33 = vld [vmem:[%s2064_s1 + $0x60] sm:$0xff] }
   0xe   :  { %1647 = vmatpush.bf16.msra.mxu1 %v1574_v2  ;;  %1648 = vmatpush.bf16.msra.mxu2 %v1574_v2  ;;  %v1599_v26 = vld [vmem:[%s2064_s1 + $0xf0] sm:$0xff]  ;;  %v1598_v30 = vld [vmem:[%s2064_s1 + $0xe8] sm:$0xff]  ;;  %v1597_v34 = vld [vmem:[%s2064_s1 + $0xe0] sm:$0xff] }
   0xf   :  { %1649 = vmatpush.bf16.msra.mxu3 %v1574_v2  ;;  %821 = vmatpush.bf16.msra.mxu0 %v1574_v2  ;;  %v1607_v27 = vld [vmem:[%s2064_s1 + $0x130] sm:$0xff]  ;;  %v1606_v31 = vld [vmem:[%s2064_s1 + $0x128] sm:$0xff]  ;;  %v1605_v35 = vld [vmem:[%s2064_s1 + $0x120] sm:$0xff] }
  0x10   :  { %v81_v36 = vld [vmem:[#allocation2 + $0x1b0] sm:$0xff]  ;;  %v90_v37 = vld [vmem:[#allocation2 + $0x1f8] sm:$0xff]  ;;  %v1586_v56 = vld [vmem:[%s2064_s1 + $0x88] sm:$0xff] }
  0x11   :  { %v117_v38 = vld [vmem:[#allocation2 + $0x2d0] sm:$0xff]  ;;  %v126_v39 = vld [vmem:[#allocation2 + $0x318] sm:$0xff]  ;;  %v198_v46 = vpack.c.bf16 %v90_v37, %v81_v36  ;;  %v1578_v57 = vld [vmem:[%s2064_s1 + $0x48] sm:$0xff] }
  0x12   :  { %1650 = vmatpush.bf16.msra.mxu1 %v1573_v3  ;;  %1651 = vmatpush.bf16.msra.mxu2 %v1573_v3  ;;  %v153_v40 = vld [vmem:[#allocation2 + $0x3f0] sm:$0xff]  ;;  %v162_v41 = vld [vmem:[#allocation2 + $0x438] sm:$0xff]  ;;  %v216_v47 = vpack.c.bf16 %v126_v39, %v117_v38  ;;  %v1594_v58 = vld [vmem:[%s2064_s1 + $0xc8] sm:$0xff] }
  0x13   :  { %1652 = vmatpush.bf16.msra.mxu3 %v1573_v3  ;;  %822 = vmatpush.bf16.msra.mxu0 %v1573_v3  ;;  %v45_v42 = vld [vmem:[#allocation2 + $0x90] sm:$0xff]  ;;  %v54_v43 = vld [vmem:[#allocation2 + $0xd8] sm:$0xff]  ;;  %v234_v48 = vpack.c.bf16 %v162_v41, %v153_v40  ;;  %v1602_v59 = vld [vmem:[%s2064_s1 + $0x108] sm:$0xff] }
  0x14   :  { %v1588_v44 = vld [vmem:[%s2064_s1 + $0x98] sm:$0xff]  ;;  %v180_v49 = vpack.c.bf16 %v54_v43, %v45_v42  ;;  %v1587_v52 = vld [vmem:[%s2064_s1 + $0x90] sm:$0xff]  ;;  %v1585_v60 = vld [vmem:[%s2064_s1 + $0x80] sm:$0xff] }
  0x15   :  { %v1580_v45 = vld [vmem:[%s2064_s1 + $0x58] sm:$0xff]  ;;  %v1579_v53 = vld [vmem:[%s2064_s1 + $0x50] sm:$0xff]  ;;  %v1577_v61 = vld [vmem:[%s2064_s1 + $0x40] sm:$0xff] }
  0x16   :  { %1653 = vmatpush.bf16.msra.mxu1 %v1572_v4  ;;  %1654 = vmatpush.bf16.msra.mxu2 %v1572_v4  ;;  %v1596_v50 = vld [vmem:[%s2064_s1 + $0xd8] sm:$0xff]  ;;  %v1595_v54 = vld [vmem:[%s2064_s1 + $0xd0] sm:$0xff]  ;;  %v28_v62 = vld [vmem:[#allocation2 + $0x8] sm:$0xff] }
  0x17   :  { %1655 = vmatpush.bf16.msra.mxu3 %v1572_v4  ;;  %823 = vmatpush.bf16.msra.mxu0 %v1572_v4  ;;  %v1604_v51 = vld [vmem:[%s2064_s1 + $0x118] sm:$0xff]  ;;  %v1603_v55 = vld [vmem:[%s2064_s1 + $0x110] sm:$0xff]  ;;  %v1593_v63 = vld [vmem:[%s2064_s1 + $0xc0] sm:$0xff] }
  0x18   :  { %v1601_v0 = vld [vmem:[%s2064_s1 + $0x100] sm:$0xff]  ;;  %v37_v1 = vld [vmem:[#allocation2 + $0x50] sm:$0xff]  ;;  %v1624_v2 = vld [vmem:[%s2064_s1 + $0x1b8] sm:$0xff] }
  0x19   :  { %v1616_v3 = vld [vmem:[%s2064_s1 + $0x178] sm:$0xff]  ;;  %v29_v4 = vld [vmem:[#allocation2 + $0x10] sm:$0xff]  ;;  %v31_v8 = vld [vmem:[#allocation2 + $0x20] sm:$0xff]  ;;  %v172_v12 = vpack.c.bf16 %v37_v1, %v28_v62 }
  0x1a   :  { %1656 = vmatpush.bf16.msra.mxu1 %v1571_v5  ;;  %1657 = vmatpush.bf16.msra.mxu2 %v1571_v5  ;;  %v40_v9 = vld [vmem:[#allocation2 + $0x68] sm:$0xff]  ;;  %v1632_v10 = vld [vmem:[%s2064_s1 + $0x1f8] sm:$0xff]  ;;  %v1621_v36 = vld [vmem:[%s2064_s1 + $0x1a0] sm:$0xff] }
  0x1b   :  { %1658 = vmatpush.bf16.msra.mxu3 %v1571_v5  ;;  %824 = vmatpush.bf16.msra.mxu0 %v1571_v5  ;;  %v38_v5 = vld [vmem:[#allocation2 + $0x58] sm:$0xff]  ;;  %v175_v15 = vpack.c.bf16 %v40_v9, %v31_v8  ;;  %v1629_v37 = vld [vmem:[%s2064_s1 + $0x1e0] sm:$0xff]  ;;  %v64_v40 = vld [vmem:[#allocation2 + $0x128] sm:$0xff] }
  0x1c   :  { %v1640_v11 = vld [vmem:[%s2064_s1 + $0x238] sm:$0xff]  ;;  %v173_v13 = vpack.c.bf16 %v38_v5, %v29_v4  ;;  %v1613_v38 = vld [vmem:[%s2064_s1 + $0x160] sm:$0xff]  ;;  %v73_v41 = vld [vmem:[#allocation2 + $0x170] sm:$0xff] }
  0x1d   :  { %v1637_v39 = vld [vmem:[%s2064_s1 + $0x220] sm:$0xff]  ;;  %v65_v42 = vld [vmem:[#allocation2 + $0x130] sm:$0xff]  ;;  %v74_v43 = vld [vmem:[#allocation2 + $0x178] sm:$0xff] }
  0x1e   :  { %1659 = vmatpush.bf16.msra.mxu1 %v1570_v6  ;;  %1660 = vmatpush.bf16.msra.mxu2 %v1570_v6  ;;  %v85_v62 = vld [vmem:[#allocation2 + $0x1d0] sm:$0xff]  ;;  %v100_v8 = vld [vmem:[#allocation2 + $0x248] sm:$0xff] }
  0x1f   :  { %1661 = vmatpush.bf16.msra.mxu3 %v1570_v6  ;;  %825 = vmatpush.bf16.msra.mxu0 %v1570_v6  ;;  %v30_v6 = vld [vmem:[#allocation2 + $0x18] sm:$0xff]  ;;  %v1619_v4 = vld [vmem:[%s2064_s1 + $0x190] sm:$0xff] }
  0x20   :  { %v1627_v5 = vld [vmem:[%s2064_s1 + $0x1d0] sm:$0xff] }
  0x21   :  { %v109_v9 = vld [vmem:[#allocation2 + $0x290] sm:$0xff] }
  0x22   :  { %1662 = vmatpush.bf16.msra.mxu1 %v1569_v7  ;;  %1663 = vmatpush.bf16.msra.mxu2 %v1569_v7 }
  0x23   :  { %1664 = vmatpush.bf16.msra.mxu3 %v1569_v7  ;;  %826 = vmatpush.bf16.msra.mxu0 %v1569_v7  ;;  %v39_v7 = vld [vmem:[#allocation2 + $0x60] sm:$0xff] }
  0x24   :  { %v174_v14 = vpack.c.bf16 %v39_v7, %v30_v6  ;;  %v1611_v6 = vld [vmem:[%s2064_s1 + $0x150] sm:$0xff] }
  0x25   :  { %837 = vmatmul.bf16.vlgmr.msra.gmra.mxu1 %v189_v18  ;;  %847 = vmatmul.bf16.vlgmr.msra.gmra.mxu2 %v207_v19  ;;  %v1631_v18 = vld [vmem:[%s2064_s1 + $0x1f0] sm:$0xff] }
  0x26   :  { %917 = vmatpush.bf16.msrb.mxu2 %v1592_v16  ;;  %868 = vmatpush.bf16.msrb.mxu1 %v1584_v17  ;;  %v1623_v16 = vld [vmem:[%s2064_s1 + $0x1b0] sm:$0xff] }
  0x27   :  { %857 = vmatmul.bf16.vlgmr.msra.gmra.mxu3 %v225_v20  ;;  %827 = vmatmul.bf16.vlgmr.msra.gmra.mxu0 %v171_v21  ;;  %v1615_v17 = vld [vmem:[%s2064_s1 + $0x170] sm:$0xff]  ;;  %v1622_v20 = vld [vmem:[%s2064_s1 + $0x1a8] sm:$0xff] }
  0x28   :  { %966 = vmatpush.bf16.msrb.mxu3 %v1600_v22  ;;  %1015 = vmatpush.bf16.msrb.mxu0 %v1608_v23  ;;  %v1639_v19 = vld [vmem:[%s2064_s1 + $0x230] sm:$0xff]  ;;  %v1614_v21 = vld [vmem:[%s2064_s1 + $0x168] sm:$0xff] }
  0x29   :  { %v1630_v22 = vld [vmem:[%s2064_s1 + $0x1e8] sm:$0xff]  ;;  %v1635_v7 = vld [vmem:[%s2064_s1 + $0x210] sm:$0xff] }
  0x2a   :  { %918 = vmatpush.bf16.msrb.mxu2 %v1591_v24  ;;  %869 = vmatpush.bf16.msrb.mxu1 %v1583_v25  ;;  %v1638_v23 = vld [vmem:[%s2064_s1 + $0x228] sm:$0xff]  ;;  %v46_v24 = vld [vmem:[#allocation2 + $0x98] sm:$0xff]  ;;  %v55_v25 = vld [vmem:[#allocation2 + $0xe0] sm:$0xff] }
  0x2c   :  { %967 = vmatpush.bf16.msrb.mxu3 %v1599_v26  ;;  %1016 = vmatpush.bf16.msrb.mxu0 %v1607_v27  ;;  %v47_v26 = vld [vmem:[#allocation2 + $0xa0] sm:$0xff]  ;;  %v56_v27 = vld [vmem:[#allocation2 + $0xe8] sm:$0xff] }
  0x2e   :  { %919 = vmatpush.bf16.msrb.mxu2 %v1590_v28  ;;  %870 = vmatpush.bf16.msrb.mxu1 %v1582_v29  ;;  %v48_v28 = vld [vmem:[#allocation2 + $0xa8] sm:$0xff]  ;;  %v57_v29 = vld [vmem:[#allocation2 + $0xf0] sm:$0xff] }
  0x30   :  { %968 = vmatpush.bf16.msrb.mxu3 %v1598_v30  ;;  %1017 = vmatpush.bf16.msrb.mxu0 %v1606_v31  ;;  %v49_v30 = vld [vmem:[#allocation2 + $0xb0] sm:$0xff]  ;;  %v58_v31 = vld [vmem:[#allocation2 + $0xf8] sm:$0xff] }
  0x32   :  { %920 = vmatpush.bf16.msrb.mxu2 %v1589_v32  ;;  %871 = vmatpush.bf16.msrb.mxu1 %v1581_v33  ;;  %v181_v32 = vpack.c.bf16 %v55_v25, %v46_v24  ;;  %v182_v33 = vpack.c.bf16 %v56_v27, %v47_v26  ;;  %v118_v24 = vld [vmem:[#allocation2 + $0x2d8] sm:$0xff]  ;;  %v127_v25 = vld [vmem:[#allocation2 + $0x320] sm:$0xff]  ;;  %v128_v27 = vld [vmem:[#allocation2 + $0x328] sm:$0xff] }
  0x33   :  { %v119_v26 = vld [vmem:[#allocation2 + $0x2e0] sm:$0xff] }
  0x34   :  { %969 = vmatpush.bf16.msrb.mxu3 %v1597_v34  ;;  %1018 = vmatpush.bf16.msrb.mxu0 %v1605_v35  ;;  %v183_v34 = vpack.c.bf16 %v57_v29, %v48_v28  ;;  %v184_v35 = vpack.c.bf16 %v58_v31, %v49_v30  ;;  %v120_v28 = vld [vmem:[#allocation2 + $0x2e8] sm:$0xff]  ;;  %v129_v29 = vld [vmem:[#allocation2 + $0x330] sm:$0xff]  ;;  %v130_v31 = vld [vmem:[#allocation2 + $0x338] sm:$0xff] }
  0x35   :  { %842 = vmatmul.bf16.gmra.mxu1 %v198_v46  ;;  %852 = vmatmul.bf16.gmra.mxu2 %v216_v47  ;;  %v67_v46 = vld [vmem:[#allocation2 + $0x140] sm:$0xff]  ;;  %v76_v47 = vld [vmem:[#allocation2 + $0x188] sm:$0xff]  ;;  %v121_v30 = vld [vmem:[#allocation2 + $0x2f0] sm:$0xff] }
  0x36   :  { %921 = vmatpush.bf16.msrb.mxu2 %v1588_v44  ;;  %872 = vmatpush.bf16.msrb.mxu1 %v1580_v45  ;;  %v66_v44 = vld [vmem:[#allocation2 + $0x138] sm:$0xff]  ;;  %v75_v45 = vld [vmem:[#allocation2 + $0x180] sm:$0xff] }
  0x37   :  { %862 = vmatmul.bf16.gmra.mxu3 %v234_v48  ;;  %832 = vmatmul.bf16.gmra.mxu0 %v180_v49  ;;  %v190_v48 = vpack.c.bf16 %v73_v41, %v64_v40  ;;  %v191_v49 = vpack.c.bf16 %v74_v43, %v65_v42  ;;  %v136_v40 = vld [vmem:[#allocation2 + $0x368] sm:$0xff]  ;;  %v145_v41 = vld [vmem:[#allocation2 + $0x3b0] sm:$0xff]  ;;  %v146_v43 = vld [vmem:[#allocation2 + $0x3b8] sm:$0xff] }
  0x38   :  { %970 = vmatpush.bf16.msrb.mxu3 %v1596_v50  ;;  %1019 = vmatpush.bf16.msrb.mxu0 %v1604_v51  ;;  %v192_v50 = vpack.c.bf16 %v75_v45, %v66_v44  ;;  %v193_v51 = vpack.c.bf16 %v76_v47, %v67_v46  ;;  %v137_v42 = vld [vmem:[#allocation2 + $0x370] sm:$0xff]  ;;  %v138_v44 = vld [vmem:[#allocation2 + $0x378] sm:$0xff]  ;;  %v147_v45 = vld [vmem:[#allocation2 + $0x3c0] sm:$0xff] }
  0x39   :  { %v139_v46 = vld [vmem:[#allocation2 + $0x380] sm:$0xff]  ;;  %v148_v47 = vld [vmem:[#allocation2 + $0x3c8] sm:$0xff] }
  0x3a   :  { %922 = vmatpush.bf16.msrb.mxu2 %v1587_v52  ;;  %873 = vmatpush.bf16.msrb.mxu1 %v1579_v53  ;;  %v1620_v52 = vld [vmem:[%s2064_s1 + $0x198] sm:$0xff] }
  0x3b   :  { %v1628_v53 = vld [vmem:[%s2064_s1 + $0x1d8] sm:$0xff] }
  0x3c   :  { %971 = vmatpush.bf16.msrb.mxu3 %v1595_v54  ;;  %1020 = vmatpush.bf16.msrb.mxu0 %v1603_v55  ;;  %v1612_v54 = vld [vmem:[%s2064_s1 + $0x158] sm:$0xff] }
  0x3d   :  { %v1636_v55 = vld [vmem:[%s2064_s1 + $0x218] sm:$0xff] }
  0x3e   :  { %923 = vmatpush.bf16.msrb.mxu2 %v1586_v56  ;;  %874 = vmatpush.bf16.msrb.mxu1 %v1578_v57  ;;  %v82_v56 = vld [vmem:[#allocation2 + $0x1b8] sm:$0xff]  ;;  %v91_v57 = vld [vmem:[#allocation2 + $0x200] sm:$0xff] }
  0x40   :  { %972 = vmatpush.bf16.msrb.mxu3 %v1594_v58  ;;  %1021 = vmatpush.bf16.msrb.mxu0 %v1602_v59  ;;  %v83_v58 = vld [vmem:[#allocation2 + $0x1c0] sm:$0xff]  ;;  %v92_v59 = vld [vmem:[#allocation2 + $0x208] sm:$0xff] }
  0x41   :  { %v200_v1 = vpack.c.bf16 %v92_v59, %v83_v58  ;;  %v154_v58 = vld [vmem:[#allocation2 + $0x3f8] sm:$0xff]  ;;  %v163_v59 = vld [vmem:[#allocation2 + $0x440] sm:$0xff] }
  0x42   :  { %924 = vmatpush.bf16.msrb.mxu2 %v1585_v60  ;;  %875 = vmatpush.bf16.msrb.mxu1 %v1577_v61  ;;  %v84_v60 = vld [vmem:[#allocation2 + $0x1c8] sm:$0xff]  ;;  %v93_v61 = vld [vmem:[#allocation2 + $0x210] sm:$0xff] }
  0x44   :  { %973 = vmatpush.bf16.msrb.mxu3 %v1593_v63  ;;  %1022 = vmatpush.bf16.msrb.mxu0 %v1601_v0  ;;  %v94_v63 = vld [vmem:[#allocation2 + $0x218] sm:$0xff]  ;;  %v199_v0 = vpack.c.bf16 %v91_v57, %v82_v56 }
  0x45   :  { %876 = vmatmul.bf16.vlgmr.msrb.gmra.mxu1 %v172_v12  ;;  %925 = vmatmul.bf16.vlgmr.msrb.gmra.mxu2 %v173_v13  ;;  %v102_v12 = vld [vmem:[#allocation2 + $0x258] sm:$0xff]  ;;  %v111_v13 = vld [vmem:[#allocation2 + $0x2a0] sm:$0xff] }
  0x46   :  { %1113 = vmatpush.bf16.msra.mxu2 %v1624_v2  ;;  %1064 = vmatpush.bf16.msra.mxu1 %v1616_v3  ;;  %v201_v2 = vpack.c.bf16 %v93_v61, %v84_v60  ;;  %v202_v3 = vpack.c.bf16 %v94_v63, %v85_v62  ;;  %v155_v60 = vld [vmem:[#allocation2 + $0x400] sm:$0xff]  ;;  %v164_v61 = vld [vmem:[#allocation2 + $0x448] sm:$0xff]  ;;  %v165_v63 = vld [vmem:[#allocation2 + $0x450] sm:$0xff] }
  0x47   :  { %974 = vmatmul.bf16.vlgmr.msrb.gmra.mxu3 %v174_v14  ;;  %1023 = vmatmul.bf16.vlgmr.msrb.gmra.mxu0 %v175_v15  ;;  %v103_v14 = vld [vmem:[#allocation2 + $0x260] sm:$0xff]  ;;  %v112_v15 = vld [vmem:[#allocation2 + $0x2a8] sm:$0xff] }
  0x48   :  { %1162 = vmatpush.bf16.msra.mxu3 %v1632_v10  ;;  %1211 = vmatpush.bf16.msra.mxu0 %v1640_v11  ;;  %v101_v10 = vld [vmem:[#allocation2 + $0x250] sm:$0xff]  ;;  %v110_v11 = vld [vmem:[#allocation2 + $0x298] sm:$0xff]  ;;  %v156_v62 = vld [vmem:[#allocation2 + $0x408] sm:$0xff] }
  0x4a   :  { %1114 = vmatpush.bf16.msra.mxu2 %v1623_v16  ;;  %1065 = vmatpush.bf16.msra.mxu1 %v1615_v17  ;;  %v208_v16 = vpack.c.bf16 %v109_v9, %v100_v8  ;;  %v209_v17 = vpack.c.bf16 %v110_v11, %v101_v10 }
  0x4c   :  { %1163 = vmatpush.bf16.msra.mxu3 %v1631_v18  ;;  %1212 = vmatpush.bf16.msra.mxu0 %v1639_v19  ;;  %v210_v18 = vpack.c.bf16 %v111_v13, %v102_v12  ;;  %v211_v19 = vpack.c.bf16 %v112_v15, %v103_v14  ;;  %v32_v14 = vld [vmem:[#allocation2 + $0x28] sm:$0xff]  ;;  %v41_v15 = vld [vmem:[#allocation2 + $0x70] sm:$0xff] }
  0x4e   :  { %1115 = vmatpush.bf16.msra.mxu2 %v1622_v20  ;;  %1066 = vmatpush.bf16.msra.mxu1 %v1614_v21  ;;  %v1618_v20 = vld [vmem:[%s2064_s1 + $0x188] sm:$0xff] }
  0x4f   :  { %v1626_v21 = vld [vmem:[%s2064_s1 + $0x1c8] sm:$0xff] }
  0x50   :  { %1164 = vmatpush.bf16.msra.mxu3 %v1630_v22  ;;  %1213 = vmatpush.bf16.msra.mxu0 %v1638_v23  ;;  %v1610_v22 = vld [vmem:[%s2064_s1 + $0x148] sm:$0xff] }
  0x51   :  { %v1634_v23 = vld [vmem:[%s2064_s1 + $0x208] sm:$0xff] }
  0x52   :  { %1116 = vmatpush.bf16.msra.mxu2 %v1621_v36  ;;  %1067 = vmatpush.bf16.msra.mxu1 %v1613_v38  ;;  %v1617_v36 = vld [vmem:[%s2064_s1 + $0x180] sm:$0xff] }
  0x53   :  { %v1609_v38 = vld [vmem:[%s2064_s1 + $0x140] sm:$0xff] }
  0x54   :  { %1165 = vmatpush.bf16.msra.mxu3 %v1629_v37  ;;  %1214 = vmatpush.bf16.msra.mxu0 %v1637_v39  ;;  %v1625_v37 = vld [vmem:[%s2064_s1 + $0x1c0] sm:$0xff] }
  0x55   :  { %881 = vmatmul.bf16.gmra.mxu1 %v181_v32  ;;  %930 = vmatmul.bf16.gmra.mxu2 %v182_v33  ;;  %v217_v32 = vpack.c.bf16 %v127_v25, %v118_v24  ;;  %v218_v33 = vpack.c.bf16 %v128_v27, %v119_v26  ;;  %v1633_v39 = vld [vmem:[%s2064_s1 + $0x200] sm:$0xff]  ;;  %v176_v24 = vpack.c.bf16 %v41_v15, %v32_v14  ;;  %v68_v14 = vld [vmem:[#allocation2 + $0x148] sm:$0xff]  ;;  %v77_v15 = vld [vmem:[#allocation2 + $0x190] sm:$0xff] }
  0x56   :  { %1117 = vmatpush.bf16.msra.mxu2 %v1620_v52  ;;  %1068 = vmatpush.bf16.msra.mxu1 %v1612_v54  ;;  %v229_v52 = vpack.c.bf16 %v148_v47, %v139_v46  ;;  %v62_v46 = vld [vmem:[#allocation2 + $0x118] sm:$0xff] }
  0x57   :  { %979 = vmatmul.bf16.gmra.mxu3 %v183_v34  ;;  %1028 = vmatmul.bf16.gmra.mxu0 %v184_v35  ;;  %v219_v34 = vpack.c.bf16 %v129_v29, %v120_v28  ;;  %v220_v35 = vpack.c.bf16 %v130_v31, %v121_v30 }
  0x58   :  { %1166 = vmatpush.bf16.msra.mxu3 %v1628_v53  ;;  %1215 = vmatpush.bf16.msra.mxu0 %v1636_v55 }
  0x5a   :  { %1118 = vmatpush.bf16.msra.mxu2 %v1619_v4  ;;  %1069 = vmatpush.bf16.msra.mxu1 %v1611_v6  ;;  %v235_v4 = vpack.c.bf16 %v163_v59, %v154_v58 }
  0x5c   :  { %1167 = vmatpush.bf16.msra.mxu3 %v1627_v5  ;;  %1216 = vmatpush.bf16.msra.mxu0 %v1635_v7  ;;  %v236_v5 = vpack.c.bf16 %v164_v61, %v155_v60  ;;  %v237_v7 = vpack.c.bf16 %v165_v63, %v156_v62 }
  0x5e   :  { %1119 = vmatpush.bf16.msra.mxu2 %v1618_v20  ;;  %1070 = vmatpush.bf16.msra.mxu1 %v1610_v22  ;;  %v35_v20 = vld [vmem:[#allocation2 + $0x40] sm:$0xff] }
  0x60   :  { %1168 = vmatpush.bf16.msra.mxu3 %v1626_v21  ;;  %1217 = vmatpush.bf16.msra.mxu0 %v1634_v23  ;;  %v44_v21 = vld [vmem:[#allocation2 + $0x88] sm:$0xff] }
  0x61   :  { %v179_v28 = vpack.c.bf16 %v44_v21, %v35_v20  ;;  %v71_v20 = vld [vmem:[#allocation2 + $0x160] sm:$0xff]  ;;  %v80_v21 = vld [vmem:[#allocation2 + $0x1a8] sm:$0xff] }
  0x62   :  { %1120 = vmatpush.bf16.msra.mxu2 %v1617_v36  ;;  %1071 = vmatpush.bf16.msra.mxu1 %v1609_v38  ;;  %v50_v38 = vld [vmem:[#allocation2 + $0xb8] sm:$0xff] }
  0x64   :  { %1169 = vmatpush.bf16.msra.mxu3 %v1625_v37  ;;  %1218 = vmatpush.bf16.msra.mxu0 %v1633_v39  ;;  %v59_v39 = vld [vmem:[#allocation2 + $0x100] sm:$0xff] }
  0x65   :  { %886 = vmatmul.bf16.gmra.mxu1 %v190_v48  ;;  %935 = vmatmul.bf16.gmra.mxu2 %v191_v49  ;;  %v226_v48 = vpack.c.bf16 %v145_v41, %v136_v40  ;;  %v227_v49 = vpack.c.bf16 %v146_v43, %v137_v42  ;;  %v51_v41 = vld [vmem:[#allocation2 + $0xc0] sm:$0xff]  ;;  %v60_v42 = vld [vmem:[#allocation2 + $0x108] sm:$0xff] }
  0x66   :  { %v52_v43 = vld [vmem:[#allocation2 + $0xc8] sm:$0xff] }
  0x67   :  { %984 = vmatmul.bf16.gmra.mxu3 %v192_v50  ;;  %1033 = vmatmul.bf16.gmra.mxu0 %v193_v51  ;;  %v228_v51 = vpack.c.bf16 %v147_v45, %v138_v44  ;;  %v61_v44 = vld [vmem:[#allocation2 + $0x110] sm:$0xff] }
  0x68   :  { %v53_v45 = vld [vmem:[#allocation2 + $0xd0] sm:$0xff]  ;;  %v187_v58 = vpack.c.bf16 %v61_v44, %v52_v43  ;;  %v86_v43 = vld [vmem:[#allocation2 + $0x1d8] sm:$0xff]  ;;  %v95_v44 = vld [vmem:[#allocation2 + $0x220] sm:$0xff] }
  0x69   :  { %v188_v59 = vpack.c.bf16 %v62_v46, %v53_v45  ;;  %v96_v46 = vld [vmem:[#allocation2 + $0x228] sm:$0xff] }
  0x75   :  { %891 = vmatmul.bf16.gmra.mxu1 %v199_v0  ;;  %940 = vmatmul.bf16.gmra.mxu2 %v200_v1  ;;  %v157_v0 = vld [vmem:[#allocation2 + $0x410] sm:$0xff]  ;;  %v166_v1 = vld [vmem:[#allocation2 + $0x458] sm:$0xff] }
  0x76   :  { %v238_v8 = vpack.c.bf16 %v166_v1, %v157_v0 }
  0x77   :  { %989 = vmatmul.bf16.gmra.mxu3 %v201_v2  ;;  %1038 = vmatmul.bf16.gmra.mxu0 %v202_v3 }
  0x85   :  { %896 = vmatmul.bf16.gmra.mxu1 %v208_v16  ;;  %945 = vmatmul.bf16.gmra.mxu2 %v209_v17  ;;  %v33_v16 = vld [vmem:[#allocation2 + $0x30] sm:$0xff]  ;;  %v42_v17 = vld [vmem:[#allocation2 + $0x78] sm:$0xff] }
  0x86   :  { %v177_v25 = vpack.c.bf16 %v42_v17, %v33_v16  ;;  %v69_v17 = vld [vmem:[#allocation2 + $0x150] sm:$0xff] }
  0x87   :  { %994 = vmatmul.bf16.gmra.mxu3 %v210_v18  ;;  %1043 = vmatmul.bf16.gmra.mxu0 %v211_v19  ;;  %v34_v18 = vld [vmem:[#allocation2 + $0x38] sm:$0xff]  ;;  %v43_v19 = vld [vmem:[#allocation2 + $0x80] sm:$0xff] }
  0x88   :  { %v178_v27 = vpack.c.bf16 %v43_v19, %v34_v18  ;;  %v70_v18 = vld [vmem:[#allocation2 + $0x158] sm:$0xff]  ;;  %v79_v19 = vld [vmem:[#allocation2 + $0x1a0] sm:$0xff] }
  0x95   :  { %901 = vmatmul.bf16.gmra.mxu1 %v217_v32  ;;  %950 = vmatmul.bf16.gmra.mxu2 %v218_v33 }
  0x97   :  { %999 = vmatmul.bf16.gmra.mxu3 %v219_v34  ;;  %1048 = vmatmul.bf16.gmra.mxu0 %v220_v35 }
  0xa2   :  { %v1931_v50 = vpop.f32.mrf.mxu1 }
  0xa4   :  { %v828_v53 = vpop.f32.mrf.mxu0 }
  0xa5   :  { %906 = vmatmul.bf16.gmra.mxu1 %v226_v48  ;;  %955 = vmatmul.bf16.gmra.mxu2 %v227_v49 }
  0xa7   :  { %1004 = vmatmul.bf16.gmra.mxu3 %v228_v51  ;;  %1053 = vmatmul.bf16.gmra.mxu0 %v229_v52  ;;  %v185_v51 = vpack.c.bf16 %v59_v39, %v50_v38  ;;  %v186_v52 = vpack.c.bf16 %v60_v42, %v51_v41 }
  0xa8   :  { %v1933_v54 = vpop.f32.mrf.mxu2 }
  0xaa   :  { %v1935_v55 = vpop.f32.mrf.mxu3  ;;  %v1937_v56 = vpop.f32.mrf.mxu1 }
  0xac   :  { %v830_v57 = vpop.f32.mrf.mxu0 }
  0xb0   :  { %v1939_v2 = vpop.f32.mrf.mxu2 }
  0xb2   :  { %v1941_v3 = vpop.f32.mrf.mxu3  ;;  %v1943_v6 = vpop.f32.mrf.mxu1 }
  0xb4   :  { %v833_v9 = vpop.f32.mrf.mxu0 }
  0xb5   :  { %911 = vmatmul.bf16.gmra.mxu1 %v235_v4  ;;  %960 = vmatmul.bf16.gmra.mxu2 %v236_v5 }
  0xb7   :  { %1009 = vmatmul.bf16.gmra.mxu3 %v237_v7  ;;  %1058 = vmatmul.bf16.gmra.mxu0 %v238_v8 }
  0xb8   :  { %v1945_v10 = vpop.f32.mrf.mxu2 }
  0xba   :  { %v1947_v11 = vpop.f32.mrf.mxu3  ;;  %v1949_v12 = vpop.f32.mrf.mxu1 }
  0xbc   :  { %v835_v13 = vpop.f32.mrf.mxu0 }
  0xc0   :  { %v1951_v22 = vpop.f32.mrf.mxu2 }
  0xc2   :  { %v1953_v23 = vpop.f32.mrf.mxu3  ;;  %v877_v26 = vpop.f32.mrf.mxu1 }
  0xc3   :  { %v878_v29 = vadd.f32 %v877_v26, %v828_v53 }
  0xc4   :  { %v1024_v30 = vpop.f32.mrf.mxu0 }
  0xc5   :  { %1072 = vmatmul.bf16.vlgmr.msra.gmra.mxu1 %v176_v24  ;;  %1121 = vmatmul.bf16.vlgmr.msra.gmra.mxu2 %v177_v25 }
  0xc7   :  { %1170 = vmatmul.bf16.vlgmr.msra.gmra.mxu3 %v178_v27  ;;  %1219 = vmatmul.bf16.vlgmr.msra.gmra.mxu0 %v179_v28  ;;  %v194_v27 = vpack.c.bf16 %v77_v15, %v68_v14 }
  0xc8   :  { %v926_v31 = vpop.f32.mrf.mxu2 }
  0xc9   :  { %v927_v32 = vadd.f32 %v926_v31, %v878_v29  ;;  %v197_v31 = vpack.c.bf16 %v80_v21, %v71_v20  ;;  %v114_v21 = vld [vmem:[#allocation2 + $0x2b8] sm:$0xff] }
  0xca   :  { %v975_v33 = vpop.f32.mrf.mxu3  ;;  %v879_v34 = vpop.f32.mrf.mxu1 }
  0xcb   :  { %v976_v35 = vadd.f32 %v975_v33, %v927_v32  ;;  %v880_v36 = vadd.f32 %v879_v34, %v830_v57 }
  0xcc   :  { %v1026_v37 = vpop.f32.mrf.mxu0 }
  0xcd   :  { %v1955_v40 = vadd.f32 %v1024_v30, %v976_v35  ;;  %v196_v30 = vpack.c.bf16 %v79_v19, %v70_v18  ;;  %v104_v18 = vld [vmem:[#allocation2 + $0x268] sm:$0xff]  ;;  %v113_v19 = vld [vmem:[#allocation2 + $0x2b0] sm:$0xff] }
  0xd0   :  { %v928_v47 = vpop.f32.mrf.mxu2 }
  0xd1   :  { %v929_v48 = vadd.f32 %v928_v47, %v880_v36  ;;  %v88_v47 = vld [vmem:[#allocation2 + $0x1e8] sm:$0xff] }
  0xd2   :  { %v977_v49 = vpop.f32.mrf.mxu3  ;;  %v882_v53 = vpop.f32.mrf.mxu1 }
  0xd3   :  { %v978_v57 = vadd.f32 %v977_v49, %v929_v48  ;;  %v883_v60 = vadd.f32 %v882_v53, %v833_v9  ;;  %v78_v9 = vld [vmem:[#allocation2 + $0x198] sm:$0xff]  ;;  %v97_v48 = vld [vmem:[#allocation2 + $0x230] sm:$0xff] }
  0xd4   :  { %v1029_v61 = vpop.f32.mrf.mxu0  ;;  %v195_v28 = vpack.c.bf16 %v78_v9, %v69_v17  ;;  %v89_v49 = vld [vmem:[#allocation2 + $0x1f0] sm:$0xff] }
  0xd5   :  { %1077 = vmatmul.bf16.gmra.mxu1 %v185_v51  ;;  %1126 = vmatmul.bf16.gmra.mxu2 %v186_v52  ;;  %v1957_v62 = vadd.f32 %v1026_v37, %v978_v57  ;;  %v98_v51 = vld [vmem:[#allocation2 + $0x238] sm:$0xff] }
  0xd7   :  { %1175 = vmatmul.bf16.gmra.mxu3 %v187_v58  ;;  %1224 = vmatmul.bf16.gmra.mxu0 %v188_v59  ;;  %v203_v59 = vpack.c.bf16 %v95_v44, %v86_v43 }
  0xd8   :  { %v931_v63 = vpop.f32.mrf.mxu2 }
  0xd9   :  { %v932_v0 = vadd.f32 %v931_v63, %v883_v60  ;;  %v206_v63 = vpack.c.bf16 %v98_v51, %v89_v49  ;;  %v123_v49 = vld [vmem:[#allocation2 + $0x300] sm:$0xff]  ;;  %v132_v51 = vld [vmem:[#allocation2 + $0x348] sm:$0xff] }
  0xda   :  { %v980_v1 = vpop.f32.mrf.mxu3  ;;  %v884_v4 = vpop.f32.mrf.mxu1 }
  0xdb   :  { %v981_v5 = vadd.f32 %v980_v1, %v932_v0  ;;  %v885_v7 = vadd.f32 %v884_v4, %v835_v13 }
  0xdc   :  { %v1031_v8 = vpop.f32.mrf.mxu0 }
  0xdd   :  { %v1959_v16 = vadd.f32 %v1029_v61, %v981_v5  ;;  %v205_v61 = vpack.c.bf16 %v97_v48, %v88_v47  ;;  %v131_v47 = vld [vmem:[#allocation2 + $0x340] sm:$0xff] }
  0xe0   :  { %v933_v24 = vpop.f32.mrf.mxu2 }
  0xe1   :  { %v934_v25 = vadd.f32 %v933_v24, %v885_v7  ;;  %v106_v24 = vld [vmem:[#allocation2 + $0x278] sm:$0xff] }
  0xe2   :  { %v982_v26 = vpop.f32.mrf.mxu3  ;;  %v887_v29 = vpop.f32.mrf.mxu1 }
  0xe3   :  { %v983_v13 = vadd.f32 %v982_v26, %v934_v25  ;;  %v888_v32 = vadd.f32 %v887_v29, %v1931_v50  ;;  %v87_v50 = vld [vmem:[#allocation2 + $0x1e0] sm:$0xff] }
  0xe4   :  { %v1034_v33 = vpop.f32.mrf.mxu0  ;;  %v204_v57 = vpack.c.bf16 %v96_v46, %v87_v50  ;;  %v115_v25 = vld [vmem:[#allocation2 + $0x2c0] sm:$0xff]  ;;  %v122_v46 = vld [vmem:[#allocation2 + $0x2f8] sm:$0xff] }
  0xe5   :  { %1082 = vmatmul.bf16.gmra.mxu1 %v194_v27  ;;  %1131 = vmatmul.bf16.gmra.mxu2 %v195_v28  ;;  %v1962_v34 = vadd.f32 %v1031_v8, %v983_v13  ;;  %v107_v26 = vld [vmem:[#allocation2 + $0x280] sm:$0xff]  ;;  %v116_v27 = vld [vmem:[#allocation2 + $0x2c8] sm:$0xff] }
  0xe7   :  { %1180 = vmatmul.bf16.gmra.mxu3 %v196_v30  ;;  %1229 = vmatmul.bf16.gmra.mxu0 %v197_v31  ;;  %v212_v31 = vpack.c.bf16 %v113_v19, %v104_v18 }
  0xe8   :  { %v936_v35 = vpop.f32.mrf.mxu2 }
  0xe9   :  { %v937_v36 = vadd.f32 %v936_v35, %v888_v32  ;;  %v215_v35 = vpack.c.bf16 %v116_v27, %v107_v26  ;;  %v141_v26 = vld [vmem:[#allocation2 + $0x390] sm:$0xff]  ;;  %v150_v27 = vld [vmem:[#allocation2 + $0x3d8] sm:$0xff] }
  0xea   :  { %v985_v37 = vpop.f32.mrf.mxu3  ;;  %v889_v38 = vpop.f32.mrf.mxu1 }
  0xeb   :  { %v986_v39 = vadd.f32 %v985_v37, %v937_v36  ;;  %v890_v41 = vadd.f32 %v889_v38, %v1937_v56 }
  0xec   :  { %v1036_v42 = vpop.f32.mrf.mxu0 }
  0xed   :  { %v1965_v45 = vadd.f32 %v1034_v33, %v986_v39  ;;  %v214_v33 = vpack.c.bf16 %v115_v25, %v106_v24  ;;  %v149_v24 = vld [vmem:[#allocation2 + $0x3d0] sm:$0xff] }
  0xf0   :  { %v938_v52 = vpop.f32.mrf.mxu2 }
  0xf1   :  { %v939_v53 = vadd.f32 %v938_v52, %v890_v41  ;;  %v124_v52 = vld [vmem:[#allocation2 + $0x308] sm:$0xff] }
  0xf2   :  { %v987_v58 = vpop.f32.mrf.mxu3  ;;  %v892_v60 = vpop.f32.mrf.mxu1 }
  0xf3   :  { %v988_v56 = vadd.f32 %v987_v58, %v939_v53  ;;  %v893_v0 = vadd.f32 %v892_v60, %v1943_v6  ;;  %v105_v6 = vld [vmem:[#allocation2 + $0x270] sm:$0xff] }
  0xf4   :  { %v1039_v1 = vpop.f32.mrf.mxu0  ;;  %v213_v13 = vpack.c.bf16 %v114_v21, %v105_v6  ;;  %v133_v58 = vld [vmem:[#allocation2 + $0x350] sm:$0xff]  ;;  %v140_v21 = vld [vmem:[#allocation2 + $0x388] sm:$0xff] }
  0xf5   :  { %1087 = vmatmul.bf16.gmra.mxu1 %v203_v59  ;;  %1136 = vmatmul.bf16.gmra.mxu2 %v204_v57  ;;  %v1968_v4 = vadd.f32 %v1036_v42, %v988_v56  ;;  %v125_v59 = vld [vmem:[#allocation2 + $0x310] sm:$0xff]  ;;  %v134_v57 = vld [vmem:[#allocation2 + $0x358] sm:$0xff]  ;;  %v222_v56 = vpack.c.bf16 %v132_v51, %v123_v49 }
  0xf7   :  { %1185 = vmatmul.bf16.gmra.mxu3 %v205_v61  ;;  %1234 = vmatmul.bf16.gmra.mxu0 %v206_v63  ;;  %v221_v63 = vpack.c.bf16 %v131_v47, %v122_v46 }
  0xf8   :  { %v941_v5 = vpop.f32.mrf.mxu2 }
  0xf9   :  { %v942_v7 = vadd.f32 %v941_v5, %v893_v0  ;;  %v224_v5 = vpack.c.bf16 %v134_v57, %v125_v59  ;;  %v159_v59 = vld [vmem:[#allocation2 + $0x420] sm:$0xff]  ;;  %v168_v57 = vld [vmem:[#allocation2 + $0x468] sm:$0xff] }
  0xfa   :  { %v990_v8 = vpop.f32.mrf.mxu3  ;;  %v894_v14 = vpop.f32.mrf.mxu1 }
  0xfb   :  { %v991_v15 = vadd.f32 %v990_v8, %v942_v7  ;;  %v895_v17 = vadd.f32 %v894_v14, %v1949_v12 }
  0xfc   :  { %v1041_v9 = vpop.f32.mrf.mxu0 }
  0xfd   :  { %v1971_v20 = vadd.f32 %v1039_v1, %v991_v15  ;;  %v223_v1 = vpack.c.bf16 %v133_v58, %v124_v52  ;;  %v158_v52 = vld [vmem:[#allocation2 + $0x418] sm:$0xff] }
 0x100   :  { %v943_v28 = vpop.f32.mrf.mxu2 }
 0x101   :  { %v944_v29 = vadd.f32 %v943_v28, %v895_v17  ;;  %v142_v28 = vld [vmem:[#allocation2 + $0x398] sm:$0xff] }
 0x102   :  { %v992_v30 = vpop.f32.mrf.mxu3  ;;  %v897_v32 = vpop.f32.mrf.mxu1 }
 0x103   :  { %v993_v12 = vadd.f32 %v992_v30, %v944_v29  ;;  %v898_v38 = vadd.f32 %v897_v32, %v1933_v54  ;;  %v151_v30 = vld [vmem:[#allocation2 + $0x3e0] sm:$0xff] }
 0x104   :  { %v1044_v36 = vpop.f32.mrf.mxu0 }
 0x105   :  { %1092 = vmatmul.bf16.gmra.mxu1 %v212_v31  ;;  %1141 = vmatmul.bf16.gmra.mxu2 %v213_v13  ;;  %v1973_v37 = vadd.f32 %v1041_v9, %v993_v12  ;;  %v143_v31 = vld [vmem:[#allocation2 + $0x3a0] sm:$0xff]  ;;  %v152_v13 = vld [vmem:[#allocation2 + $0x3e8] sm:$0xff]  ;;  %v231_v12 = vpack.c.bf16 %v150_v27, %v141_v26 }
 0x107   :  { %1190 = vmatmul.bf16.gmra.mxu3 %v214_v33  ;;  %1239 = vmatmul.bf16.gmra.mxu0 %v215_v35  ;;  %v230_v35 = vpack.c.bf16 %v149_v24, %v140_v21 }
 0x108   :  { %v946_v39 = vpop.f32.mrf.mxu2 }
 0x109   :  { %v947_v41 = vadd.f32 %v946_v39, %v898_v38  ;;  %v232_v38 = vpack.c.bf16 %v151_v30, %v142_v28  ;;  %v233_v39 = vpack.c.bf16 %v152_v13, %v143_v31 }
 0x10a   :  { %v995_v42 = vpop.f32.mrf.mxu3  ;;  %v899_v43 = vpop.f32.mrf.mxu1 }
 0x10b   :  { %v996_v44 = vadd.f32 %v995_v42, %v947_v41  ;;  %v900_v53 = vadd.f32 %v899_v43, %v1939_v2 }
 0x10c   :  { %v1046_v50 = vpop.f32.mrf.mxu0 }
 0x10d   :  { %v1976_v48 = vadd.f32 %v1044_v36, %v996_v44 }
 0x110   :  { %v948_v60 = vpop.f32.mrf.mxu2 }
 0x111   :  { %v949_v54 = vadd.f32 %v948_v60, %v900_v53  ;;  %v167_v53 = vld [vmem:[#allocation2 + $0x460] sm:$0xff]  ;;  %v160_v60 = vld [vmem:[#allocation2 + $0x428] sm:$0xff] }
 0x112   :  { %v997_v61 = vpop.f32.mrf.mxu3  ;;  %v902_v0 = vpop.f32.mrf.mxu1 }
 0x113   :  { %v998_v7 = vadd.f32 %v997_v61, %v949_v54  ;;  %v903_v2 = vadd.f32 %v902_v0, %v1945_v10  ;;  %v169_v61 = vld [vmem:[#allocation2 + $0x470] sm:$0xff] }
 0x114   :  { %v1049_v8 = vpop.f32.mrf.mxu0 }
 0x115   :  { %1097 = vmatmul.bf16.gmra.mxu1 %v221_v63  ;;  %1146 = vmatmul.bf16.gmra.mxu2 %v222_v56  ;;  %v1979_v14 = vadd.f32 %v1046_v50, %v998_v7  ;;  %v161_v63 = vld [vmem:[#allocation2 + $0x430] sm:$0xff]  ;;  %v170_v56 = vld [vmem:[#allocation2 + $0x478] sm:$0xff]  ;;  %v240_v7 = vpack.c.bf16 %v168_v57, %v159_v59 }
 0x117   :  { %1195 = vmatmul.bf16.gmra.mxu3 %v223_v1  ;;  %1244 = vmatmul.bf16.gmra.mxu0 %v224_v5  ;;  %v239_v5 = vpack.c.bf16 %v167_v53, %v158_v52 }
 0x118   :  { %v951_v15 = vpop.f32.mrf.mxu2 }
 0x119   :  { %v952_v17 = vadd.f32 %v951_v15, %v903_v2  ;;  %v241_v2 = vpack.c.bf16 %v169_v61, %v160_v60  ;;  %v242_v15 = vpack.c.bf16 %v170_v56, %v161_v63 }
 0x11a   :  { %v1000_v9 = vpop.f32.mrf.mxu3  ;;  %v904_v18 = vpop.f32.mrf.mxu1 }
 0x11b   :  { %v1001_v19 = vadd.f32 %v1000_v9, %v952_v17  ;;  %v905_v29 = vadd.f32 %v904_v18, %v1951_v22 }
 0x11c   :  { %v1051_v6 = vpop.f32.mrf.mxu0 }
 0x11d   :  { %v1982_v25 = vadd.f32 %v1049_v8, %v1001_v19 }
 0x120   :  { %v953_v32 = vpop.f32.mrf.mxu2 }
 0x121   :  { %v954_v10 = vadd.f32 %v953_v32, %v905_v29 }
 0x122   :  { %v1002_v33 = vpop.f32.mrf.mxu3  ;;  %v907_v36 = vpop.f32.mrf.mxu1 }
 0x123   :  { %v1003_v41 = vadd.f32 %v1002_v33, %v954_v10  ;;  %v908_v22 = vadd.f32 %v907_v36, %v1935_v55 }
 0x124   :  { %v1054_v42 = vpop.f32.mrf.mxu0 }
 0x125   :  { %1102 = vmatmul.bf16.gmra.mxu1 %v230_v35  ;;  %1151 = vmatmul.bf16.gmra.mxu2 %v231_v12  ;;  %v1985_v43 = vadd.f32 %v1051_v6, %v1003_v41 }
 0x127   :  { %1200 = vmatmul.bf16.gmra.mxu3 %v232_v38  ;;  %1249 = vmatmul.bf16.gmra.mxu0 %v233_v39 }
 0x128   :  { %v956_v44 = vpop.f32.mrf.mxu2 }
 0x129   :  { %v957_v50 = vadd.f32 %v956_v44, %v908_v22 }
 0x12a   :  { %v1005_v46 = vpop.f32.mrf.mxu3  ;;  %v909_v47 = vpop.f32.mrf.mxu1 }
 0x12b   :  { %v1006_v49 = vadd.f32 %v1005_v46, %v957_v50  ;;  %v910_v54 = vadd.f32 %v909_v47, %v1941_v3 }
 0x12c   :  { %v1056_v51 = vpop.f32.mrf.mxu0 }
 0x12d   :  { %v1988_v58 = vadd.f32 %v1054_v42, %v1006_v49 }
 0x130   :  { %v958_v0 = vpop.f32.mrf.mxu2 }
 0x131   :  { %v959_v55 = vadd.f32 %v958_v0, %v910_v54 }
 0x132   :  { %v1007_v1 = vpop.f32.mrf.mxu3  ;;  %v912_v8 = vpop.f32.mrf.mxu1 }
 0x133   :  { %v1008_v17 = vadd.f32 %v1007_v1, %v959_v55  ;;  %v913_v3 = vadd.f32 %v912_v8, %v1947_v11 }
 0x134   :  { %v1059_v9 = vpop.f32.mrf.mxu0 }
 0x135   :  { %1107 = vmatmul.bf16.gmra.mxu1 %v239_v5  ;;  %1156 = vmatmul.bf16.gmra.mxu2 %v240_v7  ;;  %v1991_v18 = vadd.f32 %v1056_v51, %v1008_v17 }
 0x137   :  { %1205 = vmatmul.bf16.gmra.mxu3 %v241_v2  ;;  %1254 = vmatmul.bf16.gmra.mxu0 %v242_v15 }
 0x138   :  { %v961_v19 = vpop.f32.mrf.mxu2 }
 0x139   :  { %v962_v6 = vadd.f32 %v961_v19, %v913_v3 }
 0x13a   :  { %v1010_v21 = vpop.f32.mrf.mxu3  ;;  %v914_v24 = vpop.f32.mrf.mxu1 }
 0x13b   :  { %v1011_v26 = vadd.f32 %v1010_v21, %v962_v6  ;;  %v915_v29 = vadd.f32 %v914_v24, %v1953_v23 }
 0x13c   :  { %v1061_v27 = vpop.f32.mrf.mxu0 }
 0x13d   :  { %v1994_v28 = vadd.f32 %v1059_v9, %v1011_v26 }
 0x140   :  { %v963_v30 = vpop.f32.mrf.mxu2 }
 0x141   :  { %v964_v31 = vadd.f32 %v963_v30, %v915_v29 }
 0x142   :  { %v1012_v13 = vpop.f32.mrf.mxu3  ;;  %v1073_v32 = vpop.f32.mrf.mxu1 }
 0x143   :  { %v1013_v10 = vadd.f32 %v1012_v13, %v964_v31  ;;  %v1074_v11 = vadd.f32 %v1073_v32, %v1955_v40 }
 0x144   :  { %v1220_v33 = vpop.f32.mrf.mxu0 }
 0x145   :  { %v1997_v35 = vadd.f32 %v1061_v27, %v1013_v10 }
 0x148   :  { %v1122_v12 = vpop.f32.mrf.mxu2 }
 0x149   :  { %v1123_v36 = vadd.f32 %v1122_v12, %v1074_v11 }
 0x14a   :  { %v1171_v38 = vpop.f32.mrf.mxu3  ;;  %v1075_v39 = vpop.f32.mrf.mxu1 }
 0x14b   :  { %v1172_v41 = vadd.f32 %v1171_v38, %v1123_v36  ;;  %v1076_v23 = vadd.f32 %v1075_v39, %v1957_v62 }
 0x14c   :  { %v1222_v42 = vpop.f32.mrf.mxu0 }
 0x14d   :  { %v1221_v22 = vadd.f32 %v1220_v33, %v1172_v41 }
 0x14f   :  { %1260 = vst [vmem:[%s2065_s2] sm:$0xff] %v1221_v22 }
 0x150   :  { %v1124_v44 = vpop.f32.mrf.mxu2 }
 0x151   :  { %v1125_v50 = vadd.f32 %v1124_v44, %v1076_v23 }
 0x152   :  { %v1173_v46 = vpop.f32.mrf.mxu3  ;;  %v1078_v47 = vpop.f32.mrf.mxu1 }
 0x153   :  { %v1174_v49 = vadd.f32 %v1173_v46, %v1125_v50  ;;  %v1079_v52 = vadd.f32 %v1078_v47, %v1959_v16 }
 0x154   :  { %v1225_v51 = vpop.f32.mrf.mxu0 }
 0x155   :  { %v1223_v40 = vadd.f32 %v1222_v42, %v1174_v49 }
 0x157   :  { %1261 = vst [vmem:[%s2065_s2 + $0x8] sm:$0xff] %v1223_v40 }
 0x158   :  { %v1127_v53 = vpop.f32.mrf.mxu2 }
 0x159   :  { %v1128_v59 = vadd.f32 %v1127_v53, %v1079_v52 }
 0x15a   :  { %v1176_v57 = vpop.f32.mrf.mxu3  ;;  %v1080_v60 = vpop.f32.mrf.mxu1 }
 0x15b   :  { %v1177_v54 = vadd.f32 %v1176_v57, %v1128_v59  ;;  %v1081_v63 = vadd.f32 %v1080_v60, %v1962_v34 }
 0x15c   :  { %v1227_v61 = vpop.f32.mrf.mxu0 }
 0x15d   :  { %v1226_v62 = vadd.f32 %v1225_v51, %v1177_v54 }
 0x15f   :  { %1262 = vst [vmem:[%s2065_s2 + $0x10] sm:$0xff] %v1226_v62 }
 0x160   :  { %v1129_v56 = vpop.f32.mrf.mxu2 }
 0x161   :  { %v1130_v0 = vadd.f32 %v1129_v56, %v1081_v63 }
 0x162   :  { %v1178_v55 = vpop.f32.mrf.mxu3  ;;  %v1083_v1 = vpop.f32.mrf.mxu1 }
 0x163   :  { %v1179_v5 = vadd.f32 %v1178_v55, %v1130_v0  ;;  %v1084_v8 = vadd.f32 %v1083_v1, %v1965_v45 }
 0x164   :  { %v1230_v7 = vpop.f32.mrf.mxu0 }
 0x165   :  { %v1228_v16 = vadd.f32 %v1227_v61, %v1179_v5 }
 0x167   :  { %1263 = vst [vmem:[%s2065_s2 + $0x18] sm:$0xff] %v1228_v16 }
 0x168   :  { %v1132_v2 = vpop.f32.mrf.mxu2 }
 0x169   :  { %v1133_v15 = vadd.f32 %v1132_v2, %v1084_v8 }
 0x16a   :  { %v1181_v17 = vpop.f32.mrf.mxu3  ;;  %v1085_v9 = vpop.f32.mrf.mxu1 }
 0x16b   :  { %v1182_v3 = vadd.f32 %v1181_v17, %v1133_v15  ;;  %v1086_v6 = vadd.f32 %v1085_v9, %v1968_v4 }
 0x16c   :  { %v1232_v19 = vpop.f32.mrf.mxu0 }
 0x16d   :  { %v1231_v34 = vadd.f32 %v1230_v7, %v1182_v3 }
 0x16f   :  { %1264 = vst [vmem:[%s2065_s2 + $0x20] sm:$0xff] %v1231_v34 }
 0x170   :  { %v1134_v21 = vpop.f32.mrf.mxu2 }
 0x171   :  { %v1135_v24 = vadd.f32 %v1134_v21, %v1086_v6 }
 0x172   :  { %v1183_v26 = vpop.f32.mrf.mxu3  ;;  %v1088_v27 = vpop.f32.mrf.mxu1 }
 0x173   :  { %v1184_v29 = vadd.f32 %v1183_v26, %v1135_v24  ;;  %v1089_v31 = vadd.f32 %v1088_v27, %v1971_v20 }
 0x174   :  { %v1235_v30 = vpop.f32.mrf.mxu0 }
 0x175   :  { %v1233_v45 = vadd.f32 %v1232_v19, %v1184_v29 }
 0x177   :  { %1265 = vst [vmem:[%s2065_s2 + $0x28] sm:$0xff] %v1233_v45 }
 0x178   :  { %v1137_v13 = vpop.f32.mrf.mxu2 }
 0x179   :  { %v1138_v32 = vadd.f32 %v1137_v13, %v1089_v31 }
 0x17a   :  { %v1186_v10 = vpop.f32.mrf.mxu3  ;;  %v1090_v33 = vpop.f32.mrf.mxu1 }
 0x17b   :  { %v1187_v11 = vadd.f32 %v1186_v10, %v1138_v32  ;;  %v1091_v36 = vadd.f32 %v1090_v33, %v1973_v37 }
 0x17c   :  { %v1237_v12 = vpop.f32.mrf.mxu0 }
 0x17d   :  { %v1236_v4 = vadd.f32 %v1235_v30, %v1187_v11 }
 0x17f   :  { %1266 = vst [vmem:[%s2065_s2 + $0x30] sm:$0xff] %v1236_v4 }
 0x180   :  { %v1139_v38 = vpop.f32.mrf.mxu2 }
 0x181   :  { %v1140_v39 = vadd.f32 %v1139_v38, %v1091_v36 }
 0x182   :  { %v1188_v41 = vpop.f32.mrf.mxu3  ;;  %v1093_v42 = vpop.f32.mrf.mxu1 }
 0x183   :  { %v1189_v22 = vadd.f32 %v1188_v41, %v1140_v39  ;;  %v1094_v44 = vadd.f32 %v1093_v42, %v1976_v48 }
 0x184   :  { %v1240_v23 = vpop.f32.mrf.mxu0 }
 0x185   :  { %v1238_v20 = vadd.f32 %v1237_v12, %v1189_v22 }
 0x187   :  { %1267 = vst [vmem:[%s2065_s2 + $0x38] sm:$0xff] %v1238_v20 }
 0x188   :  { %v1142_v50 = vpop.f32.mrf.mxu2 }
 0x189   :  { %v1143_v46 = vadd.f32 %v1142_v50, %v1094_v44 }
 0x18a   :  { %v1191_v47 = vpop.f32.mrf.mxu3  ;;  %v1095_v49 = vpop.f32.mrf.mxu1 }
 0x18b   :  { %v1192_v51 = vadd.f32 %v1191_v47, %v1143_v46  ;;  %v1096_v52 = vadd.f32 %v1095_v49, %v1979_v14 }
 0x18c   :  { %v1242_v40 = vpop.f32.mrf.mxu0 }
 0x18d   :  { %v1241_v37 = vadd.f32 %v1240_v23, %v1192_v51 }
 0x18f   :  { %1268 = vst [vmem:[%s2065_s2 + $0x40] sm:$0xff] %v1241_v37 }
 0x190   :  { %v1144_v53 = vpop.f32.mrf.mxu2 }
 0x191   :  { %v1145_v59 = vadd.f32 %v1144_v53, %v1096_v52 }
 0x192   :  { %v1193_v57 = vpop.f32.mrf.mxu3  ;;  %v1098_v60 = vpop.f32.mrf.mxu1 }
 0x193   :  { %v1194_v54 = vadd.f32 %v1193_v57, %v1145_v59  ;;  %v1099_v62 = vadd.f32 %v1098_v60, %v1982_v25 }
 0x194   :  { %v1245_v61 = vpop.f32.mrf.mxu0 }
 0x195   :  { %v1243_v48 = vadd.f32 %v1242_v40, %v1194_v54 }
 0x197   :  { %1269 = vst [vmem:[%s2065_s2 + $0x48] sm:$0xff] %v1243_v48 }
 0x198   :  { %v1147_v63 = vpop.f32.mrf.mxu2 }
 0x199   :  { %v1148_v56 = vadd.f32 %v1147_v63, %v1099_v62 }
 0x19a   :  { %v1196_v0 = vpop.f32.mrf.mxu3  ;;  %v1100_v55 = vpop.f32.mrf.mxu1 }
 0x19b   :  { %v1197_v1 = vadd.f32 %v1196_v0, %v1148_v56  ;;  %v1101_v7 = vadd.f32 %v1100_v55, %v1985_v43 }
 0x19c   :  { %v1247_v5 = vpop.f32.mrf.mxu0 }
 0x19d   :  { %v1246_v14 = vadd.f32 %v1245_v61, %v1197_v1 }
 0x19f   :  { %1270 = vst [vmem:[%s2065_s2 + $0x50] sm:$0xff] %v1246_v14 }
 0x1a0   :  { %v1149_v16 = vpop.f32.mrf.mxu2 }
 0x1a1   :  { %v1150_v8 = vadd.f32 %v1149_v16, %v1101_v7 }
 0x1a2   :  { %v1198_v2 = vpop.f32.mrf.mxu3  ;;  %v1103_v15 = vpop.f32.mrf.mxu1 }
 0x1a3   :  { %v1199_v17 = vadd.f32 %v1198_v2, %v1150_v8  ;;  %v1104_v3 = vadd.f32 %v1103_v15, %v1988_v58 }
 0x1a4   :  { %v1250_v25 = vpop.f32.mrf.mxu0 }
 0x1a5   :  { %v1248_v9 = vadd.f32 %v1247_v5, %v1199_v17 }
 0x1a7   :  { %1271 = vst [vmem:[%s2065_s2 + $0x58] sm:$0xff] %v1248_v9 }
 0x1a8   :  { %v1152_v19 = vpop.f32.mrf.mxu2 }
 0x1a9   :  { %v1153_v34 = vadd.f32 %v1152_v19, %v1104_v3 }
 0x1aa   :  { %v1201_v6 = vpop.f32.mrf.mxu3  ;;  %v1105_v21 = vpop.f32.mrf.mxu1 }
 0x1ab   :  { %v1202_v24 = vadd.f32 %v1201_v6, %v1153_v34  ;;  %v1106_v43 = vadd.f32 %v1105_v21, %v1991_v18 }
 0x1ac   :  { %v1252_v27 = vpop.f32.mrf.mxu0 }
 0x1ad   :  { %v1251_v26 = vadd.f32 %v1250_v25, %v1202_v24 }
 0x1af   :  { %1272 = vst [vmem:[%s2065_s2 + $0x60] sm:$0xff] %v1251_v26 }
 0x1b0   :  { %v1154_v29 = vpop.f32.mrf.mxu2 }
 0x1b1   :  { %v1155_v30 = vadd.f32 %v1154_v29, %v1106_v43 }
 0x1b2   :  { %v1203_v45 = vpop.f32.mrf.mxu3  ;;  %v1108_v31 = vpop.f32.mrf.mxu1 }
 0x1b3   :  { %v1204_v13 = vadd.f32 %v1203_v45, %v1155_v30  ;;  %v1109_v58 = vadd.f32 %v1108_v31, %v1994_v28 }
 0x1b4   :  { %v1255_v12 = vpop.f32.mrf.mxu0 }
 0x1b5   :  { %v1253_v32 = vadd.f32 %v1252_v27, %v1204_v13 }
 0x1b7   :  { %1273 = vst [vmem:[%s2065_s2 + $0x68] sm:$0xff] %v1253_v32 }
 0x1b8   :  { %v1157_v10 = vpop.f32.mrf.mxu2 }
 0x1b9   :  { %v1158_v33 = vadd.f32 %v1157_v10, %v1109_v58 }
 0x1ba   :  { %v1206_v11 = vpop.f32.mrf.mxu3  ;;  %v1110_v36 = vpop.f32.mrf.mxu1 }
 0x1bb   :  { %v1207_v4 = vadd.f32 %v1206_v11, %v1158_v33  ;;  %v1111_v38 = vadd.f32 %v1110_v36, %v1997_v35 }
 0x1bc   :  { %v1257_v23 = vpop.f32.mrf.mxu0 }
 0x1bd   :  { %v1256_v18 = vadd.f32 %v1255_v12, %v1207_v4 }
 0x1bf   :  { %1274 = vst [vmem:[%s2065_s2 + $0x70] sm:$0xff] %v1256_v18 }
 0x1c0   :  { %v1159_v39 = vpop.f32.mrf.mxu2 }
 0x1c1   :  { %v1160_v41 = vadd.f32 %v1159_v39, %v1111_v38 }
 0x1c2   :  { %v1208_v42 = vpop.f32.mrf.mxu3 }
 0x1c3   :  { %v1209_v22 = vadd.f32 %v1208_v42, %v1160_v41 }
 0x1c5   :  { %v1258_v20 = vadd.f32 %v1257_v23, %v1209_v22 }
 0x1c7   :  { %1275 = vst [vmem:[%s2065_s2 + $0x78] sm:$0xff] %v1258_v20 }
 0x1c8   :  { %1280 = vsyncpa [#allocation3], 1 }

// kernel: forward.134
= control target key start
LH: loop header
LB: loop body
LE: loop exit
PB: predicated region body
PF: predicated region fallthrough
CT: control target
= control target key end

     0   :  { %s810_s1 = inlined_call_operand.vmem [shape: bf16[256,128], index: 1, kind: input, shape index: {}]   ;;  %s811_s2 = inlined_call_operand.vmem [shape: f32[1,256], index: 2, kind: input, shape index: {}]   ;;  %s812_s0 = inlined_call_operand.vmem [shape: f32[128,256], index: 0, kind: input, shape index: {}]   ;;  %s813_s3 = inlined_call_operand.vmem [shape: f32[1,256], index: 3, kind: input, shape index: {}]   ;;  %s814_s4 = inlined_call_operand.vmem [shape: f32[128,128], index: 4, kind: output, shape index: {}]  }
   0x1   :  { %v490_v0 = vld [vmem:[%s810_s1 + $0x38] sm:$0xff]  ;;  %v489_v2 = vld [vmem:[%s810_s1 + $0x30] sm:$0xff]  ;;  %v488_v4 = vld [vmem:[%s810_s1 + $0x28] sm:$0xff] }
   0x2   :  { %v498_v1 = vld [vmem:[%s810_s1 + $0x78] sm:$0xff]  ;;  %301 = vmatpush.bf16.msra.mxu0 %v490_v0  ;;  %499 = vmatpush.bf16.msra.mxu2 %v490_v0  ;;  %v497_v3 = vld [vmem:[%s810_s1 + $0x70] sm:$0xff]  ;;  %v496_v5 = vld [vmem:[%s810_s1 + $0x68] sm:$0xff] }
   0x3   :  { %350 = vmatpush.bf16.msra.mxu1 %v498_v1  ;;  %507 = vmatpush.bf16.msra.mxu3 %v498_v1  ;;  %v49_v6 = vld [vmem:[%s811_s2] sm:$0x3]  ;;  %v486_v9 = vld [vmem:[%s810_s1 + $0x18] sm:$0xff]  ;;  %v19_v13 = vld [vmem:[%s812_s0 + $0x10] sm:$0xff] }
   0x4   :  { %v487_v7 = vld [vmem:[%s810_s1 + $0x20] sm:$0xff]  ;;  %v570_v10 = vperm.slane %v49_v6, 0  ;;  %v494_v11 = vld [vmem:[%s810_s1 + $0x58] sm:$0xff]  ;;  %v584_v15 = vperm.slane %v49_v6, 1  ;;  %v35_v17 = vld [vmem:[%s812_s0 + $0x90] sm:$0xff] }
   0x5   :  { %v495_v8 = vld [vmem:[%s810_s1 + $0x60] sm:$0xff]  ;;  %v18_v18 = vld [vmem:[%s812_s0 + $0x8] sm:$0xff]  ;;  %v20_v19 = vld [vmem:[%s812_s0 + $0x18] sm:$0xff] }
   0x6   :  { %302 = vmatpush.bf16.msra.mxu0 %v489_v2  ;;  %500 = vmatpush.bf16.msra.mxu2 %v489_v2  ;;  %v17_v12 = vld [vmem:[%s812_s0] sm:$0xff]  ;;  %v34_v20 = vld [vmem:[%s812_s0 + $0x88] sm:$0xff]  ;;  %v36_v21 = vld [vmem:[%s812_s0 + $0x98] sm:$0xff]  ;;  %v57_v25 = vmul.f32 %v570_v10, %v19_v13  ;;  %v73_v27 = vmul.f32 %v570_v10, %v35_v17  ;;  %v56_v28 = vmul.f32 %v584_v15, %v18_v18 }
   0x7   :  { %351 = vmatpush.bf16.msra.mxu1 %v497_v3  ;;  %508 = vmatpush.bf16.msra.mxu3 %v497_v3  ;;  %v87_v14 = vld [vmem:[%s813_s3] sm:$0x3]  ;;  %v55_v22 = vmul.f32 %v570_v10, %v17_v12  ;;  %v485_v29 = vld [vmem:[%s810_s1 + $0x10] sm:$0xff]  ;;  %v58_v30 = vmul.f32 %v584_v15, %v20_v19  ;;  %v72_v31 = vmul.f32 %v584_v15, %v34_v20  ;;  %v484_v39 = vld [vmem:[%s810_s1 + $0x8] sm:$0xff] }
   0x8   :  { %v33_v16 = vld [vmem:[%s812_s0 + $0x80] sm:$0xff]  ;;  %v605_v23 = vperm.slane %v87_v14, 0  ;;  %v607_v24 = vperm.slane %v87_v14, 1  ;;  %v74_v32 = vmul.f32 %v584_v15, %v36_v21  ;;  %v493_v33 = vld [vmem:[%s810_s1 + $0x50] sm:$0xff]  ;;  %v492_v43 = vld [vmem:[%s810_s1 + $0x48] sm:$0xff] }
   0x9   :  { %v71_v26 = vmul.f32 %v570_v10, %v33_v16  ;;  %v483_v48 = vld [vmem:[%s810_s1] sm:$0xff]  ;;  %v23_v57 = vld [vmem:[%s812_s0 + $0x30] sm:$0xff]  ;;  %v22_v62 = vld [vmem:[%s812_s0 + $0x28] sm:$0xff] }
   0xa   :  { %303 = vmatpush.bf16.msra.mxu0 %v488_v4  ;;  %501 = vmatpush.bf16.msra.mxu2 %v488_v4  ;;  %v93_v34 = vadd.f32 %v605_v23, %v55_v22  ;;  %v95_v35 = vadd.f32 %v605_v23, %v57_v25  ;;  %v111_v37 = vadd.f32 %v605_v23, %v73_v27  ;;  %v491_v53 = vld [vmem:[%s810_s1 + $0x40] sm:$0xff]  ;;  %v39_v61 = vld [vmem:[%s812_s0 + $0xb0] sm:$0xff]  ;;  %v24_v63 = vld [vmem:[%s812_s0 + $0x38] sm:$0xff] }
   0xb   :  { %352 = vmatpush.bf16.msra.mxu1 %v496_v5  ;;  %509 = vmatpush.bf16.msra.mxu3 %v496_v5  ;;  %v109_v36 = vadd.f32 %v605_v23, %v71_v26  ;;  %v94_v38 = vadd.f32 %v607_v24, %v56_v28  ;;  %v96_v40 = vadd.f32 %v607_v24, %v58_v30  ;;  %v21_v56 = vld [vmem:[%s812_s0 + $0x20] sm:$0xff]  ;;  %v38_v0 = vld [vmem:[%s812_s0 + $0xa8] sm:$0xff]  ;;  %v40_v1 = vld [vmem:[%s812_s0 + $0xb8] sm:$0xff] }
   0xc   :  { %v110_v41 = vadd.f32 %v607_v24, %v72_v31  ;;  %v112_v42 = vadd.f32 %v607_v24, %v74_v32  ;;  %v125_v44 = vmax.f32 %v93_v34, 0.0  ;;  %v127_v45 = vmax.f32 %v95_v35, 0.0  ;;  %v37_v60 = vld [vmem:[%s812_s0 + $0xa0] sm:$0xff] }
   0xd   :  { %v141_v46 = vmax.f32 %v109_v36, 0.0  ;;  %v143_v47 = vmax.f32 %v111_v37, 0.0  ;;  %v126_v49 = vmax.f32 %v94_v38, 0.0  ;;  %v128_v50 = vmax.f32 %v96_v40, 0.0  ;;  %v25_v32 = vld [vmem:[%s812_s0 + $0x40] sm:$0xff]  ;;  %v43_v37 = vld [vmem:[%s812_s0 + $0xd0] sm:$0xff] }
   0xe   :  { %304 = vmatpush.bf16.msra.mxu0 %v487_v7  ;;  %502 = vmatpush.bf16.msra.mxu2 %v487_v7  ;;  %v142_v51 = vmax.f32 %v110_v41, 0.0  ;;  %v144_v52 = vmax.f32 %v112_v42, 0.0  ;;  %v157_v54 = vpack.c.bf16 %v127_v45, %v125_v44  ;;  %v59_v2 = vmul.f32 %v570_v10, %v21_v56  ;;  %v41_v36 = vld [vmem:[%s812_s0 + $0xc0] sm:$0xff]  ;;  %v26_v38 = vld [vmem:[%s812_s0 + $0x48] sm:$0xff]  ;;  %v44_v41 = vld [vmem:[%s812_s0 + $0xd8] sm:$0xff] }
   0xf   :  { %353 = vmatpush.bf16.msra.mxu1 %v495_v8  ;;  %510 = vmatpush.bf16.msra.mxu3 %v495_v8  ;;  %v165_v55 = vpack.c.bf16 %v143_v47, %v141_v46  ;;  %v158_v58 = vpack.c.bf16 %v128_v50, %v126_v49  ;;  %v61_v3 = vmul.f32 %v570_v10, %v23_v57  ;;  %v42_v40 = vld [vmem:[%s812_s0 + $0xc8] sm:$0xff] }
  0x10   :  { %v166_v59 = vpack.c.bf16 %v144_v52, %v142_v51  ;;  %v75_v4 = vmul.f32 %v570_v10, %v37_v60  ;;  %v77_v5 = vmul.f32 %v570_v10, %v39_v61  ;;  %v60_v6 = vmul.f32 %v584_v15, %v22_v62 }
  0x11   :  { %v62_v7 = vmul.f32 %v584_v15, %v24_v63  ;;  %v76_v8 = vmul.f32 %v584_v15, %v38_v0  ;;  %v99_v12 = vadd.f32 %v605_v23, %v61_v3  ;;  %v63_v42 = vmul.f32 %v570_v10, %v25_v32 }
  0x12   :  { %305 = vmatpush.bf16.msra.mxu0 %v486_v9  ;;  %503 = vmatpush.bf16.msra.mxu2 %v486_v9  ;;  %v78_v9 = vmul.f32 %v584_v15, %v40_v1  ;;  %v113_v13 = vadd.f32 %v605_v23, %v75_v4  ;;  %v115_v14 = vadd.f32 %v605_v23, %v77_v5  ;;  %v29_v4 = vld [vmem:[%s812_s0 + $0x60] sm:$0xff]  ;;  %v31_v5 = vld [vmem:[%s812_s0 + $0x70] sm:$0xff] }
  0x13   :  { %354 = vmatpush.bf16.msra.mxu1 %v494_v11  ;;  %511 = vmatpush.bf16.msra.mxu3 %v494_v11  ;;  %v97_v11 = vadd.f32 %v605_v23, %v59_v2  ;;  %v98_v16 = vadd.f32 %v607_v24, %v60_v6  ;;  %v100_v17 = vadd.f32 %v607_v24, %v62_v7  ;;  %v131_v21 = vmax.f32 %v99_v12, 0.0  ;;  %v32_v12 = vld [vmem:[%s812_s0 + $0x78] sm:$0xff] }
  0x14   :  { %v114_v18 = vadd.f32 %v607_v24, %v76_v8  ;;  %v116_v19 = vadd.f32 %v607_v24, %v78_v9  ;;  %v145_v22 = vmax.f32 %v113_v13, 0.0  ;;  %v147_v25 = vmax.f32 %v115_v14, 0.0  ;;  %v45_v8 = vld [vmem:[%s812_s0 + $0xe0] sm:$0xff]  ;;  %v47_v9 = vld [vmem:[%s812_s0 + $0xf0] sm:$0xff]  ;;  %v46_v13 = vld [vmem:[%s812_s0 + $0xe8] sm:$0xff] }
  0x15   :  { %v129_v20 = vmax.f32 %v97_v11, 0.0  ;;  %v130_v26 = vmax.f32 %v98_v16, 0.0  ;;  %v132_v27 = vmax.f32 %v100_v17, 0.0  ;;  %v79_v44 = vmul.f32 %v570_v10, %v41_v36  ;;  %v30_v11 = vld [vmem:[%s812_s0 + $0x68] sm:$0xff]  ;;  %v48_v14 = vld [vmem:[%s812_s0 + $0xf8] sm:$0xff] }
  0x16   :  { %306 = vmatpush.bf16.msra.mxu0 %v485_v29  ;;  %504 = vmatpush.bf16.msra.mxu2 %v485_v29  ;;  %v146_v28 = vmax.f32 %v114_v18, 0.0  ;;  %v148_v29 = vmax.f32 %v116_v19, 0.0  ;;  %v167_v31 = vpack.c.bf16 %v147_v25, %v145_v22  ;;  %v81_v45 = vmul.f32 %v570_v10, %v43_v37 }
  0x17   :  { %355 = vmatpush.bf16.msra.mxu1 %v493_v33  ;;  %512 = vmatpush.bf16.msra.mxu3 %v493_v33  ;;  %v159_v30 = vpack.c.bf16 %v131_v21, %v129_v20  ;;  %v27_v33 = vld [vmem:[%s812_s0 + $0x50] sm:$0xff]  ;;  %v160_v34 = vpack.c.bf16 %v132_v27, %v130_v26  ;;  %v64_v46 = vmul.f32 %v584_v15, %v26_v38 }
  0x18   :  { %v168_v35 = vpack.c.bf16 %v148_v29, %v146_v28  ;;  %v82_v49 = vmul.f32 %v584_v15, %v44_v41  ;;  %v101_v50 = vadd.f32 %v605_v23, %v63_v42  ;;  %v117_v52 = vadd.f32 %v605_v23, %v79_v44 }
  0x19   :  { %v67_v16 = vmul.f32 %v570_v10, %v29_v4  ;;  %v69_v17 = vmul.f32 %v570_v10, %v31_v5  ;;  %v83_v18 = vmul.f32 %v570_v10, %v45_v8  ;;  %v85_v19 = vmul.f32 %v570_v10, %v47_v9 }
  0x1a   :  { %307 = vmatpush.bf16.msra.mxu0 %v484_v39  ;;  %505 = vmatpush.bf16.msra.mxu2 %v484_v39  ;;  %v28_v39 = vld [vmem:[%s812_s0 + $0x58] sm:$0xff]  ;;  %v120_v57 = vadd.f32 %v607_v24, %v82_v49  ;;  %v149_v60 = vmax.f32 %v117_v52, 0.0  ;;  %v68_v20 = vmul.f32 %v584_v15, %v30_v11  ;;  %v70_v21 = vmul.f32 %v584_v15, %v32_v12 }
  0x1b   :  { %356 = vmatpush.bf16.msra.mxu1 %v492_v43  ;;  %513 = vmatpush.bf16.msra.mxu3 %v492_v43  ;;  %v65_v43 = vmul.f32 %v570_v10, %v27_v33  ;;  %v66_v47 = vmul.f32 %v584_v15, %v28_v39  ;;  %v84_v22 = vmul.f32 %v584_v15, %v46_v13 }
  0x1c   :  { %v152_v1 = vmax.f32 %v120_v57, 0.0  ;;  %v86_v25 = vmul.f32 %v584_v15, %v48_v14  ;;  %v105_v26 = vadd.f32 %v605_v23, %v67_v16  ;;  %v107_v27 = vadd.f32 %v605_v23, %v69_v17 }
  0x1d   :  { %v103_v51 = vadd.f32 %v605_v23, %v65_v43  ;;  %v121_v28 = vadd.f32 %v605_v23, %v83_v18  ;;  %v123_v29 = vadd.f32 %v605_v23, %v85_v19  ;;  %v106_v10 = vadd.f32 %v607_v24, %v68_v20 }
  0x1e   :  { %308 = vmatpush.bf16.msra.mxu0 %v483_v48  ;;  %506 = vmatpush.bf16.msra.mxu2 %v483_v48  ;;  %v80_v48 = vmul.f32 %v584_v15, %v42_v40  ;;  %v124_v32 = vadd.f32 %v607_v24, %v86_v25  ;;  %v137_v33 = vmax.f32 %v105_v26, 0.0 }
  0x1f   :  { %357 = vmatpush.bf16.msra.mxu1 %v491_v53  ;;  %514 = vmatpush.bf16.msra.mxu3 %v491_v53  ;;  %v119_v53 = vadd.f32 %v605_v23, %v81_v45  ;;  %v155_v15 = vmax.f32 %v123_v29, 0.0  ;;  %v138_v36 = vmax.f32 %v106_v10, 0.0 }
  0x20   :  { %v118_v56 = vadd.f32 %v607_v24, %v80_v48  ;;  %v156_v39 = vmax.f32 %v124_v32, 0.0 }
  0x21   :  { %309 = vmatmul.bf16.vlgmr.msra.gmra.mxu0 %v157_v54  ;;  %329 = vmatmul.bf16.vlgmr.msra.gmra.mxu2 %v165_v55  ;;  %v102_v54 = vadd.f32 %v607_v24, %v64_v46  ;;  %v104_v55 = vadd.f32 %v607_v24, %v66_v47  ;;  %v151_v61 = vmax.f32 %v119_v53, 0.0 }
  0x22   :  { %358 = vmatmul.bf16.vlgmr.msra.gmra.mxu1 %v158_v58  ;;  %378 = vmatmul.bf16.vlgmr.msra.gmra.mxu3 %v166_v59  ;;  %v133_v58 = vmax.f32 %v101_v50, 0.0  ;;  %v135_v59 = vmax.f32 %v103_v51, 0.0  ;;  %v150_v0 = vmax.f32 %v118_v56, 0.0 }
  0x23   :  { %v134_v62 = vmax.f32 %v102_v54, 0.0  ;;  %v136_v63 = vmax.f32 %v104_v55, 0.0  ;;  %v169_v3 = vpack.c.bf16 %v151_v61, %v149_v60 }
  0x24   :  { %v161_v2 = vpack.c.bf16 %v135_v59, %v133_v58  ;;  %v170_v7 = vpack.c.bf16 %v152_v1, %v150_v0 }
  0x25   :  { %v162_v6 = vpack.c.bf16 %v136_v63, %v134_v62 }
  0x31   :  { %314 = vmatmul.bf16.gmra.mxu0 %v159_v30  ;;  %334 = vmatmul.bf16.gmra.mxu2 %v167_v31  ;;  %v108_v30 = vadd.f32 %v607_v24, %v70_v21  ;;  %v122_v31 = vadd.f32 %v607_v24, %v84_v22 }
  0x32   :  { %363 = vmatmul.bf16.gmra.mxu1 %v160_v34  ;;  %383 = vmatmul.bf16.gmra.mxu3 %v168_v35  ;;  %v139_v34 = vmax.f32 %v107_v27, 0.0  ;;  %v153_v35 = vmax.f32 %v121_v28, 0.0 }
  0x33   :  { %v140_v37 = vmax.f32 %v108_v30, 0.0  ;;  %v154_v38 = vmax.f32 %v122_v31, 0.0 }
  0x34   :  { %v163_v40 = vpack.c.bf16 %v139_v34, %v137_v33  ;;  %v171_v41 = vpack.c.bf16 %v155_v15, %v153_v35 }
  0x35   :  { %v164_v42 = vpack.c.bf16 %v140_v37, %v138_v36  ;;  %v172_v23 = vpack.c.bf16 %v156_v39, %v154_v38 }
  0x41   :  { %319 = vmatmul.bf16.gmra.mxu0 %v161_v2  ;;  %339 = vmatmul.bf16.gmra.mxu2 %v169_v3 }
  0x42   :  { %368 = vmatmul.bf16.gmra.mxu1 %v162_v6  ;;  %388 = vmatmul.bf16.gmra.mxu3 %v170_v7 }
  0x51   :  { %324 = vmatmul.bf16.gmra.mxu0 %v163_v40  ;;  %344 = vmatmul.bf16.gmra.mxu2 %v171_v41 }
  0x52   :  { %373 = vmatmul.bf16.gmra.mxu1 %v164_v42  ;;  %393 = vmatmul.bf16.gmra.mxu3 %v172_v23 }
  0x9e   :  { %v310_v43 = vpop.f32.mrf.mxu0 }
  0x9f   :  { %v359_v44 = vpop.f32.mrf.mxu1 }
  0xa0   :  { %v360_v45 = vadd.f32 %v359_v44, %v310_v43 }
  0xa2   :  { %399 = vst [vmem:[%s814_s4] sm:$0xff] %v360_v45 }
  0xa4   :  { %v330_v24 = vpop.f32.mrf.mxu2 }
  0xa5   :  { %v379_v46 = vpop.f32.mrf.mxu3 }
  0xa6   :  { %v380_v47 = vadd.f32 %v379_v46, %v330_v24  ;;  %v312_v48 = vpop.f32.mrf.mxu0 }
  0xa7   :  { %v361_v49 = vpop.f32.mrf.mxu1 }
  0xa8   :  { %407 = vst [vmem:[%s814_s4 + $0x40] sm:$0xff] %v380_v47  ;;  %v362_v50 = vadd.f32 %v361_v49, %v312_v48 }
  0xaa   :  { %400 = vst [vmem:[%s814_s4 + $0x8] sm:$0xff] %v362_v50 }
  0xac   :  { %v332_v51 = vpop.f32.mrf.mxu2 }
  0xad   :  { %v381_v52 = vpop.f32.mrf.mxu3 }
  0xae   :  { %v382_v53 = vadd.f32 %v381_v52, %v332_v51  ;;  %v315_v54 = vpop.f32.mrf.mxu0 }
  0xaf   :  { %v364_v55 = vpop.f32.mrf.mxu1 }
  0xb0   :  { %408 = vst [vmem:[%s814_s4 + $0x48] sm:$0xff] %v382_v53  ;;  %v365_v56 = vadd.f32 %v364_v55, %v315_v54 }
  0xb2   :  { %401 = vst [vmem:[%s814_s4 + $0x10] sm:$0xff] %v365_v56 }
  0xb4   :  { %v335_v57 = vpop.f32.mrf.mxu2 }
  0xb5   :  { %v384_v58 = vpop.f32.mrf.mxu3 }
  0xb6   :  { %v385_v59 = vadd.f32 %v384_v58, %v335_v57  ;;  %v317_v60 = vpop.f32.mrf.mxu0 }
  0xb7   :  { %v366_v61 = vpop.f32.mrf.mxu1 }
  0xb8   :  { %409 = vst [vmem:[%s814_s4 + $0x50] sm:$0xff] %v385_v59  ;;  %v367_v62 = vadd.f32 %v366_v61, %v317_v60 }
  0xba   :  { %402 = vst [vmem:[%s814_s4 + $0x18] sm:$0xff] %v367_v62 }
  0xbc   :  { %v337_v63 = vpop.f32.mrf.mxu2 }
  0xbd   :  { %v386_v0 = vpop.f32.mrf.mxu3 }
  0xbe   :  { %v387_v1 = vadd.f32 %v386_v0, %v337_v63  ;;  %v320_v2 = vpop.f32.mrf.mxu0 }
  0xbf   :  { %v369_v3 = vpop.f32.mrf.mxu1 }
  0xc0   :  { %410 = vst [vmem:[%s814_s4 + $0x58] sm:$0xff] %v387_v1  ;;  %v370_v4 = vadd.f32 %v369_v3, %v320_v2 }
  0xc2   :  { %403 = vst [vmem:[%s814_s4 + $0x20] sm:$0xff] %v370_v4 }
  0xc4   :  { %v340_v5 = vpop.f32.mrf.mxu2 }
  0xc5   :  { %v389_v6 = vpop.f32.mrf.mxu3 }
  0xc6   :  { %v390_v7 = vadd.f32 %v389_v6, %v340_v5  ;;  %v322_v8 = vpop.f32.mrf.mxu0 }
  0xc7   :  { %v371_v9 = vpop.f32.mrf.mxu1 }
  0xc8   :  { %411 = vst [vmem:[%s814_s4 + $0x60] sm:$0xff] %v390_v7  ;;  %v372_v11 = vadd.f32 %v371_v9, %v322_v8 }
  0xca   :  { %404 = vst [vmem:[%s814_s4 + $0x28] sm:$0xff] %v372_v11 }
  0xcc   :  { %v342_v12 = vpop.f32.mrf.mxu2 }
  0xcd   :  { %v391_v13 = vpop.f32.mrf.mxu3 }
  0xce   :  { %v392_v14 = vadd.f32 %v391_v13, %v342_v12  ;;  %v325_v16 = vpop.f32.mrf.mxu0 }
  0xcf   :  { %v374_v17 = vpop.f32.mrf.mxu1 }
  0xd0   :  { %412 = vst [vmem:[%s814_s4 + $0x68] sm:$0xff] %v392_v14  ;;  %v375_v18 = vadd.f32 %v374_v17, %v325_v16 }
  0xd2   :  { %405 = vst [vmem:[%s814_s4 + $0x30] sm:$0xff] %v375_v18 }
  0xd4   :  { %v345_v19 = vpop.f32.mrf.mxu2 }
  0xd5   :  { %v394_v20 = vpop.f32.mrf.mxu3 }
  0xd6   :  { %v395_v21 = vadd.f32 %v394_v20, %v345_v19  ;;  %v327_v22 = vpop.f32.mrf.mxu0 }
  0xd7   :  { %v376_v25 = vpop.f32.mrf.mxu1 }
  0xd8   :  { %413 = vst [vmem:[%s814_s4 + $0x70] sm:$0xff] %v395_v21  ;;  %v377_v26 = vadd.f32 %v376_v25, %v327_v22 }
  0xda   :  { %406 = vst [vmem:[%s814_s4 + $0x38] sm:$0xff] %v377_v26 }
  0xdc   :  { %v347_v27 = vpop.f32.mrf.mxu2 }
  0xdd   :  { %v396_v28 = vpop.f32.mrf.mxu3 }
  0xde   :  { %v397_v29 = vadd.f32 %v396_v28, %v347_v27 }
  0xe0   :  { %414 = vst [vmem:[%s814_s4 + $0x78] sm:$0xff] %v397_v29 }

// kernel: forward.135
= control target key start
LH: loop header
LB: loop body
LE: loop exit
PB: predicated region body
PF: predicated region fallthrough
CT: control target
= control target key end

     0   :  { %s888_s1 = inlined_call_operand.vmem [shape: bf16[512,128], index: 1, kind: input, shape index: {}]   ;;  %s889_s2 = inlined_call_operand.vmem [shape: f32[1,512], index: 2, kind: input, shape index: {}]   ;;  %s890_s0 = inlined_call_operand.vmem [shape: f32[32,512], index: 0, kind: input, shape index: {}]   ;;  %s891_s3 = inlined_call_operand.vmem [shape: f32[1,512], index: 3, kind: input, shape index: {}]   ;;  %s892_s4 = inlined_call_operand.vmem [shape: f32[1,128], index: 4, kind: input, shape index: {}]   ;;  %s893_s5 = inlined_call_operand.vmem [shape: f32[1,128], index: 5, kind: input, shape index: {}]   ;;  %s894_s6 = inlined_call_operand.vmem [shape: f32[32,128], index: 6, kind: output, shape index: {}]  }
   0x1   :  { %v610_v0 = vld [vmem:[%s888_s1 + $0x38] sm:$0xff]  ;;  %v609_v4 = vld [vmem:[%s888_s1 + $0x30] sm:$0xff]  ;;  %v608_v8 = vld [vmem:[%s888_s1 + $0x28] sm:$0xff] }
   0x2   :  { %v618_v1 = vld [vmem:[%s888_s1 + $0x78] sm:$0xff]  ;;  %371 = vmatpush.bf16.msra.mxu0 %v610_v0  ;;  %v617_v5 = vld [vmem:[%s888_s1 + $0x70] sm:$0xff]  ;;  %v616_v9 = vld [vmem:[%s888_s1 + $0x68] sm:$0xff] }
   0x3   :  { %v626_v2 = vld [vmem:[%s888_s1 + $0xb8] sm:$0xff]  ;;  %390 = vmatpush.bf16.msra.mxu1 %v618_v1  ;;  %v625_v6 = vld [vmem:[%s888_s1 + $0xb0] sm:$0xff]  ;;  %v624_v10 = vld [vmem:[%s888_s1 + $0xa8] sm:$0xff] }
   0x4   :  { %v634_v3 = vld [vmem:[%s888_s1 + $0xf8] sm:$0xff]  ;;  %409 = vmatpush.bf16.msra.mxu2 %v626_v2  ;;  %v633_v7 = vld [vmem:[%s888_s1 + $0xf0] sm:$0xff]  ;;  %v632_v11 = vld [vmem:[%s888_s1 + $0xe8] sm:$0xff] }
   0x5   :  { %428 = vmatpush.bf16.msra.mxu3 %v634_v3  ;;  %v607_v12 = vld [vmem:[%s888_s1 + $0x20] sm:$0xff]  ;;  %v606_v17 = vld [vmem:[%s888_s1 + $0x18] sm:$0xff]  ;;  %v24_v27 = vld [vmem:[%s890_s0 + $0x8] sm:$0xff] }
   0x6   :  { %372 = vmatpush.bf16.msra.mxu0 %v609_v4  ;;  %v615_v13 = vld [vmem:[%s888_s1 + $0x60] sm:$0xff]  ;;  %v614_v18 = vld [vmem:[%s888_s1 + $0x58] sm:$0xff]  ;;  %v28_v28 = vld [vmem:[%s890_s0 + $0x28] sm:$0xff] }
   0x7   :  { %391 = vmatpush.bf16.msra.mxu1 %v617_v5  ;;  %v623_v14 = vld [vmem:[%s888_s1 + $0xa0] sm:$0xff]  ;;  %v622_v20 = vld [vmem:[%s888_s1 + $0x98] sm:$0xff]  ;;  %v25_v29 = vld [vmem:[%s890_s0 + $0x10] sm:$0xff] }
   0x8   :  { %410 = vmatpush.bf16.msra.mxu2 %v625_v6  ;;  %v631_v15 = vld [vmem:[%s888_s1 + $0xe0] sm:$0xff]  ;;  %v630_v21 = vld [vmem:[%s888_s1 + $0xd8] sm:$0xff]  ;;  %v29_v31 = vld [vmem:[%s890_s0 + $0x30] sm:$0xff] }
   0x9   :  { %429 = vmatpush.bf16.msra.mxu3 %v633_v7  ;;  %v39_v16 = vld [vmem:[%s889_s2] sm:$0xf]  ;;  %v26_v32 = vld [vmem:[%s890_s0 + $0x18] sm:$0xff]  ;;  %v605_v42 = vld [vmem:[%s888_s1 + $0x10] sm:$0xff] }
   0xa   :  { %373 = vmatpush.bf16.msra.mxu0 %v608_v8  ;;  %v729_v19 = vperm.slane %v39_v16, 0  ;;  %v23_v22 = vld [vmem:[%s890_s0] sm:$0xff]  ;;  %v746_v25 = vperm.slane %v39_v16, 1  ;;  %v748_v26 = vperm.slane %v39_v16, 2  ;;  %v759_v30 = vperm.slane %v39_v16, 3  ;;  %v30_v33 = vld [vmem:[%s890_s0 + $0x38] sm:$0xff] }
   0xb   :  { %392 = vmatpush.bf16.msra.mxu1 %v616_v9  ;;  %v27_v23 = vld [vmem:[%s890_s0 + $0x20] sm:$0xff]  ;;  %v613_v43 = vld [vmem:[%s888_s1 + $0x50] sm:$0xff]  ;;  %v604_v55 = vld [vmem:[%s888_s1 + $0x8] sm:$0xff] }
   0xc   :  { %411 = vmatpush.bf16.msra.mxu2 %v624_v10  ;;  %v65_v24 = vld [vmem:[%s891_s3] sm:$0xf]  ;;  %v49_v34 = vmul.f32 %v729_v19, %v23_v22  ;;  %v53_v38 = vmul.f32 %v729_v19, %v27_v23  ;;  %v50_v39 = vmul.f32 %v746_v25, %v24_v27  ;;  %v54_v40 = vmul.f32 %v746_v25, %v28_v28  ;;  %v621_v48 = vld [vmem:[%s888_s1 + $0x90] sm:$0xff]  ;;  %v612_v56 = vld [vmem:[%s888_s1 + $0x48] sm:$0xff] }
   0xd   :  { %430 = vmatpush.bf16.msra.mxu3 %v632_v11  ;;  %v771_v35 = vperm.slane %v65_v24, 0  ;;  %v773_v36 = vperm.slane %v65_v24, 1  ;;  %v775_v37 = vperm.slane %v65_v24, 2  ;;  %v51_v41 = vmul.f32 %v748_v26, %v25_v29  ;;  %v629_v49 = vld [vmem:[%s888_s1 + $0xd0] sm:$0xff]  ;;  %v620_v60 = vld [vmem:[%s888_s1 + $0x88] sm:$0xff]  ;;  %v603_v2 = vld [vmem:[%s888_s1] sm:$0xff] }
   0xe   :  { %374 = vmatpush.bf16.msra.mxu0 %v607_v12  ;;  %v55_v44 = vmul.f32 %v748_v26, %v29_v31  ;;  %v52_v45 = vmul.f32 %v759_v30, %v26_v32  ;;  %v56_v46 = vmul.f32 %v759_v30, %v30_v33  ;;  %v790_v47 = vperm.slane %v65_v24, 3  ;;  %v628_v61 = vld [vmem:[%s888_s1 + $0xc8] sm:$0xff]  ;;  %v611_v3 = vld [vmem:[%s888_s1 + $0x40] sm:$0xff]  ;;  %v38_v22 = vld [vmem:[%s890_s0 + $0x78] sm:$0xff] }
   0xf   :  { %393 = vmatpush.bf16.msra.mxu1 %v615_v13  ;;  %v75_v50 = vadd.f32 %v771_v35, %v49_v34  ;;  %v79_v51 = vadd.f32 %v771_v35, %v53_v38  ;;  %v76_v52 = vadd.f32 %v773_v36, %v50_v39  ;;  %v80_v53 = vadd.f32 %v773_v36, %v54_v40  ;;  %v619_v8 = vld [vmem:[%s888_s1 + $0x80] sm:$0xff]  ;;  %v32_v16 = vld [vmem:[%s890_s0 + $0x48] sm:$0xff] }
  0x10   :  { %412 = vmatpush.bf16.msra.mxu2 %v623_v14  ;;  %v77_v54 = vadd.f32 %v775_v37, %v51_v41  ;;  %v81_v57 = vadd.f32 %v775_v37, %v55_v44  ;;  %v78_v58 = vadd.f32 %v790_v47, %v52_v45  ;;  %v82_v59 = vadd.f32 %v790_v47, %v56_v46  ;;  %v627_v9 = vld [vmem:[%s888_s1 + $0xc0] sm:$0xff] }
  0x11   :  { %431 = vmatpush.bf16.msra.mxu3 %v631_v15  ;;  %v91_v62 = vmax.f32 %v75_v50, 0.0  ;;  %v95_v63 = vmax.f32 %v79_v51, 0.0  ;;  %v92_v0 = vmax.f32 %v76_v52, 0.0  ;;  %v96_v1 = vmax.f32 %v80_v53, 0.0  ;;  %v31_v12 = vld [vmem:[%s890_s0 + $0x40] sm:$0xff] }
  0x12   :  { %375 = vmatpush.bf16.msra.mxu0 %v606_v17  ;;  %v93_v4 = vmax.f32 %v77_v54, 0.0  ;;  %v97_v5 = vmax.f32 %v81_v57, 0.0  ;;  %v94_v6 = vmax.f32 %v78_v58, 0.0  ;;  %v98_v7 = vmax.f32 %v82_v59, 0.0  ;;  %v35_v13 = vld [vmem:[%s890_s0 + $0x60] sm:$0xff]  ;;  %v36_v17 = vld [vmem:[%s890_s0 + $0x68] sm:$0xff] }
  0x13   :  { %394 = vmatpush.bf16.msra.mxu1 %v614_v18  ;;  %v107_v10 = vpack.c.bf16 %v95_v63, %v91_v62  ;;  %v108_v11 = vpack.c.bf16 %v96_v1, %v92_v0  ;;  %v33_v18 = vld [vmem:[%s890_s0 + $0x50] sm:$0xff]  ;;  %v57_v23 = vmul.f32 %v729_v19, %v31_v12  ;;  %v61_v24 = vmul.f32 %v729_v19, %v35_v13 }
  0x14   :  { %413 = vmatpush.bf16.msra.mxu2 %v622_v20  ;;  %v109_v14 = vpack.c.bf16 %v97_v5, %v93_v4  ;;  %v110_v15 = vpack.c.bf16 %v98_v7, %v94_v6  ;;  %v37_v20 = vld [vmem:[%s890_s0 + $0x70] sm:$0xff]  ;;  %v58_v27 = vmul.f32 %v746_v25, %v32_v16  ;;  %v62_v28 = vmul.f32 %v746_v25, %v36_v17 }
  0x15   :  { %432 = vmatpush.bf16.msra.mxu3 %v630_v21  ;;  %v34_v21 = vld [vmem:[%s890_s0 + $0x58] sm:$0xff]  ;;  %v59_v29 = vmul.f32 %v748_v26, %v33_v18  ;;  %v63_v31 = vmul.f32 %v748_v26, %v37_v20  ;;  %v64_v33 = vmul.f32 %v759_v30, %v38_v22  ;;  %v83_v34 = vadd.f32 %v771_v35, %v57_v23 }
  0x16   :  { %376 = vmatpush.bf16.msra.mxu0 %v605_v42  ;;  %v60_v32 = vmul.f32 %v759_v30, %v34_v21  ;;  %v87_v19 = vadd.f32 %v771_v35, %v61_v24  ;;  %v84_v38 = vadd.f32 %v773_v36, %v58_v27  ;;  %v88_v39 = vadd.f32 %v773_v36, %v62_v28 }
  0x17   :  { %395 = vmatpush.bf16.msra.mxu1 %v613_v43  ;;  %v85_v25 = vadd.f32 %v775_v37, %v59_v29  ;;  %v89_v40 = vadd.f32 %v775_v37, %v63_v31  ;;  %v90_v26 = vadd.f32 %v790_v47, %v64_v33  ;;  %v99_v42 = vmax.f32 %v83_v34, 0.0 }
  0x18   :  { %414 = vmatpush.bf16.msra.mxu2 %v621_v48  ;;  %v86_v41 = vadd.f32 %v790_v47, %v60_v32  ;;  %v103_v43 = vmax.f32 %v87_v19, 0.0  ;;  %v100_v44 = vmax.f32 %v84_v38, 0.0  ;;  %v104_v30 = vmax.f32 %v88_v39, 0.0 }
  0x19   :  { %433 = vmatpush.bf16.msra.mxu3 %v629_v49  ;;  %v101_v45 = vmax.f32 %v85_v25, 0.0  ;;  %v105_v46 = vmax.f32 %v89_v40, 0.0  ;;  %v106_v35 = vmax.f32 %v90_v26, 0.0 }
  0x1a   :  { %377 = vmatpush.bf16.msra.mxu0 %v604_v55  ;;  %v102_v48 = vmax.f32 %v86_v41, 0.0  ;;  %v111_v49 = vpack.c.bf16 %v103_v43, %v99_v42  ;;  %v112_v50 = vpack.c.bf16 %v104_v30, %v100_v44 }
  0x1b   :  { %396 = vmatpush.bf16.msra.mxu1 %v612_v56  ;;  %v113_v51 = vpack.c.bf16 %v105_v46, %v101_v45  ;;  %v635_v56 = vld [vmem:[%s892_s4] ss:$0 sm:$0xff] }
  0x1c   :  { %415 = vmatpush.bf16.msra.mxu2 %v620_v60  ;;  %v114_v36 = vpack.c.bf16 %v106_v35, %v102_v48  ;;  %v636_v60 = vld [vmem:[%s893_s5] ss:$0 sm:$0xff] }
  0x1d   :  { %434 = vmatpush.bf16.msra.mxu3 %v628_v61 }
  0x1e   :  { %378 = vmatpush.bf16.msra.mxu0 %v603_v2 }
  0x1f   :  { %397 = vmatpush.bf16.msra.mxu1 %v611_v3 }
  0x20   :  { %416 = vmatpush.bf16.msra.mxu2 %v619_v8 }
  0x21   :  { %435 = vmatpush.bf16.msra.mxu3 %v627_v9  ;;  %379 = vmatmul.bf16.vlgmr.msra.gmra.mxu0 %v107_v10 }
  0x22   :  { %398 = vmatmul.bf16.vlgmr.msra.gmra.mxu1 %v108_v11 }
  0x23   :  { %417 = vmatmul.bf16.vlgmr.msra.gmra.mxu2 %v109_v14 }
  0x24   :  { %436 = vmatmul.bf16.vlgmr.msra.gmra.mxu3 %v110_v15 }
  0x31   :  { %384 = vmatmul.bf16.gmra.mxu0 %v111_v49 }
  0x32   :  { %403 = vmatmul.bf16.gmra.mxu1 %v112_v50 }
  0x33   :  { %422 = vmatmul.bf16.gmra.mxu2 %v113_v51 }
  0x34   :  { %441 = vmatmul.bf16.gmra.mxu3 %v114_v36 }
  0x9e   :  { %v380_v37 = vpop.f32.mrf.mxu0 }
  0x9f   :  { %v399_v52 = vpop.f32.mrf.mxu1 }
  0xa0   :  { %v400_v53 = vadd.f32 %v399_v52, %v380_v37 }
  0xa6   :  { %v418_v47 = vpop.f32.mrf.mxu2  ;;  %v382_v57 = vpop.f32.mrf.mxu0 }
  0xa7   :  { %v437_v54 = vpop.f32.mrf.mxu3  ;;  %v419_v55 = vadd.f32 %v418_v47, %v400_v53  ;;  %v401_v58 = vpop.f32.mrf.mxu1 }
  0xa8   :  { %v402_v63 = vadd.f32 %v401_v58, %v382_v57 }
  0xa9   :  { %v438_v59 = vadd.f32 %v437_v54, %v419_v55 }
  0xab   :  { %v451_v61 = vmul.f32 %v635_v56, %v438_v59 }
  0xad   :  { %v459_v62 = vadd.f32 %v636_v60, %v451_v61 }
  0xae   :  { %v420_v0 = vpop.f32.mrf.mxu2  ;;  %v385_v4 = vpop.f32.mrf.mxu0 }
  0xaf   :  { %v439_v1 = vpop.f32.mrf.mxu3  ;;  %v463_v2 = vmax.f32 %v459_v62, 0.0  ;;  %v421_v3 = vadd.f32 %v420_v0, %v402_v63  ;;  %v404_v5 = vpop.f32.mrf.mxu1 }
  0xb0   :  { %v405_v8 = vadd.f32 %v404_v5, %v385_v4 }
  0xb1   :  { %467 = vst [vmem:[%s894_s6] sm:$0xff] %v463_v2  ;;  %v440_v6 = vadd.f32 %v439_v1, %v421_v3 }
  0xb3   :  { %v452_v7 = vmul.f32 %v635_v56, %v440_v6 }
  0xb5   :  { %v460_v9 = vadd.f32 %v636_v60, %v452_v7 }
  0xb6   :  { %v423_v10 = vpop.f32.mrf.mxu2  ;;  %v387_v15 = vpop.f32.mrf.mxu0 }
  0xb7   :  { %v442_v11 = vpop.f32.mrf.mxu3  ;;  %v464_v12 = vmax.f32 %v460_v9, 0.0  ;;  %v424_v13 = vadd.f32 %v423_v10, %v405_v8  ;;  %v406_v16 = vpop.f32.mrf.mxu1 }
  0xb8   :  { %v407_v20 = vadd.f32 %v406_v16, %v387_v15 }
  0xb9   :  { %468 = vst [vmem:[%s894_s6 + $0x8] sm:$0xff] %v464_v12  ;;  %v443_v14 = vadd.f32 %v442_v11, %v424_v13 }
  0xbb   :  { %v453_v17 = vmul.f32 %v635_v56, %v443_v14 }
  0xbd   :  { %v461_v18 = vadd.f32 %v636_v60, %v453_v17 }
  0xbe   :  { %v425_v21 = vpop.f32.mrf.mxu2 }
  0xbf   :  { %v465_v22 = vmax.f32 %v461_v18, 0.0  ;;  %v426_v23 = vadd.f32 %v425_v21, %v407_v20  ;;  %v444_v24 = vpop.f32.mrf.mxu3 }
  0xc1   :  { %469 = vst [vmem:[%s894_s6 + $0x10] sm:$0xff] %v465_v22  ;;  %v445_v27 = vadd.f32 %v444_v24, %v426_v23 }
  0xc3   :  { %v454_v28 = vmul.f32 %v635_v56, %v445_v27 }
  0xc5   :  { %v462_v29 = vadd.f32 %v636_v60, %v454_v28 }
  0xc7   :  { %v466_v31 = vmax.f32 %v462_v29, 0.0 }
  0xc9   :  { %470 = vst [vmem:[%s894_s6 + $0x18] sm:$0xff] %v466_v31 }

// kernel: forward.136
= control target key start
LH: loop header
LB: loop body
LE: loop exit
PB: predicated region body
PF: predicated region fallthrough
CT: control target
= control target key end

     0   :  { %s1539_s1 = inlined_call_operand.vmem [shape: bf16[1152,128], index: 1, kind: input, shape index: {}]   ;;  %s1540_s0 = inlined_call_operand.vmem [shape: f32[32,1152], index: 0, kind: input, shape index: {}]   ;;  %s1541_s2 = inlined_call_operand.vmem [shape: f32[32,128], index: 2, kind: output, shape index: {}]  }
   0x1   :  { %v1115_v0 = vld [vmem:[%s1539_s1 + $0x38] sm:$0xff]  ;;  %v1114_v4 = vld [vmem:[%s1539_s1 + $0x30] sm:$0xff]  ;;  %v1113_v8 = vld [vmem:[%s1539_s1 + $0x28] sm:$0xff] }
   0x2   :  { %v1123_v1 = vld [vmem:[%s1539_s1 + $0x78] sm:$0xff]  ;;  %641 = vmatpush.bf16.msra.mxu0 %v1115_v0  ;;  %v1122_v5 = vld [vmem:[%s1539_s1 + $0x70] sm:$0xff]  ;;  %v1121_v9 = vld [vmem:[%s1539_s1 + $0x68] sm:$0xff] }
   0x3   :  { %v1131_v2 = vld [vmem:[%s1539_s1 + $0xb8] sm:$0xff]  ;;  %660 = vmatpush.bf16.msra.mxu1 %v1123_v1  ;;  %v1130_v6 = vld [vmem:[%s1539_s1 + $0xb0] sm:$0xff]  ;;  %v1129_v10 = vld [vmem:[%s1539_s1 + $0xa8] sm:$0xff] }
   0x4   :  { %v1139_v3 = vld [vmem:[%s1539_s1 + $0xf8] sm:$0xff]  ;;  %679 = vmatpush.bf16.msra.mxu2 %v1131_v2  ;;  %v1138_v7 = vld [vmem:[%s1539_s1 + $0xf0] sm:$0xff]  ;;  %v1137_v11 = vld [vmem:[%s1539_s1 + $0xe8] sm:$0xff] }
   0x5   :  { %698 = vmatpush.bf16.msra.mxu3 %v1139_v3  ;;  %v1112_v12 = vld [vmem:[%s1539_s1 + $0x20] sm:$0xff]  ;;  %v1111_v16 = vld [vmem:[%s1539_s1 + $0x18] sm:$0xff]  ;;  %v1110_v20 = vld [vmem:[%s1539_s1 + $0x10] sm:$0xff] }
   0x6   :  { %642 = vmatpush.bf16.msra.mxu0 %v1114_v4  ;;  %v1120_v13 = vld [vmem:[%s1539_s1 + $0x60] sm:$0xff]  ;;  %v1119_v17 = vld [vmem:[%s1539_s1 + $0x58] sm:$0xff]  ;;  %v1118_v21 = vld [vmem:[%s1539_s1 + $0x50] sm:$0xff] }
   0x7   :  { %661 = vmatpush.bf16.msra.mxu1 %v1122_v5  ;;  %v1128_v14 = vld [vmem:[%s1539_s1 + $0xa0] sm:$0xff]  ;;  %v1127_v18 = vld [vmem:[%s1539_s1 + $0x98] sm:$0xff]  ;;  %v1126_v22 = vld [vmem:[%s1539_s1 + $0x90] sm:$0xff] }
   0x8   :  { %680 = vmatpush.bf16.msra.mxu2 %v1130_v6  ;;  %v1136_v15 = vld [vmem:[%s1539_s1 + $0xe0] sm:$0xff]  ;;  %v1135_v19 = vld [vmem:[%s1539_s1 + $0xd8] sm:$0xff]  ;;  %v1134_v23 = vld [vmem:[%s1539_s1 + $0xd0] sm:$0xff] }
   0x9   :  { %699 = vmatpush.bf16.msra.mxu3 %v1138_v7  ;;  %v1109_v24 = vld [vmem:[%s1539_s1 + $0x8] sm:$0xff]  ;;  %v1108_v28 = vld [vmem:[%s1539_s1] sm:$0xff]  ;;  %v21_v35 = vld [vmem:[%s1540_s0 + $0x50] sm:$0xff] }
   0xa   :  { %643 = vmatpush.bf16.msra.mxu0 %v1113_v8  ;;  %v1117_v25 = vld [vmem:[%s1539_s1 + $0x48] sm:$0xff]  ;;  %v1116_v29 = vld [vmem:[%s1539_s1 + $0x40] sm:$0xff]  ;;  %v13_v36 = vld [vmem:[%s1540_s0 + $0x10] sm:$0xff] }
   0xb   :  { %662 = vmatpush.bf16.msra.mxu1 %v1121_v9  ;;  %v1125_v26 = vld [vmem:[%s1539_s1 + $0x88] sm:$0xff]  ;;  %v1124_v30 = vld [vmem:[%s1539_s1 + $0x80] sm:$0xff]  ;;  %v22_v37 = vld [vmem:[%s1540_s0 + $0x58] sm:$0xff] }
   0xc   :  { %681 = vmatpush.bf16.msra.mxu2 %v1129_v10  ;;  %v1133_v27 = vld [vmem:[%s1539_s1 + $0xc8] sm:$0xff]  ;;  %v1132_v31 = vld [vmem:[%s1539_s1 + $0xc0] sm:$0xff]  ;;  %v14_v38 = vld [vmem:[%s1540_s0 + $0x18] sm:$0xff]  ;;  %v49_v44 = vpack.c.bf16 %v22_v37, %v13_v36 }
   0xd   :  { %700 = vmatpush.bf16.msra.mxu3 %v1137_v11  ;;  %v11_v32 = vld [vmem:[%s1540_s0] sm:$0xff]  ;;  %v20_v33 = vld [vmem:[%s1540_s0 + $0x48] sm:$0xff]  ;;  %v1147_v40 = vld [vmem:[%s1539_s1 + $0x138] sm:$0xff] }
   0xe   :  { %644 = vmatpush.bf16.msra.mxu0 %v1112_v12  ;;  %v12_v34 = vld [vmem:[%s1540_s0 + $0x8] sm:$0xff]  ;;  %v23_v39 = vld [vmem:[%s1540_s0 + $0x60] sm:$0xff]  ;;  %v1155_v41 = vld [vmem:[%s1539_s1 + $0x178] sm:$0xff]  ;;  %v47_v42 = vpack.c.bf16 %v20_v33, %v11_v32 }
   0xf   :  { %663 = vmatpush.bf16.msra.mxu1 %v1120_v13  ;;  %v48_v43 = vpack.c.bf16 %v21_v35, %v12_v34  ;;  %v50_v45 = vpack.c.bf16 %v23_v39, %v14_v38  ;;  %v1163_v46 = vld [vmem:[%s1539_s1 + $0x1b8] sm:$0xff]  ;;  %v1146_v48 = vld [vmem:[%s1539_s1 + $0x130] sm:$0xff]  ;;  %v1145_v52 = vld [vmem:[%s1539_s1 + $0x128] sm:$0xff] }
  0x10   :  { %682 = vmatpush.bf16.msra.mxu2 %v1128_v14  ;;  %v1171_v47 = vld [vmem:[%s1539_s1 + $0x1f8] sm:$0xff]  ;;  %v1154_v49 = vld [vmem:[%s1539_s1 + $0x170] sm:$0xff]  ;;  %v1153_v53 = vld [vmem:[%s1539_s1 + $0x168] sm:$0xff] }
  0x11   :  { %701 = vmatpush.bf16.msra.mxu3 %v1136_v15  ;;  %v1162_v50 = vld [vmem:[%s1539_s1 + $0x1b0] sm:$0xff]  ;;  %v1161_v54 = vld [vmem:[%s1539_s1 + $0x1a8] sm:$0xff]  ;;  %v1144_v56 = vld [vmem:[%s1539_s1 + $0x120] sm:$0xff] }
  0x12   :  { %645 = vmatpush.bf16.msra.mxu0 %v1111_v16  ;;  %v1170_v51 = vld [vmem:[%s1539_s1 + $0x1f0] sm:$0xff]  ;;  %v1169_v55 = vld [vmem:[%s1539_s1 + $0x1e8] sm:$0xff]  ;;  %v1152_v57 = vld [vmem:[%s1539_s1 + $0x160] sm:$0xff] }
  0x13   :  { %664 = vmatpush.bf16.msra.mxu1 %v1119_v17  ;;  %v1160_v58 = vld [vmem:[%s1539_s1 + $0x1a0] sm:$0xff]  ;;  %v29_v60 = vld [vmem:[%s1540_s0 + $0x90] sm:$0xff]  ;;  %v38_v61 = vld [vmem:[%s1540_s0 + $0xd8] sm:$0xff] }
  0x14   :  { %683 = vmatpush.bf16.msra.mxu2 %v1127_v18  ;;  %v1168_v59 = vld [vmem:[%s1539_s1 + $0x1e0] sm:$0xff]  ;;  %v30_v62 = vld [vmem:[%s1540_s0 + $0x98] sm:$0xff]  ;;  %v40_v1 = vld [vmem:[%s1540_s0 + $0xe8] sm:$0xff]  ;;  %v56_v6 = vpack.c.bf16 %v38_v61, %v29_v60 }
  0x15   :  { %702 = vmatpush.bf16.msra.mxu3 %v1135_v19  ;;  %v39_v63 = vld [vmem:[%s1540_s0 + $0xe0] sm:$0xff]  ;;  %v32_v2 = vld [vmem:[%s1540_s0 + $0xa8] sm:$0xff]  ;;  %v41_v3 = vld [vmem:[%s1540_s0 + $0xf0] sm:$0xff] }
  0x16   :  { %646 = vmatpush.bf16.msra.mxu0 %v1110_v20  ;;  %v31_v0 = vld [vmem:[%s1540_s0 + $0xa0] sm:$0xff]  ;;  %v1143_v4 = vld [vmem:[%s1539_s1 + $0x118] sm:$0xff]  ;;  %v57_v7 = vpack.c.bf16 %v39_v63, %v30_v62  ;;  %v59_v9 = vpack.c.bf16 %v41_v3, %v32_v2  ;;  %v1142_v12 = vld [vmem:[%s1539_s1 + $0x110] sm:$0xff] }
  0x17   :  { %665 = vmatpush.bf16.msra.mxu1 %v1118_v21  ;;  %v1151_v5 = vld [vmem:[%s1539_s1 + $0x158] sm:$0xff]  ;;  %v58_v8 = vpack.c.bf16 %v40_v1, %v31_v0  ;;  %v1150_v13 = vld [vmem:[%s1539_s1 + $0x150] sm:$0xff]  ;;  %v1141_v16 = vld [vmem:[%s1539_s1 + $0x108] sm:$0xff] }
  0x18   :  { %684 = vmatpush.bf16.msra.mxu2 %v1126_v22  ;;  %v1159_v10 = vld [vmem:[%s1539_s1 + $0x198] sm:$0xff]  ;;  %v1158_v14 = vld [vmem:[%s1539_s1 + $0x190] sm:$0xff]  ;;  %v1149_v17 = vld [vmem:[%s1539_s1 + $0x148] sm:$0xff] }
  0x19   :  { %703 = vmatpush.bf16.msra.mxu3 %v1134_v23  ;;  %v1167_v11 = vld [vmem:[%s1539_s1 + $0x1d8] sm:$0xff]  ;;  %v1166_v15 = vld [vmem:[%s1539_s1 + $0x1d0] sm:$0xff]  ;;  %v1157_v18 = vld [vmem:[%s1539_s1 + $0x188] sm:$0xff] }
  0x1a   :  { %647 = vmatpush.bf16.msra.mxu0 %v1109_v24  ;;  %v1165_v19 = vld [vmem:[%s1539_s1 + $0x1c8] sm:$0xff]  ;;  %v1140_v20 = vld [vmem:[%s1539_s1 + $0x100] sm:$0xff]  ;;  %v1178_v37 = vld [vmem:[%s1539_s1 + $0x230] sm:$0xff] }
  0x1b   :  { %666 = vmatpush.bf16.msra.mxu1 %v1117_v25  ;;  %v1148_v21 = vld [vmem:[%s1539_s1 + $0x140] sm:$0xff]  ;;  %v24_v25 = vld [vmem:[%s1540_s0 + $0x68] sm:$0xff] }
  0x1c   :  { %685 = vmatpush.bf16.msra.mxu2 %v1125_v26  ;;  %v1156_v22 = vld [vmem:[%s1539_s1 + $0x180] sm:$0xff]  ;;  %v1179_v26 = vld [vmem:[%s1539_s1 + $0x238] sm:$0xff]  ;;  %v1177_v38 = vld [vmem:[%s1539_s1 + $0x228] sm:$0xff] }
  0x1d   :  { %704 = vmatpush.bf16.msra.mxu3 %v1133_v27  ;;  %v1164_v23 = vld [vmem:[%s1539_s1 + $0x1c0] sm:$0xff]  ;;  %v16_v27 = vld [vmem:[%s1540_s0 + $0x28] sm:$0xff] }
  0x1e   :  { %648 = vmatpush.bf16.msra.mxu0 %v1108_v28  ;;  %v15_v24 = vld [vmem:[%s1540_s0 + $0x20] sm:$0xff]  ;;  %v25_v28 = vld [vmem:[%s1540_s0 + $0x70] sm:$0xff] }
  0x1f   :  { %667 = vmatpush.bf16.msra.mxu1 %v1116_v29  ;;  %v17_v29 = vld [vmem:[%s1540_s0 + $0x30] sm:$0xff]  ;;  %v27_v32 = vld [vmem:[%s1540_s0 + $0x80] sm:$0xff]  ;;  %v51_v33 = vpack.c.bf16 %v24_v25, %v15_v24  ;;  %v52_v34 = vpack.c.bf16 %v25_v28, %v16_v27 }
  0x20   :  { %686 = vmatpush.bf16.msra.mxu2 %v1124_v30  ;;  %v26_v30 = vld [vmem:[%s1540_s0 + $0x78] sm:$0xff]  ;;  %v1176_v39 = vld [vmem:[%s1539_s1 + $0x220] sm:$0xff] }
  0x21   :  { %705 = vmatpush.bf16.msra.mxu3 %v1132_v31  ;;  %649 = vmatmul.bf16.vlgmr.msra.gmra.mxu0 %v47_v42  ;;  %v18_v31 = vld [vmem:[%s1540_s0 + $0x38] sm:$0xff]  ;;  %v53_v35 = vpack.c.bf16 %v26_v30, %v17_v29 }
  0x22   :  { %717 = vmatpush.bf16.msrb.mxu0 %v1147_v40  ;;  %668 = vmatmul.bf16.vlgmr.msra.gmra.mxu1 %v48_v43  ;;  %v54_v36 = vpack.c.bf16 %v27_v32, %v18_v31  ;;  %v33_v40 = vld [vmem:[%s1540_s0 + $0xb0] sm:$0xff]  ;;  %v34_v42 = vld [vmem:[%s1540_s0 + $0xb8] sm:$0xff]  ;;  %v43_v43 = vld [vmem:[%s1540_s0 + $0x100] sm:$0xff] }
  0x23   :  { %736 = vmatpush.bf16.msrb.mxu1 %v1155_v41  ;;  %687 = vmatmul.bf16.vlgmr.msra.gmra.mxu2 %v49_v44  ;;  %v42_v41 = vld [vmem:[%s1540_s0 + $0xf8] sm:$0xff]  ;;  %v35_v44 = vld [vmem:[%s1540_s0 + $0xc0] sm:$0xff] }
  0x24   :  { %706 = vmatmul.bf16.vlgmr.msra.gmra.mxu3 %v50_v45  ;;  %755 = vmatpush.bf16.msrb.mxu2 %v1163_v46  ;;  %v44_v45 = vld [vmem:[%s1540_s0 + $0x108] sm:$0xff] }
  0x25   :  { %774 = vmatpush.bf16.msrb.mxu3 %v1171_v47  ;;  %v36_v46 = vld [vmem:[%s1540_s0 + $0xc8] sm:$0xff]  ;;  %v45_v47 = vld [vmem:[%s1540_s0 + $0x110] sm:$0xff] }
  0x26   :  { %718 = vmatpush.bf16.msrb.mxu0 %v1146_v48  ;;  %v1175_v48 = vld [vmem:[%s1539_s1 + $0x218] sm:$0xff] }
  0x27   :  { %737 = vmatpush.bf16.msrb.mxu1 %v1154_v49  ;;  %v60_v49 = vpack.c.bf16 %v42_v41, %v33_v40 }
  0x28   :  { %756 = vmatpush.bf16.msrb.mxu2 %v1162_v50  ;;  %v61_v50 = vpack.c.bf16 %v43_v43, %v34_v42 }
  0x29   :  { %775 = vmatpush.bf16.msrb.mxu3 %v1170_v51  ;;  %v62_v51 = vpack.c.bf16 %v44_v45, %v35_v44 }
  0x2a   :  { %719 = vmatpush.bf16.msrb.mxu0 %v1145_v52  ;;  %v63_v52 = vpack.c.bf16 %v45_v47, %v36_v46 }
  0x2b   :  { %738 = vmatpush.bf16.msrb.mxu1 %v1153_v53  ;;  %v1174_v53 = vld [vmem:[%s1539_s1 + $0x210] sm:$0xff] }
  0x2c   :  { %757 = vmatpush.bf16.msrb.mxu2 %v1161_v54  ;;  %v1173_v54 = vld [vmem:[%s1539_s1 + $0x208] sm:$0xff] }
  0x2d   :  { %776 = vmatpush.bf16.msrb.mxu3 %v1169_v55  ;;  %v1172_v55 = vld [vmem:[%s1539_s1 + $0x200] sm:$0xff] }
  0x2e   :  { %720 = vmatpush.bf16.msrb.mxu0 %v1144_v56  ;;  %v19_v56 = vld [vmem:[%s1540_s0 + $0x40] sm:$0xff] }
  0x2f   :  { %739 = vmatpush.bf16.msrb.mxu1 %v1152_v57  ;;  %v28_v57 = vld [vmem:[%s1540_s0 + $0x88] sm:$0xff] }
  0x30   :  { %758 = vmatpush.bf16.msrb.mxu2 %v1160_v58  ;;  %v37_v58 = vld [vmem:[%s1540_s0 + $0xd0] sm:$0xff]  ;;  %v55_v60 = vpack.c.bf16 %v28_v57, %v19_v56 }
  0x31   :  { %777 = vmatpush.bf16.msrb.mxu3 %v1168_v59  ;;  %654 = vmatmul.bf16.gmra.mxu0 %v56_v6  ;;  %v46_v59 = vld [vmem:[%s1540_s0 + $0x118] sm:$0xff] }
  0x32   :  { %721 = vmatpush.bf16.msrb.mxu0 %v1143_v4  ;;  %673 = vmatmul.bf16.gmra.mxu1 %v57_v7  ;;  %v64_v61 = vpack.c.bf16 %v46_v59, %v37_v58 }
  0x33   :  { %740 = vmatpush.bf16.msrb.mxu1 %v1151_v5  ;;  %692 = vmatmul.bf16.gmra.mxu2 %v58_v8 }
  0x34   :  { %711 = vmatmul.bf16.gmra.mxu3 %v59_v9  ;;  %759 = vmatpush.bf16.msrb.mxu2 %v1159_v10 }
  0x35   :  { %778 = vmatpush.bf16.msrb.mxu3 %v1167_v11 }
  0x36   :  { %722 = vmatpush.bf16.msrb.mxu0 %v1142_v12 }
  0x37   :  { %741 = vmatpush.bf16.msrb.mxu1 %v1150_v13 }
  0x38   :  { %760 = vmatpush.bf16.msrb.mxu2 %v1158_v14 }
  0x39   :  { %779 = vmatpush.bf16.msrb.mxu3 %v1166_v15 }
  0x3a   :  { %723 = vmatpush.bf16.msrb.mxu0 %v1141_v16 }
  0x3b   :  { %742 = vmatpush.bf16.msrb.mxu1 %v1149_v17 }
  0x3c   :  { %761 = vmatpush.bf16.msrb.mxu2 %v1157_v18 }
  0x3d   :  { %780 = vmatpush.bf16.msrb.mxu3 %v1165_v19 }
  0x3e   :  { %724 = vmatpush.bf16.msrb.mxu0 %v1140_v20 }
  0x3f   :  { %743 = vmatpush.bf16.msrb.mxu1 %v1148_v21 }
  0x40   :  { %762 = vmatpush.bf16.msrb.mxu2 %v1156_v22 }
  0x41   :  { %781 = vmatpush.bf16.msrb.mxu3 %v1164_v23  ;;  %725 = vmatmul.bf16.vlgmr.msrb.gmra.mxu0 %v51_v33 }
  0x42   :  { %793 = vmatpush.bf16.msra.mxu0 %v1179_v26  ;;  %744 = vmatmul.bf16.vlgmr.msrb.gmra.mxu1 %v52_v34 }
  0x43   :  { %1180 = vmatpush.bf16.msra.mxu1 %v1179_v26  ;;  %763 = vmatmul.bf16.vlgmr.msrb.gmra.mxu2 %v53_v35 }
  0x44   :  { %782 = vmatmul.bf16.vlgmr.msrb.gmra.mxu3 %v54_v36 }
  0x46   :  { %794 = vmatpush.bf16.msra.mxu0 %v1178_v37 }
  0x47   :  { %1181 = vmatpush.bf16.msra.mxu1 %v1178_v37 }
  0x4a   :  { %795 = vmatpush.bf16.msra.mxu0 %v1177_v38 }
  0x4b   :  { %1182 = vmatpush.bf16.msra.mxu1 %v1177_v38 }
  0x4e   :  { %796 = vmatpush.bf16.msra.mxu0 %v1176_v39 }
  0x4f   :  { %1183 = vmatpush.bf16.msra.mxu1 %v1176_v39 }
  0x51   :  { %730 = vmatmul.bf16.gmra.mxu0 %v60_v49 }
  0x52   :  { %797 = vmatpush.bf16.msra.mxu0 %v1175_v48  ;;  %749 = vmatmul.bf16.gmra.mxu1 %v61_v50 }
  0x53   :  { %1184 = vmatpush.bf16.msra.mxu1 %v1175_v48  ;;  %768 = vmatmul.bf16.gmra.mxu2 %v62_v51 }
  0x54   :  { %787 = vmatmul.bf16.gmra.mxu3 %v63_v52 }
  0x56   :  { %798 = vmatpush.bf16.msra.mxu0 %v1174_v53 }
  0x57   :  { %1185 = vmatpush.bf16.msra.mxu1 %v1174_v53 }
  0x5a   :  { %799 = vmatpush.bf16.msra.mxu0 %v1173_v54 }
  0x5b   :  { %1186 = vmatpush.bf16.msra.mxu1 %v1173_v54 }
  0x5e   :  { %800 = vmatpush.bf16.msra.mxu0 %v1172_v55 }
  0x5f   :  { %1187 = vmatpush.bf16.msra.mxu1 %v1172_v55 }
  0x61   :  { %801 = vmatmul.bf16.vlgmr.msra.gmra.mxu0 %v55_v60 }
  0x62   :  { %806 = vmatmul.bf16.vlgmr.msra.gmra.mxu1 %v64_v61 }
  0x9e   :  { %v650_v62 = vpop.f32.mrf.mxu0 }
  0x9f   :  { %v669_v63 = vpop.f32.mrf.mxu1 }
  0xa0   :  { %v670_v20 = vadd.f32 %v669_v63, %v650_v62 }
  0xa6   :  { %v688_v0 = vpop.f32.mrf.mxu2  ;;  %v652_v2 = vpop.f32.mrf.mxu0 }
  0xa7   :  { %v707_v1 = vpop.f32.mrf.mxu3  ;;  %v671_v3 = vpop.f32.mrf.mxu1  ;;  %v689_v22 = vadd.f32 %v688_v0, %v670_v20 }
  0xa8   :  { %v672_v30 = vadd.f32 %v671_v3, %v652_v2 }
  0xa9   :  { %v708_v28 = vadd.f32 %v707_v1, %v689_v22 }
  0xae   :  { %v690_v4 = vpop.f32.mrf.mxu2  ;;  %v655_v6 = vpop.f32.mrf.mxu0 }
  0xaf   :  { %v709_v5 = vpop.f32.mrf.mxu3  ;;  %v674_v7 = vpop.f32.mrf.mxu1  ;;  %v691_v34 = vadd.f32 %v690_v4, %v672_v30 }
  0xb0   :  { %v675_v21 = vadd.f32 %v674_v7, %v655_v6 }
  0xb1   :  { %v710_v41 = vadd.f32 %v709_v5, %v691_v34 }
  0xb6   :  { %v693_v8 = vpop.f32.mrf.mxu2  ;;  %v657_v10 = vpop.f32.mrf.mxu0 }
  0xb7   :  { %v712_v9 = vpop.f32.mrf.mxu3  ;;  %v676_v11 = vpop.f32.mrf.mxu1  ;;  %v694_v23 = vadd.f32 %v693_v8, %v675_v21 }
  0xb8   :  { %v677_v31 = vadd.f32 %v676_v11, %v657_v10 }
  0xb9   :  { %v713_v29 = vadd.f32 %v712_v9, %v694_v23 }
  0xbe   :  { %v695_v12 = vpop.f32.mrf.mxu2  ;;  %v726_v14 = vpop.f32.mrf.mxu0 }
  0xbf   :  { %v714_v13 = vpop.f32.mrf.mxu3  ;;  %v745_v15 = vpop.f32.mrf.mxu1  ;;  %v727_v32 = vadd.f32 %v726_v14, %v708_v28  ;;  %v696_v35 = vadd.f32 %v695_v12, %v677_v31 }
  0xc1   :  { %v746_v39 = vadd.f32 %v745_v15, %v727_v32  ;;  %v715_v42 = vadd.f32 %v714_v13, %v696_v35 }
  0xc6   :  { %v764_v16 = vpop.f32.mrf.mxu2  ;;  %v728_v18 = vpop.f32.mrf.mxu0 }
  0xc7   :  { %v783_v17 = vpop.f32.mrf.mxu3  ;;  %v747_v19 = vpop.f32.mrf.mxu1  ;;  %v765_v43 = vadd.f32 %v764_v16, %v746_v39  ;;  %v729_v46 = vadd.f32 %v728_v18, %v710_v41 }
  0xc9   :  { %v784_v48 = vadd.f32 %v783_v17, %v765_v43  ;;  %v748_v53 = vadd.f32 %v747_v19, %v729_v46 }
  0xce   :  { %v766_v24 = vpop.f32.mrf.mxu2  ;;  %v731_v25 = vpop.f32.mrf.mxu0 }
  0xcf   :  { %v750_v26 = vpop.f32.mrf.mxu1  ;;  %v785_v27 = vpop.f32.mrf.mxu3  ;;  %v732_v33 = vadd.f32 %v731_v25, %v713_v29  ;;  %v767_v57 = vadd.f32 %v766_v24, %v748_v53 }
  0xd1   :  { %v751_v40 = vadd.f32 %v750_v26, %v732_v33  ;;  %v786_v60 = vadd.f32 %v785_v27, %v767_v57 }
  0xd6   :  { %v769_v36 = vpop.f32.mrf.mxu2  ;;  %v733_v37 = vpop.f32.mrf.mxu0 }
  0xd7   :  { %v752_v38 = vpop.f32.mrf.mxu1  ;;  %v770_v44 = vadd.f32 %v769_v36, %v751_v40  ;;  %v788_v45 = vpop.f32.mrf.mxu3  ;;  %v734_v47 = vadd.f32 %v733_v37, %v715_v42 }
  0xd9   :  { %v789_v49 = vadd.f32 %v788_v45, %v770_v44  ;;  %v753_v54 = vadd.f32 %v752_v38, %v734_v47 }
  0xde   :  { %v771_v50 = vpop.f32.mrf.mxu2  ;;  %v802_v51 = vpop.f32.mrf.mxu0 }
  0xdf   :  { %v807_v52 = vpop.f32.mrf.mxu1  ;;  %v803_v55 = vadd.f32 %v802_v51, %v784_v48  ;;  %v772_v58 = vadd.f32 %v771_v50, %v753_v54  ;;  %v790_v59 = vpop.f32.mrf.mxu3 }
  0xe0   :  { %v808_v56 = vadd.f32 %v807_v52, %v789_v49 }
  0xe1   :  { %812 = vst [vmem:[%s1541_s2] sm:$0xff] %v803_v55  ;;  %v791_v61 = vadd.f32 %v790_v59, %v772_v58 }
  0xe2   :  { %814 = vst [vmem:[%s1541_s2 + $0x10] sm:$0xff] %v808_v56 }
  0xe6   :  { %v804_v62 = vpop.f32.mrf.mxu0 }
  0xe7   :  { %v809_v63 = vpop.f32.mrf.mxu1  ;;  %v805_v0 = vadd.f32 %v804_v62, %v786_v60 }
  0xe8   :  { %v810_v1 = vadd.f32 %v809_v63, %v791_v61 }
  0xe9   :  { %813 = vst [vmem:[%s1541_s2 + $0x8] sm:$0xff] %v805_v0 }
  0xea   :  { %815 = vst [vmem:[%s1541_s2 + $0x18] sm:$0xff] %v810_v1 }

// kernel: forward.159
= control target key start
LH: loop header
LB: loop body
LE: loop exit
PB: predicated region body
PF: predicated region fallthrough
CT: control target
= control target key end

     0   :  { %s1609_s1 = inlined_call_operand.vmem [shape: bf16[512,256], index: 1, kind: input, shape index: {}]   ;;  %s1610_s0 = inlined_call_operand.vmem [shape: f32[32,512], index: 0, kind: input, shape index: {}]   ;;  %s1611_s2 = inlined_call_operand.vmem [shape: f32[1,512], index: 2, kind: input, shape index: {}]   ;;  %s1612_s3 = inlined_call_operand.vmem [shape: f32[1,512], index: 3, kind: input, shape index: {}]   ;;  %s1613_s4 = inlined_call_operand.vmem [shape: f32[32,256], index: 4, kind: output, shape index: {}]  }
   0x1   :  { %v715_v0 = vld [vmem:[%s1609_s1 + $0x70] sm:$0xf]  ;;  %v928_v1 = vld [vmem:[%s1609_s1 + $0x74] sm:$0xf0]  ;;  %v707_v11 = vld [vmem:[%s1609_s1 + $0x60] sm:$0xf] }
   0x2   :  { %v779_v2 = vld [vmem:[%s1609_s1 + $0xf0] sm:$0xf]  ;;  %v716_v3 = vor.u32 %v928_v1, %v715_v0  ;;  %v944_v4 = vld [vmem:[%s1609_s1 + $0xf4] sm:$0xf0]  ;;  %v926_v13 = vld [vmem:[%s1609_s1 + $0x64] sm:$0xf0] }
   0x3   :  { %v843_v5 = vld [vmem:[%s1609_s1 + $0x170] sm:$0xf]  ;;  %v960_v6 = vld [vmem:[%s1609_s1 + $0x174] sm:$0xf0]  ;;  %v780_v7 = vor.u32 %v944_v4, %v779_v2  ;;  %v771_v14 = vld [vmem:[%s1609_s1 + $0xe0] sm:$0xf]  ;;  %v708_v16 = vor.u32 %v926_v13, %v707_v11 }
   0x4   :  { %v844_v8 = vor.u32 %v960_v6, %v843_v5  ;;  %v907_v9 = vld [vmem:[%s1609_s1 + $0x1f0] sm:$0xf]  ;;  %v976_v10 = vld [vmem:[%s1609_s1 + $0x1f4] sm:$0xf0]  ;;  %493 = vmatpush.bf16.msra.mxu0 %v716_v3  ;;  %v942_v15 = vld [vmem:[%s1609_s1 + $0xe4] sm:$0xf0] }
   0x5   :  { %v908_v12 = vor.u32 %v976_v10, %v907_v9  ;;  %512 = vmatpush.bf16.msra.mxu1 %v780_v7  ;;  %v772_v17 = vor.u32 %v942_v15, %v771_v14  ;;  %v835_v18 = vld [vmem:[%s1609_s1 + $0x160] sm:$0xf]  ;;  %v958_v19 = vld [vmem:[%s1609_s1 + $0x164] sm:$0xf0]  ;;  %v699_v23 = vld [vmem:[%s1609_s1 + $0x50] sm:$0xf] }
   0x6   :  { %531 = vmatpush.bf16.msra.mxu2 %v844_v8  ;;  %v899_v20 = vld [vmem:[%s1609_s1 + $0x1e0] sm:$0xf]  ;;  %v836_v21 = vor.u32 %v958_v19, %v835_v18  ;;  %v974_v22 = vld [vmem:[%s1609_s1 + $0x1e4] sm:$0xf0]  ;;  %v924_v24 = vld [vmem:[%s1609_s1 + $0x54] sm:$0xf0] }
   0x7   :  { %550 = vmatpush.bf16.msra.mxu3 %v908_v12  ;;  %v900_v25 = vor.u32 %v974_v22, %v899_v20  ;;  %v763_v26 = vld [vmem:[%s1609_s1 + $0xd0] sm:$0xf]  ;;  %v940_v27 = vld [vmem:[%s1609_s1 + $0xd4] sm:$0xf0]  ;;  %v700_v29 = vor.u32 %v924_v24, %v699_v23  ;;  %v691_v35 = vld [vmem:[%s1609_s1 + $0x40] sm:$0xf] }
   0x8   :  { %v827_v28 = vld [vmem:[%s1609_s1 + $0x150] sm:$0xf]  ;;  %494 = vmatpush.bf16.msra.mxu0 %v708_v16  ;;  %v956_v30 = vld [vmem:[%s1609_s1 + $0x154] sm:$0xf0]  ;;  %v764_v33 = vor.u32 %v940_v27, %v763_v26  ;;  %v922_v36 = vld [vmem:[%s1609_s1 + $0x44] sm:$0xf0] }
   0x9   :  { %v891_v31 = vld [vmem:[%s1609_s1 + $0x1d0] sm:$0xf]  ;;  %v972_v32 = vld [vmem:[%s1609_s1 + $0x1d4] sm:$0xf0]  ;;  %513 = vmatpush.bf16.msra.mxu1 %v772_v17  ;;  %v828_v34 = vor.u32 %v956_v30, %v827_v28  ;;  %v755_v37 = vld [vmem:[%s1609_s1 + $0xc0] sm:$0xf]  ;;  %v692_v44 = vor.u32 %v922_v36, %v691_v35 }
   0xa   :  { %532 = vmatpush.bf16.msra.mxu2 %v836_v21  ;;  %v892_v38 = vor.u32 %v972_v32, %v891_v31  ;;  %v938_v39 = vld [vmem:[%s1609_s1 + $0xc4] sm:$0xf0]  ;;  %v819_v40 = vld [vmem:[%s1609_s1 + $0x140] sm:$0xf]  ;;  %v683_v45 = vld [vmem:[%s1609_s1 + $0x30] sm:$0xf] }
   0xb   :  { %551 = vmatpush.bf16.msra.mxu3 %v900_v25  ;;  %v954_v41 = vld [vmem:[%s1609_s1 + $0x144] sm:$0xf0]  ;;  %v883_v42 = vld [vmem:[%s1609_s1 + $0x1c0] sm:$0xf]  ;;  %v756_v46 = vor.u32 %v938_v39, %v755_v37  ;;  %v920_v48 = vld [vmem:[%s1609_s1 + $0x34] sm:$0xf0] }
   0xc   :  { %v970_v43 = vld [vmem:[%s1609_s1 + $0x1c4] sm:$0xf0]  ;;  %495 = vmatpush.bf16.msra.mxu0 %v700_v29  ;;  %v820_v47 = vor.u32 %v954_v41, %v819_v40  ;;  %v747_v49 = vld [vmem:[%s1609_s1 + $0xb0] sm:$0xf]  ;;  %v936_v50 = vld [vmem:[%s1609_s1 + $0xb4] sm:$0xf0]  ;;  %v684_v58 = vor.u32 %v920_v48, %v683_v45 }
   0xd   :  { %514 = vmatpush.bf16.msra.mxu1 %v764_v33  ;;  %v884_v51 = vor.u32 %v970_v43, %v883_v42  ;;  %v811_v52 = vld [vmem:[%s1609_s1 + $0x130] sm:$0xf]  ;;  %v952_v53 = vld [vmem:[%s1609_s1 + $0x134] sm:$0xf0]  ;;  %v675_v56 = vld [vmem:[%s1609_s1 + $0x20] sm:$0xf]  ;;  %v748_v63 = vor.u32 %v936_v50, %v747_v49 }
   0xe   :  { %533 = vmatpush.bf16.msra.mxu2 %v828_v34  ;;  %v875_v54 = vld [vmem:[%s1609_s1 + $0x1b0] sm:$0xf]  ;;  %v968_v55 = vld [vmem:[%s1609_s1 + $0x1b4] sm:$0xf0]  ;;  %v918_v57 = vld [vmem:[%s1609_s1 + $0x24] sm:$0xf0]  ;;  %v812_v0 = vor.u32 %v952_v53, %v811_v52 }
   0xf   :  { %552 = vmatpush.bf16.msra.mxu3 %v892_v38  ;;  %v739_v59 = vld [vmem:[%s1609_s1 + $0xa0] sm:$0xf]  ;;  %v934_v60 = vld [vmem:[%s1609_s1 + $0xa4] sm:$0xf0]  ;;  %v1149_v3 = vld [vmem:[%s1609_s1 + $0x10] sm:$0xf]  ;;  %v876_v6 = vor.u32 %v968_v55, %v875_v54  ;;  %v676_v13 = vor.u32 %v918_v57, %v675_v56 }
  0x10   :  { %496 = vmatpush.bf16.msra.mxu0 %v692_v44  ;;  %v803_v61 = vld [vmem:[%s1609_s1 + $0x120] sm:$0xf]  ;;  %v950_v62 = vld [vmem:[%s1609_s1 + $0x124] sm:$0xf0]  ;;  %v1154_v4 = vld [vmem:[%s1609_s1 + $0x14] sm:$0xf0]  ;;  %v740_v17 = vor.u32 %v934_v60, %v739_v59 }
  0x11   :  { %515 = vmatpush.bf16.msra.mxu1 %v756_v46  ;;  %v867_v1 = vld [vmem:[%s1609_s1 + $0x1a0] sm:$0xf]  ;;  %v966_v2 = vld [vmem:[%s1609_s1 + $0x1a4] sm:$0xf0]  ;;  %v1159_v5 = vld [vmem:[%s1609_s1 + $0x90] sm:$0xf]  ;;  %v804_v18 = vor.u32 %v950_v62, %v803_v61  ;;  %v668_v23 = vor.u32 %v1154_v4, %v1149_v3 }
  0x12   :  { %534 = vmatpush.bf16.msra.mxu2 %v820_v47  ;;  %v1164_v7 = vld [vmem:[%s1609_s1 + $0x94] sm:$0xf0]  ;;  %v1169_v8 = vld [vmem:[%s1609_s1 + $0x110] sm:$0xf]  ;;  %v1189_v12 = vld [vmem:[%s1609_s1] sm:$0xf]  ;;  %v868_v22 = vor.u32 %v966_v2, %v867_v1 }
  0x13   :  { %553 = vmatpush.bf16.msra.mxu3 %v884_v51  ;;  %v1174_v9 = vld [vmem:[%s1609_s1 + $0x114] sm:$0xf0]  ;;  %v1179_v10 = vld [vmem:[%s1609_s1 + $0x190] sm:$0xf]  ;;  %v1194_v14 = vld [vmem:[%s1609_s1 + $0x4] sm:$0xf0]  ;;  %v732_v24 = vor.u32 %v1164_v7, %v1159_v5 }
  0x14   :  { %v1184_v11 = vld [vmem:[%s1609_s1 + $0x194] sm:$0xf0]  ;;  %497 = vmatpush.bf16.msra.mxu0 %v684_v58  ;;  %v1199_v15 = vld [vmem:[%s1609_s1 + $0x80] sm:$0xf]  ;;  %v1204_v16 = vld [vmem:[%s1609_s1 + $0x84] sm:$0xf0]  ;;  %v796_v25 = vor.u32 %v1174_v9, %v1169_v8  ;;  %v660_v30 = vor.u32 %v1194_v14, %v1189_v12 }
  0x15   :  { %516 = vmatpush.bf16.msra.mxu1 %v748_v63  ;;  %v1209_v19 = vld [vmem:[%s1609_s1 + $0x100] sm:$0xf]  ;;  %v1214_v20 = vld [vmem:[%s1609_s1 + $0x104] sm:$0xf0]  ;;  %v860_v29 = vor.u32 %v1184_v11, %v1179_v10  ;;  %v724_v31 = vor.u32 %v1204_v16, %v1199_v15  ;;  %v19_v41 = vld [vmem:[%s1610_s0 + $0x10] sm:$0xff] }
  0x16   :  { %535 = vmatpush.bf16.msra.mxu2 %v812_v0  ;;  %v1219_v21 = vld [vmem:[%s1609_s1 + $0x180] sm:$0xf]  ;;  %v1230_v26 = vld [vmem:[%s1609_s1 + $0x184] sm:$0xf0]  ;;  %v788_v32 = vor.u32 %v1214_v20, %v1209_v19  ;;  %v23_v43 = vld [vmem:[%s1610_s0 + $0x30] sm:$0xff] }
  0x17   :  { %554 = vmatpush.bf16.msra.mxu3 %v876_v6  ;;  %v17_v27 = vld [vmem:[%s1610_s0] sm:$0xff]  ;;  %v18_v35 = vld [vmem:[%s1610_s0 + $0x8] sm:$0xff]  ;;  %v852_v42 = vor.u32 %v1230_v26, %v1219_v21  ;;  %v20_v46 = vld [vmem:[%s1610_s0 + $0x18] sm:$0xff] }
  0x18   :  { %v21_v28 = vld [vmem:[%s1610_s0 + $0x20] sm:$0xff]  ;;  %498 = vmatpush.bf16.msra.mxu0 %v676_v13  ;;  %v22_v38 = vld [vmem:[%s1610_s0 + $0x28] sm:$0xff]  ;;  %v24_v47 = vld [vmem:[%s1610_s0 + $0x38] sm:$0xff] }
  0x19   :  { %v33_v33 = vld [vmem:[%s1611_s2] sm:$0xf]  ;;  %517 = vmatpush.bf16.msra.mxu1 %v740_v17  ;;  %v959_v53 = vld [vmem:[%s1609_s1 + $0x174] sm:$0xf]  ;;  %v845_v54 = vld [vmem:[%s1609_s1 + $0x178] sm:$0xf0] }
  0x1a   :  { %v59_v34 = vld [vmem:[%s1612_s3] sm:$0xf]  ;;  %v1255_v36 = vperm.slane %v33_v33, 0  ;;  %v1262_v39 = vperm.slane %v33_v33, 1  ;;  %536 = vmatpush.bf16.msra.mxu2 %v804_v18  ;;  %v1274_v44 = vperm.slane %v33_v33, 2  ;;  %v1284_v48 = vperm.slane %v33_v33, 3 }
  0x1b   :  { %v1257_v37 = vperm.slane %v59_v34, 0  ;;  %v1264_v40 = vperm.slane %v59_v34, 1  ;;  %v1276_v45 = vperm.slane %v59_v34, 2  ;;  %555 = vmatpush.bf16.msra.mxu3 %v868_v22  ;;  %v927_v63 = vld [vmem:[%s1609_s1 + $0x74] sm:$0xf]  ;;  %v1315_v4 = vperm.slane %v59_v34, 3 }
  0x1c   :  { %v43_v49 = vmul.f32 %v1255_v36, %v17_v27  ;;  %v47_v50 = vmul.f32 %v1255_v36, %v21_v28  ;;  %v44_v51 = vmul.f32 %v1262_v39, %v18_v35  ;;  %v48_v52 = vmul.f32 %v1262_v39, %v22_v38  ;;  %499 = vmatpush.bf16.msra.mxu0 %v668_v23  ;;  %v717_v0 = vld [vmem:[%s1609_s1 + $0x78] sm:$0xf0]  ;;  %v943_v1 = vld [vmem:[%s1609_s1 + $0xf4] sm:$0xf]  ;;  %v957_v21 = vld [vmem:[%s1609_s1 + $0x164] sm:$0xf] }
  0x1d   :  { %v45_v55 = vmul.f32 %v1274_v44, %v19_v41  ;;  %v49_v56 = vmul.f32 %v1274_v44, %v23_v43  ;;  %v46_v57 = vmul.f32 %v1284_v48, %v20_v46  ;;  %v50_v58 = vmul.f32 %v1284_v48, %v24_v47  ;;  %518 = vmatpush.bf16.msra.mxu1 %v732_v24  ;;  %v781_v6 = vld [vmem:[%s1609_s1 + $0xf8] sm:$0xf0]  ;;  %v975_v7 = vld [vmem:[%s1609_s1 + $0x1f4] sm:$0xf]  ;;  %v837_v22 = vld [vmem:[%s1609_s1 + $0x168] sm:$0xf0] }
  0x1e   :  { %v69_v59 = vadd.f32 %v1257_v37, %v43_v49  ;;  %v73_v60 = vadd.f32 %v1257_v37, %v47_v50  ;;  %v70_v61 = vadd.f32 %v1264_v40, %v44_v51  ;;  %v74_v62 = vadd.f32 %v1264_v40, %v48_v52  ;;  %537 = vmatpush.bf16.msra.mxu2 %v796_v25  ;;  %v909_v12 = vld [vmem:[%s1609_s1 + $0x1f8] sm:$0xf0]  ;;  %v925_v26 = vld [vmem:[%s1609_s1 + $0x64] sm:$0xf]  ;;  %v709_v27 = vld [vmem:[%s1609_s1 + $0x68] sm:$0xf0] }
  0x1f   :  { %v71_v2 = vadd.f32 %v1276_v45, %v45_v55  ;;  %v75_v3 = vadd.f32 %v1276_v45, %v49_v56  ;;  %v848_v5 = vor.u32 %v959_v53, %v845_v54  ;;  %556 = vmatpush.bf16.msra.mxu3 %v860_v29  ;;  %v72_v17 = vadd.f32 %v1315_v4, %v46_v57  ;;  %v941_v28 = vld [vmem:[%s1609_s1 + $0xe4] sm:$0xf]  ;;  %v773_v29 = vld [vmem:[%s1609_s1 + $0xe8] sm:$0xf0]  ;;  %v955_v19 = vld [vmem:[%s1609_s1 + $0x154] sm:$0xf] }
  0x20   :  { %v85_v8 = vmax.f32 %v69_v59, 0.0  ;;  %v89_v9 = vmax.f32 %v73_v60, 0.0  ;;  %v86_v10 = vmax.f32 %v70_v61, 0.0  ;;  %v90_v11 = vmax.f32 %v74_v62, 0.0  ;;  %500 = vmatpush.bf16.msra.mxu0 %v660_v30  ;;  %v25_v30 = vld [vmem:[%s1610_s0 + $0x40] sm:$0xff] }
  0x21   :  { %v87_v13 = vmax.f32 %v71_v2, 0.0  ;;  %v91_v14 = vmax.f32 %v75_v3, 0.0  ;;  %v76_v18 = vadd.f32 %v1315_v4, %v50_v58  ;;  %v784_v25 = vor.u32 %v943_v1, %v781_v6  ;;  %519 = vmatpush.bf16.msra.mxu1 %v724_v31  ;;  %v973_v41 = vld [vmem:[%s1609_s1 + $0x1e4] sm:$0xf]  ;;  %v901_v43 = vld [vmem:[%s1609_s1 + $0x1e8] sm:$0xf0] }
  0x22   :  { %v1334_v23 = vpack.c.bf16 %v89_v9, %v85_v8  ;;  %v1336_v24 = vpack.c.bf16 %v90_v11, %v86_v10  ;;  %538 = vmatpush.bf16.msra.mxu2 %v788_v32  ;;  %v88_v34 = vmax.f32 %v72_v17, 0.0  ;;  %v720_v38 = vor.u32 %v927_v63, %v717_v0  ;;  %v829_v20 = vld [vmem:[%s1609_s1 + $0x158] sm:$0xf0]  ;;  %v1376_v31 = vld [vmem:[%s1609_s1 + $0x54] sm:$0xf]  ;;  %v29_v62 = vld [vmem:[%s1610_s0 + $0x60] sm:$0xff] }
  0x23   :  { %v1359_v33 = vpack.c.bf16 %v91_v14, %v87_v13  ;;  %v92_v35 = vmax.f32 %v76_v18, 0.0  ;;  %557 = vmatpush.bf16.msra.mxu3 %v852_v42  ;;  %v912_v15 = vor.u32 %v975_v7, %v909_v12  ;;  %v840_v16 = vor.u32 %v957_v21, %v837_v22  ;;  %v1384_v46 = vld [vmem:[%s1609_s1 + $0x58] sm:$0xf0]  ;;  %v939_v47 = vld [vmem:[%s1609_s1 + $0xd4] sm:$0xf]  ;;  %v26_v63 = vld [vmem:[%s1610_s0 + $0x48] sm:$0xff] }
  0x24   :  { %501 = vmatmul.bf16.vlgmr.msra.gmra.mxu0 %v1334_v23  ;;  %v776_v42 = vor.u32 %v941_v28, %v773_v29  ;;  %v765_v49 = vld [vmem:[%s1609_s1 + $0xd8] sm:$0xf0]  ;;  %520 = vmatmul.bf16.vlgmr.msra.gmra.mxu1 %v1336_v24  ;;  %v1397_v50 = vld [vmem:[%s1609_s1 + $0x1d4] sm:$0xf]  ;;  %v712_v52 = vor.u32 %v925_v26, %v709_v27  ;;  %v904_v53 = vor.u32 %v973_v41, %v901_v43  ;;  %v953_v54 = vld [vmem:[%s1609_s1 + $0x144] sm:$0xf] }
  0x25   :  { %v1379_v32 = vpack.c.bf16 %v92_v35, %v88_v34  ;;  %588 = vmatpush.bf16.msrb.mxu1 %v784_v25  ;;  %539 = vmatmul.bf16.vlgmr.msra.gmra.mxu2 %v1359_v33  ;;  %v1402_v51 = vld [vmem:[%s1609_s1 + $0x1d8] sm:$0xf0]  ;;  %v821_v55 = vld [vmem:[%s1609_s1 + $0x148] sm:$0xf0]  ;;  %v1414_v56 = vld [vmem:[%s1609_s1 + $0xc4] sm:$0xf]  ;;  %v51_v57 = vmul.f32 %v1255_v36, %v25_v30  ;;  %v832_v58 = vor.u32 %v955_v19, %v829_v20 }
  0x26   :  { %607 = vmatpush.bf16.msrb.mxu2 %v848_v5  ;;  %569 = vmatpush.bf16.msrb.mxu0 %v720_v38  ;;  %v704_v59 = vor.u32 %v1376_v31, %v1384_v46  ;;  %v768_v60 = vor.u32 %v939_v47, %v765_v49  ;;  %v757_v61 = vld [vmem:[%s1609_s1 + $0xc8] sm:$0xf0]  ;;  %v896_v0 = vor.u32 %v1397_v50, %v1402_v51  ;;  %v27_v6 = vld [vmem:[%s1610_s0 + $0x50] sm:$0xff]  ;;  %v28_v11 = vld [vmem:[%s1610_s0 + $0x58] sm:$0xff] }
  0x27   :  { %558 = vmatmul.bf16.vlgmr.msra.gmra.mxu3 %v1379_v32  ;;  %v55_v1 = vmul.f32 %v1255_v36, %v29_v62  ;;  %v77_v2 = vadd.f32 %v1257_v37, %v51_v57  ;;  %v30_v3 = vld [vmem:[%s1610_s0 + $0x68] sm:$0xff]  ;;  %v52_v5 = vmul.f32 %v1262_v39, %v26_v63  ;;  %v31_v7 = vld [vmem:[%s1610_s0 + $0x70] sm:$0xff]  ;;  %v824_v8 = vor.u32 %v953_v54, %v821_v55  ;;  %v32_v12 = vld [vmem:[%s1610_s0 + $0x78] sm:$0xff] }
  0x28   :  { %626 = vmatpush.bf16.msrb.mxu3 %v912_v15  ;;  %v56_v9 = vmul.f32 %v1262_v39, %v30_v3  ;;  %v53_v36 = vmul.f32 %v1274_v44, %v27_v6  ;;  %v57_v10 = vmul.f32 %v1274_v44, %v31_v7  ;;  %v921_v13 = vld [vmem:[%s1609_s1 + $0x44] sm:$0xf]  ;;  %v693_v39 = vld [vmem:[%s1609_s1 + $0x48] sm:$0xf0]  ;;  %v760_v14 = vor.u32 %v1414_v56, %v757_v61  ;;  %v951_v27 = vld [vmem:[%s1609_s1 + $0x134] sm:$0xf] }
  0x29   :  { %589 = vmatpush.bf16.msrb.mxu1 %v776_v42  ;;  %v81_v44 = vadd.f32 %v1257_v37, %v55_v1  ;;  %v78_v17 = vadd.f32 %v1264_v40, %v52_v5  ;;  %v54_v18 = vmul.f32 %v1284_v48, %v28_v11  ;;  %v969_v21 = vld [vmem:[%s1609_s1 + $0x1c4] sm:$0xf]  ;;  %v885_v22 = vld [vmem:[%s1609_s1 + $0x1c8] sm:$0xf0]  ;;  %v93_v28 = vmax.f32 %v77_v2, 0.0 }
  0x2a   :  { %608 = vmatpush.bf16.msrb.mxu2 %v840_v16  ;;  %570 = vmatpush.bf16.msrb.mxu0 %v712_v52  ;;  %v82_v25 = vadd.f32 %v1264_v40, %v56_v9  ;;  %v79_v26 = vadd.f32 %v1276_v45, %v53_v36  ;;  %v83_v37 = vadd.f32 %v1276_v45, %v57_v10  ;;  %v813_v35 = vld [vmem:[%s1609_s1 + $0x138] sm:$0xf0]  ;;  %v935_v40 = vld [vmem:[%s1609_s1 + $0xb4] sm:$0xf]  ;;  %v949_v52 = vld [vmem:[%s1609_s1 + $0x124] sm:$0xf] }
  0x2b   :  { %v97_v29 = vmax.f32 %v81_v44, 0.0  ;;  %v58_v30 = vmul.f32 %v1284_v48, %v32_v12  ;;  %v80_v34 = vadd.f32 %v1315_v4, %v54_v18  ;;  %v94_v45 = vmax.f32 %v78_v17, 0.0  ;;  %v749_v15 = vld [vmem:[%s1609_s1 + $0xb8] sm:$0xf0]  ;;  %v919_v20 = vld [vmem:[%s1609_s1 + $0x34] sm:$0xf] }
  0x2c   :  { %627 = vmatpush.bf16.msrb.mxu3 %v904_v53  ;;  %v98_v38 = vmax.f32 %v82_v25, 0.0  ;;  %v95_v41 = vmax.f32 %v79_v26, 0.0  ;;  %v99_v43 = vmax.f32 %v83_v37, 0.0  ;;  %v696_v48 = vor.u32 %v921_v13, %v693_v39  ;;  %v685_v46 = vld [vmem:[%s1609_s1 + $0x38] sm:$0xf0] }
  0x2d   :  { %590 = vmatpush.bf16.msrb.mxu1 %v768_v60  ;;  %v84_v16 = vadd.f32 %v1315_v4, %v58_v30  ;;  %v96_v19 = vmax.f32 %v80_v34, 0.0  ;;  %v888_v31 = vor.u32 %v969_v21, %v885_v22  ;;  %v816_v42 = vor.u32 %v951_v27, %v813_v35  ;;  %v967_v47 = vld [vmem:[%s1609_s1 + $0x1b4] sm:$0xf]  ;;  %v877_v4 = vld [vmem:[%s1609_s1 + $0x1b8] sm:$0xf0] }
  0x2e   :  { %609 = vmatpush.bf16.msrb.mxu2 %v832_v58  ;;  %571 = vmatpush.bf16.msrb.mxu0 %v704_v59  ;;  %v1497_v49 = vpack.c.bf16 %v97_v29, %v93_v28  ;;  %v752_v51 = vor.u32 %v935_v40, %v749_v15  ;;  %v805_v53 = vld [vmem:[%s1609_s1 + $0x128] sm:$0xf0]  ;;  %v1505_v54 = vpack.c.bf16 %v98_v38, %v94_v45  ;;  %v933_v56 = vld [vmem:[%s1609_s1 + $0xa4] sm:$0xf]  ;;  %v947_v3 = vld [vmem:[%s1609_s1 + $0x114] sm:$0xf] }
  0x2f   :  { %v100_v50 = vmax.f32 %v84_v16, 0.0  ;;  %v1507_v55 = vpack.c.bf16 %v99_v43, %v95_v41  ;;  %v741_v57 = vld [vmem:[%s1609_s1 + $0xa8] sm:$0xf0]  ;;  %v688_v59 = vor.u32 %v919_v20, %v685_v46  ;;  %v880_v60 = vor.u32 %v967_v47, %v877_v4  ;;  %v917_v62 = vld [vmem:[%s1609_s1 + $0x24] sm:$0xf] }
  0x30   :  { %628 = vmatpush.bf16.msrb.mxu3 %v896_v0  ;;  %v808_v61 = vor.u32 %v949_v52, %v805_v53  ;;  %v677_v63 = vld [vmem:[%s1609_s1 + $0x28] sm:$0xf0]  ;;  %v965_v0 = vld [vmem:[%s1609_s1 + $0x1a4] sm:$0xf]  ;;  %v744_v1 = vor.u32 %v933_v56, %v741_v57  ;;  %v797_v5 = vld [vmem:[%s1609_s1 + $0x118] sm:$0xf0] }
  0x31   :  { %591 = vmatpush.bf16.msrb.mxu1 %v760_v14  ;;  %v108_v58 = vpack.c.bf16 %v100_v50, %v96_v19  ;;  %v869_v2 = vld [vmem:[%s1609_s1 + $0x1a8] sm:$0xf0]  ;;  %v931_v6 = vld [vmem:[%s1609_s1 + $0x94] sm:$0xf]  ;;  %v733_v7 = vld [vmem:[%s1609_s1 + $0x98] sm:$0xf0]  ;;  %v800_v36 = vor.u32 %v947_v3, %v797_v5 }
  0x32   :  { %610 = vmatpush.bf16.msrb.mxu2 %v824_v8  ;;  %572 = vmatpush.bf16.msrb.mxu0 %v696_v48  ;;  %v680_v8 = vor.u32 %v917_v62, %v677_v63  ;;  %v872_v9 = vor.u32 %v965_v0, %v869_v2  ;;  %v915_v10 = vld [vmem:[%s1609_s1 + $0x14] sm:$0xf]  ;;  %v669_v11 = vld [vmem:[%s1609_s1 + $0x18] sm:$0xf0]  ;;  %v736_v13 = vor.u32 %v931_v6, %v733_v7  ;;  %v945_v14 = vld [vmem:[%s1609_s1 + $0x104] sm:$0xf] }
  0x33   :  { %v963_v12 = vld [vmem:[%s1609_s1 + $0x194] sm:$0xf]  ;;  %v861_v39 = vld [vmem:[%s1609_s1 + $0x198] sm:$0xf0]  ;;  %v789_v44 = vld [vmem:[%s1609_s1 + $0x108] sm:$0xf0]  ;;  %v672_v21 = vor.u32 %v915_v10, %v669_v11 }
  0x34   :  { %629 = vmatpush.bf16.msrb.mxu3 %v888_v31  ;;  %506 = vmatmul.bf16.gmra.mxu0 %v1497_v49  ;;  %v929_v17 = vld [vmem:[%s1609_s1 + $0x84] sm:$0xf]  ;;  %v725_v18 = vld [vmem:[%s1609_s1 + $0x88] sm:$0xf0]  ;;  %v864_v22 = vor.u32 %v963_v12, %v861_v39  ;;  %v792_v25 = vor.u32 %v945_v14, %v789_v44 }
  0x35   :  { %592 = vmatpush.bf16.msrb.mxu1 %v752_v51  ;;  %544 = vmatmul.bf16.gmra.mxu2 %v1507_v55  ;;  %v913_v26 = vld [vmem:[%s1609_s1 + $0x4] sm:$0xf]  ;;  %v661_v37 = vld [vmem:[%s1609_s1 + $0x8] sm:$0xf0]  ;;  %v728_v27 = vor.u32 %v929_v17, %v725_v18 }
  0x36   :  { %611 = vmatpush.bf16.msrb.mxu2 %v816_v42  ;;  %525 = vmatmul.bf16.gmra.mxu1 %v1505_v54  ;;  %v961_v28 = vld [vmem:[%s1609_s1 + $0x184] sm:$0xf]  ;;  %v853_v29 = vld [vmem:[%s1609_s1 + $0x188] sm:$0xf0]  ;;  %v664_v30 = vor.u32 %v913_v26, %v661_v37 }
  0x37   :  { %563 = vmatmul.bf16.gmra.mxu3 %v108_v58  ;;  %573 = vmatpush.bf16.msrb.mxu0 %v688_v59  ;;  %v856_v34 = vor.u32 %v961_v28, %v853_v29 }
  0x38   :  { %630 = vmatpush.bf16.msrb.mxu3 %v880_v60 }
  0x39   :  { %593 = vmatpush.bf16.msrb.mxu1 %v744_v1 }
  0x3a   :  { %612 = vmatpush.bf16.msrb.mxu2 %v808_v61 }
  0x3b   :  { %574 = vmatpush.bf16.msrb.mxu0 %v680_v8 }
  0x3c   :  { %631 = vmatpush.bf16.msrb.mxu3 %v872_v9 }
  0x3d   :  { %594 = vmatpush.bf16.msrb.mxu1 %v736_v13 }
  0x3e   :  { %613 = vmatpush.bf16.msrb.mxu2 %v800_v36 }
  0x3f   :  { %575 = vmatpush.bf16.msrb.mxu0 %v672_v21 }
  0x40   :  { %632 = vmatpush.bf16.msrb.mxu3 %v864_v22 }
  0x41   :  { %595 = vmatpush.bf16.msrb.mxu1 %v728_v27 }
  0x42   :  { %614 = vmatpush.bf16.msrb.mxu2 %v792_v25 }
  0x43   :  { %576 = vmatpush.bf16.msrb.mxu0 %v664_v30 }
  0x44   :  { %633 = vmatpush.bf16.msrb.mxu3 %v856_v34 }
  0x45   :  { %615 = vmatmul.bf16.vlgmr.msrb.gmra.mxu2 %v1359_v33 }
  0x46   :  { %577 = vmatmul.bf16.vlgmr.msrb.gmra.mxu0 %v1334_v23  ;;  %596 = vmatmul.bf16.vlgmr.msrb.gmra.mxu1 %v1336_v24 }
  0x47   :  { %634 = vmatmul.bf16.vlgmr.msrb.gmra.mxu3 %v1379_v32 }
  0x55   :  { %620 = vmatmul.bf16.gmra.mxu2 %v1507_v55 }
  0x56   :  { %582 = vmatmul.bf16.gmra.mxu0 %v1497_v49  ;;  %601 = vmatmul.bf16.gmra.mxu1 %v1505_v54 }
  0x57   :  { %639 = vmatmul.bf16.gmra.mxu3 %v108_v58 }
  0xa1   :  { %v502_v35 = vpop.f32.mrf.mxu0  ;;  %v521_v40 = vpop.f32.mrf.mxu1 }
  0xa2   :  { %v522_v45 = vadd.f32 %v521_v40, %v502_v35 }
  0xa8   :  { %v540_v38 = vpop.f32.mrf.mxu2 }
  0xa9   :  { %v541_v41 = vadd.f32 %v540_v38, %v522_v45  ;;  %v504_v23 = vpop.f32.mrf.mxu0  ;;  %v523_v15 = vpop.f32.mrf.mxu1 }
  0xaa   :  { %v559_v43 = vpop.f32.mrf.mxu3  ;;  %v524_v33 = vadd.f32 %v523_v15, %v504_v23 }
  0xab   :  { %v560_v24 = vadd.f32 %v559_v43, %v541_v41 }
  0xad   :  { %645 = vst [vmem:[%s1613_s4] sm:$0xff] %v560_v24 }
  0xb0   :  { %v542_v32 = vpop.f32.mrf.mxu2 }
  0xb1   :  { %v543_v48 = vadd.f32 %v542_v32, %v524_v33  ;;  %v507_v19 = vpop.f32.mrf.mxu0 }
  0xb2   :  { %v561_v16 = vpop.f32.mrf.mxu3 }
  0xb3   :  { %v526_v20 = vpop.f32.mrf.mxu1  ;;  %v562_v31 = vadd.f32 %v561_v16, %v543_v48 }
  0xb4   :  { %v527_v42 = vadd.f32 %v526_v20, %v507_v19 }
  0xb5   :  { %647 = vst [vmem:[%s1613_s4 + $0x10] sm:$0xff] %v562_v31 }
  0xb8   :  { %v545_v46 = vpop.f32.mrf.mxu2 }
  0xb9   :  { %v546_v47 = vadd.f32 %v545_v46, %v527_v42  ;;  %v509_v49 = vpop.f32.mrf.mxu0 }
  0xba   :  { %v564_v4 = vpop.f32.mrf.mxu3 }
  0xbb   :  { %v528_v50 = vpop.f32.mrf.mxu1  ;;  %v565_v51 = vadd.f32 %v564_v4, %v546_v47 }
  0xbc   :  { %v529_v52 = vadd.f32 %v528_v50, %v509_v49 }
  0xbd   :  { %649 = vst [vmem:[%s1613_s4 + $0x20] sm:$0xff] %v565_v51 }
  0xc0   :  { %v547_v53 = vpop.f32.mrf.mxu2 }
  0xc1   :  { %v548_v54 = vadd.f32 %v547_v53, %v529_v52 }
  0xc2   :  { %v566_v55 = vpop.f32.mrf.mxu3 }
  0xc3   :  { %v578_v56 = vpop.f32.mrf.mxu0  ;;  %v597_v57 = vpop.f32.mrf.mxu1  ;;  %v567_v58 = vadd.f32 %v566_v55, %v548_v54 }
  0xc4   :  { %v598_v59 = vadd.f32 %v597_v57, %v578_v56 }
  0xc5   :  { %651 = vst [vmem:[%s1613_s4 + $0x30] sm:$0xff] %v567_v58 }
  0xc8   :  { %v616_v60 = vpop.f32.mrf.mxu2 }
  0xc9   :  { %v617_v62 = vadd.f32 %v616_v60, %v598_v59 }
  0xca   :  { %v635_v61 = vpop.f32.mrf.mxu3 }
  0xcb   :  { %v580_v63 = vpop.f32.mrf.mxu0  ;;  %v599_v0 = vpop.f32.mrf.mxu1  ;;  %v636_v1 = vadd.f32 %v635_v61, %v617_v62 }
  0xcc   :  { %v600_v2 = vadd.f32 %v599_v0, %v580_v63 }
  0xcd   :  { %646 = vst [vmem:[%s1613_s4 + $0x8] sm:$0xff] %v636_v1 }
  0xd0   :  { %v618_v3 = vpop.f32.mrf.mxu2 }
  0xd1   :  { %v619_v6 = vadd.f32 %v618_v3, %v600_v2 }
  0xd2   :  { %v637_v5 = vpop.f32.mrf.mxu3 }
  0xd3   :  { %v583_v7 = vpop.f32.mrf.mxu0  ;;  %v602_v8 = vpop.f32.mrf.mxu1  ;;  %v638_v9 = vadd.f32 %v637_v5, %v619_v6 }
  0xd4   :  { %v603_v36 = vadd.f32 %v602_v8, %v583_v7 }
  0xd5   :  { %648 = vst [vmem:[%s1613_s4 + $0x18] sm:$0xff] %v638_v9 }
  0xd8   :  { %v621_v10 = vpop.f32.mrf.mxu2 }
  0xd9   :  { %v622_v12 = vadd.f32 %v621_v10, %v603_v36 }
  0xda   :  { %v640_v11 = vpop.f32.mrf.mxu3 }
  0xdb   :  { %v641_v13 = vadd.f32 %v640_v11, %v622_v12  ;;  %v585_v39 = vpop.f32.mrf.mxu0  ;;  %v604_v14 = vpop.f32.mrf.mxu1 }
  0xdc   :  { %v605_v44 = vadd.f32 %v604_v14, %v585_v39 }
  0xdd   :  { %650 = vst [vmem:[%s1613_s4 + $0x28] sm:$0xff] %v641_v13 }
  0xe0   :  { %v623_v17 = vpop.f32.mrf.mxu2 }
  0xe1   :  { %v624_v18 = vadd.f32 %v623_v17, %v605_v44 }
  0xe2   :  { %v642_v21 = vpop.f32.mrf.mxu3 }
  0xe3   :  { %v643_v22 = vadd.f32 %v642_v21, %v624_v18 }
  0xe5   :  { %652 = vst [vmem:[%s1613_s4 + $0x38] sm:$0xff] %v643_v22 }

// kernel: forward.161
= control target key start
LH: loop header
LB: loop body
LE: loop exit
PB: predicated region body
PF: predicated region fallthrough
CT: control target
= control target key end

     0   :  { %s1348_s1 = inlined_call_operand.vmem [shape: bf16[1152,128], index: 1, kind: input, shape index: {}]   ;;  %s1349_s0 = inlined_call_operand.vmem [shape: f32[8,1152], index: 0, kind: input, shape index: {}]   ;;  %s1350_s2 = inlined_call_operand.vmem [shape: f32[8,128], index: 2, kind: output, shape index: {}]  }
   0x1   :  { %v1022_v0 = vld [vmem:[%s1348_s1 + $0x38] sm:$0xff]  ;;  %v1021_v4 = vld [vmem:[%s1348_s1 + $0x30] sm:$0xff]  ;;  %v1020_v8 = vld [vmem:[%s1348_s1 + $0x28] sm:$0xff] }
   0x2   :  { %v1038_v1 = vld [vmem:[%s1348_s1 + $0xb8] sm:$0xff]  ;;  %605 = vmatpush.bf16.msra.mxu0 %v1022_v0  ;;  %v1037_v5 = vld [vmem:[%s1348_s1 + $0xb0] sm:$0xff]  ;;  %v1036_v9 = vld [vmem:[%s1348_s1 + $0xa8] sm:$0xff] }
   0x3   :  { %v1046_v2 = vld [vmem:[%s1348_s1 + $0xf8] sm:$0xff]  ;;  %631 = vmatpush.bf16.msra.mxu2 %v1038_v1  ;;  %v1045_v6 = vld [vmem:[%s1348_s1 + $0xf0] sm:$0xff]  ;;  %v1044_v10 = vld [vmem:[%s1348_s1 + $0xe8] sm:$0xff] }
   0x4   :  { %v1030_v3 = vld [vmem:[%s1348_s1 + $0x78] sm:$0xff]  ;;  %644 = vmatpush.bf16.msra.mxu3 %v1046_v2  ;;  %v1029_v7 = vld [vmem:[%s1348_s1 + $0x70] sm:$0xff]  ;;  %v1028_v11 = vld [vmem:[%s1348_s1 + $0x68] sm:$0xff] }
   0x5   :  { %618 = vmatpush.bf16.msra.mxu1 %v1030_v3  ;;  %v1019_v12 = vld [vmem:[%s1348_s1 + $0x20] sm:$0xff]  ;;  %v1018_v16 = vld [vmem:[%s1348_s1 + $0x18] sm:$0xff]  ;;  %v1017_v20 = vld [vmem:[%s1348_s1 + $0x10] sm:$0xff] }
   0x6   :  { %606 = vmatpush.bf16.msra.mxu0 %v1021_v4  ;;  %v1035_v13 = vld [vmem:[%s1348_s1 + $0xa0] sm:$0xff]  ;;  %v1034_v17 = vld [vmem:[%s1348_s1 + $0x98] sm:$0xff]  ;;  %v1033_v21 = vld [vmem:[%s1348_s1 + $0x90] sm:$0xff] }
   0x7   :  { %632 = vmatpush.bf16.msra.mxu2 %v1037_v5  ;;  %v1043_v14 = vld [vmem:[%s1348_s1 + $0xe0] sm:$0xff]  ;;  %v1042_v18 = vld [vmem:[%s1348_s1 + $0xd8] sm:$0xff]  ;;  %v1041_v22 = vld [vmem:[%s1348_s1 + $0xd0] sm:$0xff] }
   0x8   :  { %645 = vmatpush.bf16.msra.mxu3 %v1045_v6  ;;  %v1027_v15 = vld [vmem:[%s1348_s1 + $0x60] sm:$0xff]  ;;  %v1026_v19 = vld [vmem:[%s1348_s1 + $0x58] sm:$0xff]  ;;  %v1025_v23 = vld [vmem:[%s1348_s1 + $0x50] sm:$0xff] }
   0x9   :  { %619 = vmatpush.bf16.msra.mxu1 %v1029_v7  ;;  %v1016_v24 = vld [vmem:[%s1348_s1 + $0x8] sm:$0xff]  ;;  %v1015_v28 = vld [vmem:[%s1348_s1] sm:$0xff]  ;;  %v1054_v30 = vld [vmem:[%s1348_s1 + $0x138] sm:$0xff] }
   0xa   :  { %607 = vmatpush.bf16.msra.mxu0 %v1020_v8  ;;  %v1032_v25 = vld [vmem:[%s1348_s1 + $0x88] sm:$0xff]  ;;  %v1031_v29 = vld [vmem:[%s1348_s1 + $0x80] sm:$0xff]  ;;  %v1070_v31 = vld [vmem:[%s1348_s1 + $0x1b8] sm:$0xff] }
   0xb   :  { %633 = vmatpush.bf16.msra.mxu2 %v1036_v9  ;;  %v1040_v26 = vld [vmem:[%s1348_s1 + $0xc8] sm:$0xff]  ;;  %v13_v32 = vld [vmem:[%s1349_s0 + $0x10] sm:$0xff]  ;;  %v11_v33 = vld [vmem:[%s1349_s0] sm:$0xff] }
   0xc   :  { %646 = vmatpush.bf16.msra.mxu3 %v1044_v10  ;;  %v1024_v27 = vld [vmem:[%s1348_s1 + $0x48] sm:$0xff]  ;;  %v1039_v34 = vld [vmem:[%s1348_s1 + $0xc0] sm:$0xff]  ;;  %v1078_v35 = vld [vmem:[%s1348_s1 + $0x1f8] sm:$0xff]  ;;  %v22_v40 = vpack.c.bf16 %v13_v32, %v13_v32  ;;  %v20_v41 = vpack.c.bf16 %v11_v33, %v11_v33 }
   0xd   :  { %620 = vmatpush.bf16.msra.mxu1 %v1028_v11  ;;  %v1023_v36 = vld [vmem:[%s1348_s1 + $0x40] sm:$0xff]  ;;  %v1062_v37 = vld [vmem:[%s1348_s1 + $0x178] sm:$0xff]  ;;  %v12_v39 = vld [vmem:[%s1349_s0 + $0x8] sm:$0xff] }
   0xe   :  { %608 = vmatpush.bf16.msra.mxu0 %v1019_v12  ;;  %v14_v38 = vld [vmem:[%s1349_s0 + $0x18] sm:$0xff]  ;;  %v1053_v42 = vld [vmem:[%s1348_s1 + $0x130] sm:$0xff]  ;;  %v21_v45 = vpack.c.bf16 %v12_v39, %v12_v39  ;;  %v1052_v48 = vld [vmem:[%s1348_s1 + $0x128] sm:$0xff] }
   0xf   :  { %634 = vmatpush.bf16.msra.mxu2 %v1035_v13  ;;  %v1069_v43 = vld [vmem:[%s1348_s1 + $0x1b0] sm:$0xff]  ;;  %v23_v44 = vpack.c.bf16 %v14_v38, %v14_v38  ;;  %v1068_v49 = vld [vmem:[%s1348_s1 + $0x1a8] sm:$0xff]  ;;  %v1051_v52 = vld [vmem:[%s1348_s1 + $0x120] sm:$0xff] }
  0x10   :  { %647 = vmatpush.bf16.msra.mxu3 %v1043_v14  ;;  %v1077_v46 = vld [vmem:[%s1348_s1 + $0x1f0] sm:$0xff]  ;;  %v1076_v50 = vld [vmem:[%s1348_s1 + $0x1e8] sm:$0xff]  ;;  %v1067_v53 = vld [vmem:[%s1348_s1 + $0x1a0] sm:$0xff] }
  0x11   :  { %621 = vmatpush.bf16.msra.mxu1 %v1027_v15  ;;  %v1061_v47 = vld [vmem:[%s1348_s1 + $0x170] sm:$0xff]  ;;  %v1060_v51 = vld [vmem:[%s1348_s1 + $0x168] sm:$0xff]  ;;  %v1075_v54 = vld [vmem:[%s1348_s1 + $0x1e0] sm:$0xff] }
  0x12   :  { %609 = vmatpush.bf16.msra.mxu0 %v1018_v16  ;;  %v1059_v55 = vld [vmem:[%s1348_s1 + $0x160] sm:$0xff]  ;;  %v1050_v56 = vld [vmem:[%s1348_s1 + $0x118] sm:$0xff]  ;;  %v1049_v60 = vld [vmem:[%s1348_s1 + $0x110] sm:$0xff] }
  0x13   :  { %635 = vmatpush.bf16.msra.mxu2 %v1034_v17  ;;  %v1066_v57 = vld [vmem:[%s1348_s1 + $0x198] sm:$0xff]  ;;  %v1065_v61 = vld [vmem:[%s1348_s1 + $0x190] sm:$0xff]  ;;  %v1048_v0 = vld [vmem:[%s1348_s1 + $0x108] sm:$0xff] }
  0x14   :  { %648 = vmatpush.bf16.msra.mxu3 %v1042_v18  ;;  %v1074_v58 = vld [vmem:[%s1348_s1 + $0x1d8] sm:$0xff]  ;;  %v1073_v62 = vld [vmem:[%s1348_s1 + $0x1d0] sm:$0xff]  ;;  %v1064_v1 = vld [vmem:[%s1348_s1 + $0x188] sm:$0xff] }
  0x15   :  { %622 = vmatpush.bf16.msra.mxu1 %v1026_v19  ;;  %v1058_v59 = vld [vmem:[%s1348_s1 + $0x158] sm:$0xff]  ;;  %v1057_v63 = vld [vmem:[%s1348_s1 + $0x150] sm:$0xff]  ;;  %v1072_v2 = vld [vmem:[%s1348_s1 + $0x1c8] sm:$0xff] }
  0x16   :  { %610 = vmatpush.bf16.msra.mxu0 %v1017_v20  ;;  %v1056_v3 = vld [vmem:[%s1348_s1 + $0x148] sm:$0xff]  ;;  %v1047_v4 = vld [vmem:[%s1348_s1 + $0x100] sm:$0xff]  ;;  %v17_v6 = vld [vmem:[%s1349_s0 + $0x30] sm:$0xff] }
  0x17   :  { %636 = vmatpush.bf16.msra.mxu2 %v1033_v21  ;;  %v1063_v5 = vld [vmem:[%s1348_s1 + $0x180] sm:$0xff]  ;;  %v1086_v8 = vld [vmem:[%s1348_s1 + $0x238] sm:$0xff]  ;;  %v26_v12 = vpack.c.bf16 %v17_v6, %v17_v6  ;;  %v16_v14 = vld [vmem:[%s1349_s0 + $0x28] sm:$0xff] }
  0x18   :  { %649 = vmatpush.bf16.msra.mxu3 %v1041_v22  ;;  %v15_v7 = vld [vmem:[%s1349_s0 + $0x20] sm:$0xff]  ;;  %v18_v11 = vld [vmem:[%s1349_s0 + $0x38] sm:$0xff]  ;;  %v1085_v15 = vld [vmem:[%s1348_s1 + $0x230] sm:$0xff]  ;;  %v25_v17 = vpack.c.bf16 %v16_v14, %v16_v14 }
  0x19   :  { %623 = vmatpush.bf16.msra.mxu1 %v1025_v23  ;;  %v1071_v9 = vld [vmem:[%s1348_s1 + $0x1c0] sm:$0xff]  ;;  %v24_v13 = vpack.c.bf16 %v15_v7, %v15_v7  ;;  %v27_v16 = vpack.c.bf16 %v18_v11, %v18_v11  ;;  %v1084_v18 = vld [vmem:[%s1348_s1 + $0x228] sm:$0xff]  ;;  %v1082_v20 = vld [vmem:[%s1348_s1 + $0x218] sm:$0xff] }
  0x1a   :  { %611 = vmatpush.bf16.msra.mxu0 %v1016_v24  ;;  %v1055_v10 = vld [vmem:[%s1348_s1 + $0x140] sm:$0xff]  ;;  %v1081_v21 = vld [vmem:[%s1348_s1 + $0x210] sm:$0xff]  ;;  %v1080_v22 = vld [vmem:[%s1348_s1 + $0x208] sm:$0xff] }
  0x1b   :  { %637 = vmatpush.bf16.msra.mxu2 %v1032_v25  ;;  %v1083_v19 = vld [vmem:[%s1348_s1 + $0x220] sm:$0xff] }
  0x1c   :  { %650 = vmatpush.bf16.msra.mxu3 %v1040_v26  ;;  %v1079_v23 = vld [vmem:[%s1348_s1 + $0x200] sm:$0xff] }
  0x1d   :  { %624 = vmatpush.bf16.msra.mxu1 %v1024_v27  ;;  %v19_v24 = vld [vmem:[%s1349_s0 + $0x40] sm:$0xff] }
  0x1e   :  { %612 = vmatpush.bf16.msra.mxu0 %v1015_v28  ;;  %v28_v25 = vpack.c.bf16 %v19_v24, %v19_v24 }
  0x1f   :  { %638 = vmatpush.bf16.msra.mxu2 %v1031_v29 }
  0x20   :  { %651 = vmatpush.bf16.msra.mxu3 %v1039_v34 }
  0x21   :  { %625 = vmatpush.bf16.msra.mxu1 %v1023_v36  ;;  %613 = vmatmul.bf16.vlgmr.msra.gmra.mxu0 %v20_v41 }
  0x22   :  { %657 = vmatpush.bf16.msrb.mxu0 %v1054_v30  ;;  %639 = vmatmul.bf16.vlgmr.msra.gmra.mxu2 %v22_v40 }
  0x23   :  { %683 = vmatpush.bf16.msrb.mxu2 %v1070_v31  ;;  %652 = vmatmul.bf16.vlgmr.msra.gmra.mxu3 %v23_v44 }
  0x24   :  { %696 = vmatpush.bf16.msrb.mxu3 %v1078_v35  ;;  %626 = vmatmul.bf16.vlgmr.msra.gmra.mxu1 %v21_v45 }
  0x25   :  { %670 = vmatpush.bf16.msrb.mxu1 %v1062_v37 }
  0x26   :  { %658 = vmatpush.bf16.msrb.mxu0 %v1053_v42 }
  0x27   :  { %684 = vmatpush.bf16.msrb.mxu2 %v1069_v43 }
  0x28   :  { %697 = vmatpush.bf16.msrb.mxu3 %v1077_v46 }
  0x29   :  { %671 = vmatpush.bf16.msrb.mxu1 %v1061_v47 }
  0x2a   :  { %659 = vmatpush.bf16.msrb.mxu0 %v1052_v48 }
  0x2b   :  { %685 = vmatpush.bf16.msrb.mxu2 %v1068_v49 }
  0x2c   :  { %698 = vmatpush.bf16.msrb.mxu3 %v1076_v50 }
  0x2d   :  { %672 = vmatpush.bf16.msrb.mxu1 %v1060_v51 }
  0x2e   :  { %660 = vmatpush.bf16.msrb.mxu0 %v1051_v52 }
  0x2f   :  { %686 = vmatpush.bf16.msrb.mxu2 %v1067_v53 }
  0x30   :  { %699 = vmatpush.bf16.msrb.mxu3 %v1075_v54 }
  0x31   :  { %673 = vmatpush.bf16.msrb.mxu1 %v1059_v55 }
  0x32   :  { %661 = vmatpush.bf16.msrb.mxu0 %v1050_v56 }
  0x33   :  { %687 = vmatpush.bf16.msrb.mxu2 %v1066_v57 }
  0x34   :  { %700 = vmatpush.bf16.msrb.mxu3 %v1074_v58 }
  0x35   :  { %674 = vmatpush.bf16.msrb.mxu1 %v1058_v59 }
  0x36   :  { %662 = vmatpush.bf16.msrb.mxu0 %v1049_v60 }
  0x37   :  { %688 = vmatpush.bf16.msrb.mxu2 %v1065_v61 }
  0x38   :  { %701 = vmatpush.bf16.msrb.mxu3 %v1073_v62 }
  0x39   :  { %675 = vmatpush.bf16.msrb.mxu1 %v1057_v63 }
  0x3a   :  { %663 = vmatpush.bf16.msrb.mxu0 %v1048_v0 }
  0x3b   :  { %689 = vmatpush.bf16.msrb.mxu2 %v1064_v1 }
  0x3c   :  { %702 = vmatpush.bf16.msrb.mxu3 %v1072_v2 }
  0x3d   :  { %676 = vmatpush.bf16.msrb.mxu1 %v1056_v3 }
  0x3e   :  { %664 = vmatpush.bf16.msrb.mxu0 %v1047_v4 }
  0x3f   :  { %690 = vmatpush.bf16.msrb.mxu2 %v1063_v5 }
  0x40   :  { %703 = vmatpush.bf16.msrb.mxu3 %v1071_v9 }
  0x41   :  { %677 = vmatpush.bf16.msrb.mxu1 %v1055_v10  ;;  %665 = vmatmul.bf16.vlgmr.msrb.gmra.mxu0 %v24_v13 }
  0x42   :  { %709 = vmatpush.bf16.msra.mxu0 %v1086_v8  ;;  %691 = vmatmul.bf16.vlgmr.msrb.gmra.mxu2 %v26_v12 }
  0x43   :  { %704 = vmatmul.bf16.vlgmr.msrb.gmra.mxu3 %v27_v16 }
  0x44   :  { %678 = vmatmul.bf16.vlgmr.msrb.gmra.mxu1 %v25_v17 }
  0x46   :  { %710 = vmatpush.bf16.msra.mxu0 %v1085_v15 }
  0x4a   :  { %711 = vmatpush.bf16.msra.mxu0 %v1084_v18 }
  0x4e   :  { %712 = vmatpush.bf16.msra.mxu0 %v1083_v19 }
  0x52   :  { %713 = vmatpush.bf16.msra.mxu0 %v1082_v20 }
  0x56   :  { %714 = vmatpush.bf16.msra.mxu0 %v1081_v21 }
  0x5a   :  { %715 = vmatpush.bf16.msra.mxu0 %v1080_v22 }
  0x5e   :  { %716 = vmatpush.bf16.msra.mxu0 %v1079_v23 }
  0x61   :  { %717 = vmatmul.bf16.vlgmr.msra.gmra.mxu0 %v28_v25 }
  0x9e   :  { %v614_v26 = vpop.f32.mrf.mxu0 }
  0xa1   :  { %v627_v27 = vpop.f32.mrf.mxu1 }
  0xa2   :  { %v628_v36 = vadd.f32 %v627_v27, %v614_v26 }
  0xa5   :  { %v640_v28 = vpop.f32.mrf.mxu2 }
  0xa6   :  { %v653_v29 = vpop.f32.mrf.mxu3  ;;  %v616_v30 = vpop.f32.mrf.mxu0  ;;  %v641_v38 = vadd.f32 %v640_v28, %v628_v36 }
  0xa8   :  { %v654_v42 = vadd.f32 %v653_v29, %v641_v38 }
  0xa9   :  { %v629_v31 = vpop.f32.mrf.mxu1 }
  0xad   :  { %v642_v32 = vpop.f32.mrf.mxu2 }
  0xae   :  { %v655_v33 = vpop.f32.mrf.mxu3 }
  0xbe   :  { %v666_v34 = vpop.f32.mrf.mxu0 }
  0xbf   :  { %v667_v44 = vadd.f32 %v666_v34, %v654_v42 }
  0xc1   :  { %v679_v35 = vpop.f32.mrf.mxu1 }
  0xc2   :  { %v680_v46 = vadd.f32 %v679_v35, %v667_v44 }
  0xc5   :  { %v692_v37 = vpop.f32.mrf.mxu2 }
  0xc6   :  { %v705_v39 = vpop.f32.mrf.mxu3  ;;  %v668_v40 = vpop.f32.mrf.mxu0  ;;  %v693_v47 = vadd.f32 %v692_v37, %v680_v46 }
  0xc8   :  { %v706_v48 = vadd.f32 %v705_v39, %v693_v47 }
  0xc9   :  { %v681_v41 = vpop.f32.mrf.mxu1 }
  0xcd   :  { %v694_v43 = vpop.f32.mrf.mxu2 }
  0xce   :  { %v707_v45 = vpop.f32.mrf.mxu3 }
  0xde   :  { %v718_v49 = vpop.f32.mrf.mxu0 }
  0xdf   :  { %v719_v50 = vadd.f32 %v718_v49, %v706_v48 }
  0xe1   :  { %722 = vst [vmem:[%s1350_s2] sm:$0xff] %v719_v50 }
  0xe6   :  { %v720_v51 = vpop.f32.mrf.mxu0 }

// kernel: forward.160
= control target key start
LH: loop header
LB: loop body
LE: loop exit
PB: predicated region body
PF: predicated region fallthrough
CT: control target
= control target key end

     0   :  { %s1339_s1 = inlined_call_operand.vmem [shape: bf16[1024,128], index: 1, kind: input, shape index: {}]   ;;  %s1340_s2 = inlined_call_operand.vmem [shape: f32[1,1024], index: 2, kind: input, shape index: {}]   ;;  %s1341_s0 = inlined_call_operand.vmem [shape: f32[8,1024], index: 0, kind: input, shape index: {}]   ;;  %s1342_s3 = inlined_call_operand.vmem [shape: f32[1,1024], index: 3, kind: input, shape index: {}]   ;;  %s1343_s4 = inlined_call_operand.vmem [shape: f32[1,128], index: 4, kind: input, shape index: {}]   ;;  %s1344_s5 = inlined_call_operand.vmem [shape: f32[1,128], index: 5, kind: input, shape index: {}]   ;;  %s1345_s6 = inlined_call_operand.vmem [shape: f32[8,128], index: 6, kind: output, shape index: {}]  }
   0x1   :  { %v994_v0 = vld [vmem:[%s1339_s1 + $0x38] sm:$0xff]  ;;  %v993_v4 = vld [vmem:[%s1339_s1 + $0x30] sm:$0xff]  ;;  %v992_v8 = vld [vmem:[%s1339_s1 + $0x28] sm:$0xff] }
   0x2   :  { %v1002_v1 = vld [vmem:[%s1339_s1 + $0x78] sm:$0xff]  ;;  %611 = vmatpush.bf16.msra.mxu0 %v994_v0  ;;  %v1001_v5 = vld [vmem:[%s1339_s1 + $0x70] sm:$0xff]  ;;  %v1000_v9 = vld [vmem:[%s1339_s1 + $0x68] sm:$0xff] }
   0x3   :  { %v1010_v2 = vld [vmem:[%s1339_s1 + $0xb8] sm:$0xff]  ;;  %624 = vmatpush.bf16.msra.mxu1 %v1002_v1  ;;  %v1009_v6 = vld [vmem:[%s1339_s1 + $0xb0] sm:$0xff]  ;;  %v1008_v10 = vld [vmem:[%s1339_s1 + $0xa8] sm:$0xff] }
   0x4   :  { %v1018_v3 = vld [vmem:[%s1339_s1 + $0xf8] sm:$0xff]  ;;  %637 = vmatpush.bf16.msra.mxu2 %v1010_v2  ;;  %v1017_v7 = vld [vmem:[%s1339_s1 + $0xf0] sm:$0xff]  ;;  %v1016_v11 = vld [vmem:[%s1339_s1 + $0xe8] sm:$0xff] }
   0x5   :  { %650 = vmatpush.bf16.msra.mxu3 %v1018_v3  ;;  %v991_v12 = vld [vmem:[%s1339_s1 + $0x20] sm:$0xff]  ;;  %v990_v16 = vld [vmem:[%s1339_s1 + $0x18] sm:$0xff]  ;;  %v25_v23 = vld [vmem:[%s1341_s0 + $0x10] sm:$0xff] }
   0x6   :  { %612 = vmatpush.bf16.msra.mxu0 %v993_v4  ;;  %v999_v13 = vld [vmem:[%s1339_s1 + $0x60] sm:$0xff]  ;;  %v998_v18 = vld [vmem:[%s1339_s1 + $0x58] sm:$0xff]  ;;  %v24_v28 = vld [vmem:[%s1341_s0 + $0x8] sm:$0xff] }
   0x7   :  { %625 = vmatpush.bf16.msra.mxu1 %v1001_v5  ;;  %v1007_v14 = vld [vmem:[%s1339_s1 + $0xa0] sm:$0xff]  ;;  %v1006_v19 = vld [vmem:[%s1339_s1 + $0x98] sm:$0xff]  ;;  %v989_v30 = vld [vmem:[%s1339_s1 + $0x10] sm:$0xff] }
   0x8   :  { %638 = vmatpush.bf16.msra.mxu2 %v1009_v6  ;;  %v1015_v15 = vld [vmem:[%s1339_s1 + $0xe0] sm:$0xff]  ;;  %v1014_v20 = vld [vmem:[%s1339_s1 + $0xd8] sm:$0xff]  ;;  %v997_v31 = vld [vmem:[%s1339_s1 + $0x50] sm:$0xff] }
   0x9   :  { %651 = vmatpush.bf16.msra.mxu3 %v1017_v7  ;;  %v1142_v17 = vld [vmem:[%s1340_s2] sm:$0xff]  ;;  %v26_v27 = vld [vmem:[%s1341_s0 + $0x18] sm:$0xff]  ;;  %v1005_v36 = vld [vmem:[%s1339_s1 + $0x90] sm:$0xff] }
   0xa   :  { %613 = vmatpush.bf16.msra.mxu0 %v992_v8  ;;  %v35_v21 = vperm.slane %v1142_v17, 2  ;;  %v33_v22 = vperm.slane %v1142_v17, 0  ;;  %v1161_v24 = vld [vmem:[%s1342_s3] sm:$0xff]  ;;  %v36_v26 = vperm.slane %v1142_v17, 3  ;;  %v34_v29 = vperm.slane %v1142_v17, 1  ;;  %v1013_v37 = vld [vmem:[%s1339_s1 + $0xd0] sm:$0xff] }
   0xb   :  { %626 = vmatpush.bf16.msra.mxu1 %v1000_v9  ;;  %v23_v25 = vld [vmem:[%s1341_s0] sm:$0xff]  ;;  %v61_v33 = vperm.slane %v1161_v24, 2  ;;  %v59_v35 = vperm.slane %v1161_v24, 0  ;;  %v62_v39 = vperm.slane %v1161_v24, 3  ;;  %v60_v41 = vperm.slane %v1161_v24, 1  ;;  %v988_v42 = vld [vmem:[%s1339_s1 + $0x8] sm:$0xff] }
   0xc   :  { %639 = vmatpush.bf16.msra.mxu2 %v1008_v10  ;;  %v51_v32 = vmul.f32 %v35_v21, %v25_v23  ;;  %v49_v34 = vmul.f32 %v33_v22, %v23_v25  ;;  %v52_v38 = vmul.f32 %v36_v26, %v26_v27  ;;  %v50_v40 = vmul.f32 %v34_v29, %v24_v28  ;;  %v996_v43 = vld [vmem:[%s1339_s1 + $0x48] sm:$0xff]  ;;  %v987_v50 = vld [vmem:[%s1339_s1] sm:$0xff]  ;;  %v1026_v58 = vld [vmem:[%s1339_s1 + $0x138] sm:$0xff] }
   0xd   :  { %652 = vmatpush.bf16.msra.mxu3 %v1016_v11  ;;  %v1004_v46 = vld [vmem:[%s1339_s1 + $0x88] sm:$0xff]  ;;  %v995_v51 = vld [vmem:[%s1339_s1 + $0x40] sm:$0xff]  ;;  %v1034_v59 = vld [vmem:[%s1339_s1 + $0x178] sm:$0xff]  ;;  %v39_v22 = vperm.slane %v1142_v17, 6  ;;  %v40_v23 = vperm.slane %v1142_v17, 7  ;;  %v63_v29 = vperm.slane %v1161_v24, 4 }
   0xe   :  { %614 = vmatpush.bf16.msra.mxu0 %v991_v12  ;;  %v77_v44 = vadd.f32 %v61_v33, %v51_v32  ;;  %v75_v45 = vadd.f32 %v59_v35, %v49_v34  ;;  %v1012_v47 = vld [vmem:[%s1339_s1 + $0xc8] sm:$0xff]  ;;  %v78_v48 = vadd.f32 %v62_v39, %v52_v38  ;;  %v76_v49 = vadd.f32 %v60_v41, %v50_v40  ;;  %v1003_v54 = vld [vmem:[%s1339_s1 + $0x80] sm:$0xff]  ;;  %v1042_v60 = vld [vmem:[%s1339_s1 + $0x1b8] sm:$0xff] }
   0xf   :  { %627 = vmatpush.bf16.msra.mxu1 %v999_v13  ;;  %v1011_v55 = vld [vmem:[%s1339_s1 + $0xc0] sm:$0xff]  ;;  %v1050_v61 = vld [vmem:[%s1339_s1 + $0x1f8] sm:$0xff]  ;;  %v1025_v2 = vld [vmem:[%s1339_s1 + $0x130] sm:$0xff]  ;;  %v65_v34 = vperm.slane %v1161_v24, 6 }
  0x10   :  { %640 = vmatpush.bf16.msra.mxu2 %v1007_v14  ;;  %v85_v52 = vmax.f32 %v77_v44, 0.0  ;;  %v83_v53 = vmax.f32 %v75_v45, 0.0  ;;  %v86_v56 = vmax.f32 %v78_v48, 0.0  ;;  %v84_v57 = vmax.f32 %v76_v49, 0.0  ;;  %v1033_v3 = vld [vmem:[%s1339_s1 + $0x170] sm:$0xff]  ;;  %v1024_v6 = vld [vmem:[%s1339_s1 + $0x128] sm:$0xff] }
  0x11   :  { %653 = vmatpush.bf16.msra.mxu3 %v1015_v15  ;;  %v1041_v4 = vld [vmem:[%s1339_s1 + $0x1b0] sm:$0xff]  ;;  %v1032_v7 = vld [vmem:[%s1339_s1 + $0x168] sm:$0xff]  ;;  %v1023_v10 = vld [vmem:[%s1339_s1 + $0x120] sm:$0xff] }
  0x12   :  { %615 = vmatpush.bf16.msra.mxu0 %v990_v16  ;;  %v93_v62 = vpack.c.bf16 %v85_v52, %v85_v52  ;;  %v91_v63 = vpack.c.bf16 %v83_v53, %v83_v53  ;;  %v94_v0 = vpack.c.bf16 %v86_v56, %v86_v56  ;;  %v92_v1 = vpack.c.bf16 %v84_v57, %v84_v57  ;;  %v1049_v5 = vld [vmem:[%s1339_s1 + $0x1f0] sm:$0xff]  ;;  %v1040_v8 = vld [vmem:[%s1339_s1 + $0x1a8] sm:$0xff]  ;;  %v1031_v11 = vld [vmem:[%s1339_s1 + $0x160] sm:$0xff] }
  0x13   :  { %628 = vmatpush.bf16.msra.mxu1 %v998_v18  ;;  %v1048_v9 = vld [vmem:[%s1339_s1 + $0x1e8] sm:$0xff]  ;;  %v1039_v12 = vld [vmem:[%s1339_s1 + $0x1a0] sm:$0xff]  ;;  %v1022_v14 = vld [vmem:[%s1339_s1 + $0x118] sm:$0xff]  ;;  %v37_v16 = vperm.slane %v1142_v17, 4  ;;  %v38_v18 = vperm.slane %v1142_v17, 5  ;;  %v64_v17 = vperm.slane %v1161_v24, 5 }
  0x14   :  { %641 = vmatpush.bf16.msra.mxu2 %v1006_v19  ;;  %v1047_v13 = vld [vmem:[%s1339_s1 + $0x1e0] sm:$0xff]  ;;  %v1030_v15 = vld [vmem:[%s1339_s1 + $0x158] sm:$0xff]  ;;  %v28_v21 = vld [vmem:[%s1341_s0 + $0x28] sm:$0xff] }
  0x15   :  { %654 = vmatpush.bf16.msra.mxu3 %v1014_v20  ;;  %v1038_v19 = vld [vmem:[%s1339_s1 + $0x198] sm:$0xff]  ;;  %v27_v20 = vld [vmem:[%s1341_s0 + $0x20] sm:$0xff]  ;;  %v29_v26 = vld [vmem:[%s1341_s0 + $0x30] sm:$0xff] }
  0x16   :  { %616 = vmatpush.bf16.msra.mxu0 %v989_v30  ;;  %v1046_v25 = vld [vmem:[%s1339_s1 + $0x1d8] sm:$0xff]  ;;  %v53_v28 = vmul.f32 %v37_v16, %v27_v20  ;;  %v54_v30 = vmul.f32 %v38_v18, %v28_v21  ;;  %v1029_v32 = vld [vmem:[%s1339_s1 + $0x150] sm:$0xff]  ;;  %v55_v33 = vmul.f32 %v39_v22, %v29_v26  ;;  %v1020_v41 = vld [vmem:[%s1339_s1 + $0x108] sm:$0xff] }
  0x17   :  { %629 = vmatpush.bf16.msra.mxu1 %v997_v31  ;;  %v30_v27 = vld [vmem:[%s1341_s0 + $0x38] sm:$0xff]  ;;  %v1021_v31 = vld [vmem:[%s1339_s1 + $0x110] sm:$0xff]  ;;  %v1036_v44 = vld [vmem:[%s1339_s1 + $0x188] sm:$0xff] }
  0x18   :  { %642 = vmatpush.bf16.msra.mxu2 %v1005_v36  ;;  %v56_v35 = vmul.f32 %v40_v23, %v30_v27  ;;  %v66_v36 = vperm.slane %v1161_v24, 7  ;;  %v1045_v38 = vld [vmem:[%s1339_s1 + $0x1d0] sm:$0xff]  ;;  %v79_v39 = vadd.f32 %v63_v29, %v53_v28  ;;  %v80_v40 = vadd.f32 %v64_v17, %v54_v30  ;;  %v1028_v24 = vld [vmem:[%s1339_s1 + $0x148] sm:$0xff]  ;;  %v1019_v48 = vld [vmem:[%s1339_s1 + $0x100] sm:$0xff] }
  0x19   :  { %655 = vmatpush.bf16.msra.mxu3 %v1013_v37  ;;  %v1037_v37 = vld [vmem:[%s1339_s1 + $0x190] sm:$0xff]  ;;  %v1044_v45 = vld [vmem:[%s1339_s1 + $0x1c8] sm:$0xff]  ;;  %v1027_v49 = vld [vmem:[%s1339_s1 + $0x140] sm:$0xff] }
  0x1a   :  { %617 = vmatpush.bf16.msra.mxu0 %v988_v42  ;;  %v81_v42 = vadd.f32 %v65_v34, %v55_v33  ;;  %v1035_v52 = vld [vmem:[%s1339_s1 + $0x180] sm:$0xff] }
  0x1b   :  { %630 = vmatpush.bf16.msra.mxu1 %v996_v43  ;;  %v82_v43 = vadd.f32 %v66_v36, %v56_v35  ;;  %v1043_v53 = vld [vmem:[%s1339_s1 + $0x1c0] sm:$0xff] }
  0x1c   :  { %643 = vmatpush.bf16.msra.mxu2 %v1004_v46  ;;  %v87_v46 = vmax.f32 %v79_v39, 0.0  ;;  %v1052_v16 = vld [vmem:[%s1344_s5] ss:$0 sm:$0xff] }
  0x1d   :  { %656 = vmatpush.bf16.msra.mxu3 %v1012_v47  ;;  %v88_v47 = vmax.f32 %v80_v40, 0.0 }
  0x1e   :  { %618 = vmatpush.bf16.msra.mxu0 %v987_v50  ;;  %v89_v50 = vmax.f32 %v81_v42, 0.0 }
  0x1f   :  { %631 = vmatpush.bf16.msra.mxu1 %v995_v51  ;;  %v90_v51 = vmax.f32 %v82_v43, 0.0 }
  0x20   :  { %644 = vmatpush.bf16.msra.mxu2 %v1003_v54  ;;  %v95_v54 = vpack.c.bf16 %v87_v46, %v87_v46  ;;  %v97_v56 = vpack.c.bf16 %v89_v50, %v89_v50 }
  0x21   :  { %657 = vmatpush.bf16.msra.mxu3 %v1011_v55  ;;  %619 = vmatmul.bf16.vlgmr.msra.gmra.mxu0 %v91_v63  ;;  %v96_v55 = vpack.c.bf16 %v88_v47, %v88_v47  ;;  %v98_v57 = vpack.c.bf16 %v90_v51, %v90_v51 }
  0x22   :  { %663 = vmatpush.bf16.msrb.mxu0 %v1026_v58  ;;  %632 = vmatmul.bf16.vlgmr.msra.gmra.mxu1 %v92_v1 }
  0x23   :  { %676 = vmatpush.bf16.msrb.mxu1 %v1034_v59  ;;  %645 = vmatmul.bf16.vlgmr.msra.gmra.mxu2 %v93_v62 }
  0x24   :  { %689 = vmatpush.bf16.msrb.mxu2 %v1042_v60  ;;  %658 = vmatmul.bf16.vlgmr.msra.gmra.mxu3 %v94_v0 }
  0x25   :  { %702 = vmatpush.bf16.msrb.mxu3 %v1050_v61 }
  0x26   :  { %664 = vmatpush.bf16.msrb.mxu0 %v1025_v2 }
  0x27   :  { %677 = vmatpush.bf16.msrb.mxu1 %v1033_v3 }
  0x28   :  { %690 = vmatpush.bf16.msrb.mxu2 %v1041_v4 }
  0x29   :  { %703 = vmatpush.bf16.msrb.mxu3 %v1049_v5 }
  0x2a   :  { %665 = vmatpush.bf16.msrb.mxu0 %v1024_v6 }
  0x2b   :  { %678 = vmatpush.bf16.msrb.mxu1 %v1032_v7 }
  0x2c   :  { %691 = vmatpush.bf16.msrb.mxu2 %v1040_v8 }
  0x2d   :  { %704 = vmatpush.bf16.msrb.mxu3 %v1048_v9 }
  0x2e   :  { %666 = vmatpush.bf16.msrb.mxu0 %v1023_v10 }
  0x2f   :  { %679 = vmatpush.bf16.msrb.mxu1 %v1031_v11 }
  0x30   :  { %692 = vmatpush.bf16.msrb.mxu2 %v1039_v12  ;;  %v1051_v12 = vld [vmem:[%s1343_s4] ss:$0 sm:$0xff] }
  0x31   :  { %705 = vmatpush.bf16.msrb.mxu3 %v1047_v13 }
  0x32   :  { %667 = vmatpush.bf16.msrb.mxu0 %v1022_v14 }
  0x33   :  { %680 = vmatpush.bf16.msrb.mxu1 %v1030_v15 }
  0x34   :  { %693 = vmatpush.bf16.msrb.mxu2 %v1038_v19 }
  0x35   :  { %706 = vmatpush.bf16.msrb.mxu3 %v1046_v25 }
  0x36   :  { %668 = vmatpush.bf16.msrb.mxu0 %v1021_v31 }
  0x37   :  { %681 = vmatpush.bf16.msrb.mxu1 %v1029_v32 }
  0x38   :  { %694 = vmatpush.bf16.msrb.mxu2 %v1037_v37 }
  0x39   :  { %707 = vmatpush.bf16.msrb.mxu3 %v1045_v38 }
  0x3a   :  { %669 = vmatpush.bf16.msrb.mxu0 %v1020_v41 }
  0x3b   :  { %682 = vmatpush.bf16.msrb.mxu1 %v1028_v24 }
  0x3c   :  { %695 = vmatpush.bf16.msrb.mxu2 %v1036_v44 }
  0x3d   :  { %708 = vmatpush.bf16.msrb.mxu3 %v1044_v45 }
  0x3e   :  { %670 = vmatpush.bf16.msrb.mxu0 %v1019_v48 }
  0x3f   :  { %683 = vmatpush.bf16.msrb.mxu1 %v1027_v49 }
  0x40   :  { %696 = vmatpush.bf16.msrb.mxu2 %v1035_v52 }
  0x41   :  { %709 = vmatpush.bf16.msrb.mxu3 %v1043_v53  ;;  %671 = vmatmul.bf16.vlgmr.msrb.gmra.mxu0 %v95_v54 }
  0x42   :  { %684 = vmatmul.bf16.vlgmr.msrb.gmra.mxu1 %v96_v55 }
  0x43   :  { %697 = vmatmul.bf16.vlgmr.msrb.gmra.mxu2 %v97_v56 }
  0x44   :  { %710 = vmatmul.bf16.vlgmr.msrb.gmra.mxu3 %v98_v57 }
  0x9e   :  { %v620_v58 = vpop.f32.mrf.mxu0 }
  0x9f   :  { %v633_v59 = vpop.f32.mrf.mxu1 }
  0xa0   :  { %v634_v2 = vadd.f32 %v633_v59, %v620_v58 }
  0xa6   :  { %v646_v60 = vpop.f32.mrf.mxu2  ;;  %v622_v62 = vpop.f32.mrf.mxu0 }
  0xa7   :  { %v659_v61 = vpop.f32.mrf.mxu3  ;;  %v635_v63 = vpop.f32.mrf.mxu1  ;;  %v647_v3 = vadd.f32 %v646_v60, %v634_v2 }
  0xa9   :  { %v660_v4 = vadd.f32 %v659_v61, %v647_v3 }
  0xae   :  { %v648_v0 = vpop.f32.mrf.mxu2 }
  0xaf   :  { %v661_v1 = vpop.f32.mrf.mxu3 }
  0xbe   :  { %v672_v5 = vpop.f32.mrf.mxu0 }
  0xbf   :  { %v685_v6 = vpop.f32.mrf.mxu1  ;;  %v673_v7 = vadd.f32 %v672_v5, %v660_v4 }
  0xc1   :  { %v686_v8 = vadd.f32 %v685_v6, %v673_v7 }
  0xc6   :  { %v698_v9 = vpop.f32.mrf.mxu2  ;;  %v674_v13 = vpop.f32.mrf.mxu0 }
  0xc7   :  { %v711_v10 = vpop.f32.mrf.mxu3  ;;  %v699_v11 = vadd.f32 %v698_v9, %v686_v8  ;;  %v687_v14 = vpop.f32.mrf.mxu1 }
  0xc9   :  { %v712_v15 = vadd.f32 %v711_v10, %v699_v11 }
  0xcb   :  { %v719_v18 = vmul.f32 %v1051_v12, %v712_v15 }
  0xcd   :  { %v724_v19 = vadd.f32 %v1052_v16, %v719_v18 }
  0xce   :  { %v700_v20 = vpop.f32.mrf.mxu2 }
  0xcf   :  { %v713_v21 = vpop.f32.mrf.mxu3  ;;  %v725_v22 = vmax.f32 %v724_v19, 0.0 }
  0xd1   :  { %726 = vst [vmem:[%s1345_s6] sm:$0xff] %v725_v22 }

// kernel: forward.208
= control target key start
LH: loop header
LB: loop body
LE: loop exit
PB: predicated region body
PF: predicated region fallthrough
CT: control target
= control target key end

     0   :  { %s5010_s1 = inlined_call_operand.vmem [shape: bf16[1024,512], index: 1, kind: input, shape index: {}]   ;;  %s5011_s0 = inlined_call_operand.vmem [shape: f32[8,1024], index: 0, kind: input, shape index: {}]   ;;  %s5012_s2 = inlined_call_operand.vmem [shape: f32[1,1024], index: 2, kind: input, shape index: {}]   ;;  %s5013_s3 = inlined_call_operand.vmem [shape: f32[1,1024], index: 3, kind: input, shape index: {}]   ;;  %s5014_s4 = inlined_call_operand.vmem [shape: f32[8,512], index: 4, kind: output, shape index: {}]  }
   0x1   :  { %v2167_v0 = vld [vmem:[%s5010_s1 + $0xe0] sm:$0xf]  ;;  %v3107_v1 = vld [vmem:[%s5010_s1 + $0xec] sm:$0xf0] }
   0x2   :  { %v2295_v2 = vld [vmem:[%s5010_s1 + $0x1e0] sm:$0xf]  ;;  %v2168_v3 = vor.u32 %v3107_v1, %v2167_v0  ;;  %v3139_v4 = vld [vmem:[%s5010_s1 + $0x1ec] sm:$0xf0] }
   0x3   :  { %v2423_v5 = vld [vmem:[%s5010_s1 + $0x2e0] sm:$0xf]  ;;  %v3171_v6 = vld [vmem:[%s5010_s1 + $0x2ec] sm:$0xf0]  ;;  %v2296_v7 = vor.u32 %v3139_v4, %v2295_v2 }
   0x4   :  { %v2424_v8 = vor.u32 %v3171_v6, %v2423_v5  ;;  %v2551_v9 = vld [vmem:[%s5010_s1 + $0x3e0] sm:$0xf]  ;;  %v3203_v10 = vld [vmem:[%s5010_s1 + $0x3ec] sm:$0xf0]  ;;  %1629 = vmatpush.bf16.msra.mxu0 %v2168_v3 }
   0x5   :  { %v2151_v11 = vld [vmem:[%s5010_s1 + $0xc0] sm:$0xf]  ;;  %v2552_v12 = vor.u32 %v3203_v10, %v2551_v9  ;;  %v3103_v13 = vld [vmem:[%s5010_s1 + $0xcc] sm:$0xf0]  ;;  %1642 = vmatpush.bf16.msra.mxu1 %v2296_v7 }
   0x6   :  { %v2279_v14 = vld [vmem:[%s5010_s1 + $0x1c0] sm:$0xf]  ;;  %v3135_v15 = vld [vmem:[%s5010_s1 + $0x1cc] sm:$0xf0]  ;;  %1655 = vmatpush.bf16.msra.mxu2 %v2424_v8  ;;  %v2152_v16 = vor.u32 %v3103_v13, %v2151_v11 }
   0x7   :  { %v2280_v17 = vor.u32 %v3135_v15, %v2279_v14  ;;  %v2407_v18 = vld [vmem:[%s5010_s1 + $0x2c0] sm:$0xf]  ;;  %v3167_v19 = vld [vmem:[%s5010_s1 + $0x2cc] sm:$0xf0]  ;;  %1668 = vmatpush.bf16.msra.mxu3 %v2552_v12 }
   0x8   :  { %v2535_v20 = vld [vmem:[%s5010_s1 + $0x3c0] sm:$0xf]  ;;  %v2408_v21 = vor.u32 %v3167_v19, %v2407_v18  ;;  %v3199_v22 = vld [vmem:[%s5010_s1 + $0x3cc] sm:$0xf0]  ;;  %1630 = vmatpush.bf16.msra.mxu0 %v2152_v16 }
   0x9   :  { %v2135_v23 = vld [vmem:[%s5010_s1 + $0xa0] sm:$0xf]  ;;  %v3099_v24 = vld [vmem:[%s5010_s1 + $0xac] sm:$0xf0]  ;;  %v2536_v25 = vor.u32 %v3199_v22, %v2535_v20  ;;  %1643 = vmatpush.bf16.msra.mxu1 %v2280_v17 }
   0xa   :  { %v2263_v26 = vld [vmem:[%s5010_s1 + $0x1a0] sm:$0xf]  ;;  %v3131_v27 = vld [vmem:[%s5010_s1 + $0x1ac] sm:$0xf0]  ;;  %v2136_v29 = vor.u32 %v3099_v24, %v2135_v23  ;;  %1656 = vmatpush.bf16.msra.mxu2 %v2408_v21 }
   0xb   :  { %v2391_v28 = vld [vmem:[%s5010_s1 + $0x2a0] sm:$0xf]  ;;  %v3163_v30 = vld [vmem:[%s5010_s1 + $0x2ac] sm:$0xf0]  ;;  %v2264_v33 = vor.u32 %v3131_v27, %v2263_v26  ;;  %1669 = vmatpush.bf16.msra.mxu3 %v2536_v25 }
   0xc   :  { %v2519_v31 = vld [vmem:[%s5010_s1 + $0x3a0] sm:$0xf]  ;;  %v3195_v32 = vld [vmem:[%s5010_s1 + $0x3ac] sm:$0xf0]  ;;  %v2392_v34 = vor.u32 %v3163_v30, %v2391_v28  ;;  %1631 = vmatpush.bf16.msra.mxu0 %v2136_v29 }
   0xd   :  { %v2119_v35 = vld [vmem:[%s5010_s1 + $0x80] sm:$0xf]  ;;  %v3095_v36 = vld [vmem:[%s5010_s1 + $0x8c] sm:$0xf0]  ;;  %v2520_v38 = vor.u32 %v3195_v32, %v2519_v31  ;;  %1644 = vmatpush.bf16.msra.mxu1 %v2264_v33 }
   0xe   :  { %v2247_v37 = vld [vmem:[%s5010_s1 + $0x180] sm:$0xf]  ;;  %v3127_v39 = vld [vmem:[%s5010_s1 + $0x18c] sm:$0xf0]  ;;  %v2120_v44 = vor.u32 %v3095_v36, %v2119_v35  ;;  %1657 = vmatpush.bf16.msra.mxu2 %v2392_v34 }
   0xf   :  { %v2375_v40 = vld [vmem:[%s5010_s1 + $0x280] sm:$0xf]  ;;  %v3159_v41 = vld [vmem:[%s5010_s1 + $0x28c] sm:$0xf0]  ;;  %v2248_v45 = vor.u32 %v3127_v39, %v2247_v37  ;;  %1670 = vmatpush.bf16.msra.mxu3 %v2520_v38 }
  0x10   :  { %v2503_v42 = vld [vmem:[%s5010_s1 + $0x380] sm:$0xf]  ;;  %v3191_v43 = vld [vmem:[%s5010_s1 + $0x38c] sm:$0xf0]  ;;  %v2376_v46 = vor.u32 %v3159_v41, %v2375_v40  ;;  %1632 = vmatpush.bf16.msra.mxu0 %v2120_v44 }
  0x11   :  { %v2103_v47 = vld [vmem:[%s5010_s1 + $0x60] sm:$0xf]  ;;  %v3091_v48 = vld [vmem:[%s5010_s1 + $0x6c] sm:$0xf0]  ;;  %v2504_v50 = vor.u32 %v3191_v43, %v2503_v42  ;;  %1645 = vmatpush.bf16.msra.mxu1 %v2248_v45 }
  0x12   :  { %v2231_v49 = vld [vmem:[%s5010_s1 + $0x160] sm:$0xf]  ;;  %v3123_v51 = vld [vmem:[%s5010_s1 + $0x16c] sm:$0xf0]  ;;  %v2104_v56 = vor.u32 %v3091_v48, %v2103_v47  ;;  %1658 = vmatpush.bf16.msra.mxu2 %v2376_v46 }
  0x13   :  { %v2359_v52 = vld [vmem:[%s5010_s1 + $0x260] sm:$0xf]  ;;  %v3155_v53 = vld [vmem:[%s5010_s1 + $0x26c] sm:$0xf0]  ;;  %v2232_v57 = vor.u32 %v3123_v51, %v2231_v49  ;;  %1671 = vmatpush.bf16.msra.mxu3 %v2504_v50 }
  0x14   :  { %v2487_v54 = vld [vmem:[%s5010_s1 + $0x360] sm:$0xf]  ;;  %v3187_v55 = vld [vmem:[%s5010_s1 + $0x36c] sm:$0xf0]  ;;  %v2360_v58 = vor.u32 %v3155_v53, %v2359_v52  ;;  %1633 = vmatpush.bf16.msra.mxu0 %v2104_v56 }
  0x15   :  { %v2087_v59 = vld [vmem:[%s5010_s1 + $0x40] sm:$0xf]  ;;  %v3087_v60 = vld [vmem:[%s5010_s1 + $0x4c] sm:$0xf0]  ;;  %v2488_v62 = vor.u32 %v3187_v55, %v2487_v54  ;;  %1646 = vmatpush.bf16.msra.mxu1 %v2232_v57 }
  0x16   :  { %v2215_v61 = vld [vmem:[%s5010_s1 + $0x140] sm:$0xf]  ;;  %v3119_v63 = vld [vmem:[%s5010_s1 + $0x14c] sm:$0xf0]  ;;  %v2088_v4 = vor.u32 %v3087_v60, %v2087_v59  ;;  %1659 = vmatpush.bf16.msra.mxu2 %v2360_v58 }
  0x17   :  { %v2343_v0 = vld [vmem:[%s5010_s1 + $0x240] sm:$0xf]  ;;  %v3151_v1 = vld [vmem:[%s5010_s1 + $0x24c] sm:$0xf0]  ;;  %v2216_v5 = vor.u32 %v3119_v63, %v2215_v61  ;;  %1672 = vmatpush.bf16.msra.mxu3 %v2488_v62 }
  0x18   :  { %v2471_v2 = vld [vmem:[%s5010_s1 + $0x340] sm:$0xf]  ;;  %v3183_v3 = vld [vmem:[%s5010_s1 + $0x34c] sm:$0xf0]  ;;  %v2344_v6 = vor.u32 %v3151_v1, %v2343_v0  ;;  %1634 = vmatpush.bf16.msra.mxu0 %v2088_v4 }
  0x19   :  { %v2071_v7 = vld [vmem:[%s5010_s1 + $0x20] sm:$0xf]  ;;  %v3083_v8 = vld [vmem:[%s5010_s1 + $0x2c] sm:$0xf0]  ;;  %v2472_v10 = vor.u32 %v3183_v3, %v2471_v2  ;;  %1647 = vmatpush.bf16.msra.mxu1 %v2216_v5 }
  0x1a   :  { %v2199_v9 = vld [vmem:[%s5010_s1 + $0x120] sm:$0xf]  ;;  %v3115_v11 = vld [vmem:[%s5010_s1 + $0x12c] sm:$0xf0]  ;;  %v2072_v16 = vor.u32 %v3083_v8, %v2071_v7  ;;  %1660 = vmatpush.bf16.msra.mxu2 %v2344_v6 }
  0x1b   :  { %v2327_v12 = vld [vmem:[%s5010_s1 + $0x220] sm:$0xf]  ;;  %v3147_v13 = vld [vmem:[%s5010_s1 + $0x22c] sm:$0xf0]  ;;  %v2200_v19 = vor.u32 %v3115_v11, %v2199_v9  ;;  %1673 = vmatpush.bf16.msra.mxu3 %v2472_v10 }
  0x1c   :  { %v2455_v14 = vld [vmem:[%s5010_s1 + $0x320] sm:$0xf]  ;;  %v3179_v15 = vld [vmem:[%s5010_s1 + $0x32c] sm:$0xf0]  ;;  %v2328_v20 = vor.u32 %v3147_v13, %v2327_v12  ;;  %1635 = vmatpush.bf16.msra.mxu0 %v2072_v16 }
  0x1d   :  { %v2055_v17 = vld [vmem:[%s5010_s1] sm:$0xf]  ;;  %v3079_v18 = vld [vmem:[%s5010_s1 + $0xc] sm:$0xf0]  ;;  %v2456_v24 = vor.u32 %v3179_v15, %v2455_v14  ;;  %1648 = vmatpush.bf16.msra.mxu1 %v2200_v19  ;;  %v20_v19 = vld [vmem:[%s5011_s0 + $0x18] sm:$0xff] }
  0x1e   :  { %v2183_v21 = vld [vmem:[%s5010_s1 + $0x100] sm:$0xf]  ;;  %v3111_v22 = vld [vmem:[%s5010_s1 + $0x10c] sm:$0xf0]  ;;  %v2056_v31 = vor.u32 %v3079_v18, %v2055_v17  ;;  %1661 = vmatpush.bf16.msra.mxu2 %v2328_v20 }
  0x1f   :  { %v2311_v23 = vld [vmem:[%s5010_s1 + $0x200] sm:$0xf]  ;;  %v3143_v25 = vld [vmem:[%s5010_s1 + $0x20c] sm:$0xf0]  ;;  %v2184_v35 = vor.u32 %v3111_v22, %v2183_v21  ;;  %1674 = vmatpush.bf16.msra.mxu3 %v2456_v24  ;;  %v18_v22 = vld [vmem:[%s5011_s0 + $0x8] sm:$0xff] }
  0x20   :  { %v2439_v26 = vld [vmem:[%s5010_s1 + $0x300] sm:$0xf]  ;;  %v3175_v27 = vld [vmem:[%s5010_s1 + $0x30c] sm:$0xf0]  ;;  %v2312_v36 = vor.u32 %v3143_v25, %v2311_v23  ;;  %1636 = vmatpush.bf16.msra.mxu0 %v2056_v31 }
  0x21   :  { %v2679_v28 = vld [vmem:[%s5010_s1 + $0x4e0] sm:$0xf]  ;;  %v3235_v29 = vld [vmem:[%s5010_s1 + $0x4ec] sm:$0xf0]  ;;  %v2440_v39 = vor.u32 %v3175_v27, %v2439_v26  ;;  %1649 = vmatpush.bf16.msra.mxu1 %v2184_v35 }
  0x22   :  { %v2807_v30 = vld [vmem:[%s5010_s1 + $0x5e0] sm:$0xf]  ;;  %v3267_v32 = vld [vmem:[%s5010_s1 + $0x5ec] sm:$0xf0]  ;;  %v2680_v40 = vor.u32 %v3235_v29, %v2679_v28  ;;  %1662 = vmatpush.bf16.msra.mxu2 %v2312_v36 }
  0x23   :  { %v2935_v33 = vld [vmem:[%s5010_s1 + $0x6e0] sm:$0xf]  ;;  %v3299_v34 = vld [vmem:[%s5010_s1 + $0x6ec] sm:$0xf0]  ;;  %v2808_v41 = vor.u32 %v3267_v32, %v2807_v30  ;;  %1675 = vmatpush.bf16.msra.mxu3 %v2440_v39 }
  0x24   :  { %v3063_v37 = vld [vmem:[%s5010_s1 + $0x7e0] sm:$0xf]  ;;  %v3331_v38 = vld [vmem:[%s5010_s1 + $0x7ec] sm:$0xf0]  ;;  %v2936_v42 = vor.u32 %v3299_v34, %v2935_v33  ;;  %1681 = vmatpush.bf16.msrb.mxu0 %v2680_v40 }
  0x25   :  { %v2663_v43 = vld [vmem:[%s5010_s1 + $0x4c0] sm:$0xf]  ;;  %v3231_v44 = vld [vmem:[%s5010_s1 + $0x4cc] sm:$0xf0]  ;;  %v3064_v46 = vor.u32 %v3331_v38, %v3063_v37  ;;  %1694 = vmatpush.bf16.msrb.mxu1 %v2808_v41 }
  0x26   :  { %v2791_v45 = vld [vmem:[%s5010_s1 + $0x5c0] sm:$0xf]  ;;  %v3263_v47 = vld [vmem:[%s5010_s1 + $0x5cc] sm:$0xf0]  ;;  %v2664_v53 = vor.u32 %v3231_v44, %v2663_v43  ;;  %1707 = vmatpush.bf16.msrb.mxu2 %v2936_v42 }
  0x27   :  { %v2919_v48 = vld [vmem:[%s5010_s1 + $0x6c0] sm:$0xf]  ;;  %v3295_v49 = vld [vmem:[%s5010_s1 + $0x6cc] sm:$0xf0]  ;;  %v2792_v57 = vor.u32 %v3263_v47, %v2791_v45  ;;  %1720 = vmatpush.bf16.msrb.mxu3 %v3064_v46 }
  0x28   :  { %v3047_v50 = vld [vmem:[%s5010_s1 + $0x7c0] sm:$0xf]  ;;  %v3327_v51 = vld [vmem:[%s5010_s1 + $0x7cc] sm:$0xf0]  ;;  %v2920_v58 = vor.u32 %v3295_v49, %v2919_v48  ;;  %1682 = vmatpush.bf16.msrb.mxu0 %v2664_v53 }
  0x29   :  { %v2647_v52 = vld [vmem:[%s5010_s1 + $0x4a0] sm:$0xf]  ;;  %v3227_v54 = vld [vmem:[%s5010_s1 + $0x4ac] sm:$0xf0]  ;;  %v3048_v62 = vor.u32 %v3327_v51, %v3047_v50  ;;  %1695 = vmatpush.bf16.msrb.mxu1 %v2792_v57 }
  0x2a   :  { %v2775_v55 = vld [vmem:[%s5010_s1 + $0x5a0] sm:$0xf]  ;;  %v3259_v56 = vld [vmem:[%s5010_s1 + $0x5ac] sm:$0xf0]  ;;  %v2648_v6 = vor.u32 %v3227_v54, %v2647_v52  ;;  %1708 = vmatpush.bf16.msrb.mxu2 %v2920_v58 }
  0x2b   :  { %v2903_v59 = vld [vmem:[%s5010_s1 + $0x6a0] sm:$0xf]  ;;  %v3291_v60 = vld [vmem:[%s5010_s1 + $0x6ac] sm:$0xf0]  ;;  %v2776_v10 = vor.u32 %v3259_v56, %v2775_v55  ;;  %1721 = vmatpush.bf16.msrb.mxu3 %v3048_v62 }
  0x2c   :  { %v3031_v61 = vld [vmem:[%s5010_s1 + $0x7a0] sm:$0xf]  ;;  %v19_v63 = vld [vmem:[%s5011_s0 + $0x10] sm:$0xff]  ;;  %v2904_v11 = vor.u32 %v3291_v60, %v2903_v59  ;;  %1683 = vmatpush.bf16.msrb.mxu0 %v2648_v6 }
  0x2d   :  { %v3625_v0 = vld [vmem:[%s5012_s2] sm:$0xff]  ;;  %v3323_v2 = vld [vmem:[%s5010_s1 + $0x7ac] sm:$0xf0]  ;;  %1696 = vmatpush.bf16.msrb.mxu1 %v2776_v10 }
  0x2e   :  { %v3630_v1 = vld [vmem:[%s5013_s3] sm:$0xff]  ;;  %v29_v4 = vperm.slane %v3625_v0, 2  ;;  %v3223_v7 = vld [vmem:[%s5010_s1 + $0x48c] sm:$0xf0]  ;;  %v27_v16 = vperm.slane %v3625_v0, 0  ;;  %v3032_v17 = vor.u32 %v3323_v2, %v3031_v61  ;;  %v30_v20 = vperm.slane %v3625_v0, 3  ;;  %1709 = vmatpush.bf16.msrb.mxu2 %v2904_v11 }
  0x2f   :  { %v2631_v3 = vld [vmem:[%s5010_s1 + $0x480] sm:$0xf]  ;;  %v55_v5 = vperm.slane %v3630_v1, 2  ;;  %v3255_v9 = vld [vmem:[%s5010_s1 + $0x58c] sm:$0xf0]  ;;  %v53_v18 = vperm.slane %v3630_v1, 0 }
  0x30   :  { %v2759_v8 = vld [vmem:[%s5010_s1 + $0x580] sm:$0xf]  ;;  %v3287_v13 = vld [vmem:[%s5010_s1 + $0x68c] sm:$0xf0]  ;;  %v45_v14 = vmul.f32 %v29_v4, %v19_v63  ;;  %v56_v21 = vperm.slane %v3630_v1, 3  ;;  %v28_v27 = vperm.slane %v3625_v0, 1  ;;  %v2632_v29 = vor.u32 %v3223_v7, %v2631_v3  ;;  %1722 = vmatpush.bf16.msrb.mxu3 %v3032_v17 }
  0x31   :  { %v2887_v12 = vld [vmem:[%s5010_s1 + $0x680] sm:$0xf]  ;;  %v3319_v24 = vld [vmem:[%s5010_s1 + $0x78c] sm:$0xf0]  ;;  %v54_v28 = vperm.slane %v3630_v1, 1  ;;  %v2760_v30 = vor.u32 %v3255_v9, %v2759_v8  ;;  %v46_v32 = vmul.f32 %v30_v20, %v20_v19  ;;  %v33_v52 = vperm.slane %v3625_v0, 6 }
  0x32   :  { %v17_v15 = vld [vmem:[%s5011_s0] sm:$0xff]  ;;  %v71_v25 = vadd.f32 %v55_v5, %v45_v14  ;;  %v2888_v33 = vor.u32 %v3287_v13, %v2887_v12  ;;  %v3219_v34 = vld [vmem:[%s5010_s1 + $0x46c] sm:$0xf0]  ;;  %v44_v38 = vmul.f32 %v28_v27, %v18_v22  ;;  %1684 = vmatpush.bf16.msrb.mxu0 %v2632_v29  ;;  %v59_v11 = vperm.slane %v3630_v1, 6 }
  0x33   :  { %v3015_v23 = vld [vmem:[%s5010_s1 + $0x780] sm:$0xf]  ;;  %v43_v26 = vmul.f32 %v27_v16, %v17_v15  ;;  %v3251_v40 = vld [vmem:[%s5010_s1 + $0x56c] sm:$0xf0]  ;;  %v72_v43 = vadd.f32 %v56_v21, %v46_v32  ;;  %1697 = vmatpush.bf16.msrb.mxu1 %v2760_v30  ;;  %v60_v32 = vperm.slane %v3630_v1, 7 }
  0x34   :  { %v2615_v31 = vld [vmem:[%s5010_s1 + $0x460] sm:$0xf]  ;;  %v79_v36 = vmax.f32 %v71_v25, 0.0  ;;  %v3016_v39 = vor.u32 %v3319_v24, %v3015_v23  ;;  %v3283_v42 = vld [vmem:[%s5010_s1 + $0x66c] sm:$0xf0]  ;;  %v70_v48 = vadd.f32 %v54_v28, %v44_v38  ;;  %1710 = vmatpush.bf16.msrb.mxu2 %v2888_v33  ;;  %v31_v23 = vperm.slane %v3625_v0, 4 }
  0x35   :  { %v2743_v35 = vld [vmem:[%s5010_s1 + $0x560] sm:$0xf]  ;;  %v69_v37 = vadd.f32 %v53_v18, %v43_v26  ;;  %v3315_v45 = vld [vmem:[%s5010_s1 + $0x76c] sm:$0xf0]  ;;  %v2616_v49 = vor.u32 %v3219_v34, %v2615_v31  ;;  %v80_v51 = vmax.f32 %v72_v43, 0.0  ;;  %v57_v24 = vperm.slane %v3630_v1, 4 }
  0x36   :  { %v2871_v41 = vld [vmem:[%s5010_s1 + $0x660] sm:$0xf]  ;;  %v3700_v46 = vpack.c.bf16 %v79_v36, %v79_v36  ;;  %v2744_v53 = vor.u32 %v3251_v40, %v2743_v35  ;;  %v3215_v55 = vld [vmem:[%s5010_s1 + $0x44c] sm:$0xf0]  ;;  %v78_v58 = vmax.f32 %v70_v48, 0.0  ;;  %1723 = vmatpush.bf16.msrb.mxu3 %v3016_v39  ;;  %v24_v25 = vld [vmem:[%s5011_s0 + $0x38] sm:$0xff] }
  0x37   :  { %v2999_v44 = vld [vmem:[%s5010_s1 + $0x760] sm:$0xf]  ;;  %v77_v47 = vmax.f32 %v69_v37, 0.0  ;;  %v2872_v54 = vor.u32 %v3283_v42, %v2871_v41  ;;  %v23_v59 = vld [vmem:[%s5011_s0 + $0x30] sm:$0xff]  ;;  %v3727_v2 = vpack.c.bf16 %v80_v51, %v80_v51  ;;  %1685 = vmatpush.bf16.msrb.mxu0 %v2616_v49  ;;  %v34_v31 = vperm.slane %v3625_v0, 7  ;;  %v22_v43 = vld [vmem:[%s5011_s0 + $0x28] sm:$0xff] }
  0x38   :  { %v2599_v50 = vld [vmem:[%s5010_s1 + $0x440] sm:$0xf]  ;;  %v3000_v60 = vor.u32 %v3315_v45, %v2999_v44  ;;  %1663 = vmatmul.bf16.vlgmr.msra.gmra.mxu2 %v3700_v46  ;;  %v3247_v61 = vld [vmem:[%s5010_s1 + $0x54c] sm:$0xf0]  ;;  %v3736_v5 = vpack.c.bf16 %v78_v58, %v78_v58  ;;  %v49_v10 = vmul.f32 %v33_v52, %v23_v59  ;;  %1698 = vmatpush.bf16.msrb.mxu1 %v2744_v53  ;;  %v3105_v40 = vld [vmem:[%s5010_s1 + $0xe4] sm:$0xf] }
  0x39   :  { %v2727_v56 = vld [vmem:[%s5010_s1 + $0x540] sm:$0xf]  ;;  %v3712_v57 = vpack.c.bf16 %v77_v47, %v77_v47  ;;  %v3279_v63 = vld [vmem:[%s5010_s1 + $0x64c] sm:$0xf0]  ;;  %v2600_v7 = vor.u32 %v3215_v55, %v2599_v50  ;;  %1676 = vmatmul.bf16.vlgmr.msra.gmra.mxu3 %v3727_v2  ;;  %1711 = vmatpush.bf16.msrb.mxu2 %v2872_v54  ;;  %v2169_v41 = vld [vmem:[%s5010_s1 + $0xf0] sm:$0xf0]  ;;  %v50_v42 = vmul.f32 %v34_v31, %v24_v25 }
  0x3a   :  { %v2855_v62 = vld [vmem:[%s5010_s1 + $0x640] sm:$0xf]  ;;  %v3311_v4 = vld [vmem:[%s5010_s1 + $0x74c] sm:$0xf0]  ;;  %v2728_v12 = vor.u32 %v3247_v61, %v2727_v56  ;;  %1724 = vmatpush.bf16.msrb.mxu3 %v3000_v60  ;;  %1650 = vmatmul.bf16.vlgmr.msra.gmra.mxu1 %v3736_v5  ;;  %v75_v30 = vadd.f32 %v59_v11, %v49_v10  ;;  %v3137_v44 = vld [vmem:[%s5010_s1 + $0x1e4] sm:$0xf] }
  0x3b   :  { %v2983_v3 = vld [vmem:[%s5010_s1 + $0x740] sm:$0xf]  ;;  %1637 = vmatmul.bf16.vlgmr.msra.gmra.mxu0 %v3712_v57  ;;  %v3211_v8 = vld [vmem:[%s5010_s1 + $0x42c] sm:$0xf0]  ;;  %v2856_v13 = vor.u32 %v3279_v63, %v2855_v62  ;;  %v2297_v45 = vld [vmem:[%s5010_s1 + $0x1f0] sm:$0xf0]  ;;  %v76_v53 = vadd.f32 %v60_v32, %v50_v42  ;;  %v2172_v62 = vor.u32 %v3105_v40, %v2169_v41 }
  0x3c   :  { %v2583_v6 = vld [vmem:[%s5010_s1 + $0x420] sm:$0xf]  ;;  %v3243_v14 = vld [vmem:[%s5010_s1 + $0x52c] sm:$0xf0]  ;;  %v2984_v17 = vor.u32 %v3311_v4, %v2983_v3  ;;  %1686 = vmatpush.bf16.msrb.mxu0 %v2600_v7  ;;  %1699 = vmatpush.bf16.msrb.mxu1 %v2728_v12  ;;  %v32_v48 = vperm.slane %v3625_v0, 5  ;;  %v83_v52 = vmax.f32 %v75_v30, 0.0  ;;  %v2300_v3 = vor.u32 %v3137_v44, %v2297_v45 }
  0x3d   :  { %v2711_v9 = vld [vmem:[%s5010_s1 + $0x520] sm:$0xf]  ;;  %v3275_v16 = vld [vmem:[%s5010_s1 + $0x62c] sm:$0xf0]  ;;  %v2584_v26 = vor.u32 %v3211_v8, %v2583_v6  ;;  %1712 = vmatpush.bf16.msrb.mxu2 %v2856_v13  ;;  %v3169_v50 = vld [vmem:[%s5010_s1 + $0x2e4] sm:$0xf] }
  0x3e   :  { %v2839_v15 = vld [vmem:[%s5010_s1 + $0x620] sm:$0xf]  ;;  %v3307_v19 = vld [vmem:[%s5010_s1 + $0x72c] sm:$0xf0]  ;;  %v2712_v33 = vor.u32 %v3243_v14, %v2711_v9  ;;  %1725 = vmatpush.bf16.msrb.mxu3 %v2984_v17  ;;  %v2425_v51 = vld [vmem:[%s5010_s1 + $0x2f0] sm:$0xf0]  ;;  %v48_v60 = vmul.f32 %v32_v48, %v22_v43  ;;  %v3846_v13 = vpack.c.bf16 %v83_v52, %v83_v52 }
  0x3f   :  { %v2967_v18 = vld [vmem:[%s5010_s1 + $0x720] sm:$0xf]  ;;  %v3207_v22 = vld [vmem:[%s5010_s1 + $0x40c] sm:$0xf0]  ;;  %v2840_v34 = vor.u32 %v3275_v16, %v2839_v15  ;;  %v58_v54 = vperm.slane %v3630_v1, 5  ;;  %v84_v63 = vmax.f32 %v76_v53, 0.0  ;;  %v2428_v1 = vor.u32 %v3169_v50, %v2425_v51 }
  0x40   :  { %v21_v20 = vld [vmem:[%s5011_s0 + $0x20] sm:$0xff]  ;;  %v3239_v28 = vld [vmem:[%s5010_s1 + $0x50c] sm:$0xf0]  ;;  %v2968_v39 = vor.u32 %v3307_v19, %v2967_v18  ;;  %1687 = vmatpush.bf16.msrb.mxu0 %v2584_v26  ;;  %1700 = vmatpush.bf16.msrb.mxu1 %v2712_v33  ;;  %v2553_v58 = vld [vmem:[%s5010_s1 + $0x3f0] sm:$0xf0] }
  0x41   :  { %v2567_v21 = vld [vmem:[%s5010_s1 + $0x400] sm:$0xf]  ;;  %v3271_v35 = vld [vmem:[%s5010_s1 + $0x60c] sm:$0xf0]  ;;  %v47_v38 = vmul.f32 %v31_v23, %v21_v20  ;;  %1713 = vmatpush.bf16.msrb.mxu2 %v2840_v34  ;;  %v3201_v0 = vld [vmem:[%s5010_s1 + $0x3e4] sm:$0xf]  ;;  %v74_v8 = vadd.f32 %v58_v54, %v48_v60  ;;  %v3856_v17 = vpack.c.bf16 %v84_v63, %v84_v63 }
  0x42   :  { %v2695_v27 = vld [vmem:[%s5010_s1 + $0x500] sm:$0xf]  ;;  %v3303_v37 = vld [vmem:[%s5010_s1 + $0x70c] sm:$0xf0]  ;;  %v2568_v49 = vor.u32 %v3207_v22, %v2567_v21  ;;  %1726 = vmatpush.bf16.msrb.mxu3 %v2968_v39  ;;  %v3101_v4 = vld [vmem:[%s5010_s1 + $0xc4] sm:$0xf]  ;;  %v2556_v9 = vor.u32 %v3201_v0, %v2553_v58 }
  0x43   :  { %v2823_v29 = vld [vmem:[%s5010_s1 + $0x600] sm:$0xf]  ;;  %v73_v47 = vadd.f32 %v57_v24, %v47_v38  ;;  %v2696_v55 = vor.u32 %v3239_v28, %v2695_v27  ;;  %v2153_v6 = vld [vmem:[%s5010_s1 + $0xd0] sm:$0xf0]  ;;  %v3133_v7 = vld [vmem:[%s5010_s1 + $0x1c4] sm:$0xf] }
  0x44   :  { %v2951_v36 = vld [vmem:[%s5010_s1 + $0x700] sm:$0xf]  ;;  %v2824_v56 = vor.u32 %v3271_v35, %v2823_v29  ;;  %1688 = vmatpush.bf16.msrb.mxu0 %v2568_v49  ;;  %v2281_v10 = vld [vmem:[%s5010_s1 + $0x1d0] sm:$0xf0]  ;;  %v3165_v11 = vld [vmem:[%s5010_s1 + $0x2c4] sm:$0xf]  ;;  %v2156_v19 = vor.u32 %v3101_v4, %v2153_v6 }
  0x45   :  { %v81_v59 = vmax.f32 %v73_v47, 0.0  ;;  %v2952_v61 = vor.u32 %v3303_v37, %v2951_v36  ;;  %v2409_v12 = vld [vmem:[%s5010_s1 + $0x2d0] sm:$0xf0]  ;;  %1701 = vmatpush.bf16.msrb.mxu1 %v2696_v55  ;;  %v3197_v14 = vld [vmem:[%s5010_s1 + $0x3c4] sm:$0xf]  ;;  %v82_v18 = vmax.f32 %v74_v8, 0.0  ;;  %v2284_v20 = vor.u32 %v3133_v7, %v2281_v10 }
  0x46   :  { %1714 = vmatpush.bf16.msrb.mxu2 %v2824_v56  ;;  %v2537_v15 = vld [vmem:[%s5010_s1 + $0x3d0] sm:$0xf0]  ;;  %v2412_v21 = vor.u32 %v3165_v11, %v2409_v12  ;;  %v3097_v22 = vld [vmem:[%s5010_s1 + $0xa4] sm:$0xf] }
  0x47   :  { %v3854_v16 = vpack.c.bf16 %v81_v59, %v81_v59  ;;  %1727 = vmatpush.bf16.msrb.mxu3 %v2952_v61  ;;  %v2137_v23 = vld [vmem:[%s5010_s1 + $0xb0] sm:$0xf0]  ;;  %v3129_v24 = vld [vmem:[%s5010_s1 + $0x1a4] sm:$0xf]  ;;  %v3867_v25 = vpack.c.bf16 %v82_v18, %v82_v18  ;;  %v2540_v26 = vor.u32 %v3197_v14, %v2537_v15 }
  0x48   :  { %1733 = vmatpush.bf16.msra.mxu0 %v2172_v62  ;;  %v2265_v27 = vld [vmem:[%s5010_s1 + $0x1b0] sm:$0xf0]  ;;  %v3161_v28 = vld [vmem:[%s5010_s1 + $0x2a4] sm:$0xf]  ;;  %v2140_v32 = vor.u32 %v3097_v22, %v2137_v23 }
  0x49   :  { %1746 = vmatpush.bf16.msra.mxu1 %v2300_v3  ;;  %1715 = vmatmul.bf16.vlgmr.msrb.gmra.mxu2 %v3846_v13  ;;  %v2393_v29 = vld [vmem:[%s5010_s1 + $0x2b0] sm:$0xf0]  ;;  %v3193_v30 = vld [vmem:[%s5010_s1 + $0x3a4] sm:$0xf]  ;;  %v2268_v33 = vor.u32 %v3129_v24, %v2265_v27 }
  0x4a   :  { %1759 = vmatpush.bf16.msra.mxu2 %v2428_v1  ;;  %1728 = vmatmul.bf16.vlgmr.msrb.gmra.mxu3 %v3856_v17  ;;  %v2521_v31 = vld [vmem:[%s5010_s1 + $0x3b0] sm:$0xf0]  ;;  %v2396_v34 = vor.u32 %v3161_v28, %v2393_v29  ;;  %v3093_v35 = vld [vmem:[%s5010_s1 + $0x84] sm:$0xf] }
  0x4b   :  { %1772 = vmatpush.bf16.msra.mxu3 %v2556_v9  ;;  %1689 = vmatmul.bf16.vlgmr.msrb.gmra.mxu0 %v3854_v16  ;;  %v2121_v36 = vld [vmem:[%s5010_s1 + $0x90] sm:$0xf0]  ;;  %v3125_v37 = vld [vmem:[%s5010_s1 + $0x184] sm:$0xf]  ;;  %v2524_v38 = vor.u32 %v3193_v30, %v2521_v31 }
  0x4c   :  { %1734 = vmatpush.bf16.msra.mxu0 %v2156_v19  ;;  %1702 = vmatmul.bf16.vlgmr.msrb.gmra.mxu1 %v3867_v25  ;;  %v2249_v39 = vld [vmem:[%s5010_s1 + $0x190] sm:$0xf0]  ;;  %v3157_v40 = vld [vmem:[%s5010_s1 + $0x284] sm:$0xf]  ;;  %v2124_v44 = vor.u32 %v3093_v35, %v2121_v36 }
  0x4d   :  { %1747 = vmatpush.bf16.msra.mxu1 %v2284_v20  ;;  %v2377_v41 = vld [vmem:[%s5010_s1 + $0x290] sm:$0xf0]  ;;  %v3189_v42 = vld [vmem:[%s5010_s1 + $0x384] sm:$0xf]  ;;  %v2252_v45 = vor.u32 %v3125_v37, %v2249_v39 }
  0x4e   :  { %1760 = vmatpush.bf16.msra.mxu2 %v2412_v21  ;;  %v2505_v43 = vld [vmem:[%s5010_s1 + $0x390] sm:$0xf0]  ;;  %v2380_v47 = vor.u32 %v3157_v40, %v2377_v41  ;;  %v3089_v48 = vld [vmem:[%s5010_s1 + $0x64] sm:$0xf] }
  0x4f   :  { %1773 = vmatpush.bf16.msra.mxu3 %v2540_v26  ;;  %v2105_v49 = vld [vmem:[%s5010_s1 + $0x70] sm:$0xf0]  ;;  %v3121_v50 = vld [vmem:[%s5010_s1 + $0x164] sm:$0xf]  ;;  %v2508_v51 = vor.u32 %v3189_v42, %v2505_v43 }
  0x50   :  { %1735 = vmatpush.bf16.msra.mxu0 %v2140_v32  ;;  %v2233_v52 = vld [vmem:[%s5010_s1 + $0x170] sm:$0xf0]  ;;  %v3153_v53 = vld [vmem:[%s5010_s1 + $0x264] sm:$0xf]  ;;  %v2108_v0 = vor.u32 %v3089_v48, %v2105_v49 }
  0x51   :  { %1748 = vmatpush.bf16.msra.mxu1 %v2268_v33  ;;  %v2361_v54 = vld [vmem:[%s5010_s1 + $0x270] sm:$0xf0]  ;;  %v3185_v55 = vld [vmem:[%s5010_s1 + $0x364] sm:$0xf]  ;;  %v2236_v58 = vor.u32 %v3121_v50, %v2233_v52 }
  0x52   :  { %1761 = vmatpush.bf16.msra.mxu2 %v2396_v34  ;;  %v2489_v56 = vld [vmem:[%s5010_s1 + $0x370] sm:$0xf0]  ;;  %v2364_v59 = vor.u32 %v3153_v53, %v2361_v54  ;;  %v3085_v60 = vld [vmem:[%s5010_s1 + $0x44] sm:$0xf] }
  0x53   :  { %1774 = vmatpush.bf16.msra.mxu3 %v2524_v38  ;;  %v2089_v61 = vld [vmem:[%s5010_s1 + $0x50] sm:$0xf0]  ;;  %v3117_v62 = vld [vmem:[%s5010_s1 + $0x144] sm:$0xf]  ;;  %v2492_v63 = vor.u32 %v3185_v55, %v2489_v56 }
  0x54   :  { %1736 = vmatpush.bf16.msra.mxu0 %v2124_v44  ;;  %v2217_v3 = vld [vmem:[%s5010_s1 + $0x150] sm:$0xf0]  ;;  %v3149_v1 = vld [vmem:[%s5010_s1 + $0x244] sm:$0xf]  ;;  %v2092_v8 = vor.u32 %v3085_v60, %v2089_v61 }
  0x55   :  { %1749 = vmatpush.bf16.msra.mxu1 %v2252_v45  ;;  %v2345_v4 = vld [vmem:[%s5010_s1 + $0x250] sm:$0xf0]  ;;  %v3181_v6 = vld [vmem:[%s5010_s1 + $0x344] sm:$0xf]  ;;  %v2220_v9 = vor.u32 %v3117_v62, %v2217_v3 }
  0x56   :  { %1762 = vmatpush.bf16.msra.mxu2 %v2380_v47  ;;  %v2473_v7 = vld [vmem:[%s5010_s1 + $0x350] sm:$0xf0]  ;;  %v2348_v10 = vor.u32 %v3149_v1, %v2345_v4  ;;  %v3081_v11 = vld [vmem:[%s5010_s1 + $0x24] sm:$0xf] }
  0x57   :  { %1775 = vmatpush.bf16.msra.mxu3 %v2508_v51  ;;  %v2073_v12 = vld [vmem:[%s5010_s1 + $0x30] sm:$0xf0]  ;;  %v3113_v14 = vld [vmem:[%s5010_s1 + $0x124] sm:$0xf]  ;;  %v2476_v15 = vor.u32 %v3181_v6, %v2473_v7 }
  0x58   :  { %1737 = vmatpush.bf16.msra.mxu0 %v2108_v0  ;;  %v2201_v18 = vld [vmem:[%s5010_s1 + $0x130] sm:$0xf0]  ;;  %v3145_v19 = vld [vmem:[%s5010_s1 + $0x224] sm:$0xf]  ;;  %v2076_v23 = vor.u32 %v3081_v11, %v2073_v12 }
  0x59   :  { %1750 = vmatpush.bf16.msra.mxu1 %v2236_v58  ;;  %v2329_v20 = vld [vmem:[%s5010_s1 + $0x230] sm:$0xf0]  ;;  %v3177_v21 = vld [vmem:[%s5010_s1 + $0x324] sm:$0xf]  ;;  %v2204_v27 = vor.u32 %v3113_v14, %v2201_v18 }
  0x5a   :  { %1763 = vmatpush.bf16.msra.mxu2 %v2364_v59  ;;  %v2457_v22 = vld [vmem:[%s5010_s1 + $0x330] sm:$0xf0]  ;;  %v3077_v24 = vld [vmem:[%s5010_s1 + $0x4] sm:$0xf]  ;;  %v2332_v28 = vor.u32 %v3145_v19, %v2329_v20 }
  0x5b   :  { %1776 = vmatpush.bf16.msra.mxu3 %v2492_v63  ;;  %v2057_v26 = vld [vmem:[%s5010_s1 + $0x10] sm:$0xf0]  ;;  %v3109_v29 = vld [vmem:[%s5010_s1 + $0x104] sm:$0xf]  ;;  %v2460_v32 = vor.u32 %v3177_v21, %v2457_v22 }
  0x5c   :  { %1738 = vmatpush.bf16.msra.mxu0 %v2092_v8  ;;  %v2185_v30 = vld [vmem:[%s5010_s1 + $0x110] sm:$0xf0]  ;;  %v3141_v31 = vld [vmem:[%s5010_s1 + $0x204] sm:$0xf]  ;;  %v2060_v39 = vor.u32 %v3077_v24, %v2057_v26 }
  0x5d   :  { %1751 = vmatpush.bf16.msra.mxu1 %v2220_v9  ;;  %v2313_v33 = vld [vmem:[%s5010_s1 + $0x210] sm:$0xf0]  ;;  %v3173_v34 = vld [vmem:[%s5010_s1 + $0x304] sm:$0xf]  ;;  %v2188_v43 = vor.u32 %v3109_v29, %v2185_v30 }
  0x5e   :  { %1764 = vmatpush.bf16.msra.mxu2 %v2348_v10  ;;  %v2441_v35 = vld [vmem:[%s5010_s1 + $0x310] sm:$0xf0]  ;;  %v3233_v36 = vld [vmem:[%s5010_s1 + $0x4e4] sm:$0xf]  ;;  %v2316_v44 = vor.u32 %v3141_v31, %v2313_v33 }
  0x5f   :  { %1777 = vmatpush.bf16.msra.mxu3 %v2476_v15  ;;  %v2681_v37 = vld [vmem:[%s5010_s1 + $0x4f0] sm:$0xf0]  ;;  %v3265_v38 = vld [vmem:[%s5010_s1 + $0x5e4] sm:$0xf]  ;;  %v2444_v48 = vor.u32 %v3173_v34, %v2441_v35 }
  0x60   :  { %1739 = vmatpush.bf16.msra.mxu0 %v2076_v23  ;;  %v2809_v40 = vld [vmem:[%s5010_s1 + $0x5f0] sm:$0xf0]  ;;  %v3297_v41 = vld [vmem:[%s5010_s1 + $0x6e4] sm:$0xf]  ;;  %v2684_v49 = vor.u32 %v3233_v36, %v2681_v37 }
  0x61   :  { %v2937_v42 = vld [vmem:[%s5010_s1 + $0x6f0] sm:$0xf0]  ;;  %1752 = vmatpush.bf16.msra.mxu1 %v2204_v27  ;;  %v3329_v45 = vld [vmem:[%s5010_s1 + $0x7e4] sm:$0xf]  ;;  %v2812_v50 = vor.u32 %v3265_v38, %v2809_v40 }
  0x62   :  { %1765 = vmatpush.bf16.msra.mxu2 %v2332_v28  ;;  %v3065_v47 = vld [vmem:[%s5010_s1 + $0x7f0] sm:$0xf0]  ;;  %v2940_v51 = vor.u32 %v3297_v41, %v2937_v42  ;;  %v3229_v52 = vld [vmem:[%s5010_s1 + $0x4c4] sm:$0xf] }
  0x63   :  { %1778 = vmatpush.bf16.msra.mxu3 %v2460_v32  ;;  %v2665_v53 = vld [vmem:[%s5010_s1 + $0x4d0] sm:$0xf0]  ;;  %v3261_v54 = vld [vmem:[%s5010_s1 + $0x5c4] sm:$0xf]  ;;  %v3068_v55 = vor.u32 %v3329_v45, %v3065_v47 }
  0x64   :  { %1740 = vmatpush.bf16.msra.mxu0 %v2060_v39  ;;  %v2793_v56 = vld [vmem:[%s5010_s1 + $0x5d0] sm:$0xf0]  ;;  %v3293_v0 = vld [vmem:[%s5010_s1 + $0x6c4] sm:$0xf]  ;;  %v2668_v61 = vor.u32 %v3229_v52, %v2665_v53 }
  0x65   :  { %v2921_v58 = vld [vmem:[%s5010_s1 + $0x6d0] sm:$0xf0]  ;;  %1753 = vmatpush.bf16.msra.mxu1 %v2188_v43  ;;  %v3325_v59 = vld [vmem:[%s5010_s1 + $0x7c4] sm:$0xf]  ;;  %v2796_v62 = vor.u32 %v3261_v54, %v2793_v56 }
  0x66   :  { %1766 = vmatpush.bf16.msra.mxu2 %v2316_v44  ;;  %v3049_v60 = vld [vmem:[%s5010_s1 + $0x7d0] sm:$0xf0]  ;;  %v2924_v63 = vor.u32 %v3293_v0, %v2921_v58  ;;  %v3225_v3 = vld [vmem:[%s5010_s1 + $0x4a4] sm:$0xf] }
  0x67   :  { %1779 = vmatpush.bf16.msra.mxu3 %v2444_v48  ;;  %v2649_v1 = vld [vmem:[%s5010_s1 + $0x4b0] sm:$0xf0]  ;;  %v3257_v4 = vld [vmem:[%s5010_s1 + $0x5a4] sm:$0xf]  ;;  %v3052_v6 = vor.u32 %v3325_v59, %v3049_v60  ;;  %1741 = vmatmul.bf16.vlgmr.msra.gmra.mxu0 %v3712_v57 }
  0x68   :  { %1785 = vmatpush.bf16.msrb.mxu0 %v2684_v49  ;;  %v2777_v7 = vld [vmem:[%s5010_s1 + $0x5b0] sm:$0xf0]  ;;  %v3289_v8 = vld [vmem:[%s5010_s1 + $0x6a4] sm:$0xf]  ;;  %v2652_v12 = vor.u32 %v3225_v3, %v2649_v1  ;;  %1754 = vmatmul.bf16.vlgmr.msra.gmra.mxu1 %v3736_v5 }
  0x69   :  { %1798 = vmatpush.bf16.msrb.mxu1 %v2812_v50  ;;  %v2905_v9 = vld [vmem:[%s5010_s1 + $0x6b0] sm:$0xf0]  ;;  %1767 = vmatmul.bf16.vlgmr.msra.gmra.mxu2 %v3700_v46  ;;  %v3321_v10 = vld [vmem:[%s5010_s1 + $0x7a4] sm:$0xf]  ;;  %v2780_v14 = vor.u32 %v3257_v4, %v2777_v7 }
  0x6a   :  { %1811 = vmatpush.bf16.msrb.mxu2 %v2940_v51  ;;  %v3033_v11 = vld [vmem:[%s5010_s1 + $0x7b0] sm:$0xf0]  ;;  %1780 = vmatmul.bf16.vlgmr.msra.gmra.mxu3 %v3727_v2  ;;  %v2908_v15 = vor.u32 %v3289_v8, %v2905_v9  ;;  %v3221_v18 = vld [vmem:[%s5010_s1 + $0x484] sm:$0xf] }
  0x6b   :  { %1824 = vmatpush.bf16.msrb.mxu3 %v3068_v55  ;;  %v2633_v19 = vld [vmem:[%s5010_s1 + $0x490] sm:$0xf0]  ;;  %v3253_v20 = vld [vmem:[%s5010_s1 + $0x584] sm:$0xf]  ;;  %v3036_v21 = vor.u32 %v3321_v10, %v3033_v11 }
  0x6c   :  { %1786 = vmatpush.bf16.msrb.mxu0 %v2668_v61  ;;  %v2761_v22 = vld [vmem:[%s5010_s1 + $0x590] sm:$0xf0]  ;;  %v3285_v23 = vld [vmem:[%s5010_s1 + $0x684] sm:$0xf]  ;;  %v2636_v28 = vor.u32 %v3221_v18, %v2633_v19  ;;  %v2175_v19 = vld [vmem:[%s5010_s1 + $0xe8] sm:$0xf] }
  0x6d   :  { %1799 = vmatpush.bf16.msrb.mxu1 %v2796_v62  ;;  %v2889_v24 = vld [vmem:[%s5010_s1 + $0x690] sm:$0xf0]  ;;  %v3317_v26 = vld [vmem:[%s5010_s1 + $0x784] sm:$0xf]  ;;  %v2764_v29 = vor.u32 %v3253_v20, %v2761_v22  ;;  %v3108_v20 = vld [vmem:[%s5010_s1 + $0xf4] sm:$0xf0] }
  0x6e   :  { %1812 = vmatpush.bf16.msrb.mxu2 %v2924_v63  ;;  %v3017_v27 = vld [vmem:[%s5010_s1 + $0x790] sm:$0xf0]  ;;  %v2892_v30 = vor.u32 %v3285_v23, %v2889_v24  ;;  %v3217_v31 = vld [vmem:[%s5010_s1 + $0x464] sm:$0xf]  ;;  %v3140_v23 = vld [vmem:[%s5010_s1 + $0x1f4] sm:$0xf0] }
  0x6f   :  { %1825 = vmatpush.bf16.msrb.mxu3 %v3052_v6  ;;  %v2617_v32 = vld [vmem:[%s5010_s1 + $0x470] sm:$0xf0]  ;;  %v3249_v33 = vld [vmem:[%s5010_s1 + $0x564] sm:$0xf]  ;;  %v3020_v34 = vor.u32 %v3317_v26, %v3017_v27  ;;  %v2431_v24 = vld [vmem:[%s5010_s1 + $0x2e8] sm:$0xf] }
  0x70   :  { %1787 = vmatpush.bf16.msrb.mxu0 %v2652_v12  ;;  %v2745_v35 = vld [vmem:[%s5010_s1 + $0x570] sm:$0xf0]  ;;  %v3281_v36 = vld [vmem:[%s5010_s1 + $0x664] sm:$0xf]  ;;  %v2620_v40 = vor.u32 %v3217_v31, %v2617_v32  ;;  %v3172_v26 = vld [vmem:[%s5010_s1 + $0x2f4] sm:$0xf0]  ;;  %v2176_v32 = vor.u32 %v3108_v20, %v2175_v19 }
  0x71   :  { %1800 = vmatpush.bf16.msrb.mxu1 %v2780_v14  ;;  %v2873_v37 = vld [vmem:[%s5010_s1 + $0x670] sm:$0xf0]  ;;  %v3313_v38 = vld [vmem:[%s5010_s1 + $0x764] sm:$0xf]  ;;  %v2748_v41 = vor.u32 %v3249_v33, %v2745_v35  ;;  %v2159_v35 = vld [vmem:[%s5010_s1 + $0xc8] sm:$0xf] }
  0x72   :  { %1813 = vmatpush.bf16.msrb.mxu2 %v2908_v15  ;;  %v3001_v39 = vld [vmem:[%s5010_s1 + $0x770] sm:$0xf0]  ;;  %v2876_v42 = vor.u32 %v3281_v36, %v2873_v37  ;;  %v3213_v43 = vld [vmem:[%s5010_s1 + $0x444] sm:$0xf]  ;;  %v3104_v36 = vld [vmem:[%s5010_s1 + $0xd4] sm:$0xf0] }
  0x73   :  { %1826 = vmatpush.bf16.msrb.mxu3 %v3036_v21  ;;  %v2601_v44 = vld [vmem:[%s5010_s1 + $0x450] sm:$0xf0]  ;;  %v3245_v45 = vld [vmem:[%s5010_s1 + $0x544] sm:$0xf]  ;;  %v3004_v47 = vor.u32 %v3313_v38, %v3001_v39  ;;  %v2303_v21 = vld [vmem:[%s5010_s1 + $0x1e8] sm:$0xf] }
  0x74   :  { %1788 = vmatpush.bf16.msrb.mxu0 %v2636_v28  ;;  %v2729_v48 = vld [vmem:[%s5010_s1 + $0x550] sm:$0xf0]  ;;  %v3277_v49 = vld [vmem:[%s5010_s1 + $0x644] sm:$0xf]  ;;  %v2604_v53 = vor.u32 %v3213_v43, %v2601_v44  ;;  %v2304_v33 = vor.u32 %v3140_v23, %v2303_v21  ;;  %v2287_v37 = vld [vmem:[%s5010_s1 + $0x1c8] sm:$0xf]  ;;  %v2160_v44 = vor.u32 %v3104_v36, %v2159_v35 }
  0x75   :  { %1801 = vmatpush.bf16.msrb.mxu1 %v2764_v29  ;;  %v2857_v50 = vld [vmem:[%s5010_s1 + $0x650] sm:$0xf0]  ;;  %v3309_v51 = vld [vmem:[%s5010_s1 + $0x744] sm:$0xf]  ;;  %v2732_v54 = vor.u32 %v3245_v45, %v2729_v48  ;;  %v2559_v29 = vld [vmem:[%s5010_s1 + $0x3e8] sm:$0xf] }
  0x76   :  { %1814 = vmatpush.bf16.msrb.mxu2 %v2892_v30  ;;  %v2985_v52 = vld [vmem:[%s5010_s1 + $0x750] sm:$0xf0]  ;;  %v2860_v55 = vor.u32 %v3277_v49, %v2857_v50  ;;  %v3209_v56 = vld [vmem:[%s5010_s1 + $0x424] sm:$0xf]  ;;  %v3204_v30 = vld [vmem:[%s5010_s1 + $0x3f4] sm:$0xf0] }
  0x77   :  { %1827 = vmatpush.bf16.msrb.mxu3 %v3020_v34  ;;  %v2585_v0 = vld [vmem:[%s5010_s1 + $0x430] sm:$0xf0]  ;;  %v3241_v58 = vld [vmem:[%s5010_s1 + $0x524] sm:$0xf]  ;;  %v2988_v59 = vor.u32 %v3309_v51, %v2985_v52  ;;  %v2432_v34 = vor.u32 %v3172_v26, %v2431_v24  ;;  %v2560_v38 = vor.u32 %v3204_v30, %v2559_v29  ;;  %v3136_v39 = vld [vmem:[%s5010_s1 + $0x1d4] sm:$0xf0] }
  0x78   :  { %1789 = vmatpush.bf16.msrb.mxu0 %v2620_v40  ;;  %v2713_v60 = vld [vmem:[%s5010_s1 + $0x530] sm:$0xf0]  ;;  %v3273_v61 = vld [vmem:[%s5010_s1 + $0x624] sm:$0xf]  ;;  %v2588_v1 = vor.u32 %v3209_v56, %v2585_v0  ;;  %v2415_v40 = vld [vmem:[%s5010_s1 + $0x2c8] sm:$0xf]  ;;  %v2288_v45 = vor.u32 %v3136_v39, %v2287_v37 }
  0x79   :  { %1802 = vmatpush.bf16.msrb.mxu1 %v2748_v41  ;;  %v2841_v62 = vld [vmem:[%s5010_s1 + $0x630] sm:$0xf0]  ;;  %v3305_v63 = vld [vmem:[%s5010_s1 + $0x724] sm:$0xf]  ;;  %v2716_v7 = vor.u32 %v3241_v58, %v2713_v60  ;;  %v3168_v41 = vld [vmem:[%s5010_s1 + $0x2d4] sm:$0xf0] }
  0x7a   :  { %1815 = vmatpush.bf16.msrb.mxu2 %v2876_v42  ;;  %v2969_v3 = vld [vmem:[%s5010_s1 + $0x730] sm:$0xf0]  ;;  %v3205_v4 = vld [vmem:[%s5010_s1 + $0x404] sm:$0xf]  ;;  %v2844_v8 = vor.u32 %v3273_v61, %v2841_v62  ;;  %v2543_v42 = vld [vmem:[%s5010_s1 + $0x3c8] sm:$0xf] }
  0x7b   :  { %1828 = vmatpush.bf16.msrb.mxu3 %v3004_v47  ;;  %v2569_v6 = vld [vmem:[%s5010_s1 + $0x410] sm:$0xf0]  ;;  %v3237_v9 = vld [vmem:[%s5010_s1 + $0x504] sm:$0xf]  ;;  %v2972_v12 = vor.u32 %v3305_v63, %v2969_v3  ;;  %v3200_v43 = vld [vmem:[%s5010_s1 + $0x3d4] sm:$0xf0]  ;;  %v2416_v47 = vor.u32 %v3168_v41, %v2415_v40 }
  0x7c   :  { %1790 = vmatpush.bf16.msrb.mxu0 %v2604_v53  ;;  %v2697_v10 = vld [vmem:[%s5010_s1 + $0x510] sm:$0xf0]  ;;  %v3269_v11 = vld [vmem:[%s5010_s1 + $0x604] sm:$0xf]  ;;  %v2572_v22 = vor.u32 %v3205_v4, %v2569_v6  ;;  %v2143_v48 = vld [vmem:[%s5010_s1 + $0xa8] sm:$0xf]  ;;  %v2544_v51 = vor.u32 %v3200_v43, %v2543_v42 }
  0x7d   :  { %1803 = vmatpush.bf16.msrb.mxu1 %v2732_v54  ;;  %v2825_v14 = vld [vmem:[%s5010_s1 + $0x610] sm:$0xf0]  ;;  %v3301_v15 = vld [vmem:[%s5010_s1 + $0x704] sm:$0xf]  ;;  %v2700_v27 = vor.u32 %v3237_v9, %v2697_v10  ;;  %v3100_v49 = vld [vmem:[%s5010_s1 + $0xb4] sm:$0xf0] }
  0x7e   :  { %1816 = vmatpush.bf16.msrb.mxu2 %v2860_v55  ;;  %v2953_v18 = vld [vmem:[%s5010_s1 + $0x710] sm:$0xf0]  ;;  %v2828_v28 = vor.u32 %v3269_v11, %v2825_v14  ;;  %v2271_v50 = vld [vmem:[%s5010_s1 + $0x1a8] sm:$0xf]  ;;  %v3132_v52 = vld [vmem:[%s5010_s1 + $0x1b4] sm:$0xf0]  ;;  %v2144_v0 = vor.u32 %v3100_v49, %v2143_v48 }
  0x7f   :  { %1829 = vmatpush.bf16.msrb.mxu3 %v2988_v59  ;;  %v2956_v31 = vor.u32 %v3301_v15, %v2953_v18  ;;  %v2399_v53 = vld [vmem:[%s5010_s1 + $0x2a8] sm:$0xf]  ;;  %v3164_v54 = vld [vmem:[%s5010_s1 + $0x2b4] sm:$0xf0]  ;;  %v2272_v58 = vor.u32 %v3132_v52, %v2271_v50 }
  0x80   :  { %1791 = vmatpush.bf16.msrb.mxu0 %v2588_v1  ;;  %v2527_v55 = vld [vmem:[%s5010_s1 + $0x3a8] sm:$0xf]  ;;  %v3196_v56 = vld [vmem:[%s5010_s1 + $0x3b4] sm:$0xf0]  ;;  %v2400_v59 = vor.u32 %v3164_v54, %v2399_v53 }
  0x81   :  { %1804 = vmatpush.bf16.msrb.mxu1 %v2716_v7  ;;  %v2127_v60 = vld [vmem:[%s5010_s1 + $0x88] sm:$0xf]  ;;  %v3096_v61 = vld [vmem:[%s5010_s1 + $0x94] sm:$0xf0]  ;;  %v2528_v63 = vor.u32 %v3196_v56, %v2527_v55 }
  0x82   :  { %1817 = vmatpush.bf16.msrb.mxu2 %v2844_v8  ;;  %v2255_v62 = vld [vmem:[%s5010_s1 + $0x188] sm:$0xf]  ;;  %v3128_v3 = vld [vmem:[%s5010_s1 + $0x194] sm:$0xf0]  ;;  %v2128_v8 = vor.u32 %v3096_v61, %v2127_v60 }
  0x83   :  { %1830 = vmatpush.bf16.msrb.mxu3 %v2972_v12  ;;  %v2383_v1 = vld [vmem:[%s5010_s1 + $0x288] sm:$0xf]  ;;  %v3160_v4 = vld [vmem:[%s5010_s1 + $0x294] sm:$0xf0]  ;;  %v2256_v9 = vor.u32 %v3128_v3, %v2255_v62 }
  0x84   :  { %1792 = vmatpush.bf16.msrb.mxu0 %v2572_v22  ;;  %v2511_v6 = vld [vmem:[%s5010_s1 + $0x388] sm:$0xf]  ;;  %v3192_v7 = vld [vmem:[%s5010_s1 + $0x394] sm:$0xf0]  ;;  %v2384_v10 = vor.u32 %v3160_v4, %v2383_v1 }
  0x85   :  { %1805 = vmatpush.bf16.msrb.mxu1 %v2700_v27  ;;  %v2111_v11 = vld [vmem:[%s5010_s1 + $0x68] sm:$0xf]  ;;  %v3092_v12 = vld [vmem:[%s5010_s1 + $0x74] sm:$0xf0]  ;;  %v2512_v15 = vor.u32 %v3192_v7, %v2511_v6 }
  0x86   :  { %1818 = vmatpush.bf16.msrb.mxu2 %v2828_v28  ;;  %v2239_v14 = vld [vmem:[%s5010_s1 + $0x168] sm:$0xf]  ;;  %v3124_v18 = vld [vmem:[%s5010_s1 + $0x174] sm:$0xf0]  ;;  %v2112_v23 = vor.u32 %v3092_v12, %v2111_v11 }
  0x87   :  { %1831 = vmatpush.bf16.msrb.mxu3 %v2956_v31  ;;  %1793 = vmatmul.bf16.vlgmr.msrb.gmra.mxu0 %v3854_v16  ;;  %v2367_v19 = vld [vmem:[%s5010_s1 + $0x268] sm:$0xf]  ;;  %v3156_v20 = vld [vmem:[%s5010_s1 + $0x274] sm:$0xf0]  ;;  %v2240_v24 = vor.u32 %v3124_v18, %v2239_v14 }
  0x88   :  { %1837 = vmatpush.bf16.msra.mxu0 %v2176_v32  ;;  %1806 = vmatmul.bf16.vlgmr.msrb.gmra.mxu1 %v3867_v25  ;;  %v2495_v21 = vld [vmem:[%s5010_s1 + $0x368] sm:$0xf]  ;;  %v3188_v22 = vld [vmem:[%s5010_s1 + $0x374] sm:$0xf0]  ;;  %v2368_v26 = vor.u32 %v3156_v20, %v2367_v19 }
  0x89   :  { %1850 = vmatpush.bf16.msra.mxu1 %v2304_v33  ;;  %1819 = vmatmul.bf16.vlgmr.msrb.gmra.mxu2 %v3846_v13  ;;  %v2095_v27 = vld [vmem:[%s5010_s1 + $0x48] sm:$0xf]  ;;  %v3088_v28 = vld [vmem:[%s5010_s1 + $0x54] sm:$0xf0]  ;;  %v2496_v30 = vor.u32 %v3188_v22, %v2495_v21 }
  0x8a   :  { %1863 = vmatpush.bf16.msra.mxu2 %v2432_v34  ;;  %1832 = vmatmul.bf16.vlgmr.msrb.gmra.mxu3 %v3856_v17  ;;  %v2223_v29 = vld [vmem:[%s5010_s1 + $0x148] sm:$0xf]  ;;  %v3120_v31 = vld [vmem:[%s5010_s1 + $0x154] sm:$0xf0]  ;;  %v2096_v36 = vor.u32 %v3088_v28, %v2095_v27 }
  0x8b   :  { %1876 = vmatpush.bf16.msra.mxu3 %v2560_v38  ;;  %v2351_v32 = vld [vmem:[%s5010_s1 + $0x248] sm:$0xf]  ;;  %v3152_v33 = vld [vmem:[%s5010_s1 + $0x254] sm:$0xf0]  ;;  %v2224_v37 = vor.u32 %v3120_v31, %v2223_v29 }
  0x8c   :  { %1838 = vmatpush.bf16.msra.mxu0 %v2160_v44  ;;  %v2479_v34 = vld [vmem:[%s5010_s1 + $0x348] sm:$0xf]  ;;  %v3184_v35 = vld [vmem:[%s5010_s1 + $0x354] sm:$0xf0]  ;;  %v2352_v38 = vor.u32 %v3152_v33, %v2351_v32 }
  0x8d   :  { %1851 = vmatpush.bf16.msra.mxu1 %v2288_v45  ;;  %v2079_v39 = vld [vmem:[%s5010_s1 + $0x28] sm:$0xf]  ;;  %v3084_v40 = vld [vmem:[%s5010_s1 + $0x34] sm:$0xf0]  ;;  %v2480_v42 = vor.u32 %v3184_v35, %v2479_v34 }
  0x8e   :  { %1864 = vmatpush.bf16.msra.mxu2 %v2416_v47  ;;  %v2207_v41 = vld [vmem:[%s5010_s1 + $0x128] sm:$0xf]  ;;  %v3116_v43 = vld [vmem:[%s5010_s1 + $0x134] sm:$0xf0]  ;;  %v2080_v49 = vor.u32 %v3084_v40, %v2079_v39 }
  0x8f   :  { %1877 = vmatpush.bf16.msra.mxu3 %v2544_v51  ;;  %v2335_v44 = vld [vmem:[%s5010_s1 + $0x228] sm:$0xf]  ;;  %v3148_v45 = vld [vmem:[%s5010_s1 + $0x234] sm:$0xf0]  ;;  %v2208_v52 = vor.u32 %v3116_v43, %v2207_v41 }
  0x90   :  { %1839 = vmatpush.bf16.msra.mxu0 %v2144_v0  ;;  %v2463_v47 = vld [vmem:[%s5010_s1 + $0x328] sm:$0xf]  ;;  %v3180_v48 = vld [vmem:[%s5010_s1 + $0x334] sm:$0xf0]  ;;  %v2336_v53 = vor.u32 %v3148_v45, %v2335_v44 }
  0x91   :  { %1852 = vmatpush.bf16.msra.mxu1 %v2272_v58  ;;  %v2063_v50 = vld [vmem:[%s5010_s1 + $0x8] sm:$0xf]  ;;  %v3080_v51 = vld [vmem:[%s5010_s1 + $0x14] sm:$0xf0]  ;;  %v2464_v0 = vor.u32 %v3180_v48, %v2463_v47 }
  0x92   :  { %1865 = vmatpush.bf16.msra.mxu2 %v2400_v59  ;;  %v2191_v54 = vld [vmem:[%s5010_s1 + $0x108] sm:$0xf]  ;;  %v3112_v55 = vld [vmem:[%s5010_s1 + $0x114] sm:$0xf0]  ;;  %v2064_v3 = vor.u32 %v3080_v51, %v2063_v50 }
  0x93   :  { %1878 = vmatpush.bf16.msra.mxu3 %v2528_v63  ;;  %v2319_v56 = vld [vmem:[%s5010_s1 + $0x208] sm:$0xf]  ;;  %v3144_v58 = vld [vmem:[%s5010_s1 + $0x214] sm:$0xf0]  ;;  %v2192_v7 = vor.u32 %v3112_v55, %v2191_v54 }
  0x94   :  { %1840 = vmatpush.bf16.msra.mxu0 %v2128_v8  ;;  %v2447_v59 = vld [vmem:[%s5010_s1 + $0x308] sm:$0xf]  ;;  %v3176_v60 = vld [vmem:[%s5010_s1 + $0x314] sm:$0xf0]  ;;  %v2320_v8 = vor.u32 %v3144_v58, %v2319_v56 }
  0x95   :  { %1853 = vmatpush.bf16.msra.mxu1 %v2256_v9  ;;  %v2687_v61 = vld [vmem:[%s5010_s1 + $0x4e8] sm:$0xf]  ;;  %v3236_v62 = vld [vmem:[%s5010_s1 + $0x4f4] sm:$0xf0]  ;;  %v2448_v11 = vor.u32 %v3176_v60, %v2447_v59 }
  0x96   :  { %1866 = vmatpush.bf16.msra.mxu2 %v2384_v10  ;;  %v2815_v63 = vld [vmem:[%s5010_s1 + $0x5e8] sm:$0xf]  ;;  %v3268_v1 = vld [vmem:[%s5010_s1 + $0x5f4] sm:$0xf0]  ;;  %v2688_v12 = vor.u32 %v3236_v62, %v2687_v61 }
  0x97   :  { %1879 = vmatpush.bf16.msra.mxu3 %v2512_v15  ;;  %v2943_v4 = vld [vmem:[%s5010_s1 + $0x6e8] sm:$0xf]  ;;  %v3300_v6 = vld [vmem:[%s5010_s1 + $0x6f4] sm:$0xf0]  ;;  %v2816_v14 = vor.u32 %v3268_v1, %v2815_v63 }
  0x98   :  { %1841 = vmatpush.bf16.msra.mxu0 %v2112_v23  ;;  %v3071_v9 = vld [vmem:[%s5010_s1 + $0x7e8] sm:$0xf]  ;;  %v3332_v10 = vld [vmem:[%s5010_s1 + $0x7f4] sm:$0xf0]  ;;  %v2944_v15 = vor.u32 %v3300_v6, %v2943_v4 }
  0x99   :  { %1854 = vmatpush.bf16.msra.mxu1 %v2240_v24  ;;  %v2671_v18 = vld [vmem:[%s5010_s1 + $0x4c8] sm:$0xf]  ;;  %v3232_v19 = vld [vmem:[%s5010_s1 + $0x4d4] sm:$0xf0]  ;;  %v3072_v21 = vor.u32 %v3332_v10, %v3071_v9 }
  0x9a   :  { %1867 = vmatpush.bf16.msra.mxu2 %v2368_v26  ;;  %v2799_v20 = vld [vmem:[%s5010_s1 + $0x5c8] sm:$0xf]  ;;  %v3264_v22 = vld [vmem:[%s5010_s1 + $0x5d4] sm:$0xf0]  ;;  %v2672_v28 = vor.u32 %v3232_v19, %v2671_v18 }
  0x9b   :  { %1880 = vmatpush.bf16.msra.mxu3 %v2496_v30  ;;  %v2927_v23 = vld [vmem:[%s5010_s1 + $0x6c8] sm:$0xf]  ;;  %v3296_v24 = vld [vmem:[%s5010_s1 + $0x6d4] sm:$0xf0]  ;;  %v2800_v29 = vor.u32 %v3264_v22, %v2799_v20 }
  0x9c   :  { %1842 = vmatpush.bf16.msra.mxu0 %v2096_v36  ;;  %v3055_v26 = vld [vmem:[%s5010_s1 + $0x7c8] sm:$0xf]  ;;  %v3328_v27 = vld [vmem:[%s5010_s1 + $0x7d4] sm:$0xf0]  ;;  %v2928_v30 = vor.u32 %v3296_v24, %v2927_v23 }
  0x9d   :  { %1855 = vmatpush.bf16.msra.mxu1 %v2224_v37  ;;  %v2655_v31 = vld [vmem:[%s5010_s1 + $0x4a8] sm:$0xf]  ;;  %v3228_v32 = vld [vmem:[%s5010_s1 + $0x4b4] sm:$0xf0]  ;;  %v3056_v34 = vor.u32 %v3328_v27, %v3055_v26 }
  0x9e   :  { %1868 = vmatpush.bf16.msra.mxu2 %v2352_v38  ;;  %v2783_v33 = vld [vmem:[%s5010_s1 + $0x5a8] sm:$0xf]  ;;  %v3260_v35 = vld [vmem:[%s5010_s1 + $0x5b4] sm:$0xf0]  ;;  %v2656_v40 = vor.u32 %v3228_v32, %v2655_v31 }
  0x9f   :  { %1881 = vmatpush.bf16.msra.mxu3 %v2480_v42  ;;  %v2911_v36 = vld [vmem:[%s5010_s1 + $0x6a8] sm:$0xf]  ;;  %v3292_v37 = vld [vmem:[%s5010_s1 + $0x6b4] sm:$0xf0]  ;;  %v2784_v41 = vor.u32 %v3260_v35, %v2783_v33 }
  0xa0   :  { %1843 = vmatpush.bf16.msra.mxu0 %v2080_v49  ;;  %v3039_v38 = vld [vmem:[%s5010_s1 + $0x7a8] sm:$0xf]  ;;  %v3324_v39 = vld [vmem:[%s5010_s1 + $0x7b4] sm:$0xf0]  ;;  %v2912_v42 = vor.u32 %v3292_v37, %v2911_v36 }
  0xa1   :  { %1856 = vmatpush.bf16.msra.mxu1 %v2208_v52  ;;  %v2639_v43 = vld [vmem:[%s5010_s1 + $0x488] sm:$0xf]  ;;  %v3224_v44 = vld [vmem:[%s5010_s1 + $0x494] sm:$0xf0]  ;;  %v3040_v47 = vor.u32 %v3324_v39, %v3039_v38 }
  0xa2   :  { %1869 = vmatpush.bf16.msra.mxu2 %v2336_v53  ;;  %v2767_v45 = vld [vmem:[%s5010_s1 + $0x588] sm:$0xf]  ;;  %v3256_v48 = vld [vmem:[%s5010_s1 + $0x594] sm:$0xf0]  ;;  %v2640_v53 = vor.u32 %v3224_v44, %v2639_v43 }
  0xa3   :  { %1882 = vmatpush.bf16.msra.mxu3 %v2464_v0  ;;  %v2895_v49 = vld [vmem:[%s5010_s1 + $0x688] sm:$0xf]  ;;  %v3288_v50 = vld [vmem:[%s5010_s1 + $0x694] sm:$0xf0]  ;;  %v2768_v54 = vor.u32 %v3256_v48, %v2767_v45  ;;  %v3106_v45 = vld [vmem:[%s5010_s1 + $0xec] sm:$0xf] }
  0xa4   :  { %1844 = vmatpush.bf16.msra.mxu0 %v2064_v3  ;;  %v3023_v51 = vld [vmem:[%s5010_s1 + $0x788] sm:$0xf]  ;;  %v3320_v52 = vld [vmem:[%s5010_s1 + $0x794] sm:$0xf0]  ;;  %v2896_v55 = vor.u32 %v3288_v50, %v2895_v49  ;;  %v3138_v48 = vld [vmem:[%s5010_s1 + $0x1ec] sm:$0xf] }
  0xa5   :  { %1857 = vmatpush.bf16.msra.mxu1 %v2192_v7  ;;  %v2623_v56 = vld [vmem:[%s5010_s1 + $0x468] sm:$0xf]  ;;  %v3220_v0 = vld [vmem:[%s5010_s1 + $0x474] sm:$0xf0]  ;;  %v3024_v59 = vor.u32 %v3320_v52, %v3023_v51  ;;  %v2305_v51 = vld [vmem:[%s5010_s1 + $0x1f8] sm:$0xf0] }
  0xa6   :  { %1870 = vmatpush.bf16.msra.mxu2 %v2320_v8  ;;  %v2751_v58 = vld [vmem:[%s5010_s1 + $0x568] sm:$0xf]  ;;  %v3252_v60 = vld [vmem:[%s5010_s1 + $0x574] sm:$0xf0]  ;;  %v2624_v1 = vor.u32 %v3220_v0, %v2623_v56  ;;  %v3170_v52 = vld [vmem:[%s5010_s1 + $0x2ec] sm:$0xf] }
  0xa7   :  { %1883 = vmatpush.bf16.msra.mxu3 %v2448_v11  ;;  %1845 = vmatmul.bf16.vlgmr.msra.gmra.mxu0 %v3712_v57  ;;  %v2879_v61 = vld [vmem:[%s5010_s1 + $0x668] sm:$0xf]  ;;  %v3284_v62 = vld [vmem:[%s5010_s1 + $0x674] sm:$0xf0]  ;;  %v2752_v4 = vor.u32 %v3252_v60, %v2751_v58  ;;  %v3202_v56 = vld [vmem:[%s5010_s1 + $0x3ec] sm:$0xf] }
  0xa8   :  { %1889 = vmatpush.bf16.msrb.mxu0 %v2688_v12  ;;  %1858 = vmatmul.bf16.vlgmr.msra.gmra.mxu1 %v3736_v5  ;;  %v3007_v63 = vld [vmem:[%s5010_s1 + $0x768] sm:$0xf]  ;;  %v3316_v3 = vld [vmem:[%s5010_s1 + $0x774] sm:$0xf0]  ;;  %v2880_v6 = vor.u32 %v3284_v62, %v2879_v61  ;;  %v2561_v0 = vld [vmem:[%s5010_s1 + $0x3f8] sm:$0xf0]  ;;  %v2308_v61 = vor.u32 %v3138_v48, %v2305_v51 }
  0xa9   :  { %1902 = vmatpush.bf16.msrb.mxu1 %v2816_v14  ;;  %1871 = vmatmul.bf16.vlgmr.msra.gmra.mxu2 %v3700_v46  ;;  %v2607_v7 = vld [vmem:[%s5010_s1 + $0x448] sm:$0xf]  ;;  %v3216_v8 = vld [vmem:[%s5010_s1 + $0x454] sm:$0xf0]  ;;  %v3008_v10 = vor.u32 %v3316_v3, %v3007_v63  ;;  %v3102_v3 = vld [vmem:[%s5010_s1 + $0xcc] sm:$0xf] }
  0xaa   :  { %1915 = vmatpush.bf16.msrb.mxu2 %v2944_v15  ;;  %1884 = vmatmul.bf16.vlgmr.msra.gmra.mxu3 %v3727_v2  ;;  %v2735_v9 = vld [vmem:[%s5010_s1 + $0x548] sm:$0xf]  ;;  %v3248_v11 = vld [vmem:[%s5010_s1 + $0x554] sm:$0xf0]  ;;  %v2608_v19 = vor.u32 %v3216_v8, %v2607_v7  ;;  %v2564_v7 = vor.u32 %v3202_v56, %v2561_v0  ;;  %v2289_v8 = vld [vmem:[%s5010_s1 + $0x1d8] sm:$0xf0] }
  0xab   :  { %1928 = vmatpush.bf16.msrb.mxu3 %v3072_v21  ;;  %v2863_v12 = vld [vmem:[%s5010_s1 + $0x648] sm:$0xf]  ;;  %v3280_v14 = vld [vmem:[%s5010_s1 + $0x654] sm:$0xf0]  ;;  %v2736_v20 = vor.u32 %v3248_v11, %v2735_v9  ;;  %v3166_v9 = vld [vmem:[%s5010_s1 + $0x2cc] sm:$0xf] }
  0xac   :  { %1890 = vmatpush.bf16.msrb.mxu0 %v2672_v28  ;;  %v2991_v15 = vld [vmem:[%s5010_s1 + $0x748] sm:$0xf]  ;;  %v3312_v18 = vld [vmem:[%s5010_s1 + $0x754] sm:$0xf0]  ;;  %v2864_v21 = vor.u32 %v3280_v14, %v2863_v12  ;;  %v3198_v12 = vld [vmem:[%s5010_s1 + $0x3cc] sm:$0xf] }
  0xad   :  { %1903 = vmatpush.bf16.msrb.mxu1 %v2800_v29  ;;  %v2591_v22 = vld [vmem:[%s5010_s1 + $0x428] sm:$0xf]  ;;  %v3212_v23 = vld [vmem:[%s5010_s1 + $0x434] sm:$0xf0]  ;;  %v2992_v26 = vor.u32 %v3312_v18, %v2991_v15  ;;  %v2545_v14 = vld [vmem:[%s5010_s1 + $0x3d8] sm:$0xf0] }
  0xae   :  { %1916 = vmatpush.bf16.msrb.mxu2 %v2928_v30  ;;  %v2719_v24 = vld [vmem:[%s5010_s1 + $0x528] sm:$0xf]  ;;  %v3244_v27 = vld [vmem:[%s5010_s1 + $0x534] sm:$0xf0]  ;;  %v2592_v32 = vor.u32 %v3212_v23, %v2591_v22  ;;  %v2145_v22 = vld [vmem:[%s5010_s1 + $0xb8] sm:$0xf0] }
  0xaf   :  { %1929 = vmatpush.bf16.msrb.mxu3 %v3056_v34  ;;  %v2847_v28 = vld [vmem:[%s5010_s1 + $0x628] sm:$0xf]  ;;  %v3276_v29 = vld [vmem:[%s5010_s1 + $0x634] sm:$0xf0]  ;;  %v2720_v36 = vor.u32 %v3244_v27, %v2719_v24  ;;  %v3130_v23 = vld [vmem:[%s5010_s1 + $0x1ac] sm:$0xf] }
  0xb0   :  { %1891 = vmatpush.bf16.msrb.mxu0 %v2656_v40  ;;  %v2975_v30 = vld [vmem:[%s5010_s1 + $0x728] sm:$0xf]  ;;  %v3308_v31 = vld [vmem:[%s5010_s1 + $0x734] sm:$0xf0]  ;;  %v2848_v37 = vor.u32 %v3276_v29, %v2847_v28  ;;  %v2273_v27 = vld [vmem:[%s5010_s1 + $0x1b8] sm:$0xf0] }
  0xb1   :  { %1904 = vmatpush.bf16.msrb.mxu1 %v2784_v41  ;;  %v2575_v33 = vld [vmem:[%s5010_s1 + $0x408] sm:$0xf]  ;;  %v3208_v34 = vld [vmem:[%s5010_s1 + $0x414] sm:$0xf0]  ;;  %v2976_v41 = vor.u32 %v3308_v31, %v2975_v30  ;;  %v3162_v28 = vld [vmem:[%s5010_s1 + $0x2ac] sm:$0xf] }
  0xb2   :  { %1917 = vmatpush.bf16.msrb.mxu2 %v2912_v42  ;;  %v2703_v38 = vld [vmem:[%s5010_s1 + $0x508] sm:$0xf]  ;;  %v3240_v39 = vld [vmem:[%s5010_s1 + $0x514] sm:$0xf0]  ;;  %v2576_v50 = vor.u32 %v3208_v34, %v2575_v33  ;;  %v2401_v29 = vld [vmem:[%s5010_s1 + $0x2b8] sm:$0xf0] }
  0xb3   :  { %1930 = vmatpush.bf16.msrb.mxu3 %v3040_v47  ;;  %v2831_v40 = vld [vmem:[%s5010_s1 + $0x608] sm:$0xf]  ;;  %v3272_v42 = vld [vmem:[%s5010_s1 + $0x614] sm:$0xf0]  ;;  %v2177_v47 = vld [vmem:[%s5010_s1 + $0xf8] sm:$0xf0] }
  0xb4   :  { %1892 = vmatpush.bf16.msrb.mxu0 %v2640_v53  ;;  %v2959_v43 = vld [vmem:[%s5010_s1 + $0x708] sm:$0xf]  ;;  %v3304_v44 = vld [vmem:[%s5010_s1 + $0x714] sm:$0xf0]  ;;  %v2433_v53 = vld [vmem:[%s5010_s1 + $0x2f8] sm:$0xf0]  ;;  %v2180_v60 = vor.u32 %v3106_v45, %v2177_v47 }
  0xb5   :  { %1905 = vmatpush.bf16.msrb.mxu1 %v2768_v54  ;;  %v2704_v54 = vor.u32 %v3240_v39, %v2703_v38  ;;  %v2436_v62 = vor.u32 %v3170_v52, %v2433_v53  ;;  %v3194_v30 = vld [vmem:[%s5010_s1 + $0x3ac] sm:$0xf]  ;;  %v2529_v31 = vld [vmem:[%s5010_s1 + $0x3b8] sm:$0xf0] }
  0xb6   :  { %1918 = vmatpush.bf16.msrb.mxu2 %v2896_v55  ;;  %v2832_v55 = vor.u32 %v3272_v42, %v2831_v40  ;;  %v2129_v38 = vld [vmem:[%s5010_s1 + $0x98] sm:$0xf0]  ;;  %v3126_v39 = vld [vmem:[%s5010_s1 + $0x18c] sm:$0xf] }
  0xb7   :  { %1931 = vmatpush.bf16.msrb.mxu3 %v3024_v59  ;;  %v1651_v49 = vpop.f32.mrf.mxu1  ;;  %v2960_v59 = vor.u32 %v3304_v44, %v2959_v43  ;;  %v2257_v42 = vld [vmem:[%s5010_s1 + $0x198] sm:$0xf0]  ;;  %v3158_v43 = vld [vmem:[%s5010_s1 + $0x28c] sm:$0xf] }
  0xb8   :  { %1893 = vmatpush.bf16.msrb.mxu0 %v2624_v1  ;;  %v1638_v35 = vpop.f32.mrf.mxu0  ;;  %v2161_v1 = vld [vmem:[%s5010_s1 + $0xd8] sm:$0xf0]  ;;  %v3190_v45 = vld [vmem:[%s5010_s1 + $0x38c] sm:$0xf] }
  0xb9   :  { %1906 = vmatpush.bf16.msrb.mxu1 %v2752_v4  ;;  %v1652_v63 = vadd.f32 %v1651_v49, %v1638_v35  ;;  %v3134_v4 = vld [vmem:[%s5010_s1 + $0x1cc] sm:$0xf]  ;;  %v2164_v15 = vor.u32 %v3102_v3, %v2161_v1  ;;  %v2276_v35 = vor.u32 %v3130_v23, %v2273_v27  ;;  %v2385_v44 = vld [vmem:[%s5010_s1 + $0x298] sm:$0xf0] }
  0xba   :  { %1919 = vmatpush.bf16.msrb.mxu2 %v2880_v6  ;;  %v2292_v18 = vor.u32 %v3134_v4, %v2289_v8  ;;  %v2513_v47 = vld [vmem:[%s5010_s1 + $0x398] sm:$0xf0]  ;;  %v2388_v51 = vor.u32 %v3158_v43, %v2385_v44  ;;  %v3090_v52 = vld [vmem:[%s5010_s1 + $0x6c] sm:$0xf] }
  0xbb   :  { %1932 = vmatpush.bf16.msrb.mxu3 %v3008_v10  ;;  %v1664_v58 = vpop.f32.mrf.mxu2  ;;  %v2417_v10 = vld [vmem:[%s5010_s1 + $0x2d8] sm:$0xf0]  ;;  %v2516_v0 = vor.u32 %v3190_v45, %v2513_v47  ;;  %v3118_v8 = vld [vmem:[%s5010_s1 + $0x14c] sm:$0xf] }
  0xbc   :  { %1894 = vmatpush.bf16.msrb.mxu0 %v2608_v19  ;;  %v1677_v6 = vpop.f32.mrf.mxu3  ;;  %v2420_v19 = vor.u32 %v3166_v9, %v2417_v10  ;;  %v2113_v53 = vld [vmem:[%s5010_s1 + $0x78] sm:$0xf0]  ;;  %v3082_v27 = vld [vmem:[%s5010_s1 + $0x2c] sm:$0xf] }
  0xbd   :  { %1907 = vmatpush.bf16.msrb.mxu1 %v2736_v20  ;;  %v1665_v20 = vadd.f32 %v1664_v58, %v1652_v63  ;;  %v2241_v58 = vld [vmem:[%s5010_s1 + $0x178] sm:$0xf0]  ;;  %v2116_v3 = vor.u32 %v3090_v52, %v2113_v53  ;;  %v3142_v44 = vld [vmem:[%s5010_s1 + $0x20c] sm:$0xf] }
  0xbe   :  { %1920 = vmatpush.bf16.msrb.mxu2 %v2864_v21  ;;  %v3098_v21 = vld [vmem:[%s5010_s1 + $0xac] sm:$0xf]  ;;  %v2193_v43 = vld [vmem:[%s5010_s1 + $0x118] sm:$0xf0] }
  0xbf   :  { %1933 = vmatpush.bf16.msrb.mxu3 %v2992_v26  ;;  %v1653_v24 = vpop.f32.mrf.mxu1  ;;  %v2548_v26 = vor.u32 %v3198_v12, %v2545_v14  ;;  %v2148_v33 = vor.u32 %v3098_v21, %v2145_v22  ;;  %v1678_v34 = vadd.f32 %v1677_v6, %v1665_v20  ;;  %v3086_v6 = vld [vmem:[%s5010_s1 + $0x4c] sm:$0xf]  ;;  %v2353_v14 = vld [vmem:[%s5010_s1 + $0x258] sm:$0xf0] }
  0xc0   :  { %1895 = vmatpush.bf16.msrb.mxu0 %v2592_v32  ;;  %v1640_v11 = vpop.f32.mrf.mxu0  ;;  %v3150_v12 = vld [vmem:[%s5010_s1 + $0x24c] sm:$0xf]  ;;  %v2481_v20 = vld [vmem:[%s5010_s1 + $0x358] sm:$0xf0] }
  0xc1   :  { %1908 = vmatpush.bf16.msrb.mxu1 %v2720_v36  ;;  %v2404_v36 = vor.u32 %v3162_v28, %v2401_v29  ;;  %v2225_v11 = vld [vmem:[%s5010_s1 + $0x158] sm:$0xf0]  ;;  %v3114_v29 = vld [vmem:[%s5010_s1 + $0x12c] sm:$0xf] }
  0xc2   :  { %1921 = vmatpush.bf16.msrb.mxu2 %v2848_v37  ;;  %v3094_v37 = vld [vmem:[%s5010_s1 + $0x8c] sm:$0xf]  ;;  %v2228_v24 = vor.u32 %v3118_v8, %v2225_v11  ;;  %v2081_v28 = vld [vmem:[%s5010_s1 + $0x38] sm:$0xf0] }
  0xc3   :  { %1934 = vmatpush.bf16.msrb.mxu3 %v2976_v41  ;;  %v1666_v32 = vpop.f32.mrf.mxu2  ;;  %v2532_v41 = vor.u32 %v3194_v30, %v2529_v31  ;;  %v2132_v48 = vor.u32 %v3094_v37, %v2129_v38  ;;  %v2084_v37 = vor.u32 %v3082_v27, %v2081_v28  ;;  %v3078_v38 = vld [vmem:[%s5010_s1 + $0xc] sm:$0xf]  ;;  %v2689_v53 = vld [vmem:[%s5010_s1 + $0x4f8] sm:$0xf0] }
  0xc4   :  { %1896 = vmatpush.bf16.msrb.mxu0 %v2576_v50  ;;  %v1679_v40 = vpop.f32.mrf.mxu3  ;;  %v2260_v50 = vor.u32 %v3126_v39, %v2257_v42  ;;  %v2209_v32 = vld [vmem:[%s5010_s1 + $0x138] sm:$0xf0]  ;;  %v3110_v42 = vld [vmem:[%s5010_s1 + $0x10c] sm:$0xf] }
  0xc5   :  { %1909 = vmatpush.bf16.msrb.mxu1 %v2704_v54  ;;  %v3122_v54 = vld [vmem:[%s5010_s1 + $0x16c] sm:$0xf]  ;;  %v2065_v39 = vld [vmem:[%s5010_s1 + $0x18] sm:$0xf0]  ;;  %v2212_v40 = vor.u32 %v3114_v29, %v2209_v32 }
  0xc6   :  { %1922 = vmatpush.bf16.msrb.mxu2 %v2832_v55  ;;  %v2244_v1 = vor.u32 %v3122_v54, %v2241_v58  ;;  %v3234_v52 = vld [vmem:[%s5010_s1 + $0x4ec] sm:$0xf]  ;;  %v2945_v58 = vld [vmem:[%s5010_s1 + $0x6f8] sm:$0xf0] }
  0xc7   :  { %1935 = vmatpush.bf16.msrb.mxu3 %v2960_v59  ;;  %1897 = vmatmul.bf16.vlgmr.msrb.gmra.mxu0 %v3854_v16  ;;  %v3154_v59 = vld [vmem:[%s5010_s1 + $0x26c] sm:$0xf]  ;;  %v2913_v28 = vld [vmem:[%s5010_s1 + $0x6b8] sm:$0xf0] }
  0xc8   :  { %1941 = vmatpush.bf16.msra.mxu0 %v2180_v60  ;;  %1910 = vmatmul.bf16.vlgmr.msrb.gmra.mxu1 %v3867_v25  ;;  %v1690_v49 = vpop.f32.mrf.mxu0  ;;  %v2369_v60 = vld [vmem:[%s5010_s1 + $0x278] sm:$0xf0]  ;;  %v3266_v54 = vld [vmem:[%s5010_s1 + $0x5ec] sm:$0xf] }
  0xc9   :  { %1954 = vmatpush.bf16.msra.mxu1 %v2308_v61  ;;  %1923 = vmatmul.bf16.vlgmr.msrb.gmra.mxu2 %v3846_v13  ;;  %v1691_v55 = vadd.f32 %v1690_v49, %v1678_v34  ;;  %v1703_v56 = vpop.f32.mrf.mxu1  ;;  %v3186_v61 = vld [vmem:[%s5010_s1 + $0x36c] sm:$0xf]  ;;  %v2372_v4 = vor.u32 %v3154_v59, %v2369_v60  ;;  %v2337_v34 = vld [vmem:[%s5010_s1 + $0x238] sm:$0xf0]  ;;  %v2196_v59 = vor.u32 %v3110_v42, %v2193_v43 }
  0xca   :  { %1967 = vmatpush.bf16.msra.mxu2 %v2436_v62  ;;  %1936 = vmatmul.bf16.vlgmr.msrb.gmra.mxu3 %v3856_v17  ;;  %v2497_v62 = vld [vmem:[%s5010_s1 + $0x378] sm:$0xf0]  ;;  %v3174_v49 = vld [vmem:[%s5010_s1 + $0x30c] sm:$0xf] }
  0xcb   :  { %1980 = vmatpush.bf16.msra.mxu3 %v2564_v7  ;;  %v1704_v63 = vadd.f32 %v1703_v56, %v1691_v55  ;;  %v2097_v7 = vld [vmem:[%s5010_s1 + $0x58] sm:$0xf0]  ;;  %v2500_v10 = vor.u32 %v3186_v61, %v2497_v62  ;;  %v2068_v55 = vor.u32 %v3078_v38, %v2065_v39  ;;  %v3330_v61 = vld [vmem:[%s5010_s1 + $0x7ec] sm:$0xf] }
  0xcc   :  { %1942 = vmatpush.bf16.msra.mxu0 %v2164_v15  ;;  %v1716_v9 = vpop.f32.mrf.mxu2  ;;  %v2100_v21 = vor.u32 %v3086_v6, %v2097_v7  ;;  %v2817_v56 = vld [vmem:[%s5010_s1 + $0x5f8] sm:$0xf0]  ;;  %v3230_v6 = vld [vmem:[%s5010_s1 + $0x4cc] sm:$0xf] }
  0xcd   :  { %1955 = vmatpush.bf16.msra.mxu1 %v2292_v18  ;;  %v1717_v15 = vadd.f32 %v1716_v9, %v1704_v63  ;;  %v1729_v18 = vpop.f32.mrf.mxu3  ;;  %v3073_v62 = vld [vmem:[%s5010_s1 + $0x7f8] sm:$0xf0]  ;;  %v3262_v8 = vld [vmem:[%s5010_s1 + $0x5cc] sm:$0xf] }
  0xce   :  { %1968 = vmatpush.bf16.msra.mxu2 %v2420_v19  ;;  %v3182_v19 = vld [vmem:[%s5010_s1 + $0x34c] sm:$0xf]  ;;  %v2673_v7 = vld [vmem:[%s5010_s1 + $0x4d8] sm:$0xf0]  ;;  %v3076_v9 = vor.u32 %v3330_v61, %v3073_v62 }
  0xcf   :  { %1981 = vmatpush.bf16.msra.mxu3 %v2548_v26  ;;  %v1730_v22 = vadd.f32 %v1729_v18, %v1717_v15  ;;  %v2356_v26 = vor.u32 %v3150_v12, %v2353_v14  ;;  %v2484_v31 = vor.u32 %v3182_v19, %v2481_v20  ;;  %v3294_v11 = vld [vmem:[%s5010_s1 + $0x6cc] sm:$0xf]  ;;  %v2929_v12 = vld [vmem:[%s5010_s1 + $0x6d8] sm:$0xf0]  ;;  %v2676_v18 = vor.u32 %v3230_v6, %v2673_v7 }
  0xd0   :  { %1943 = vmatpush.bf16.msra.mxu0 %v2148_v33  ;;  %v1692_v23 = vpop.f32.mrf.mxu0  ;;  %v3146_v33 = vld [vmem:[%s5010_s1 + $0x22c] sm:$0xf]  ;;  %v3057_v15 = vld [vmem:[%s5010_s1 + $0x7d8] sm:$0xf0]  ;;  %v2932_v20 = vor.u32 %v3294_v11, %v2929_v12 }
  0xd1   :  { %1956 = vmatpush.bf16.msra.mxu1 %v2276_v35  ;;  %v1705_v30 = vpop.f32.mrf.mxu1  ;;  %2045 = vst [vmem:[%s5014_s4] sm:$0xff] %v1730_v22  ;;  %v3178_v35 = vld [vmem:[%s5010_s1 + $0x32c] sm:$0xf]  ;;  %v2657_v22 = vld [vmem:[%s5010_s1 + $0x4b8] sm:$0xf0] }
  0xd2   :  { %1969 = vmatpush.bf16.msra.mxu2 %v2404_v36  ;;  %v2465_v36 = vld [vmem:[%s5010_s1 + $0x338] sm:$0xf0]  ;;  %v3326_v14 = vld [vmem:[%s5010_s1 + $0x7cc] sm:$0xf] }
  0xd3   :  { %1982 = vmatpush.bf16.msra.mxu3 %v2532_v41  ;;  %v2340_v41 = vor.u32 %v3146_v33, %v2337_v34  ;;  %v2468_v47 = vor.u32 %v3178_v35, %v2465_v36  ;;  %v3258_v23 = vld [vmem:[%s5010_s1 + $0x5ac] sm:$0xf]  ;;  %v2641_v33 = vld [vmem:[%s5010_s1 + $0x498] sm:$0xf0] }
  0xd4   :  { %1944 = vmatpush.bf16.msra.mxu0 %v2132_v48  ;;  %v1718_v45 = vpop.f32.mrf.mxu2  ;;  %v2321_v48 = vld [vmem:[%s5010_s1 + $0x218] sm:$0xf0]  ;;  %v3290_v27 = vld [vmem:[%s5010_s1 + $0x6ac] sm:$0xf] }
  0xd5   :  { %1957 = vmatpush.bf16.msra.mxu1 %v2260_v50  ;;  %v2449_v50 = vld [vmem:[%s5010_s1 + $0x318] sm:$0xf0]  ;;  %v2324_v60 = vor.u32 %v3142_v44, %v2321_v48  ;;  %v3322_v29 = vld [vmem:[%s5010_s1 + $0x7ac] sm:$0xf]  ;;  %v2916_v32 = vor.u32 %v3290_v27, %v2913_v28 }
  0xd6   :  { %1970 = vmatpush.bf16.msra.mxu2 %v2388_v51  ;;  %v1731_v51 = vpop.f32.mrf.mxu3  ;;  %v2452_v63 = vor.u32 %v3174_v49, %v2449_v50  ;;  %v3286_v35 = vld [vmem:[%s5010_s1 + $0x68c] sm:$0xf]  ;;  %v2897_v36 = vld [vmem:[%s5010_s1 + $0x698] sm:$0xf0] }
  0xd7   :  { %1983 = vmatpush.bf16.msra.mxu3 %v2516_v0  ;;  %v3298_v0 = vld [vmem:[%s5010_s1 + $0x6ec] sm:$0xf]  ;;  %v3025_v38 = vld [vmem:[%s5010_s1 + $0x798] sm:$0xf0]  ;;  %v2900_v42 = vor.u32 %v3286_v35, %v2897_v36 }
  0xd8   :  { %1945 = vmatpush.bf16.msra.mxu0 %v2116_v3  ;;  %v2692_v3 = vor.u32 %v3234_v52, %v2689_v53  ;;  %v3218_v43 = vld [vmem:[%s5010_s1 + $0x46c] sm:$0xf]  ;;  %v2625_v44 = vld [vmem:[%s5010_s1 + $0x478] sm:$0xf0] }
  0xd9   :  { %1958 = vmatpush.bf16.msra.mxu1 %v2244_v1  ;;  %v2820_v1 = vor.u32 %v3266_v54, %v2817_v56  ;;  %v3250_v45 = vld [vmem:[%s5010_s1 + $0x56c] sm:$0xf]  ;;  %v2753_v49 = vld [vmem:[%s5010_s1 + $0x578] sm:$0xf0]  ;;  %v2628_v54 = vor.u32 %v3218_v43, %v2625_v44 }
  0xda   :  { %1971 = vmatpush.bf16.msra.mxu2 %v2372_v4  ;;  %v2948_v4 = vor.u32 %v3298_v0, %v2945_v58  ;;  %v3282_v50 = vld [vmem:[%s5010_s1 + $0x66c] sm:$0xf]  ;;  %v2881_v51 = vld [vmem:[%s5010_s1 + $0x678] sm:$0xf0] }
  0xdb   :  { %1984 = vmatpush.bf16.msra.mxu3 %v2500_v10  ;;  %v2801_v10 = vld [vmem:[%s5010_s1 + $0x5d8] sm:$0xf0]  ;;  %v3314_v52 = vld [vmem:[%s5010_s1 + $0x76c] sm:$0xf]  ;;  %v2884_v56 = vor.u32 %v3282_v50, %v2881_v51 }
  0xdc   :  { %1946 = vmatpush.bf16.msra.mxu0 %v2100_v21  ;;  %v2804_v19 = vor.u32 %v3262_v8, %v2801_v10  ;;  %v3226_v21 = vld [vmem:[%s5010_s1 + $0x4ac] sm:$0xf]  ;;  %v3009_v53 = vld [vmem:[%s5010_s1 + $0x778] sm:$0xf0] }
  0xdd   :  { %1959 = vmatpush.bf16.msra.mxu1 %v2228_v24  ;;  %v3060_v24 = vor.u32 %v3326_v14, %v3057_v15  ;;  %v2660_v30 = vor.u32 %v3226_v21, %v2657_v22  ;;  %v3214_v0 = vld [vmem:[%s5010_s1 + $0x44c] sm:$0xf]  ;;  %v2609_v58 = vld [vmem:[%s5010_s1 + $0x458] sm:$0xf0]  ;;  %v3012_v61 = vor.u32 %v3314_v52, %v3009_v53 }
  0xde   :  { %1972 = vmatpush.bf16.msra.mxu2 %v2356_v26  ;;  %v2785_v26 = vld [vmem:[%s5010_s1 + $0x5b8] sm:$0xf0]  ;;  %v2612_v7 = vor.u32 %v3214_v0, %v2609_v58  ;;  %v3210_v11 = vld [vmem:[%s5010_s1 + $0x42c] sm:$0xf] }
  0xdf   :  { %1985 = vmatpush.bf16.msra.mxu3 %v2484_v31  ;;  %v2788_v31 = vor.u32 %v3258_v23, %v2785_v26  ;;  %v2737_v62 = vld [vmem:[%s5010_s1 + $0x558] sm:$0xf0]  ;;  %v3242_v14 = vld [vmem:[%s5010_s1 + $0x52c] sm:$0xf] }
  0xe0   :  { %1947 = vmatpush.bf16.msra.mxu0 %v2084_v37  ;;  %v3318_v37 = vld [vmem:[%s5010_s1 + $0x78c] sm:$0xf]  ;;  %v2993_v6 = vld [vmem:[%s5010_s1 + $0x758] sm:$0xf0] }
  0xe1   :  { %1960 = vmatpush.bf16.msra.mxu1 %v2212_v40  ;;  %v3028_v48 = vor.u32 %v3318_v37, %v3025_v38  ;;  %v2593_v12 = vld [vmem:[%s5010_s1 + $0x438] sm:$0xf0]  ;;  %v3306_v22 = vld [vmem:[%s5010_s1 + $0x72c] sm:$0xf] }
  0xe2   :  { %1973 = vmatpush.bf16.msra.mxu2 %v2340_v41  ;;  %v2849_v21 = vld [vmem:[%s5010_s1 + $0x638] sm:$0xf0]  ;;  %v3206_v28 = vld [vmem:[%s5010_s1 + $0x40c] sm:$0xf] }
  0xe3   :  { %1986 = vmatpush.bf16.msra.mxu3 %v2468_v47  ;;  %v2977_v23 = vld [vmem:[%s5010_s1 + $0x738] sm:$0xf0] }
  0xe4   :  { %1948 = vmatpush.bf16.msra.mxu0 %v2068_v55  ;;  %v4895_v40 = vpop.f32.mrf.mxu0  ;;  %v2756_v55 = vor.u32 %v3250_v45, %v2753_v49 }
  0xe5   :  { %1961 = vmatpush.bf16.msra.mxu1 %v2196_v59  ;;  %v4906_v47 = vpop.f32.mrf.mxu1  ;;  %v3246_v59 = vld [vmem:[%s5010_s1 + $0x54c] sm:$0xf] }
  0xe6   :  { %1974 = vmatpush.bf16.msra.mxu2 %v2324_v60 }
  0xe7   :  { %1987 = vmatpush.bf16.msra.mxu3 %v2452_v63  ;;  %1949 = vmatmul.bf16.vlgmr.msra.gmra.mxu0 %v3712_v57  ;;  %v3254_v57 = vld [vmem:[%s5010_s1 + $0x58c] sm:$0xf] }
  0xe8   :  { %1993 = vmatpush.bf16.msrb.mxu0 %v2692_v3  ;;  %1962 = vmatmul.bf16.vlgmr.msra.gmra.mxu1 %v3736_v5  ;;  %v2769_v5 = vld [vmem:[%s5010_s1 + $0x598] sm:$0xf0]  ;;  %v3278_v63 = vld [vmem:[%s5010_s1 + $0x64c] sm:$0xf] }
  0xe9   :  { %2006 = vmatpush.bf16.msrb.mxu1 %v2820_v1  ;;  %1975 = vmatmul.bf16.vlgmr.msra.gmra.mxu2 %v3700_v46  ;;  %v3041_v46 = vld [vmem:[%s5010_s1 + $0x7b8] sm:$0xf0]  ;;  %v2772_v41 = vor.u32 %v3254_v57, %v2769_v5 }
  0xea   :  { %2019 = vmatpush.bf16.msrb.mxu2 %v2948_v4  ;;  %1988 = vmatmul.bf16.vlgmr.msra.gmra.mxu3 %v3727_v2  ;;  %v3222_v2 = vld [vmem:[%s5010_s1 + $0x48c] sm:$0xf]  ;;  %v3044_v34 = vor.u32 %v3322_v29, %v3041_v46  ;;  %v2865_v3 = vld [vmem:[%s5010_s1 + $0x658] sm:$0xf0] }
  0xeb   :  { %2032 = vmatpush.bf16.msrb.mxu3 %v3076_v9  ;;  %v2644_v39 = vor.u32 %v3222_v2, %v2641_v33  ;;  %v3310_v4 = vld [vmem:[%s5010_s1 + $0x74c] sm:$0xf]  ;;  %v2740_v9 = vor.u32 %v3246_v59, %v2737_v62  ;;  %v2868_v10 = vor.u32 %v3278_v63, %v2865_v3  ;;  %v2577_v29 = vld [vmem:[%s5010_s1 + $0x418] sm:$0xf0] }
  0xec   :  { %1994 = vmatpush.bf16.msrb.mxu0 %v2676_v18  ;;  %v1768_v60 = vpop.f32.mrf.mxu2  ;;  %v1744_v8 = vpop.f32.mrf.mxu0  ;;  %v2996_v18 = vor.u32 %v3310_v4, %v2993_v6  ;;  %v3238_v46 = vld [vmem:[%s5010_s1 + $0x50c] sm:$0xf]  ;;  %v2833_v33 = vld [vmem:[%s5010_s1 + $0x618] sm:$0xf0]  ;;  %v2580_v35 = vor.u32 %v3206_v28, %v2577_v29 }
  0xed   :  { %2007 = vmatpush.bf16.msrb.mxu1 %v2804_v19  ;;  %v1781_v1 = vpop.f32.mrf.mxu3  ;;  %v1757_v15 = vpop.f32.mrf.mxu1  ;;  %v2721_v19 = vld [vmem:[%s5010_s1 + $0x538] sm:$0xf0]  ;;  %v3270_v2 = vld [vmem:[%s5010_s1 + $0x60c] sm:$0xf] }
  0xee   :  { %2020 = vmatpush.bf16.msrb.mxu2 %v2932_v20  ;;  %v3274_v20 = vld [vmem:[%s5010_s1 + $0x62c] sm:$0xf]  ;;  %v2724_v26 = vor.u32 %v3242_v14, %v2721_v19  ;;  %v2961_v5 = vld [vmem:[%s5010_s1 + $0x718] sm:$0xf0]  ;;  %v2836_v37 = vor.u32 %v3270_v2, %v2833_v33 }
  0xef   :  { %2033 = vmatpush.bf16.msrb.mxu3 %v3060_v24  ;;  %v2596_v24 = vor.u32 %v3210_v11, %v2593_v12  ;;  %v2852_v27 = vor.u32 %v3274_v20, %v2849_v21 }
  0xf0   :  { %1995 = vmatpush.bf16.msrb.mxu0 %v2660_v30 }
  0xf1   :  { %2008 = vmatpush.bf16.msrb.mxu1 %v2788_v31  ;;  %v2980_v31 = vor.u32 %v3306_v22, %v2977_v23 }
  0xf2   :  { %2021 = vmatpush.bf16.msrb.mxu2 %v2916_v32  ;;  %v2705_v32 = vld [vmem:[%s5010_s1 + $0x518] sm:$0xf0] }
  0xf3   :  { %2034 = vmatpush.bf16.msrb.mxu3 %v3044_v34  ;;  %v3302_v34 = vld [vmem:[%s5010_s1 + $0x70c] sm:$0xf]  ;;  %v2708_v36 = vor.u32 %v3238_v46, %v2705_v32 }
  0xf4   :  { %1996 = vmatpush.bf16.msrb.mxu0 %v2644_v39  ;;  %v1770_v30 = vpop.f32.mrf.mxu2  ;;  %v2964_v38 = vor.u32 %v3302_v34, %v2961_v5  ;;  %v1756_v39 = vadd.f32 %v4906_v47, %v4895_v40 }
  0xf5   :  { %2009 = vmatpush.bf16.msrb.mxu1 %v2772_v41  ;;  %v1783_v57 = vpop.f32.mrf.mxu3 }
  0xf6   :  { %2022 = vmatpush.bf16.msrb.mxu2 %v2900_v42  ;;  %v1769_v41 = vadd.f32 %v1768_v60, %v1756_v39 }
  0xf7   :  { %2035 = vmatpush.bf16.msrb.mxu3 %v3028_v48 }
  0xf8   :  { %1997 = vmatpush.bf16.msrb.mxu0 %v2628_v54  ;;  %v1782_v42 = vadd.f32 %v1781_v1, %v1769_v41 }
  0xf9   :  { %2010 = vmatpush.bf16.msrb.mxu1 %v2756_v55 }
  0xfa   :  { %2023 = vmatpush.bf16.msrb.mxu2 %v2884_v56 }
  0xfb   :  { %2036 = vmatpush.bf16.msrb.mxu3 %v3012_v61 }
  0xfc   :  { %1998 = vmatpush.bf16.msrb.mxu0 %v2612_v7 }
  0xfd   :  { %2011 = vmatpush.bf16.msrb.mxu1 %v2740_v9 }
  0xfe   :  { %2024 = vmatpush.bf16.msrb.mxu2 %v2868_v10 }
  0xff   :  { %2037 = vmatpush.bf16.msrb.mxu3 %v2996_v18 }
 0x100   :  { %1999 = vmatpush.bf16.msrb.mxu0 %v2596_v24 }
 0x101   :  { %2012 = vmatpush.bf16.msrb.mxu1 %v2724_v26 }
 0x102   :  { %2025 = vmatpush.bf16.msrb.mxu2 %v2852_v27 }
 0x103   :  { %2038 = vmatpush.bf16.msrb.mxu3 %v2980_v31 }
 0x104   :  { %2000 = vmatpush.bf16.msrb.mxu0 %v2580_v35  ;;  %v1794_v43 = vpop.f32.mrf.mxu0 }
 0x105   :  { %2013 = vmatpush.bf16.msrb.mxu1 %v2708_v36  ;;  %v1795_v44 = vadd.f32 %v1794_v43, %v1782_v42  ;;  %v1807_v45 = vpop.f32.mrf.mxu1 }
 0x106   :  { %2026 = vmatpush.bf16.msrb.mxu2 %v2836_v37 }
 0x107   :  { %2039 = vmatpush.bf16.msrb.mxu3 %v2964_v38  ;;  %2001 = vmatmul.bf16.vlgmr.msrb.gmra.mxu0 %v3854_v16  ;;  %v1808_v48 = vadd.f32 %v1807_v45, %v1795_v44 }
 0x108   :  { %2014 = vmatmul.bf16.vlgmr.msrb.gmra.mxu1 %v3867_v25 }
 0x109   :  { %2027 = vmatmul.bf16.vlgmr.msrb.gmra.mxu2 %v3846_v13 }
 0x10a   :  { %2040 = vmatmul.bf16.vlgmr.msrb.gmra.mxu3 %v3856_v17 }
 0x10c   :  { %v1820_v49 = vpop.f32.mrf.mxu2  ;;  %v1796_v51 = vpop.f32.mrf.mxu0 }
 0x10d   :  { %v1821_v40 = vadd.f32 %v1820_v49, %v1808_v48  ;;  %v1833_v47 = vpop.f32.mrf.mxu3  ;;  %v1809_v52 = vpop.f32.mrf.mxu1 }
 0x10f   :  { %v1834_v50 = vadd.f32 %v1833_v47, %v1821_v40 }
 0x111   :  { %2046 = vst [vmem:[%s5014_s4 + $0x8] sm:$0xff] %v1834_v50 }
 0x114   :  { %v1822_v16 = vpop.f32.mrf.mxu2 }
 0x115   :  { %v1835_v25 = vpop.f32.mrf.mxu3 }
 0x124   :  { %v1846_v13 = vpop.f32.mrf.mxu0 }
 0x125   :  { %v1859_v53 = vpop.f32.mrf.mxu1 }
 0x126   :  { %v1860_v59 = vadd.f32 %v1859_v53, %v1846_v13 }
 0x12c   :  { %v1872_v17 = vpop.f32.mrf.mxu2  ;;  %v1848_v55 = vpop.f32.mrf.mxu0 }
 0x12d   :  { %v1885_v54 = vpop.f32.mrf.mxu3  ;;  %v1861_v56 = vpop.f32.mrf.mxu1  ;;  %v1873_v60 = vadd.f32 %v1872_v17, %v1860_v59 }
 0x12f   :  { %v1886_v61 = vadd.f32 %v1885_v54, %v1873_v60 }
 0x134   :  { %v1874_v0 = vpop.f32.mrf.mxu2 }
 0x135   :  { %v1887_v58 = vpop.f32.mrf.mxu3 }
 0x144   :  { %v1898_v62 = vpop.f32.mrf.mxu0 }
 0x145   :  { %v1899_v63 = vadd.f32 %v1898_v62, %v1886_v61  ;;  %v1911_v3 = vpop.f32.mrf.mxu1 }
 0x147   :  { %v1912_v1 = vadd.f32 %v1911_v3, %v1899_v63 }
 0x14c   :  { %v1924_v4 = vpop.f32.mrf.mxu2  ;;  %v1900_v9 = vpop.f32.mrf.mxu0 }
 0x14d   :  { %v1925_v6 = vadd.f32 %v1924_v4, %v1912_v1  ;;  %v1937_v7 = vpop.f32.mrf.mxu3  ;;  %v1913_v10 = vpop.f32.mrf.mxu1 }
 0x14f   :  { %v1938_v8 = vadd.f32 %v1937_v7, %v1925_v6 }
 0x151   :  { %2047 = vst [vmem:[%s5014_s4 + $0x10] sm:$0xff] %v1938_v8 }
 0x154   :  { %v1926_v11 = vpop.f32.mrf.mxu2 }
 0x155   :  { %v1939_v12 = vpop.f32.mrf.mxu3 }
 0x164   :  { %v1950_v14 = vpop.f32.mrf.mxu0 }
 0x165   :  { %v1963_v15 = vpop.f32.mrf.mxu1 }
 0x166   :  { %v1964_v24 = vadd.f32 %v1963_v15, %v1950_v14 }
 0x16c   :  { %v1976_v18 = vpop.f32.mrf.mxu2  ;;  %v1952_v20 = vpop.f32.mrf.mxu0 }
 0x16d   :  { %v1989_v19 = vpop.f32.mrf.mxu3  ;;  %v1965_v21 = vpop.f32.mrf.mxu1  ;;  %v1977_v26 = vadd.f32 %v1976_v18, %v1964_v24 }
 0x16f   :  { %v1990_v27 = vadd.f32 %v1989_v19, %v1977_v26 }
 0x174   :  { %v1978_v22 = vpop.f32.mrf.mxu2 }
 0x175   :  { %v1991_v23 = vpop.f32.mrf.mxu3 }
 0x184   :  { %v2002_v28 = vpop.f32.mrf.mxu0 }
 0x185   :  { %v2015_v29 = vpop.f32.mrf.mxu1  ;;  %v2003_v46 = vadd.f32 %v2002_v28, %v1990_v27 }
 0x187   :  { %v2016_v30 = vadd.f32 %v2015_v29, %v2003_v46 }
 0x18c   :  { %v2028_v31 = vpop.f32.mrf.mxu2  ;;  %v2004_v33 = vpop.f32.mrf.mxu0 }
 0x18d   :  { %v2029_v32 = vadd.f32 %v2028_v31, %v2016_v30  ;;  %v2041_v2 = vpop.f32.mrf.mxu3  ;;  %v2017_v57 = vpop.f32.mrf.mxu1 }
 0x18f   :  { %v2042_v34 = vadd.f32 %v2041_v2, %v2029_v32 }
 0x191   :  { %2048 = vst [vmem:[%s5014_s4 + $0x18] sm:$0xff] %v2042_v34 }
 0x194   :  { %v2030_v5 = vpop.f32.mrf.mxu2 }
 0x195   :  { %v2043_v35 = vpop.f32.mrf.mxu3 }

// kernel: forward.241
= control target key start
LH: loop header
LB: loop body
LE: loop exit
PB: predicated region body
PF: predicated region fallthrough
CT: control target
= control target key end

     0   :  { %s1236_s1 = inlined_call_operand.vmem [shape: bf16[1024,128], index: 1, kind: input, shape index: {}]   ;;  %s1237_s0 = inlined_call_operand.vmem [shape: f32[8,1024], index: 0, kind: input, shape index: {}]   ;;  %s1238_s2 = inlined_call_operand.vmem [shape: f32[1,128], index: 2, kind: input, shape index: {}]   ;;  %s1239_s3 = inlined_call_operand.vmem [shape: f32[1,128], index: 3, kind: input, shape index: {}]   ;;  %s1240_s4 = inlined_call_operand.vmem [shape: f32[8,128], index: 4, kind: output, shape index: {}]  }
   0x1   :  { %v927_v0 = vld [vmem:[%s1236_s1 + $0x38] sm:$0xff]  ;;  %v926_v4 = vld [vmem:[%s1236_s1 + $0x30] sm:$0xff]  ;;  %v925_v8 = vld [vmem:[%s1236_s1 + $0x28] sm:$0xff] }
   0x2   :  { %v935_v1 = vld [vmem:[%s1236_s1 + $0x78] sm:$0xff]  ;;  %545 = vmatpush.bf16.msra.mxu0 %v927_v0  ;;  %v934_v5 = vld [vmem:[%s1236_s1 + $0x70] sm:$0xff]  ;;  %v933_v9 = vld [vmem:[%s1236_s1 + $0x68] sm:$0xff] }
   0x3   :  { %v943_v2 = vld [vmem:[%s1236_s1 + $0xb8] sm:$0xff]  ;;  %558 = vmatpush.bf16.msra.mxu1 %v935_v1  ;;  %v942_v6 = vld [vmem:[%s1236_s1 + $0xb0] sm:$0xff]  ;;  %v941_v10 = vld [vmem:[%s1236_s1 + $0xa8] sm:$0xff] }
   0x4   :  { %v951_v3 = vld [vmem:[%s1236_s1 + $0xf8] sm:$0xff]  ;;  %571 = vmatpush.bf16.msra.mxu2 %v943_v2  ;;  %v950_v7 = vld [vmem:[%s1236_s1 + $0xf0] sm:$0xff]  ;;  %v949_v11 = vld [vmem:[%s1236_s1 + $0xe8] sm:$0xff] }
   0x5   :  { %584 = vmatpush.bf16.msra.mxu3 %v951_v3  ;;  %v924_v12 = vld [vmem:[%s1236_s1 + $0x20] sm:$0xff]  ;;  %v923_v16 = vld [vmem:[%s1236_s1 + $0x18] sm:$0xff]  ;;  %v922_v20 = vld [vmem:[%s1236_s1 + $0x10] sm:$0xff] }
   0x6   :  { %546 = vmatpush.bf16.msra.mxu0 %v926_v4  ;;  %v932_v13 = vld [vmem:[%s1236_s1 + $0x60] sm:$0xff]  ;;  %v931_v17 = vld [vmem:[%s1236_s1 + $0x58] sm:$0xff]  ;;  %v930_v21 = vld [vmem:[%s1236_s1 + $0x50] sm:$0xff] }
   0x7   :  { %559 = vmatpush.bf16.msra.mxu1 %v934_v5  ;;  %v940_v14 = vld [vmem:[%s1236_s1 + $0xa0] sm:$0xff]  ;;  %v939_v18 = vld [vmem:[%s1236_s1 + $0x98] sm:$0xff]  ;;  %v938_v22 = vld [vmem:[%s1236_s1 + $0x90] sm:$0xff] }
   0x8   :  { %572 = vmatpush.bf16.msra.mxu2 %v942_v6  ;;  %v948_v15 = vld [vmem:[%s1236_s1 + $0xe0] sm:$0xff]  ;;  %v947_v19 = vld [vmem:[%s1236_s1 + $0xd8] sm:$0xff]  ;;  %v946_v23 = vld [vmem:[%s1236_s1 + $0xd0] sm:$0xff] }
   0x9   :  { %585 = vmatpush.bf16.msra.mxu3 %v950_v7  ;;  %v921_v24 = vld [vmem:[%s1236_s1 + $0x8] sm:$0xff]  ;;  %v920_v28 = vld [vmem:[%s1236_s1] sm:$0xff]  ;;  %v959_v32 = vld [vmem:[%s1236_s1 + $0x138] sm:$0xff] }
   0xa   :  { %547 = vmatpush.bf16.msra.mxu0 %v925_v8  ;;  %v929_v25 = vld [vmem:[%s1236_s1 + $0x48] sm:$0xff]  ;;  %v928_v29 = vld [vmem:[%s1236_s1 + $0x40] sm:$0xff]  ;;  %v19_v33 = vld [vmem:[%s1237_s0 + $0x10] sm:$0xff] }
   0xb   :  { %560 = vmatpush.bf16.msra.mxu1 %v933_v9  ;;  %v937_v26 = vld [vmem:[%s1236_s1 + $0x88] sm:$0xff]  ;;  %v936_v30 = vld [vmem:[%s1236_s1 + $0x80] sm:$0xff]  ;;  %v20_v34 = vld [vmem:[%s1237_s0 + $0x18] sm:$0xff]  ;;  %v27_v40 = vpack.c.bf16 %v19_v33, %v19_v33 }
   0xc   :  { %573 = vmatpush.bf16.msra.mxu2 %v941_v10  ;;  %v945_v27 = vld [vmem:[%s1236_s1 + $0xc8] sm:$0xff]  ;;  %v944_v31 = vld [vmem:[%s1236_s1 + $0xc0] sm:$0xff]  ;;  %v967_v35 = vld [vmem:[%s1236_s1 + $0x178] sm:$0xff]  ;;  %v28_v41 = vpack.c.bf16 %v20_v34, %v20_v34 }
   0xd   :  { %586 = vmatpush.bf16.msra.mxu3 %v949_v11  ;;  %v17_v36 = vld [vmem:[%s1237_s0] sm:$0xff]  ;;  %v18_v37 = vld [vmem:[%s1237_s0 + $0x8] sm:$0xff]  ;;  %v975_v38 = vld [vmem:[%s1236_s1 + $0x1b8] sm:$0xff] }
   0xe   :  { %548 = vmatpush.bf16.msra.mxu0 %v924_v12  ;;  %v983_v39 = vld [vmem:[%s1236_s1 + $0x1f8] sm:$0xff]  ;;  %v25_v42 = vpack.c.bf16 %v17_v36, %v17_v36  ;;  %v26_v43 = vpack.c.bf16 %v18_v37, %v18_v37  ;;  %v958_v44 = vld [vmem:[%s1236_s1 + $0x130] sm:$0xff]  ;;  %v957_v48 = vld [vmem:[%s1236_s1 + $0x128] sm:$0xff] }
   0xf   :  { %561 = vmatpush.bf16.msra.mxu1 %v932_v13  ;;  %v966_v45 = vld [vmem:[%s1236_s1 + $0x170] sm:$0xff]  ;;  %v965_v49 = vld [vmem:[%s1236_s1 + $0x168] sm:$0xff]  ;;  %v956_v52 = vld [vmem:[%s1236_s1 + $0x120] sm:$0xff] }
  0x10   :  { %574 = vmatpush.bf16.msra.mxu2 %v940_v14  ;;  %v974_v46 = vld [vmem:[%s1236_s1 + $0x1b0] sm:$0xff]  ;;  %v973_v50 = vld [vmem:[%s1236_s1 + $0x1a8] sm:$0xff]  ;;  %v964_v53 = vld [vmem:[%s1236_s1 + $0x160] sm:$0xff] }
  0x11   :  { %587 = vmatpush.bf16.msra.mxu3 %v948_v15  ;;  %v982_v47 = vld [vmem:[%s1236_s1 + $0x1f0] sm:$0xff]  ;;  %v981_v51 = vld [vmem:[%s1236_s1 + $0x1e8] sm:$0xff]  ;;  %v972_v54 = vld [vmem:[%s1236_s1 + $0x1a0] sm:$0xff] }
  0x12   :  { %549 = vmatpush.bf16.msra.mxu0 %v923_v16  ;;  %v980_v55 = vld [vmem:[%s1236_s1 + $0x1e0] sm:$0xff]  ;;  %v955_v56 = vld [vmem:[%s1236_s1 + $0x118] sm:$0xff]  ;;  %v954_v60 = vld [vmem:[%s1236_s1 + $0x110] sm:$0xff] }
  0x13   :  { %562 = vmatpush.bf16.msra.mxu1 %v931_v17  ;;  %v963_v57 = vld [vmem:[%s1236_s1 + $0x158] sm:$0xff]  ;;  %v962_v61 = vld [vmem:[%s1236_s1 + $0x150] sm:$0xff]  ;;  %v953_v0 = vld [vmem:[%s1236_s1 + $0x108] sm:$0xff] }
  0x14   :  { %575 = vmatpush.bf16.msra.mxu2 %v939_v18  ;;  %v971_v58 = vld [vmem:[%s1236_s1 + $0x198] sm:$0xff]  ;;  %v970_v62 = vld [vmem:[%s1236_s1 + $0x190] sm:$0xff]  ;;  %v961_v1 = vld [vmem:[%s1236_s1 + $0x148] sm:$0xff] }
  0x15   :  { %588 = vmatpush.bf16.msra.mxu3 %v947_v19  ;;  %v979_v59 = vld [vmem:[%s1236_s1 + $0x1d8] sm:$0xff]  ;;  %v978_v63 = vld [vmem:[%s1236_s1 + $0x1d0] sm:$0xff]  ;;  %v969_v2 = vld [vmem:[%s1236_s1 + $0x188] sm:$0xff] }
  0x16   :  { %550 = vmatpush.bf16.msra.mxu0 %v922_v20  ;;  %v977_v3 = vld [vmem:[%s1236_s1 + $0x1c8] sm:$0xff]  ;;  %v952_v4 = vld [vmem:[%s1236_s1 + $0x100] sm:$0xff]  ;;  %v23_v10 = vld [vmem:[%s1237_s0 + $0x30] sm:$0xff] }
  0x17   :  { %563 = vmatpush.bf16.msra.mxu1 %v930_v21  ;;  %v960_v5 = vld [vmem:[%s1236_s1 + $0x140] sm:$0xff]  ;;  %v22_v8 = vld [vmem:[%s1237_s0 + $0x28] sm:$0xff]  ;;  %v24_v11 = vld [vmem:[%s1237_s0 + $0x38] sm:$0xff]  ;;  %v31_v14 = vpack.c.bf16 %v23_v10, %v23_v10 }
  0x18   :  { %576 = vmatpush.bf16.msra.mxu2 %v938_v22  ;;  %v968_v6 = vld [vmem:[%s1236_s1 + $0x180] sm:$0xff]  ;;  %v30_v13 = vpack.c.bf16 %v22_v8, %v22_v8  ;;  %v32_v15 = vpack.c.bf16 %v24_v11, %v24_v11 }
  0x19   :  { %589 = vmatpush.bf16.msra.mxu3 %v946_v23  ;;  %v21_v7 = vld [vmem:[%s1237_s0 + $0x20] sm:$0xff] }
  0x1a   :  { %551 = vmatpush.bf16.msra.mxu0 %v921_v24  ;;  %v976_v9 = vld [vmem:[%s1236_s1 + $0x1c0] sm:$0xff]  ;;  %v29_v12 = vpack.c.bf16 %v21_v7, %v21_v7 }
  0x1b   :  { %564 = vmatpush.bf16.msra.mxu1 %v929_v25  ;;  %v984_v34 = vld [vmem:[%s1238_s2] ss:$0 sm:$0xff] }
  0x1c   :  { %577 = vmatpush.bf16.msra.mxu2 %v937_v26 }
  0x1d   :  { %590 = vmatpush.bf16.msra.mxu3 %v945_v27 }
  0x1e   :  { %552 = vmatpush.bf16.msra.mxu0 %v920_v28 }
  0x1f   :  { %565 = vmatpush.bf16.msra.mxu1 %v928_v29 }
  0x20   :  { %578 = vmatpush.bf16.msra.mxu2 %v936_v30 }
  0x21   :  { %591 = vmatpush.bf16.msra.mxu3 %v944_v31  ;;  %553 = vmatmul.bf16.vlgmr.msra.gmra.mxu0 %v25_v42 }
  0x22   :  { %597 = vmatpush.bf16.msrb.mxu0 %v959_v32  ;;  %566 = vmatmul.bf16.vlgmr.msra.gmra.mxu1 %v26_v43 }
  0x23   :  { %610 = vmatpush.bf16.msrb.mxu1 %v967_v35  ;;  %579 = vmatmul.bf16.vlgmr.msra.gmra.mxu2 %v27_v40 }
  0x24   :  { %623 = vmatpush.bf16.msrb.mxu2 %v975_v38  ;;  %592 = vmatmul.bf16.vlgmr.msra.gmra.mxu3 %v28_v41  ;;  %v985_v38 = vld [vmem:[%s1239_s3] ss:$0 sm:$0xff] }
  0x25   :  { %636 = vmatpush.bf16.msrb.mxu3 %v983_v39 }
  0x26   :  { %598 = vmatpush.bf16.msrb.mxu0 %v958_v44 }
  0x27   :  { %611 = vmatpush.bf16.msrb.mxu1 %v966_v45 }
  0x28   :  { %624 = vmatpush.bf16.msrb.mxu2 %v974_v46 }
  0x29   :  { %637 = vmatpush.bf16.msrb.mxu3 %v982_v47 }
  0x2a   :  { %599 = vmatpush.bf16.msrb.mxu0 %v957_v48 }
  0x2b   :  { %612 = vmatpush.bf16.msrb.mxu1 %v965_v49 }
  0x2c   :  { %625 = vmatpush.bf16.msrb.mxu2 %v973_v50 }
  0x2d   :  { %638 = vmatpush.bf16.msrb.mxu3 %v981_v51 }
  0x2e   :  { %600 = vmatpush.bf16.msrb.mxu0 %v956_v52 }
  0x2f   :  { %613 = vmatpush.bf16.msrb.mxu1 %v964_v53 }
  0x30   :  { %626 = vmatpush.bf16.msrb.mxu2 %v972_v54 }
  0x31   :  { %639 = vmatpush.bf16.msrb.mxu3 %v980_v55 }
  0x32   :  { %601 = vmatpush.bf16.msrb.mxu0 %v955_v56 }
  0x33   :  { %614 = vmatpush.bf16.msrb.mxu1 %v963_v57 }
  0x34   :  { %627 = vmatpush.bf16.msrb.mxu2 %v971_v58 }
  0x35   :  { %640 = vmatpush.bf16.msrb.mxu3 %v979_v59 }
  0x36   :  { %602 = vmatpush.bf16.msrb.mxu0 %v954_v60 }
  0x37   :  { %615 = vmatpush.bf16.msrb.mxu1 %v962_v61 }
  0x38   :  { %628 = vmatpush.bf16.msrb.mxu2 %v970_v62 }
  0x39   :  { %641 = vmatpush.bf16.msrb.mxu3 %v978_v63 }
  0x3a   :  { %603 = vmatpush.bf16.msrb.mxu0 %v953_v0 }
  0x3b   :  { %616 = vmatpush.bf16.msrb.mxu1 %v961_v1 }
  0x3c   :  { %629 = vmatpush.bf16.msrb.mxu2 %v969_v2 }
  0x3d   :  { %642 = vmatpush.bf16.msrb.mxu3 %v977_v3 }
  0x3e   :  { %604 = vmatpush.bf16.msrb.mxu0 %v952_v4 }
  0x3f   :  { %617 = vmatpush.bf16.msrb.mxu1 %v960_v5 }
  0x40   :  { %630 = vmatpush.bf16.msrb.mxu2 %v968_v6 }
  0x41   :  { %643 = vmatpush.bf16.msrb.mxu3 %v976_v9  ;;  %605 = vmatmul.bf16.vlgmr.msrb.gmra.mxu0 %v29_v12 }
  0x42   :  { %618 = vmatmul.bf16.vlgmr.msrb.gmra.mxu1 %v30_v13 }
  0x43   :  { %631 = vmatmul.bf16.vlgmr.msrb.gmra.mxu2 %v31_v14 }
  0x44   :  { %644 = vmatmul.bf16.vlgmr.msrb.gmra.mxu3 %v32_v15 }
  0x9e   :  { %v554_v16 = vpop.f32.mrf.mxu0 }
  0x9f   :  { %v567_v17 = vpop.f32.mrf.mxu1 }
  0xa0   :  { %v568_v24 = vadd.f32 %v567_v17, %v554_v16 }
  0xa6   :  { %v580_v18 = vpop.f32.mrf.mxu2  ;;  %v556_v20 = vpop.f32.mrf.mxu0 }
  0xa7   :  { %v593_v19 = vpop.f32.mrf.mxu3  ;;  %v569_v21 = vpop.f32.mrf.mxu1  ;;  %v581_v25 = vadd.f32 %v580_v18, %v568_v24 }
  0xa9   :  { %v594_v26 = vadd.f32 %v593_v19, %v581_v25 }
  0xae   :  { %v582_v22 = vpop.f32.mrf.mxu2 }
  0xaf   :  { %v595_v23 = vpop.f32.mrf.mxu3 }
  0xbe   :  { %v606_v27 = vpop.f32.mrf.mxu0 }
  0xbf   :  { %v619_v28 = vpop.f32.mrf.mxu1  ;;  %v607_v29 = vadd.f32 %v606_v27, %v594_v26 }
  0xc1   :  { %v620_v30 = vadd.f32 %v619_v28, %v607_v29 }
  0xc6   :  { %v632_v31 = vpop.f32.mrf.mxu2  ;;  %v608_v35 = vpop.f32.mrf.mxu0 }
  0xc7   :  { %v645_v32 = vpop.f32.mrf.mxu3  ;;  %v633_v33 = vadd.f32 %v632_v31, %v620_v30  ;;  %v621_v36 = vpop.f32.mrf.mxu1 }
  0xc9   :  { %v646_v37 = vadd.f32 %v645_v32, %v633_v33 }
  0xcb   :  { %v653_v39 = vmul.f32 %v984_v34, %v646_v37 }
  0xcd   :  { %v658_v40 = vadd.f32 %v985_v38, %v653_v39 }
  0xce   :  { %v634_v41 = vpop.f32.mrf.mxu2 }
  0xcf   :  { %v647_v42 = vpop.f32.mrf.mxu3  ;;  %659 = vst [vmem:[%s1240_s4] sm:$0xff] %v658_v40 }

</bundles_post_ra>
